<compile_context>
chip_gen: v6e
topology: v6e:2x2x1
jax: 0.10.0
libtpu: 0.0.40
codegen_flags: <defaults>
</compile_context>

<pallas_src>
import jax
import jax.numpy as jnp
import numpy as np
from jax import lax
from jax.experimental import pallas as pl
from jax.experimental.pallas import tpu as pltpu


# ----------------------------------------------------------------------------
# Fused decoder kernel factory: one grid step == one batch element.
# ----------------------------------------------------------------------------
def _make_decoder_kernel(H, W, L):
    HW = H * W
    f32 = jnp.float32
    bf16 = jnp.bfloat16
    # ct1-output row index 2r + v (v = s+p+i-1 in {-1,0,1,2}) == 2*(r+dr)+alpha
    ROW = {-1: (1, -1), 0: (0, 0), 1: (1, 0), 2: (0, 1)}

    def kernel(m_ref, x_ref, c1w_ref, c1b_ref, rw1_ref, rw2_ref,
               ct1w_ref, ct1b_ref, ct2w_ref, ct2b_ref, o_ref):
        Ch = c1w_ref.shape[1]
        C2 = ct1w_ref.shape[2]
        Cout = ct2w_ref.shape[2]

        def shifted(v, dh, dw):
            """Zero-padded spatial shift of a channel-first (C, H*W) f32
            activation: out[:, r*W+c] = v[:, (r+dh)*W+(c+dw)], 0 outside the
            image.  Returned as bf16 for the MXU."""
            if (dh, dw) == (0, 0):
                return v.astype(bf16)
            k = dh * W + dw
            if HW % 128 == 0:
                # lane rotation -> XLU slot (has slack); mask fixes wrap-ins.
                y = pltpu.roll(v, shift=(-k) % HW, axis=1)
            else:
                # tiny / unaligned spatial sizes: robust slice+concat roll.
                y = jnp.roll(v, -k, axis=1)
            return (y * m_ref[3 * (dh + 1) + (dw + 1)]).astype(bf16)

        def shifts9(v):
            return {(dh, dw): shifted(v, dh, dw)
                    for dh in (-1, 0, 1) for dw in (-1, 0, 1)}

        # ---------------- conv_1: 3x3, pad 1, Cin -> Ch, + bias -------------
        xs = shifts9(x_ref[0])
        h = jnp.broadcast_to(c1b_ref[...], (Ch, HW))       # bias == acc init
        for kh in range(3):
            for kw in range(3):
                h = h + jnp.dot(c1w_ref[3 * kh + kw], xs[(kh - 1, kw - 1)],
                                preferred_element_type=f32)

        # --------- residual stack: x + conv1x1(relu(conv3x3(relu(x)))) ------
        # Python loop == unrolled fori_loop; weights are stacked per layer so
        # there are only two weight inputs regardless of L.
        for l in range(L):
            ts = shifts9(jnp.maximum(h, 0.0))
            t = None
            for kh in range(3):
                for kw in range(3):
                    d = jnp.dot(rw1_ref[l, 3 * kh + kw], ts[(kh - 1, kw - 1)],
                                preferred_element_type=f32)
                    t = d if t is None else t + d
            t = jnp.maximum(t, 0.0).astype(bf16)
            h = h + jnp.dot(rw2_ref[l], t, preferred_element_type=f32)

        h = jnp.maximum(h, 0.0)             # trailing F.relu of ResidualStack

        # -------- conv_trans_1 (k=4, s=2, p=1): 4 phases, + bias, + relu ----
        hs = shifts9(h)
        b1v = jnp.broadcast_to(ct1b_ref[...], (C2, HW))     # hoisted broadcast
        ph = {}
        for a in range(2):
            for b in range(2):
                acc = b1v
                for i in range(2):
                    for j in range(2):
                        acc = acc + jnp.dot(ct1w_ref[2 * a + b, 2 * i + j],
                                            hs[(a + i - 1, b + j - 1)],
                                            preferred_element_type=f32)
                ph[(a, b)] = jnp.maximum(acc, 0.0)

        # -------- conv_trans_2 (k=4, s=2, p=1): 16 output sub-phases --------
        # The interleaved ct1 image is never materialized: every tap of every
        # ct2 output sub-phase is a +-1-shifted zero-padded view of exactly
        # one ct1 phase.
        phs = {}
        for (a, b), v in ph.items():
            for dr in ((0, 1) if a == 0 else (-1, 0)):
                for dc in ((0, 1) if b == 0 else (-1, 0)):
                    phs[(a, b, dr, dc)] = shifted(v, dr, dc)

        b2v = jnp.broadcast_to(ct2b_ref[...], (Cout, HW))    # hoisted broadcast
        for P in range(4):
            s, p = P // 2, P % 2
            for Q in range(4):
                t2, q = Q // 2, Q % 2
                acc = b2v
                for i in range(2):
                    for j in range(2):
                        alpha, dr = ROW[s + p + i - 1]
                        beta, dc = ROW[t2 + q + j - 1]
                        acc = acc + jnp.dot(ct2w_ref[2 * p + q, 2 * i + j],
                                            phs[(alpha, beta, dr, dc)],
                                            preferred_element_type=f32)
                # final output pixel (4r + P, 4c + Q) == acc[:, r*W + c]
                o_ref[0, 4 * P + Q] = acc.astype(o_ref.dtype)

    return kernel


# ----------------------------------------------------------------------------
# pallas_call wrapper
# ----------------------------------------------------------------------------
def _decoder_pallas(H, W, masks, x_flat, c1w, c1b, rw1, rw2,
                    ct1w, ct1b, ct2w, ct2b):
    B, Cin, HW = x_flat.shape
    Cout = ct2w.shape[2]
    L = rw1.shape[0]
    kernel = _make_decoder_kernel(H, W, L)

    def fixed(nd):
        return lambda b: (0,) * nd

    in_specs = [
        pl.BlockSpec(masks.shape, fixed(3)),
        pl.BlockSpec((1, Cin, HW), lambda b: (b, 0, 0)),
        pl.BlockSpec(c1w.shape, fixed(3)),
        pl.BlockSpec(c1b.shape, fixed(2)),
        pl.BlockSpec(rw1.shape, fixed(4)),
        pl.BlockSpec(rw2.shape, fixed(3)),
        pl.BlockSpec(ct1w.shape, fixed(4)),
        pl.BlockSpec(ct1b.shape, fixed(2)),
        pl.BlockSpec(ct2w.shape, fixed(4)),
        pl.BlockSpec(ct2b.shape, fixed(2)),
    ]
    return pl.pallas_call(
        kernel,
        out_shape=jax.ShapeDtypeStruct((B, 16, Cout, HW), jnp.float32),
        grid=(B,),
        in_specs=in_specs,
        out_specs=pl.BlockSpec((1, 16, Cout, HW), lambda b: (b, 0, 0, 0)),
        compiler_params=pltpu.CompilerParams(
            dimension_semantics=("parallel",),
            vmem_limit_bytes=64 * 1024 * 1024),
    )(masks, x_flat, c1w, c1b, rw1, rw2, ct1w, ct1b, ct2w, ct2b)


# ----------------------------------------------------------------------------
# Wrapper-side layout plumbing (weight conversion, masks, depth-to-space)
# ----------------------------------------------------------------------------
def _shift_masks(H, W):
    """0/1 validity masks for spatial shift (dh, dw) in {-1,0,1}^2 of a
    flattened H*W image (shape (9, 1, H*W))."""
    r = np.arange(H * W) // W
    c = np.arange(H * W) % W
    m = np.zeros((9, 1, H * W), np.float32)
    for dh in (-1, 0, 1):
        for dw in (-1, 0, 1):
            ok = (r + dh >= 0) & (r + dh < H) & (c + dw >= 0) & (c + dw < W)
            m[3 * (dh + 1) + (dw + 1), 0, :] = ok
    return jnp.asarray(m)


@jax.jit
def decoder_forward(params, x_nchw):
    B, Cin, H, W = x_nchw.shape
    bf16 = jnp.bfloat16
    Cout = params["ct2_w"].shape[1]

    def taps3x3(w_oihw):
        co, ci = w_oihw.shape[0], w_oihw.shape[1]
        return jnp.transpose(w_oihw, (2, 3, 0, 1)).reshape(9, co, ci)

    def polyphase(w_t):
        # ConvTranspose2d(k=4, s=2, p=1) weight (Cin, Cout, 4, 4) ->
        # (4 phases, 4 taps, Cout, Cin): phase (a, b), tap (i, j) of the
        # 1-padded input uses kernel element (3 - a - 2i, 3 - b - 2j).
        return jnp.stack([
            jnp.stack([w_t[:, :, 3 - a - 2 * i, 3 - b - 2 * j].T
                       for i in range(2) for j in range(2)])
            for a in range(2) for b in range(2)])

    c1w = taps3x3(params["conv1_w"]).astype(bf16)                  # (9, Ch, Cin)
    c1b = params["conv1_b"][:, None]                               # (Ch, 1) f32
    rw1 = jnp.stack([taps3x3(w1) for w1, _ in params["res"]]).astype(bf16)
    rw2 = jnp.stack([w2[:, :, 0, 0] for _, w2 in params["res"]]).astype(bf16)
    ct1w = polyphase(params["ct1_w"]).astype(bf16)                 # (4,4,C2,Ch)
    ct1b = params["ct1_b"][:, None]
    ct2w = polyphase(params["ct2_w"]).astype(bf16)                 # (4,4,Cout,C2)
    ct2b = params["ct2_b"][:, None]

    masks = _shift_masks(H, W)
    x_flat = x_nchw.reshape(B, Cin, H * W)                         # channel-first

    out_ph = _decoder_pallas(H, W, masks, x_flat, c1w, c1b, rw1, rw2,
                             ct1w, ct1b, ct2w, ct2b)               # (B,16,Cout,HW)

    # (B, 16, Cout, H*W) sub-pixel phases -> NCHW (B, Cout, 4H, 4W).
    o = out_ph.reshape(B, 4, 4, Cout, H, W)                        # (b,P,Q,c,r,cc)
    o = jnp.transpose(o, (0, 3, 4, 1, 5, 2))                       # (b,c,r,P,cc,Q)
    return o.reshape(B, Cout, 4 * H, 4 * W)


# ----------------------------------------------------------------------------
# Deterministic parameter init (raw PyTorch layouts)
# ----------------------------------------------------------------------------
def init_params(key, in_channels, num_hiddens, num_residual_layers,
                num_residual_hiddens, out_channels):
    keys = iter(jax.random.split(key, 8 + 2 * num_residual_layers))

    def rnd(shape, scale=0.1):
        return (scale * jax.random.normal(next(keys), shape)).astype(jnp.float32)

    return {
        "conv1_w": rnd((num_hiddens, in_channels, 3, 3)),          # OIHW
        "conv1_b": rnd((num_hiddens,)),
        "res": [(rnd((num_residual_hiddens, num_hiddens, 3, 3)),   # OIHW, no bias
                 rnd((num_hiddens, num_residual_hiddens, 1, 1)))   # OIHW, no bias
                for _ in range(num_residual_layers)],
        "ct1_w": rnd((num_hiddens, num_hiddens // 2, 4, 4)),       # (Cin,Cout,kH,kW)
        "ct1_b": rnd((num_hiddens // 2,)),
        "ct2_w": rnd((num_hiddens // 2, out_channels, 4, 4)),
        "ct2_b": rnd((out_channels,)),
    }


# ----------------------------------------------------------------------------
# Pure-JAX reference (independent ConvTranspose formulation: flip + dilation)
# ----------------------------------------------------------------------------
def reference_forward(params, x_nchw):
    dn = ("NHWC", "HWIO", "NHWC")
    prec = lax.Precision.HIGHEST

    def conv3x3(x, w_oihw):
        w = jnp.transpose(w_oihw, (2, 3, 1, 0))                  # HWIO
        return lax.conv_general_dilated(x, w, (1, 1), [(1, 1), (1, 1)],
                                        dimension_numbers=dn, precision=prec)

    def conv_transpose(x, w_t, b):
        # ConvTranspose2d(k=4, s=2, p=1) == lhs-dilated conv with the flipped
        # kernel and padding k-1-p = 2.
        w = jnp.transpose(w_t, (2, 3, 0, 1))[::-1, ::-1, :, :]   # HWIO, flipped
        y = lax.conv_general_dilated(x, w, (1, 1), [(2, 2), (2, 2)],
                                     lhs_dilation=(2, 2),
                                     dimension_numbers=dn, precision=prec)
        return y + b

    x = jnp.transpose(x_nchw, (0, 2, 3, 1))
    h = conv3x3(x, params["conv1_w"]) + params["conv1_b"]
    for w1, w2 in params["res"]:
        t = jnp.maximum(h, 0.0)
        t = conv3x3(t, w1)
        t = jnp.maximum(t, 0.0)
        h = h + jnp.einsum("bhwc,cd->bhwd", t,
                           jnp.transpose(w2[:, :, 0, 0], (1, 0)),
                           precision=prec)
    h = jnp.maximum(h, 0.0)
    h = jnp.maximum(conv_transpose(h, params["ct1_w"], params["ct1_b"]), 0.0)
    h = conv_transpose(h, params["ct2_w"], params["ct2_b"])
    return jnp.transpose(h, (0, 3, 1, 2))


# ----------------------------------------------------------------------------
# Main
# ----------------------------------------------------------------------------
if __name__ == "__main__":
    B = 2
    in_channels = 4
    H = W = 8
    num_hiddens = 32
    num_residual_layers = 2
    num_residual_hiddens = 16
    out_channels = 3

    key = jax.random.PRNGKey(0)
    k_par, k_in = jax.random.split(key)
    params = init_params(k_par, in_channels, num_hiddens, num_residual_layers,
                         num_residual_hiddens, out_channels)
    x = jax.random.normal(k_in, (B, in_channels, H, W), dtype=jnp.float32)

    out = jax.block_until_ready(decoder_forward(params, x))

    assert out.shape == (B, out_channels, 4 * H, 4 * W), out.shape
    assert bool(jnp.all(jnp.isfinite(out)))

    ref = jax.block_until_ready(reference_forward(params, x))
    # bf16 MXU operands (f32 accumulation) vs. f32-HIGHEST reference.
    np.testing.assert_allclose(np.asarray(out), np.asarray(ref),
                               rtol=5e-2, atol=5e-2)

    print("KERNEL_OK")
</pallas_src>

<mosaic_0001>
module attributes {stable_mosaic.version = 11 : i64} {
  func.func @kernel(%arg0: i32, %arg1: memref<9x1x64xf32, #tpu.memory_space<vmem>>, %arg2: memref<1x4x64xf32, #tpu.memory_space<vmem>>, %arg3: memref<9x32x4xbf16, #tpu.memory_space<vmem>>, %arg4: memref<32x1xf32, #tpu.memory_space<vmem>>, %arg5: memref<2x9x16x32xbf16, #tpu.memory_space<vmem>>, %arg6: memref<2x32x16xbf16, #tpu.memory_space<vmem>>, %arg7: memref<4x4x16x32xbf16, #tpu.memory_space<vmem>>, %arg8: memref<16x1xf32, #tpu.memory_space<vmem>>, %arg9: memref<4x4x3x16xbf16, #tpu.memory_space<vmem>>, %arg10: memref<3x1xf32, #tpu.memory_space<vmem>>, %arg11: memref<1x16x3x64xf32, #tpu.memory_space<vmem>>) attributes {dimension_semantics = [#tpu.dimension_semantics<parallel>], iteration_bounds = array<i64: 2>, scalar_prefetch = 0 : i64, scratch_operands = 0 : i64, tpu.core_type = #tpu.core_type<tc>, window_params = [{pipeline_mode = #tpu.pipeline_mode<synchronous>, transform_indices = @transform_0, window_bounds = array<i64: 9, 1, 64>}, {transform_indices = @transform_1, window_bounds = array<i64: 1, 4, 64>}, {pipeline_mode = #tpu.pipeline_mode<synchronous>, transform_indices = @transform_2, window_bounds = array<i64: 9, 32, 4>}, {pipeline_mode = #tpu.pipeline_mode<synchronous>, transform_indices = @transform_3, window_bounds = array<i64: 32, 1>}, {pipeline_mode = #tpu.pipeline_mode<synchronous>, transform_indices = @transform_4, window_bounds = array<i64: 2, 9, 16, 32>}, {pipeline_mode = #tpu.pipeline_mode<synchronous>, transform_indices = @transform_5, window_bounds = array<i64: 2, 32, 16>}, {pipeline_mode = #tpu.pipeline_mode<synchronous>, transform_indices = @transform_6, window_bounds = array<i64: 4, 4, 16, 32>}, {pipeline_mode = #tpu.pipeline_mode<synchronous>, transform_indices = @transform_7, window_bounds = array<i64: 16, 1>}, {pipeline_mode = #tpu.pipeline_mode<synchronous>, transform_indices = @transform_8, window_bounds = array<i64: 4, 4, 3, 16>}, {pipeline_mode = #tpu.pipeline_mode<synchronous>, transform_indices = @transform_9, window_bounds = array<i64: 3, 1>}, {transform_indices = @transform_10, window_bounds = array<i64: 1, 16, 3, 64>}]} {
    %c0 = arith.constant 0 : index
    %c0_0 = arith.constant 0 : index
    %c0_1 = arith.constant 0 : index
    %0 = vector.load %arg2[%c0, %c0_0, %c0_1] : memref<1x4x64xf32, #tpu.memory_space<vmem>>, vector<1x4x64xf32>
    %1 = vector.shape_cast %0 : vector<1x4x64xf32> to vector<4x64xf32>
    %2 = vector.extract_strided_slice %1 {offsets = [0, 55], sizes = [4, 9], strides = [1, 1]} : vector<4x64xf32> to vector<4x9xf32>
    %3 = vector.extract_strided_slice %1 {offsets = [0, 0], sizes = [4, 55], strides = [1, 1]} : vector<4x64xf32> to vector<4x55xf32>
    %4 = tpu.concatenate %2, %3 in 1 : vector<4x9xf32>, vector<4x55xf32> -> vector<4x64xf32>
    %c0_2 = arith.constant 0 : index
    %c0_3 = arith.constant 0 : index
    %c0_4 = arith.constant 0 : index
    %5 = vector.load %arg1[%c0_2, %c0_3, %c0_4] : memref<9x1x64xf32, #tpu.memory_space<vmem>>, vector<1x1x64xf32>
    %6 = vector.shape_cast %5 : vector<1x1x64xf32> to vector<1x64xf32>
    %7 = vector.broadcast %6 : vector<1x64xf32> to vector<4x64xf32>
    %8 = arith.mulf %4, %7 : vector<4x64xf32>
    %9 = arith.truncf %8 : vector<4x64xf32> to vector<4x64xbf16>
    %10 = vector.extract_strided_slice %1 {offsets = [0, 56], sizes = [4, 8], strides = [1, 1]} : vector<4x64xf32> to vector<4x8xf32>
    %11 = vector.extract_strided_slice %1 {offsets = [0, 0], sizes = [4, 56], strides = [1, 1]} : vector<4x64xf32> to vector<4x56xf32>
    %12 = tpu.concatenate %10, %11 in 1 : vector<4x8xf32>, vector<4x56xf32> -> vector<4x64xf32>
    %c1 = arith.constant 1 : index
    %c0_5 = arith.constant 0 : index
    %c0_6 = arith.constant 0 : index
    %13 = vector.load %arg1[%c1, %c0_5, %c0_6] : memref<9x1x64xf32, #tpu.memory_space<vmem>>, vector<1x1x64xf32>
    %14 = vector.shape_cast %13 : vector<1x1x64xf32> to vector<1x64xf32>
    %15 = vector.broadcast %14 : vector<1x64xf32> to vector<4x64xf32>
    %16 = arith.mulf %12, %15 : vector<4x64xf32>
    %17 = arith.truncf %16 : vector<4x64xf32> to vector<4x64xbf16>
    %18 = vector.extract_strided_slice %1 {offsets = [0, 57], sizes = [4, 7], strides = [1, 1]} : vector<4x64xf32> to vector<4x7xf32>
    %19 = vector.extract_strided_slice %1 {offsets = [0, 0], sizes = [4, 57], strides = [1, 1]} : vector<4x64xf32> to vector<4x57xf32>
    %20 = tpu.concatenate %18, %19 in 1 : vector<4x7xf32>, vector<4x57xf32> -> vector<4x64xf32>
    %c2 = arith.constant 2 : index
    %c0_7 = arith.constant 0 : index
    %c0_8 = arith.constant 0 : index
    %21 = vector.load %arg1[%c2, %c0_7, %c0_8] : memref<9x1x64xf32, #tpu.memory_space<vmem>>, vector<1x1x64xf32>
    %22 = vector.shape_cast %21 : vector<1x1x64xf32> to vector<1x64xf32>
    %23 = vector.broadcast %22 : vector<1x64xf32> to vector<4x64xf32>
    %24 = arith.mulf %20, %23 : vector<4x64xf32>
    %25 = arith.truncf %24 : vector<4x64xf32> to vector<4x64xbf16>
    %26 = vector.extract_strided_slice %1 {offsets = [0, 63], sizes = [4, 1], strides = [1, 1]} : vector<4x64xf32> to vector<4x1xf32>
    %27 = vector.extract_strided_slice %1 {offsets = [0, 0], sizes = [4, 63], strides = [1, 1]} : vector<4x64xf32> to vector<4x63xf32>
    %28 = tpu.concatenate %26, %27 in 1 : vector<4x1xf32>, vector<4x63xf32> -> vector<4x64xf32>
    %c3 = arith.constant 3 : index
    %c0_9 = arith.constant 0 : index
    %c0_10 = arith.constant 0 : index
    %29 = vector.load %arg1[%c3, %c0_9, %c0_10] : memref<9x1x64xf32, #tpu.memory_space<vmem>>, vector<1x1x64xf32>
    %30 = vector.shape_cast %29 : vector<1x1x64xf32> to vector<1x64xf32>
    %31 = vector.broadcast %30 : vector<1x64xf32> to vector<4x64xf32>
    %32 = arith.mulf %28, %31 : vector<4x64xf32>
    %33 = arith.truncf %32 : vector<4x64xf32> to vector<4x64xbf16>
    %34 = arith.truncf %1 : vector<4x64xf32> to vector<4x64xbf16>
    %35 = vector.extract_strided_slice %1 {offsets = [0, 1], sizes = [4, 63], strides = [1, 1]} : vector<4x64xf32> to vector<4x63xf32>
    %36 = vector.extract_strided_slice %1 {offsets = [0, 0], sizes = [4, 1], strides = [1, 1]} : vector<4x64xf32> to vector<4x1xf32>
    %37 = tpu.concatenate %35, %36 in 1 : vector<4x63xf32>, vector<4x1xf32> -> vector<4x64xf32>
    %c5 = arith.constant 5 : index
    %c0_11 = arith.constant 0 : index
    %c0_12 = arith.constant 0 : index
    %38 = vector.load %arg1[%c5, %c0_11, %c0_12] : memref<9x1x64xf32, #tpu.memory_space<vmem>>, vector<1x1x64xf32>
    %39 = vector.shape_cast %38 : vector<1x1x64xf32> to vector<1x64xf32>
    %40 = vector.broadcast %39 : vector<1x64xf32> to vector<4x64xf32>
    %41 = arith.mulf %37, %40 : vector<4x64xf32>
    %42 = arith.truncf %41 : vector<4x64xf32> to vector<4x64xbf16>
    %43 = vector.extract_strided_slice %1 {offsets = [0, 7], sizes = [4, 57], strides = [1, 1]} : vector<4x64xf32> to vector<4x57xf32>
    %44 = vector.extract_strided_slice %1 {offsets = [0, 0], sizes = [4, 7], strides = [1, 1]} : vector<4x64xf32> to vector<4x7xf32>
    %45 = tpu.concatenate %43, %44 in 1 : vector<4x57xf32>, vector<4x7xf32> -> vector<4x64xf32>
    %c6 = arith.constant 6 : index
    %c0_13 = arith.constant 0 : index
    %c0_14 = arith.constant 0 : index
    %46 = vector.load %arg1[%c6, %c0_13, %c0_14] : memref<9x1x64xf32, #tpu.memory_space<vmem>>, vector<1x1x64xf32>
    %47 = vector.shape_cast %46 : vector<1x1x64xf32> to vector<1x64xf32>
    %48 = vector.broadcast %47 : vector<1x64xf32> to vector<4x64xf32>
    %49 = arith.mulf %45, %48 : vector<4x64xf32>
    %50 = arith.truncf %49 : vector<4x64xf32> to vector<4x64xbf16>
    %51 = vector.extract_strided_slice %1 {offsets = [0, 8], sizes = [4, 56], strides = [1, 1]} : vector<4x64xf32> to vector<4x56xf32>
    %52 = vector.extract_strided_slice %1 {offsets = [0, 0], sizes = [4, 8], strides = [1, 1]} : vector<4x64xf32> to vector<4x8xf32>
    %53 = tpu.concatenate %51, %52 in 1 : vector<4x56xf32>, vector<4x8xf32> -> vector<4x64xf32>
    %c7 = arith.constant 7 : index
    %c0_15 = arith.constant 0 : index
    %c0_16 = arith.constant 0 : index
    %54 = vector.load %arg1[%c7, %c0_15, %c0_16] : memref<9x1x64xf32, #tpu.memory_space<vmem>>, vector<1x1x64xf32>
    %55 = vector.shape_cast %54 : vector<1x1x64xf32> to vector<1x64xf32>
    %56 = vector.broadcast %55 : vector<1x64xf32> to vector<4x64xf32>
    %57 = arith.mulf %53, %56 : vector<4x64xf32>
    %58 = arith.truncf %57 : vector<4x64xf32> to vector<4x64xbf16>
    %59 = vector.extract_strided_slice %1 {offsets = [0, 9], sizes = [4, 55], strides = [1, 1]} : vector<4x64xf32> to vector<4x55xf32>
    %60 = vector.extract_strided_slice %1 {offsets = [0, 0], sizes = [4, 9], strides = [1, 1]} : vector<4x64xf32> to vector<4x9xf32>
    %61 = tpu.concatenate %59, %60 in 1 : vector<4x55xf32>, vector<4x9xf32> -> vector<4x64xf32>
    %c8 = arith.constant 8 : index
    %c0_17 = arith.constant 0 : index
    %c0_18 = arith.constant 0 : index
    %62 = vector.load %arg1[%c8, %c0_17, %c0_18] : memref<9x1x64xf32, #tpu.memory_space<vmem>>, vector<1x1x64xf32>
    %63 = vector.shape_cast %62 : vector<1x1x64xf32> to vector<1x64xf32>
    %64 = vector.broadcast %63 : vector<1x64xf32> to vector<4x64xf32>
    %65 = arith.mulf %61, %64 : vector<4x64xf32>
    %66 = arith.truncf %65 : vector<4x64xf32> to vector<4x64xbf16>
    %c0_19 = arith.constant 0 : index
    %c0_20 = arith.constant 0 : index
    %67 = vector.load %arg4[%c0_19, %c0_20] : memref<32x1xf32, #tpu.memory_space<vmem>>, vector<32x1xf32>
    %68 = vector.shape_cast %67 : vector<32x1xf32> to vector<32x1xf32>
    %69 = vector.broadcast %68 : vector<32x1xf32> to vector<32x64xf32>
    %c0_21 = arith.constant 0 : index
    %c0_22 = arith.constant 0 : index
    %c0_23 = arith.constant 0 : index
    %70 = vector.load %arg3[%c0_21, %c0_22, %c0_23] : memref<9x32x4xbf16, #tpu.memory_space<vmem>>, vector<1x32x4xbf16>
    %71 = vector.shape_cast %70 : vector<1x32x4xbf16> to vector<32x4xbf16>
    %cst = arith.constant dense<0.000000e+00> : vector<32x64xf32>
    %72 = tpu.matmul %71, %9, %cst {dimension_numbers = #tpu.dot_dimension_numbers<[1], [0], [0], [1], [0, 0, 1, 1], [], []>} : vector<32x4xbf16>, vector<4x64xbf16>, vector<32x64xf32> -> vector<32x64xf32>
    %73 = arith.addf %69, %72 : vector<32x64xf32>
    %c1_24 = arith.constant 1 : index
    %c0_25 = arith.constant 0 : index
    %c0_26 = arith.constant 0 : index
    %74 = vector.load %arg3[%c1_24, %c0_25, %c0_26] : memref<9x32x4xbf16, #tpu.memory_space<vmem>>, vector<1x32x4xbf16>
    %75 = vector.shape_cast %74 : vector<1x32x4xbf16> to vector<32x4xbf16>
    %cst_27 = arith.constant dense<0.000000e+00> : vector<32x64xf32>
    %76 = tpu.matmul %75, %17, %cst_27 {dimension_numbers = #tpu.dot_dimension_numbers<[1], [0], [0], [1], [0, 0, 1, 1], [], []>} : vector<32x4xbf16>, vector<4x64xbf16>, vector<32x64xf32> -> vector<32x64xf32>
    %77 = arith.addf %73, %76 : vector<32x64xf32>
    %c2_28 = arith.constant 2 : index
    %c0_29 = arith.constant 0 : index
    %c0_30 = arith.constant 0 : index
    %78 = vector.load %arg3[%c2_28, %c0_29, %c0_30] : memref<9x32x4xbf16, #tpu.memory_space<vmem>>, vector<1x32x4xbf16>
    %79 = vector.shape_cast %78 : vector<1x32x4xbf16> to vector<32x4xbf16>
    %cst_31 = arith.constant dense<0.000000e+00> : vector<32x64xf32>
    %80 = tpu.matmul %79, %25, %cst_31 {dimension_numbers = #tpu.dot_dimension_numbers<[1], [0], [0], [1], [0, 0, 1, 1], [], []>} : vector<32x4xbf16>, vector<4x64xbf16>, vector<32x64xf32> -> vector<32x64xf32>
    %81 = arith.addf %77, %80 : vector<32x64xf32>
    %c3_32 = arith.constant 3 : index
    %c0_33 = arith.constant 0 : index
    %c0_34 = arith.constant 0 : index
    %82 = vector.load %arg3[%c3_32, %c0_33, %c0_34] : memref<9x32x4xbf16, #tpu.memory_space<vmem>>, vector<1x32x4xbf16>
    %83 = vector.shape_cast %82 : vector<1x32x4xbf16> to vector<32x4xbf16>
    %cst_35 = arith.constant dense<0.000000e+00> : vector<32x64xf32>
    %84 = tpu.matmul %83, %33, %cst_35 {dimension_numbers = #tpu.dot_dimension_numbers<[1], [0], [0], [1], [0, 0, 1, 1], [], []>} : vector<32x4xbf16>, vector<4x64xbf16>, vector<32x64xf32> -> vector<32x64xf32>
    %85 = arith.addf %81, %84 : vector<32x64xf32>
    %c4 = arith.constant 4 : index
    %c0_36 = arith.constant 0 : index
    %c0_37 = arith.constant 0 : index
    %86 = vector.load %arg3[%c4, %c0_36, %c0_37] : memref<9x32x4xbf16, #tpu.memory_space<vmem>>, vector<1x32x4xbf16>
    %87 = vector.shape_cast %86 : vector<1x32x4xbf16> to vector<32x4xbf16>
    %cst_38 = arith.constant dense<0.000000e+00> : vector<32x64xf32>
    %88 = tpu.matmul %87, %34, %cst_38 {dimension_numbers = #tpu.dot_dimension_numbers<[1], [0], [0], [1], [0, 0, 1, 1], [], []>} : vector<32x4xbf16>, vector<4x64xbf16>, vector<32x64xf32> -> vector<32x64xf32>
    %89 = arith.addf %85, %88 : vector<32x64xf32>
    %c5_39 = arith.constant 5 : index
    %c0_40 = arith.constant 0 : index
    %c0_41 = arith.constant 0 : index
    %90 = vector.load %arg3[%c5_39, %c0_40, %c0_41] : memref<9x32x4xbf16, #tpu.memory_space<vmem>>, vector<1x32x4xbf16>
    %91 = vector.shape_cast %90 : vector<1x32x4xbf16> to vector<32x4xbf16>
    %cst_42 = arith.constant dense<0.000000e+00> : vector<32x64xf32>
    %92 = tpu.matmul %91, %42, %cst_42 {dimension_numbers = #tpu.dot_dimension_numbers<[1], [0], [0], [1], [0, 0, 1, 1], [], []>} : vector<32x4xbf16>, vector<4x64xbf16>, vector<32x64xf32> -> vector<32x64xf32>
    %93 = arith.addf %89, %92 : vector<32x64xf32>
    %c6_43 = arith.constant 6 : index
    %c0_44 = arith.constant 0 : index
    %c0_45 = arith.constant 0 : index
    %94 = vector.load %arg3[%c6_43, %c0_44, %c0_45] : memref<9x32x4xbf16, #tpu.memory_space<vmem>>, vector<1x32x4xbf16>
    %95 = vector.shape_cast %94 : vector<1x32x4xbf16> to vector<32x4xbf16>
    %cst_46 = arith.constant dense<0.000000e+00> : vector<32x64xf32>
    %96 = tpu.matmul %95, %50, %cst_46 {dimension_numbers = #tpu.dot_dimension_numbers<[1], [0], [0], [1], [0, 0, 1, 1], [], []>} : vector<32x4xbf16>, vector<4x64xbf16>, vector<32x64xf32> -> vector<32x64xf32>
    %97 = arith.addf %93, %96 : vector<32x64xf32>
    %c7_47 = arith.constant 7 : index
    %c0_48 = arith.constant 0 : index
    %c0_49 = arith.constant 0 : index
    %98 = vector.load %arg3[%c7_47, %c0_48, %c0_49] : memref<9x32x4xbf16, #tpu.memory_space<vmem>>, vector<1x32x4xbf16>
    %99 = vector.shape_cast %98 : vector<1x32x4xbf16> to vector<32x4xbf16>
    %cst_50 = arith.constant dense<0.000000e+00> : vector<32x64xf32>
    %100 = tpu.matmul %99, %58, %cst_50 {dimension_numbers = #tpu.dot_dimension_numbers<[1], [0], [0], [1], [0, 0, 1, 1], [], []>} : vector<32x4xbf16>, vector<4x64xbf16>, vector<32x64xf32> -> vector<32x64xf32>
    %101 = arith.addf %97, %100 : vector<32x64xf32>
    %c8_51 = arith.constant 8 : index
    %c0_52 = arith.constant 0 : index
    %c0_53 = arith.constant 0 : index
    %102 = vector.load %arg3[%c8_51, %c0_52, %c0_53] : memref<9x32x4xbf16, #tpu.memory_space<vmem>>, vector<1x32x4xbf16>
    %103 = vector.shape_cast %102 : vector<1x32x4xbf16> to vector<32x4xbf16>
    %cst_54 = arith.constant dense<0.000000e+00> : vector<32x64xf32>
    %104 = tpu.matmul %103, %66, %cst_54 {dimension_numbers = #tpu.dot_dimension_numbers<[1], [0], [0], [1], [0, 0, 1, 1], [], []>} : vector<32x4xbf16>, vector<4x64xbf16>, vector<32x64xf32> -> vector<32x64xf32>
    %105 = arith.addf %101, %104 : vector<32x64xf32>
    %cst_55 = arith.constant 0.000000e+00 : f32
    %106 = vector.broadcast %cst_55 : f32 to vector<32x64xf32>
    %107 = arith.maximumf %105, %106 : vector<32x64xf32>
    %108 = vector.extract_strided_slice %107 {offsets = [0, 55], sizes = [32, 9], strides = [1, 1]} : vector<32x64xf32> to vector<32x9xf32>
    %109 = vector.extract_strided_slice %107 {offsets = [0, 0], sizes = [32, 55], strides = [1, 1]} : vector<32x64xf32> to vector<32x55xf32>
    %110 = tpu.concatenate %108, %109 in 1 : vector<32x9xf32>, vector<32x55xf32> -> vector<32x64xf32>
    %c0_56 = arith.constant 0 : index
    %c0_57 = arith.constant 0 : index
    %c0_58 = arith.constant 0 : index
    %111 = vector.load %arg1[%c0_56, %c0_57, %c0_58] : memref<9x1x64xf32, #tpu.memory_space<vmem>>, vector<1x1x64xf32>
    %112 = vector.shape_cast %111 : vector<1x1x64xf32> to vector<1x64xf32>
    %113 = vector.broadcast %112 : vector<1x64xf32> to vector<32x64xf32>
    %114 = arith.mulf %110, %113 : vector<32x64xf32>
    %115 = arith.truncf %114 : vector<32x64xf32> to vector<32x64xbf16>
    %116 = vector.extract_strided_slice %107 {offsets = [0, 56], sizes = [32, 8], strides = [1, 1]} : vector<32x64xf32> to vector<32x8xf32>
    %117 = vector.extract_strided_slice %107 {offsets = [0, 0], sizes = [32, 56], strides = [1, 1]} : vector<32x64xf32> to vector<32x56xf32>
    %118 = tpu.concatenate %116, %117 in 1 : vector<32x8xf32>, vector<32x56xf32> -> vector<32x64xf32>
    %c1_59 = arith.constant 1 : index
    %c0_60 = arith.constant 0 : index
    %c0_61 = arith.constant 0 : index
    %119 = vector.load %arg1[%c1_59, %c0_60, %c0_61] : memref<9x1x64xf32, #tpu.memory_space<vmem>>, vector<1x1x64xf32>
    %120 = vector.shape_cast %119 : vector<1x1x64xf32> to vector<1x64xf32>
    %121 = vector.broadcast %120 : vector<1x64xf32> to vector<32x64xf32>
    %122 = arith.mulf %118, %121 : vector<32x64xf32>
    %123 = arith.truncf %122 : vector<32x64xf32> to vector<32x64xbf16>
    %124 = vector.extract_strided_slice %107 {offsets = [0, 57], sizes = [32, 7], strides = [1, 1]} : vector<32x64xf32> to vector<32x7xf32>
    %125 = vector.extract_strided_slice %107 {offsets = [0, 0], sizes = [32, 57], strides = [1, 1]} : vector<32x64xf32> to vector<32x57xf32>
    %126 = tpu.concatenate %124, %125 in 1 : vector<32x7xf32>, vector<32x57xf32> -> vector<32x64xf32>
    %c2_62 = arith.constant 2 : index
    %c0_63 = arith.constant 0 : index
    %c0_64 = arith.constant 0 : index
    %127 = vector.load %arg1[%c2_62, %c0_63, %c0_64] : memref<9x1x64xf32, #tpu.memory_space<vmem>>, vector<1x1x64xf32>
    %128 = vector.shape_cast %127 : vector<1x1x64xf32> to vector<1x64xf32>
    %129 = vector.broadcast %128 : vector<1x64xf32> to vector<32x64xf32>
    %130 = arith.mulf %126, %129 : vector<32x64xf32>
    %131 = arith.truncf %130 : vector<32x64xf32> to vector<32x64xbf16>
    %132 = vector.extract_strided_slice %107 {offsets = [0, 63], sizes = [32, 1], strides = [1, 1]} : vector<32x64xf32> to vector<32x1xf32>
    %133 = vector.extract_strided_slice %107 {offsets = [0, 0], sizes = [32, 63], strides = [1, 1]} : vector<32x64xf32> to vector<32x63xf32>
    %134 = tpu.concatenate %132, %133 in 1 : vector<32x1xf32>, vector<32x63xf32> -> vector<32x64xf32>
    %c3_65 = arith.constant 3 : index
    %c0_66 = arith.constant 0 : index
    %c0_67 = arith.constant 0 : index
    %135 = vector.load %arg1[%c3_65, %c0_66, %c0_67] : memref<9x1x64xf32, #tpu.memory_space<vmem>>, vector<1x1x64xf32>
    %136 = vector.shape_cast %135 : vector<1x1x64xf32> to vector<1x64xf32>
    %137 = vector.broadcast %136 : vector<1x64xf32> to vector<32x64xf32>
    %138 = arith.mulf %134, %137 : vector<32x64xf32>
    %139 = arith.truncf %138 : vector<32x64xf32> to vector<32x64xbf16>
    %140 = arith.truncf %107 : vector<32x64xf32> to vector<32x64xbf16>
    %141 = vector.extract_strided_slice %107 {offsets = [0, 1], sizes = [32, 63], strides = [1, 1]} : vector<32x64xf32> to vector<32x63xf32>
    %142 = vector.extract_strided_slice %107 {offsets = [0, 0], sizes = [32, 1], strides = [1, 1]} : vector<32x64xf32> to vector<32x1xf32>
    %143 = tpu.concatenate %141, %142 in 1 : vector<32x63xf32>, vector<32x1xf32> -> vector<32x64xf32>
    %c5_68 = arith.constant 5 : index
    %c0_69 = arith.constant 0 : index
    %c0_70 = arith.constant 0 : index
    %144 = vector.load %arg1[%c5_68, %c0_69, %c0_70] : memref<9x1x64xf32, #tpu.memory_space<vmem>>, vector<1x1x64xf32>
    %145 = vector.shape_cast %144 : vector<1x1x64xf32> to vector<1x64xf32>
    %146 = vector.broadcast %145 : vector<1x64xf32> to vector<32x64xf32>
    %147 = arith.mulf %143, %146 : vector<32x64xf32>
    %148 = arith.truncf %147 : vector<32x64xf32> to vector<32x64xbf16>
    %149 = vector.extract_strided_slice %107 {offsets = [0, 7], sizes = [32, 57], strides = [1, 1]} : vector<32x64xf32> to vector<32x57xf32>
    %150 = vector.extract_strided_slice %107 {offsets = [0, 0], sizes = [32, 7], strides = [1, 1]} : vector<32x64xf32> to vector<32x7xf32>
    %151 = tpu.concatenate %149, %150 in 1 : vector<32x57xf32>, vector<32x7xf32> -> vector<32x64xf32>
    %c6_71 = arith.constant 6 : index
    %c0_72 = arith.constant 0 : index
    %c0_73 = arith.constant 0 : index
    %152 = vector.load %arg1[%c6_71, %c0_72, %c0_73] : memref<9x1x64xf32, #tpu.memory_space<vmem>>, vector<1x1x64xf32>
    %153 = vector.shape_cast %152 : vector<1x1x64xf32> to vector<1x64xf32>
    %154 = vector.broadcast %153 : vector<1x64xf32> to vector<32x64xf32>
    %155 = arith.mulf %151, %154 : vector<32x64xf32>
    %156 = arith.truncf %155 : vector<32x64xf32> to vector<32x64xbf16>
    %157 = vector.extract_strided_slice %107 {offsets = [0, 8], sizes = [32, 56], strides = [1, 1]} : vector<32x64xf32> to vector<32x56xf32>
    %158 = vector.extract_strided_slice %107 {offsets = [0, 0], sizes = [32, 8], strides = [1, 1]} : vector<32x64xf32> to vector<32x8xf32>
    %159 = tpu.concatenate %157, %158 in 1 : vector<32x56xf32>, vector<32x8xf32> -> vector<32x64xf32>
    %c7_74 = arith.constant 7 : index
    %c0_75 = arith.constant 0 : index
    %c0_76 = arith.constant 0 : index
    %160 = vector.load %arg1[%c7_74, %c0_75, %c0_76] : memref<9x1x64xf32, #tpu.memory_space<vmem>>, vector<1x1x64xf32>
    %161 = vector.shape_cast %160 : vector<1x1x64xf32> to vector<1x64xf32>
    %162 = vector.broadcast %161 : vector<1x64xf32> to vector<32x64xf32>
    %163 = arith.mulf %159, %162 : vector<32x64xf32>
    %164 = arith.truncf %163 : vector<32x64xf32> to vector<32x64xbf16>
    %165 = vector.extract_strided_slice %107 {offsets = [0, 9], sizes = [32, 55], strides = [1, 1]} : vector<32x64xf32> to vector<32x55xf32>
    %166 = vector.extract_strided_slice %107 {offsets = [0, 0], sizes = [32, 9], strides = [1, 1]} : vector<32x64xf32> to vector<32x9xf32>
    %167 = tpu.concatenate %165, %166 in 1 : vector<32x55xf32>, vector<32x9xf32> -> vector<32x64xf32>
    %c8_77 = arith.constant 8 : index
    %c0_78 = arith.constant 0 : index
    %c0_79 = arith.constant 0 : index
    %168 = vector.load %arg1[%c8_77, %c0_78, %c0_79] : memref<9x1x64xf32, #tpu.memory_space<vmem>>, vector<1x1x64xf32>
    %169 = vector.shape_cast %168 : vector<1x1x64xf32> to vector<1x64xf32>
    %170 = vector.broadcast %169 : vector<1x64xf32> to vector<32x64xf32>
    %171 = arith.mulf %167, %170 : vector<32x64xf32>
    %172 = arith.truncf %171 : vector<32x64xf32> to vector<32x64xbf16>
    %c0_80 = arith.constant 0 : index
    %c0_81 = arith.constant 0 : index
    %c0_82 = arith.constant 0 : index
    %c0_83 = arith.constant 0 : index
    %173 = vector.load %arg5[%c0_80, %c0_81, %c0_82, %c0_83] : memref<2x9x16x32xbf16, #tpu.memory_space<vmem>>, vector<1x1x16x32xbf16>
    %174 = vector.shape_cast %173 : vector<1x1x16x32xbf16> to vector<16x32xbf16>
    %cst_84 = arith.constant dense<0.000000e+00> : vector<16x64xf32>
    %175 = tpu.matmul %174, %115, %cst_84 {dimension_numbers = #tpu.dot_dimension_numbers<[1], [0], [0], [1], [0, 0, 1, 1], [], []>} : vector<16x32xbf16>, vector<32x64xbf16>, vector<16x64xf32> -> vector<16x64xf32>
    %c0_85 = arith.constant 0 : index
    %c1_86 = arith.constant 1 : index
    %c0_87 = arith.constant 0 : index
    %c0_88 = arith.constant 0 : index
    %176 = vector.load %arg5[%c0_85, %c1_86, %c0_87, %c0_88] : memref<2x9x16x32xbf16, #tpu.memory_space<vmem>>, vector<1x1x16x32xbf16>
    %177 = vector.shape_cast %176 : vector<1x1x16x32xbf16> to vector<16x32xbf16>
    %cst_89 = arith.constant dense<0.000000e+00> : vector<16x64xf32>
    %178 = tpu.matmul %177, %123, %cst_89 {dimension_numbers = #tpu.dot_dimension_numbers<[1], [0], [0], [1], [0, 0, 1, 1], [], []>} : vector<16x32xbf16>, vector<32x64xbf16>, vector<16x64xf32> -> vector<16x64xf32>
    %179 = arith.addf %175, %178 : vector<16x64xf32>
    %c0_90 = arith.constant 0 : index
    %c2_91 = arith.constant 2 : index
    %c0_92 = arith.constant 0 : index
    %c0_93 = arith.constant 0 : index
    %180 = vector.load %arg5[%c0_90, %c2_91, %c0_92, %c0_93] : memref<2x9x16x32xbf16, #tpu.memory_space<vmem>>, vector<1x1x16x32xbf16>
    %181 = vector.shape_cast %180 : vector<1x1x16x32xbf16> to vector<16x32xbf16>
    %cst_94 = arith.constant dense<0.000000e+00> : vector<16x64xf32>
    %182 = tpu.matmul %181, %131, %cst_94 {dimension_numbers = #tpu.dot_dimension_numbers<[1], [0], [0], [1], [0, 0, 1, 1], [], []>} : vector<16x32xbf16>, vector<32x64xbf16>, vector<16x64xf32> -> vector<16x64xf32>
    %183 = arith.addf %179, %182 : vector<16x64xf32>
    %c0_95 = arith.constant 0 : index
    %c3_96 = arith.constant 3 : index
    %c0_97 = arith.constant 0 : index
    %c0_98 = arith.constant 0 : index
    %184 = vector.load %arg5[%c0_95, %c3_96, %c0_97, %c0_98] : memref<2x9x16x32xbf16, #tpu.memory_space<vmem>>, vector<1x1x16x32xbf16>
    %185 = vector.shape_cast %184 : vector<1x1x16x32xbf16> to vector<16x32xbf16>
    %cst_99 = arith.constant dense<0.000000e+00> : vector<16x64xf32>
    %186 = tpu.matmul %185, %139, %cst_99 {dimension_numbers = #tpu.dot_dimension_numbers<[1], [0], [0], [1], [0, 0, 1, 1], [], []>} : vector<16x32xbf16>, vector<32x64xbf16>, vector<16x64xf32> -> vector<16x64xf32>
    %187 = arith.addf %183, %186 : vector<16x64xf32>
    %c0_100 = arith.constant 0 : index
    %c4_101 = arith.constant 4 : index
    %c0_102 = arith.constant 0 : index
    %c0_103 = arith.constant 0 : index
    %188 = vector.load %arg5[%c0_100, %c4_101, %c0_102, %c0_103] : memref<2x9x16x32xbf16, #tpu.memory_space<vmem>>, vector<1x1x16x32xbf16>
    %189 = vector.shape_cast %188 : vector<1x1x16x32xbf16> to vector<16x32xbf16>
    %cst_104 = arith.constant dense<0.000000e+00> : vector<16x64xf32>
    %190 = tpu.matmul %189, %140, %cst_104 {dimension_numbers = #tpu.dot_dimension_numbers<[1], [0], [0], [1], [0, 0, 1, 1], [], []>} : vector<16x32xbf16>, vector<32x64xbf16>, vector<16x64xf32> -> vector<16x64xf32>
    %191 = arith.addf %187, %190 : vector<16x64xf32>
    %c0_105 = arith.constant 0 : index
    %c5_106 = arith.constant 5 : index
    %c0_107 = arith.constant 0 : index
    %c0_108 = arith.constant 0 : index
    %192 = vector.load %arg5[%c0_105, %c5_106, %c0_107, %c0_108] : memref<2x9x16x32xbf16, #tpu.memory_space<vmem>>, vector<1x1x16x32xbf16>
    %193 = vector.shape_cast %192 : vector<1x1x16x32xbf16> to vector<16x32xbf16>
    %cst_109 = arith.constant dense<0.000000e+00> : vector<16x64xf32>
    %194 = tpu.matmul %193, %148, %cst_109 {dimension_numbers = #tpu.dot_dimension_numbers<[1], [0], [0], [1], [0, 0, 1, 1], [], []>} : vector<16x32xbf16>, vector<32x64xbf16>, vector<16x64xf32> -> vector<16x64xf32>
    %195 = arith.addf %191, %194 : vector<16x64xf32>
    %c0_110 = arith.constant 0 : index
    %c6_111 = arith.constant 6 : index
    %c0_112 = arith.constant 0 : index
    %c0_113 = arith.constant 0 : index
    %196 = vector.load %arg5[%c0_110, %c6_111, %c0_112, %c0_113] : memref<2x9x16x32xbf16, #tpu.memory_space<vmem>>, vector<1x1x16x32xbf16>
    %197 = vector.shape_cast %196 : vector<1x1x16x32xbf16> to vector<16x32xbf16>
    %cst_114 = arith.constant dense<0.000000e+00> : vector<16x64xf32>
    %198 = tpu.matmul %197, %156, %cst_114 {dimension_numbers = #tpu.dot_dimension_numbers<[1], [0], [0], [1], [0, 0, 1, 1], [], []>} : vector<16x32xbf16>, vector<32x64xbf16>, vector<16x64xf32> -> vector<16x64xf32>
    %199 = arith.addf %195, %198 : vector<16x64xf32>
    %c0_115 = arith.constant 0 : index
    %c7_116 = arith.constant 7 : index
    %c0_117 = arith.constant 0 : index
    %c0_118 = arith.constant 0 : index
    %200 = vector.load %arg5[%c0_115, %c7_116, %c0_117, %c0_118] : memref<2x9x16x32xbf16, #tpu.memory_space<vmem>>, vector<1x1x16x32xbf16>
    %201 = vector.shape_cast %200 : vector<1x1x16x32xbf16> to vector<16x32xbf16>
    %cst_119 = arith.constant dense<0.000000e+00> : vector<16x64xf32>
    %202 = tpu.matmul %201, %164, %cst_119 {dimension_numbers = #tpu.dot_dimension_numbers<[1], [0], [0], [1], [0, 0, 1, 1], [], []>} : vector<16x32xbf16>, vector<32x64xbf16>, vector<16x64xf32> -> vector<16x64xf32>
    %203 = arith.addf %199, %202 : vector<16x64xf32>
    %c0_120 = arith.constant 0 : index
    %c8_121 = arith.constant 8 : index
    %c0_122 = arith.constant 0 : index
    %c0_123 = arith.constant 0 : index
    %204 = vector.load %arg5[%c0_120, %c8_121, %c0_122, %c0_123] : memref<2x9x16x32xbf16, #tpu.memory_space<vmem>>, vector<1x1x16x32xbf16>
    %205 = vector.shape_cast %204 : vector<1x1x16x32xbf16> to vector<16x32xbf16>
    %cst_124 = arith.constant dense<0.000000e+00> : vector<16x64xf32>
    %206 = tpu.matmul %205, %172, %cst_124 {dimension_numbers = #tpu.dot_dimension_numbers<[1], [0], [0], [1], [0, 0, 1, 1], [], []>} : vector<16x32xbf16>, vector<32x64xbf16>, vector<16x64xf32> -> vector<16x64xf32>
    %207 = arith.addf %203, %206 : vector<16x64xf32>
    %cst_125 = arith.constant 0.000000e+00 : f32
    %208 = vector.broadcast %cst_125 : f32 to vector<16x64xf32>
    %209 = arith.maximumf %207, %208 : vector<16x64xf32>
    %210 = arith.truncf %209 : vector<16x64xf32> to vector<16x64xbf16>
    %c0_126 = arith.constant 0 : index
    %c0_127 = arith.constant 0 : index
    %c0_128 = arith.constant 0 : index
    %211 = vector.load %arg6[%c0_126, %c0_127, %c0_128] : memref<2x32x16xbf16, #tpu.memory_space<vmem>>, vector<1x32x16xbf16>
    %212 = vector.shape_cast %211 : vector<1x32x16xbf16> to vector<32x16xbf16>
    %cst_129 = arith.constant dense<0.000000e+00> : vector<32x64xf32>
    %213 = tpu.matmul %212, %210, %cst_129 {dimension_numbers = #tpu.dot_dimension_numbers<[1], [0], [0], [1], [0, 0, 1, 1], [], []>} : vector<32x16xbf16>, vector<16x64xbf16>, vector<32x64xf32> -> vector<32x64xf32>
    %214 = arith.addf %105, %213 : vector<32x64xf32>
    %cst_130 = arith.constant 0.000000e+00 : f32
    %215 = vector.broadcast %cst_130 : f32 to vector<32x64xf32>
    %216 = arith.maximumf %214, %215 : vector<32x64xf32>
    %217 = vector.extract_strided_slice %216 {offsets = [0, 55], sizes = [32, 9], strides = [1, 1]} : vector<32x64xf32> to vector<32x9xf32>
    %218 = vector.extract_strided_slice %216 {offsets = [0, 0], sizes = [32, 55], strides = [1, 1]} : vector<32x64xf32> to vector<32x55xf32>
    %219 = tpu.concatenate %217, %218 in 1 : vector<32x9xf32>, vector<32x55xf32> -> vector<32x64xf32>
    %c0_131 = arith.constant 0 : index
    %c0_132 = arith.constant 0 : index
    %c0_133 = arith.constant 0 : index
    %220 = vector.load %arg1[%c0_131, %c0_132, %c0_133] : memref<9x1x64xf32, #tpu.memory_space<vmem>>, vector<1x1x64xf32>
    %221 = vector.shape_cast %220 : vector<1x1x64xf32> to vector<1x64xf32>
    %222 = vector.broadcast %221 : vector<1x64xf32> to vector<32x64xf32>
    %223 = arith.mulf %219, %222 : vector<32x64xf32>
    %224 = arith.truncf %223 : vector<32x64xf32> to vector<32x64xbf16>
    %225 = vector.extract_strided_slice %216 {offsets = [0, 56], sizes = [32, 8], strides = [1, 1]} : vector<32x64xf32> to vector<32x8xf32>
    %226 = vector.extract_strided_slice %216 {offsets = [0, 0], sizes = [32, 56], strides = [1, 1]} : vector<32x64xf32> to vector<32x56xf32>
    %227 = tpu.concatenate %225, %226 in 1 : vector<32x8xf32>, vector<32x56xf32> -> vector<32x64xf32>
    %c1_134 = arith.constant 1 : index
    %c0_135 = arith.constant 0 : index
    %c0_136 = arith.constant 0 : index
    %228 = vector.load %arg1[%c1_134, %c0_135, %c0_136] : memref<9x1x64xf32, #tpu.memory_space<vmem>>, vector<1x1x64xf32>
    %229 = vector.shape_cast %228 : vector<1x1x64xf32> to vector<1x64xf32>
    %230 = vector.broadcast %229 : vector<1x64xf32> to vector<32x64xf32>
    %231 = arith.mulf %227, %230 : vector<32x64xf32>
    %232 = arith.truncf %231 : vector<32x64xf32> to vector<32x64xbf16>
    %233 = vector.extract_strided_slice %216 {offsets = [0, 57], sizes = [32, 7], strides = [1, 1]} : vector<32x64xf32> to vector<32x7xf32>
    %234 = vector.extract_strided_slice %216 {offsets = [0, 0], sizes = [32, 57], strides = [1, 1]} : vector<32x64xf32> to vector<32x57xf32>
    %235 = tpu.concatenate %233, %234 in 1 : vector<32x7xf32>, vector<32x57xf32> -> vector<32x64xf32>
    %c2_137 = arith.constant 2 : index
    %c0_138 = arith.constant 0 : index
    %c0_139 = arith.constant 0 : index
    %236 = vector.load %arg1[%c2_137, %c0_138, %c0_139] : memref<9x1x64xf32, #tpu.memory_space<vmem>>, vector<1x1x64xf32>
    %237 = vector.shape_cast %236 : vector<1x1x64xf32> to vector<1x64xf32>
    %238 = vector.broadcast %237 : vector<1x64xf32> to vector<32x64xf32>
    %239 = arith.mulf %235, %238 : vector<32x64xf32>
    %240 = arith.truncf %239 : vector<32x64xf32> to vector<32x64xbf16>
    %241 = vector.extract_strided_slice %216 {offsets = [0, 63], sizes = [32, 1], strides = [1, 1]} : vector<32x64xf32> to vector<32x1xf32>
    %242 = vector.extract_strided_slice %216 {offsets = [0, 0], sizes = [32, 63], strides = [1, 1]} : vector<32x64xf32> to vector<32x63xf32>
    %243 = tpu.concatenate %241, %242 in 1 : vector<32x1xf32>, vector<32x63xf32> -> vector<32x64xf32>
    %c3_140 = arith.constant 3 : index
    %c0_141 = arith.constant 0 : index
    %c0_142 = arith.constant 0 : index
    %244 = vector.load %arg1[%c3_140, %c0_141, %c0_142] : memref<9x1x64xf32, #tpu.memory_space<vmem>>, vector<1x1x64xf32>
    %245 = vector.shape_cast %244 : vector<1x1x64xf32> to vector<1x64xf32>
    %246 = vector.broadcast %245 : vector<1x64xf32> to vector<32x64xf32>
    %247 = arith.mulf %243, %246 : vector<32x64xf32>
    %248 = arith.truncf %247 : vector<32x64xf32> to vector<32x64xbf16>
    %249 = arith.truncf %216 : vector<32x64xf32> to vector<32x64xbf16>
    %250 = vector.extract_strided_slice %216 {offsets = [0, 1], sizes = [32, 63], strides = [1, 1]} : vector<32x64xf32> to vector<32x63xf32>
    %251 = vector.extract_strided_slice %216 {offsets = [0, 0], sizes = [32, 1], strides = [1, 1]} : vector<32x64xf32> to vector<32x1xf32>
    %252 = tpu.concatenate %250, %251 in 1 : vector<32x63xf32>, vector<32x1xf32> -> vector<32x64xf32>
    %c5_143 = arith.constant 5 : index
    %c0_144 = arith.constant 0 : index
    %c0_145 = arith.constant 0 : index
    %253 = vector.load %arg1[%c5_143, %c0_144, %c0_145] : memref<9x1x64xf32, #tpu.memory_space<vmem>>, vector<1x1x64xf32>
    %254 = vector.shape_cast %253 : vector<1x1x64xf32> to vector<1x64xf32>
    %255 = vector.broadcast %254 : vector<1x64xf32> to vector<32x64xf32>
    %256 = arith.mulf %252, %255 : vector<32x64xf32>
    %257 = arith.truncf %256 : vector<32x64xf32> to vector<32x64xbf16>
    %258 = vector.extract_strided_slice %216 {offsets = [0, 7], sizes = [32, 57], strides = [1, 1]} : vector<32x64xf32> to vector<32x57xf32>
    %259 = vector.extract_strided_slice %216 {offsets = [0, 0], sizes = [32, 7], strides = [1, 1]} : vector<32x64xf32> to vector<32x7xf32>
    %260 = tpu.concatenate %258, %259 in 1 : vector<32x57xf32>, vector<32x7xf32> -> vector<32x64xf32>
    %c6_146 = arith.constant 6 : index
    %c0_147 = arith.constant 0 : index
    %c0_148 = arith.constant 0 : index
    %261 = vector.load %arg1[%c6_146, %c0_147, %c0_148] : memref<9x1x64xf32, #tpu.memory_space<vmem>>, vector<1x1x64xf32>
    %262 = vector.shape_cast %261 : vector<1x1x64xf32> to vector<1x64xf32>
    %263 = vector.broadcast %262 : vector<1x64xf32> to vector<32x64xf32>
    %264 = arith.mulf %260, %263 : vector<32x64xf32>
    %265 = arith.truncf %264 : vector<32x64xf32> to vector<32x64xbf16>
    %266 = vector.extract_strided_slice %216 {offsets = [0, 8], sizes = [32, 56], strides = [1, 1]} : vector<32x64xf32> to vector<32x56xf32>
    %267 = vector.extract_strided_slice %216 {offsets = [0, 0], sizes = [32, 8], strides = [1, 1]} : vector<32x64xf32> to vector<32x8xf32>
    %268 = tpu.concatenate %266, %267 in 1 : vector<32x56xf32>, vector<32x8xf32> -> vector<32x64xf32>
    %c7_149 = arith.constant 7 : index
    %c0_150 = arith.constant 0 : index
    %c0_151 = arith.constant 0 : index
    %269 = vector.load %arg1[%c7_149, %c0_150, %c0_151] : memref<9x1x64xf32, #tpu.memory_space<vmem>>, vector<1x1x64xf32>
    %270 = vector.shape_cast %269 : vector<1x1x64xf32> to vector<1x64xf32>
    %271 = vector.broadcast %270 : vector<1x64xf32> to vector<32x64xf32>
    %272 = arith.mulf %268, %271 : vector<32x64xf32>
    %273 = arith.truncf %272 : vector<32x64xf32> to vector<32x64xbf16>
    %274 = vector.extract_strided_slice %216 {offsets = [0, 9], sizes = [32, 55], strides = [1, 1]} : vector<32x64xf32> to vector<32x55xf32>
    %275 = vector.extract_strided_slice %216 {offsets = [0, 0], sizes = [32, 9], strides = [1, 1]} : vector<32x64xf32> to vector<32x9xf32>
    %276 = tpu.concatenate %274, %275 in 1 : vector<32x55xf32>, vector<32x9xf32> -> vector<32x64xf32>
    %c8_152 = arith.constant 8 : index
    %c0_153 = arith.constant 0 : index
    %c0_154 = arith.constant 0 : index
    %277 = vector.load %arg1[%c8_152, %c0_153, %c0_154] : memref<9x1x64xf32, #tpu.memory_space<vmem>>, vector<1x1x64xf32>
    %278 = vector.shape_cast %277 : vector<1x1x64xf32> to vector<1x64xf32>
    %279 = vector.broadcast %278 : vector<1x64xf32> to vector<32x64xf32>
    %280 = arith.mulf %276, %279 : vector<32x64xf32>
    %281 = arith.truncf %280 : vector<32x64xf32> to vector<32x64xbf16>
    %c1_155 = arith.constant 1 : index
    %c0_156 = arith.constant 0 : index
    %c0_157 = arith.constant 0 : index
    %c0_158 = arith.constant 0 : index
    %282 = vector.load %arg5[%c1_155, %c0_156, %c0_157, %c0_158] : memref<2x9x16x32xbf16, #tpu.memory_space<vmem>>, vector<1x1x16x32xbf16>
    %283 = vector.shape_cast %282 : vector<1x1x16x32xbf16> to vector<16x32xbf16>
    %cst_159 = arith.constant dense<0.000000e+00> : vector<16x64xf32>
    %284 = tpu.matmul %283, %224, %cst_159 {dimension_numbers = #tpu.dot_dimension_numbers<[1], [0], [0], [1], [0, 0, 1, 1], [], []>} : vector<16x32xbf16>, vector<32x64xbf16>, vector<16x64xf32> -> vector<16x64xf32>
    %c1_160 = arith.constant 1 : index
    %c1_161 = arith.constant 1 : index
    %c0_162 = arith.constant 0 : index
    %c0_163 = arith.constant 0 : index
    %285 = vector.load %arg5[%c1_160, %c1_161, %c0_162, %c0_163] : memref<2x9x16x32xbf16, #tpu.memory_space<vmem>>, vector<1x1x16x32xbf16>
    %286 = vector.shape_cast %285 : vector<1x1x16x32xbf16> to vector<16x32xbf16>
    %cst_164 = arith.constant dense<0.000000e+00> : vector<16x64xf32>
    %287 = tpu.matmul %286, %232, %cst_164 {dimension_numbers = #tpu.dot_dimension_numbers<[1], [0], [0], [1], [0, 0, 1, 1], [], []>} : vector<16x32xbf16>, vector<32x64xbf16>, vector<16x64xf32> -> vector<16x64xf32>
    %288 = arith.addf %284, %287 : vector<16x64xf32>
    %c1_165 = arith.constant 1 : index
    %c2_166 = arith.constant 2 : index
    %c0_167 = arith.constant 0 : index
    %c0_168 = arith.constant 0 : index
    %289 = vector.load %arg5[%c1_165, %c2_166, %c0_167, %c0_168] : memref<2x9x16x32xbf16, #tpu.memory_space<vmem>>, vector<1x1x16x32xbf16>
    %290 = vector.shape_cast %289 : vector<1x1x16x32xbf16> to vector<16x32xbf16>
    %cst_169 = arith.constant dense<0.000000e+00> : vector<16x64xf32>
    %291 = tpu.matmul %290, %240, %cst_169 {dimension_numbers = #tpu.dot_dimension_numbers<[1], [0], [0], [1], [0, 0, 1, 1], [], []>} : vector<16x32xbf16>, vector<32x64xbf16>, vector<16x64xf32> -> vector<16x64xf32>
    %292 = arith.addf %288, %291 : vector<16x64xf32>
    %c1_170 = arith.constant 1 : index
    %c3_171 = arith.constant 3 : index
    %c0_172 = arith.constant 0 : index
    %c0_173 = arith.constant 0 : index
    %293 = vector.load %arg5[%c1_170, %c3_171, %c0_172, %c0_173] : memref<2x9x16x32xbf16, #tpu.memory_space<vmem>>, vector<1x1x16x32xbf16>
    %294 = vector.shape_cast %293 : vector<1x1x16x32xbf16> to vector<16x32xbf16>
    %cst_174 = arith.constant dense<0.000000e+00> : vector<16x64xf32>
    %295 = tpu.matmul %294, %248, %cst_174 {dimension_numbers = #tpu.dot_dimension_numbers<[1], [0], [0], [1], [0, 0, 1, 1], [], []>} : vector<16x32xbf16>, vector<32x64xbf16>, vector<16x64xf32> -> vector<16x64xf32>
    %296 = arith.addf %292, %295 : vector<16x64xf32>
    %c1_175 = arith.constant 1 : index
    %c4_176 = arith.constant 4 : index
    %c0_177 = arith.constant 0 : index
    %c0_178 = arith.constant 0 : index
    %297 = vector.load %arg5[%c1_175, %c4_176, %c0_177, %c0_178] : memref<2x9x16x32xbf16, #tpu.memory_space<vmem>>, vector<1x1x16x32xbf16>
    %298 = vector.shape_cast %297 : vector<1x1x16x32xbf16> to vector<16x32xbf16>
    %cst_179 = arith.constant dense<0.000000e+00> : vector<16x64xf32>
    %299 = tpu.matmul %298, %249, %cst_179 {dimension_numbers = #tpu.dot_dimension_numbers<[1], [0], [0], [1], [0, 0, 1, 1], [], []>} : vector<16x32xbf16>, vector<32x64xbf16>, vector<16x64xf32> -> vector<16x64xf32>
    %300 = arith.addf %296, %299 : vector<16x64xf32>
    %c1_180 = arith.constant 1 : index
    %c5_181 = arith.constant 5 : index
    %c0_182 = arith.constant 0 : index
    %c0_183 = arith.constant 0 : index
    %301 = vector.load %arg5[%c1_180, %c5_181, %c0_182, %c0_183] : memref<2x9x16x32xbf16, #tpu.memory_space<vmem>>, vector<1x1x16x32xbf16>
    %302 = vector.shape_cast %301 : vector<1x1x16x32xbf16> to vector<16x32xbf16>
    %cst_184 = arith.constant dense<0.000000e+00> : vector<16x64xf32>
    %303 = tpu.matmul %302, %257, %cst_184 {dimension_numbers = #tpu.dot_dimension_numbers<[1], [0], [0], [1], [0, 0, 1, 1], [], []>} : vector<16x32xbf16>, vector<32x64xbf16>, vector<16x64xf32> -> vector<16x64xf32>
    %304 = arith.addf %300, %303 : vector<16x64xf32>
    %c1_185 = arith.constant 1 : index
    %c6_186 = arith.constant 6 : index
    %c0_187 = arith.constant 0 : index
    %c0_188 = arith.constant 0 : index
    %305 = vector.load %arg5[%c1_185, %c6_186, %c0_187, %c0_188] : memref<2x9x16x32xbf16, #tpu.memory_space<vmem>>, vector<1x1x16x32xbf16>
    %306 = vector.shape_cast %305 : vector<1x1x16x32xbf16> to vector<16x32xbf16>
    %cst_189 = arith.constant dense<0.000000e+00> : vector<16x64xf32>
    %307 = tpu.matmul %306, %265, %cst_189 {dimension_numbers = #tpu.dot_dimension_numbers<[1], [0], [0], [1], [0, 0, 1, 1], [], []>} : vector<16x32xbf16>, vector<32x64xbf16>, vector<16x64xf32> -> vector<16x64xf32>
    %308 = arith.addf %304, %307 : vector<16x64xf32>
    %c1_190 = arith.constant 1 : index
    %c7_191 = arith.constant 7 : index
    %c0_192 = arith.constant 0 : index
    %c0_193 = arith.constant 0 : index
    %309 = vector.load %arg5[%c1_190, %c7_191, %c0_192, %c0_193] : memref<2x9x16x32xbf16, #tpu.memory_space<vmem>>, vector<1x1x16x32xbf16>
    %310 = vector.shape_cast %309 : vector<1x1x16x32xbf16> to vector<16x32xbf16>
    %cst_194 = arith.constant dense<0.000000e+00> : vector<16x64xf32>
    %311 = tpu.matmul %310, %273, %cst_194 {dimension_numbers = #tpu.dot_dimension_numbers<[1], [0], [0], [1], [0, 0, 1, 1], [], []>} : vector<16x32xbf16>, vector<32x64xbf16>, vector<16x64xf32> -> vector<16x64xf32>
    %312 = arith.addf %308, %311 : vector<16x64xf32>
    %c1_195 = arith.constant 1 : index
    %c8_196 = arith.constant 8 : index
    %c0_197 = arith.constant 0 : index
    %c0_198 = arith.constant 0 : index
    %313 = vector.load %arg5[%c1_195, %c8_196, %c0_197, %c0_198] : memref<2x9x16x32xbf16, #tpu.memory_space<vmem>>, vector<1x1x16x32xbf16>
    %314 = vector.shape_cast %313 : vector<1x1x16x32xbf16> to vector<16x32xbf16>
    %cst_199 = arith.constant dense<0.000000e+00> : vector<16x64xf32>
    %315 = tpu.matmul %314, %281, %cst_199 {dimension_numbers = #tpu.dot_dimension_numbers<[1], [0], [0], [1], [0, 0, 1, 1], [], []>} : vector<16x32xbf16>, vector<32x64xbf16>, vector<16x64xf32> -> vector<16x64xf32>
    %316 = arith.addf %312, %315 : vector<16x64xf32>
    %cst_200 = arith.constant 0.000000e+00 : f32
    %317 = vector.broadcast %cst_200 : f32 to vector<16x64xf32>
    %318 = arith.maximumf %316, %317 : vector<16x64xf32>
    %319 = arith.truncf %318 : vector<16x64xf32> to vector<16x64xbf16>
    %c1_201 = arith.constant 1 : index
    %c0_202 = arith.constant 0 : index
    %c0_203 = arith.constant 0 : index
    %320 = vector.load %arg6[%c1_201, %c0_202, %c0_203] : memref<2x32x16xbf16, #tpu.memory_space<vmem>>, vector<1x32x16xbf16>
    %321 = vector.shape_cast %320 : vector<1x32x16xbf16> to vector<32x16xbf16>
    %cst_204 = arith.constant dense<0.000000e+00> : vector<32x64xf32>
    %322 = tpu.matmul %321, %319, %cst_204 {dimension_numbers = #tpu.dot_dimension_numbers<[1], [0], [0], [1], [0, 0, 1, 1], [], []>} : vector<32x16xbf16>, vector<16x64xbf16>, vector<32x64xf32> -> vector<32x64xf32>
    %323 = arith.addf %214, %322 : vector<32x64xf32>
    %cst_205 = arith.constant 0.000000e+00 : f32
    %324 = vector.broadcast %cst_205 : f32 to vector<32x64xf32>
    %325 = arith.maximumf %323, %324 : vector<32x64xf32>
    %326 = vector.extract_strided_slice %325 {offsets = [0, 55], sizes = [32, 9], strides = [1, 1]} : vector<32x64xf32> to vector<32x9xf32>
    %327 = vector.extract_strided_slice %325 {offsets = [0, 0], sizes = [32, 55], strides = [1, 1]} : vector<32x64xf32> to vector<32x55xf32>
    %328 = tpu.concatenate %326, %327 in 1 : vector<32x9xf32>, vector<32x55xf32> -> vector<32x64xf32>
    %c0_206 = arith.constant 0 : index
    %c0_207 = arith.constant 0 : index
    %c0_208 = arith.constant 0 : index
    %329 = vector.load %arg1[%c0_206, %c0_207, %c0_208] : memref<9x1x64xf32, #tpu.memory_space<vmem>>, vector<1x1x64xf32>
    %330 = vector.shape_cast %329 : vector<1x1x64xf32> to vector<1x64xf32>
    %331 = vector.broadcast %330 : vector<1x64xf32> to vector<32x64xf32>
    %332 = arith.mulf %328, %331 : vector<32x64xf32>
    %333 = arith.truncf %332 : vector<32x64xf32> to vector<32x64xbf16>
    %334 = vector.extract_strided_slice %325 {offsets = [0, 56], sizes = [32, 8], strides = [1, 1]} : vector<32x64xf32> to vector<32x8xf32>
    %335 = vector.extract_strided_slice %325 {offsets = [0, 0], sizes = [32, 56], strides = [1, 1]} : vector<32x64xf32> to vector<32x56xf32>
    %336 = tpu.concatenate %334, %335 in 1 : vector<32x8xf32>, vector<32x56xf32> -> vector<32x64xf32>
    %c1_209 = arith.constant 1 : index
    %c0_210 = arith.constant 0 : index
    %c0_211 = arith.constant 0 : index
    %337 = vector.load %arg1[%c1_209, %c0_210, %c0_211] : memref<9x1x64xf32, #tpu.memory_space<vmem>>, vector<1x1x64xf32>
    %338 = vector.shape_cast %337 : vector<1x1x64xf32> to vector<1x64xf32>
    %339 = vector.broadcast %338 : vector<1x64xf32> to vector<32x64xf32>
    %340 = arith.mulf %336, %339 : vector<32x64xf32>
    %341 = arith.truncf %340 : vector<32x64xf32> to vector<32x64xbf16>
    %342 = vector.extract_strided_slice %325 {offsets = [0, 57], sizes = [32, 7], strides = [1, 1]} : vector<32x64xf32> to vector<32x7xf32>
    %343 = vector.extract_strided_slice %325 {offsets = [0, 0], sizes = [32, 57], strides = [1, 1]} : vector<32x64xf32> to vector<32x57xf32>
    %344 = tpu.concatenate %342, %343 in 1 : vector<32x7xf32>, vector<32x57xf32> -> vector<32x64xf32>
    %c2_212 = arith.constant 2 : index
    %c0_213 = arith.constant 0 : index
    %c0_214 = arith.constant 0 : index
    %345 = vector.load %arg1[%c2_212, %c0_213, %c0_214] : memref<9x1x64xf32, #tpu.memory_space<vmem>>, vector<1x1x64xf32>
    %346 = vector.shape_cast %345 : vector<1x1x64xf32> to vector<1x64xf32>
    %347 = vector.broadcast %346 : vector<1x64xf32> to vector<32x64xf32>
    %348 = arith.mulf %344, %347 : vector<32x64xf32>
    %349 = arith.truncf %348 : vector<32x64xf32> to vector<32x64xbf16>
    %350 = vector.extract_strided_slice %325 {offsets = [0, 63], sizes = [32, 1], strides = [1, 1]} : vector<32x64xf32> to vector<32x1xf32>
    %351 = vector.extract_strided_slice %325 {offsets = [0, 0], sizes = [32, 63], strides = [1, 1]} : vector<32x64xf32> to vector<32x63xf32>
    %352 = tpu.concatenate %350, %351 in 1 : vector<32x1xf32>, vector<32x63xf32> -> vector<32x64xf32>
    %c3_215 = arith.constant 3 : index
    %c0_216 = arith.constant 0 : index
    %c0_217 = arith.constant 0 : index
    %353 = vector.load %arg1[%c3_215, %c0_216, %c0_217] : memref<9x1x64xf32, #tpu.memory_space<vmem>>, vector<1x1x64xf32>
    %354 = vector.shape_cast %353 : vector<1x1x64xf32> to vector<1x64xf32>
    %355 = vector.broadcast %354 : vector<1x64xf32> to vector<32x64xf32>
    %356 = arith.mulf %352, %355 : vector<32x64xf32>
    %357 = arith.truncf %356 : vector<32x64xf32> to vector<32x64xbf16>
    %358 = arith.truncf %325 : vector<32x64xf32> to vector<32x64xbf16>
    %359 = vector.extract_strided_slice %325 {offsets = [0, 1], sizes = [32, 63], strides = [1, 1]} : vector<32x64xf32> to vector<32x63xf32>
    %360 = vector.extract_strided_slice %325 {offsets = [0, 0], sizes = [32, 1], strides = [1, 1]} : vector<32x64xf32> to vector<32x1xf32>
    %361 = tpu.concatenate %359, %360 in 1 : vector<32x63xf32>, vector<32x1xf32> -> vector<32x64xf32>
    %c5_218 = arith.constant 5 : index
    %c0_219 = arith.constant 0 : index
    %c0_220 = arith.constant 0 : index
    %362 = vector.load %arg1[%c5_218, %c0_219, %c0_220] : memref<9x1x64xf32, #tpu.memory_space<vmem>>, vector<1x1x64xf32>
    %363 = vector.shape_cast %362 : vector<1x1x64xf32> to vector<1x64xf32>
    %364 = vector.broadcast %363 : vector<1x64xf32> to vector<32x64xf32>
    %365 = arith.mulf %361, %364 : vector<32x64xf32>
    %366 = arith.truncf %365 : vector<32x64xf32> to vector<32x64xbf16>
    %367 = vector.extract_strided_slice %325 {offsets = [0, 7], sizes = [32, 57], strides = [1, 1]} : vector<32x64xf32> to vector<32x57xf32>
    %368 = vector.extract_strided_slice %325 {offsets = [0, 0], sizes = [32, 7], strides = [1, 1]} : vector<32x64xf32> to vector<32x7xf32>
    %369 = tpu.concatenate %367, %368 in 1 : vector<32x57xf32>, vector<32x7xf32> -> vector<32x64xf32>
    %c6_221 = arith.constant 6 : index
    %c0_222 = arith.constant 0 : index
    %c0_223 = arith.constant 0 : index
    %370 = vector.load %arg1[%c6_221, %c0_222, %c0_223] : memref<9x1x64xf32, #tpu.memory_space<vmem>>, vector<1x1x64xf32>
    %371 = vector.shape_cast %370 : vector<1x1x64xf32> to vector<1x64xf32>
    %372 = vector.broadcast %371 : vector<1x64xf32> to vector<32x64xf32>
    %373 = arith.mulf %369, %372 : vector<32x64xf32>
    %374 = arith.truncf %373 : vector<32x64xf32> to vector<32x64xbf16>
    %375 = vector.extract_strided_slice %325 {offsets = [0, 8], sizes = [32, 56], strides = [1, 1]} : vector<32x64xf32> to vector<32x56xf32>
    %376 = vector.extract_strided_slice %325 {offsets = [0, 0], sizes = [32, 8], strides = [1, 1]} : vector<32x64xf32> to vector<32x8xf32>
    %377 = tpu.concatenate %375, %376 in 1 : vector<32x56xf32>, vector<32x8xf32> -> vector<32x64xf32>
    %c7_224 = arith.constant 7 : index
    %c0_225 = arith.constant 0 : index
    %c0_226 = arith.constant 0 : index
    %378 = vector.load %arg1[%c7_224, %c0_225, %c0_226] : memref<9x1x64xf32, #tpu.memory_space<vmem>>, vector<1x1x64xf32>
    %379 = vector.shape_cast %378 : vector<1x1x64xf32> to vector<1x64xf32>
    %380 = vector.broadcast %379 : vector<1x64xf32> to vector<32x64xf32>
    %381 = arith.mulf %377, %380 : vector<32x64xf32>
    %382 = arith.truncf %381 : vector<32x64xf32> to vector<32x64xbf16>
    %383 = vector.extract_strided_slice %325 {offsets = [0, 9], sizes = [32, 55], strides = [1, 1]} : vector<32x64xf32> to vector<32x55xf32>
    %384 = vector.extract_strided_slice %325 {offsets = [0, 0], sizes = [32, 9], strides = [1, 1]} : vector<32x64xf32> to vector<32x9xf32>
    %385 = tpu.concatenate %383, %384 in 1 : vector<32x55xf32>, vector<32x9xf32> -> vector<32x64xf32>
    %c8_227 = arith.constant 8 : index
    %c0_228 = arith.constant 0 : index
    %c0_229 = arith.constant 0 : index
    %386 = vector.load %arg1[%c8_227, %c0_228, %c0_229] : memref<9x1x64xf32, #tpu.memory_space<vmem>>, vector<1x1x64xf32>
    %387 = vector.shape_cast %386 : vector<1x1x64xf32> to vector<1x64xf32>
    %388 = vector.broadcast %387 : vector<1x64xf32> to vector<32x64xf32>
    %389 = arith.mulf %385, %388 : vector<32x64xf32>
    %390 = arith.truncf %389 : vector<32x64xf32> to vector<32x64xbf16>
    %c0_230 = arith.constant 0 : index
    %c0_231 = arith.constant 0 : index
    %391 = vector.load %arg8[%c0_230, %c0_231] : memref<16x1xf32, #tpu.memory_space<vmem>>, vector<16x1xf32>
    %392 = vector.shape_cast %391 : vector<16x1xf32> to vector<16x1xf32>
    %393 = vector.broadcast %392 : vector<16x1xf32> to vector<16x64xf32>
    %c0_232 = arith.constant 0 : index
    %c0_233 = arith.constant 0 : index
    %c0_234 = arith.constant 0 : index
    %c0_235 = arith.constant 0 : index
    %394 = vector.load %arg7[%c0_232, %c0_233, %c0_234, %c0_235] : memref<4x4x16x32xbf16, #tpu.memory_space<vmem>>, vector<1x1x16x32xbf16>
    %395 = vector.shape_cast %394 : vector<1x1x16x32xbf16> to vector<16x32xbf16>
    %cst_236 = arith.constant dense<0.000000e+00> : vector<16x64xf32>
    %396 = tpu.matmul %395, %333, %cst_236 {dimension_numbers = #tpu.dot_dimension_numbers<[1], [0], [0], [1], [0, 0, 1, 1], [], []>} : vector<16x32xbf16>, vector<32x64xbf16>, vector<16x64xf32> -> vector<16x64xf32>
    %397 = arith.addf %393, %396 : vector<16x64xf32>
    %c0_237 = arith.constant 0 : index
    %c1_238 = arith.constant 1 : index
    %c0_239 = arith.constant 0 : index
    %c0_240 = arith.constant 0 : index
    %398 = vector.load %arg7[%c0_237, %c1_238, %c0_239, %c0_240] : memref<4x4x16x32xbf16, #tpu.memory_space<vmem>>, vector<1x1x16x32xbf16>
    %399 = vector.shape_cast %398 : vector<1x1x16x32xbf16> to vector<16x32xbf16>
    %cst_241 = arith.constant dense<0.000000e+00> : vector<16x64xf32>
    %400 = tpu.matmul %399, %341, %cst_241 {dimension_numbers = #tpu.dot_dimension_numbers<[1], [0], [0], [1], [0, 0, 1, 1], [], []>} : vector<16x32xbf16>, vector<32x64xbf16>, vector<16x64xf32> -> vector<16x64xf32>
    %401 = arith.addf %397, %400 : vector<16x64xf32>
    %c0_242 = arith.constant 0 : index
    %c2_243 = arith.constant 2 : index
    %c0_244 = arith.constant 0 : index
    %c0_245 = arith.constant 0 : index
    %402 = vector.load %arg7[%c0_242, %c2_243, %c0_244, %c0_245] : memref<4x4x16x32xbf16, #tpu.memory_space<vmem>>, vector<1x1x16x32xbf16>
    %403 = vector.shape_cast %402 : vector<1x1x16x32xbf16> to vector<16x32xbf16>
    %cst_246 = arith.constant dense<0.000000e+00> : vector<16x64xf32>
    %404 = tpu.matmul %403, %357, %cst_246 {dimension_numbers = #tpu.dot_dimension_numbers<[1], [0], [0], [1], [0, 0, 1, 1], [], []>} : vector<16x32xbf16>, vector<32x64xbf16>, vector<16x64xf32> -> vector<16x64xf32>
    %405 = arith.addf %401, %404 : vector<16x64xf32>
    %c0_247 = arith.constant 0 : index
    %c3_248 = arith.constant 3 : index
    %c0_249 = arith.constant 0 : index
    %c0_250 = arith.constant 0 : index
    %406 = vector.load %arg7[%c0_247, %c3_248, %c0_249, %c0_250] : memref<4x4x16x32xbf16, #tpu.memory_space<vmem>>, vector<1x1x16x32xbf16>
    %407 = vector.shape_cast %406 : vector<1x1x16x32xbf16> to vector<16x32xbf16>
    %cst_251 = arith.constant dense<0.000000e+00> : vector<16x64xf32>
    %408 = tpu.matmul %407, %358, %cst_251 {dimension_numbers = #tpu.dot_dimension_numbers<[1], [0], [0], [1], [0, 0, 1, 1], [], []>} : vector<16x32xbf16>, vector<32x64xbf16>, vector<16x64xf32> -> vector<16x64xf32>
    %409 = arith.addf %405, %408 : vector<16x64xf32>
    %cst_252 = arith.constant 0.000000e+00 : f32
    %410 = vector.broadcast %cst_252 : f32 to vector<16x64xf32>
    %411 = arith.maximumf %409, %410 : vector<16x64xf32>
    %c1_253 = arith.constant 1 : index
    %c0_254 = arith.constant 0 : index
    %c0_255 = arith.constant 0 : index
    %c0_256 = arith.constant 0 : index
    %412 = vector.load %arg7[%c1_253, %c0_254, %c0_255, %c0_256] : memref<4x4x16x32xbf16, #tpu.memory_space<vmem>>, vector<1x1x16x32xbf16>
    %413 = vector.shape_cast %412 : vector<1x1x16x32xbf16> to vector<16x32xbf16>
    %cst_257 = arith.constant dense<0.000000e+00> : vector<16x64xf32>
    %414 = tpu.matmul %413, %341, %cst_257 {dimension_numbers = #tpu.dot_dimension_numbers<[1], [0], [0], [1], [0, 0, 1, 1], [], []>} : vector<16x32xbf16>, vector<32x64xbf16>, vector<16x64xf32> -> vector<16x64xf32>
    %415 = arith.addf %393, %414 : vector<16x64xf32>
    %c1_258 = arith.constant 1 : index
    %c1_259 = arith.constant 1 : index
    %c0_260 = arith.constant 0 : index
    %c0_261 = arith.constant 0 : index
    %416 = vector.load %arg7[%c1_258, %c1_259, %c0_260, %c0_261] : memref<4x4x16x32xbf16, #tpu.memory_space<vmem>>, vector<1x1x16x32xbf16>
    %417 = vector.shape_cast %416 : vector<1x1x16x32xbf16> to vector<16x32xbf16>
    %cst_262 = arith.constant dense<0.000000e+00> : vector<16x64xf32>
    %418 = tpu.matmul %417, %349, %cst_262 {dimension_numbers = #tpu.dot_dimension_numbers<[1], [0], [0], [1], [0, 0, 1, 1], [], []>} : vector<16x32xbf16>, vector<32x64xbf16>, vector<16x64xf32> -> vector<16x64xf32>
    %419 = arith.addf %415, %418 : vector<16x64xf32>
    %c1_263 = arith.constant 1 : index
    %c2_264 = arith.constant 2 : index
    %c0_265 = arith.constant 0 : index
    %c0_266 = arith.constant 0 : index
    %420 = vector.load %arg7[%c1_263, %c2_264, %c0_265, %c0_266] : memref<4x4x16x32xbf16, #tpu.memory_space<vmem>>, vector<1x1x16x32xbf16>
    %421 = vector.shape_cast %420 : vector<1x1x16x32xbf16> to vector<16x32xbf16>
    %cst_267 = arith.constant dense<0.000000e+00> : vector<16x64xf32>
    %422 = tpu.matmul %421, %358, %cst_267 {dimension_numbers = #tpu.dot_dimension_numbers<[1], [0], [0], [1], [0, 0, 1, 1], [], []>} : vector<16x32xbf16>, vector<32x64xbf16>, vector<16x64xf32> -> vector<16x64xf32>
    %423 = arith.addf %419, %422 : vector<16x64xf32>
    %c1_268 = arith.constant 1 : index
    %c3_269 = arith.constant 3 : index
    %c0_270 = arith.constant 0 : index
    %c0_271 = arith.constant 0 : index
    %424 = vector.load %arg7[%c1_268, %c3_269, %c0_270, %c0_271] : memref<4x4x16x32xbf16, #tpu.memory_space<vmem>>, vector<1x1x16x32xbf16>
    %425 = vector.shape_cast %424 : vector<1x1x16x32xbf16> to vector<16x32xbf16>
    %cst_272 = arith.constant dense<0.000000e+00> : vector<16x64xf32>
    %426 = tpu.matmul %425, %366, %cst_272 {dimension_numbers = #tpu.dot_dimension_numbers<[1], [0], [0], [1], [0, 0, 1, 1], [], []>} : vector<16x32xbf16>, vector<32x64xbf16>, vector<16x64xf32> -> vector<16x64xf32>
    %427 = arith.addf %423, %426 : vector<16x64xf32>
    %cst_273 = arith.constant 0.000000e+00 : f32
    %428 = vector.broadcast %cst_273 : f32 to vector<16x64xf32>
    %429 = arith.maximumf %427, %428 : vector<16x64xf32>
    %c2_274 = arith.constant 2 : index
    %c0_275 = arith.constant 0 : index
    %c0_276 = arith.constant 0 : index
    %c0_277 = arith.constant 0 : index
    %430 = vector.load %arg7[%c2_274, %c0_275, %c0_276, %c0_277] : memref<4x4x16x32xbf16, #tpu.memory_space<vmem>>, vector<1x1x16x32xbf16>
    %431 = vector.shape_cast %430 : vector<1x1x16x32xbf16> to vector<16x32xbf16>
    %cst_278 = arith.constant dense<0.000000e+00> : vector<16x64xf32>
    %432 = tpu.matmul %431, %357, %cst_278 {dimension_numbers = #tpu.dot_dimension_numbers<[1], [0], [0], [1], [0, 0, 1, 1], [], []>} : vector<16x32xbf16>, vector<32x64xbf16>, vector<16x64xf32> -> vector<16x64xf32>
    %433 = arith.addf %393, %432 : vector<16x64xf32>
    %c2_279 = arith.constant 2 : index
    %c1_280 = arith.constant 1 : index
    %c0_281 = arith.constant 0 : index
    %c0_282 = arith.constant 0 : index
    %434 = vector.load %arg7[%c2_279, %c1_280, %c0_281, %c0_282] : memref<4x4x16x32xbf16, #tpu.memory_space<vmem>>, vector<1x1x16x32xbf16>
    %435 = vector.shape_cast %434 : vector<1x1x16x32xbf16> to vector<16x32xbf16>
    %cst_283 = arith.constant dense<0.000000e+00> : vector<16x64xf32>
    %436 = tpu.matmul %435, %358, %cst_283 {dimension_numbers = #tpu.dot_dimension_numbers<[1], [0], [0], [1], [0, 0, 1, 1], [], []>} : vector<16x32xbf16>, vector<32x64xbf16>, vector<16x64xf32> -> vector<16x64xf32>
    %437 = arith.addf %433, %436 : vector<16x64xf32>
    %c2_284 = arith.constant 2 : index
    %c2_285 = arith.constant 2 : index
    %c0_286 = arith.constant 0 : index
    %c0_287 = arith.constant 0 : index
    %438 = vector.load %arg7[%c2_284, %c2_285, %c0_286, %c0_287] : memref<4x4x16x32xbf16, #tpu.memory_space<vmem>>, vector<1x1x16x32xbf16>
    %439 = vector.shape_cast %438 : vector<1x1x16x32xbf16> to vector<16x32xbf16>
    %cst_288 = arith.constant dense<0.000000e+00> : vector<16x64xf32>
    %440 = tpu.matmul %439, %374, %cst_288 {dimension_numbers = #tpu.dot_dimension_numbers<[1], [0], [0], [1], [0, 0, 1, 1], [], []>} : vector<16x32xbf16>, vector<32x64xbf16>, vector<16x64xf32> -> vector<16x64xf32>
    %441 = arith.addf %437, %440 : vector<16x64xf32>
    %c2_289 = arith.constant 2 : index
    %c3_290 = arith.constant 3 : index
    %c0_291 = arith.constant 0 : index
    %c0_292 = arith.constant 0 : index
    %442 = vector.load %arg7[%c2_289, %c3_290, %c0_291, %c0_292] : memref<4x4x16x32xbf16, #tpu.memory_space<vmem>>, vector<1x1x16x32xbf16>
    %443 = vector.shape_cast %442 : vector<1x1x16x32xbf16> to vector<16x32xbf16>
    %cst_293 = arith.constant dense<0.000000e+00> : vector<16x64xf32>
    %444 = tpu.matmul %443, %382, %cst_293 {dimension_numbers = #tpu.dot_dimension_numbers<[1], [0], [0], [1], [0, 0, 1, 1], [], []>} : vector<16x32xbf16>, vector<32x64xbf16>, vector<16x64xf32> -> vector<16x64xf32>
    %445 = arith.addf %441, %444 : vector<16x64xf32>
    %cst_294 = arith.constant 0.000000e+00 : f32
    %446 = vector.broadcast %cst_294 : f32 to vector<16x64xf32>
    %447 = arith.maximumf %445, %446 : vector<16x64xf32>
    %c3_295 = arith.constant 3 : index
    %c0_296 = arith.constant 0 : index
    %c0_297 = arith.constant 0 : index
    %c0_298 = arith.constant 0 : index
    %448 = vector.load %arg7[%c3_295, %c0_296, %c0_297, %c0_298] : memref<4x4x16x32xbf16, #tpu.memory_space<vmem>>, vector<1x1x16x32xbf16>
    %449 = vector.shape_cast %448 : vector<1x1x16x32xbf16> to vector<16x32xbf16>
    %cst_299 = arith.constant dense<0.000000e+00> : vector<16x64xf32>
    %450 = tpu.matmul %449, %358, %cst_299 {dimension_numbers = #tpu.dot_dimension_numbers<[1], [0], [0], [1], [0, 0, 1, 1], [], []>} : vector<16x32xbf16>, vector<32x64xbf16>, vector<16x64xf32> -> vector<16x64xf32>
    %451 = arith.addf %393, %450 : vector<16x64xf32>
    %c3_300 = arith.constant 3 : index
    %c1_301 = arith.constant 1 : index
    %c0_302 = arith.constant 0 : index
    %c0_303 = arith.constant 0 : index
    %452 = vector.load %arg7[%c3_300, %c1_301, %c0_302, %c0_303] : memref<4x4x16x32xbf16, #tpu.memory_space<vmem>>, vector<1x1x16x32xbf16>
    %453 = vector.shape_cast %452 : vector<1x1x16x32xbf16> to vector<16x32xbf16>
    %cst_304 = arith.constant dense<0.000000e+00> : vector<16x64xf32>
    %454 = tpu.matmul %453, %366, %cst_304 {dimension_numbers = #tpu.dot_dimension_numbers<[1], [0], [0], [1], [0, 0, 1, 1], [], []>} : vector<16x32xbf16>, vector<32x64xbf16>, vector<16x64xf32> -> vector<16x64xf32>
    %455 = arith.addf %451, %454 : vector<16x64xf32>
    %c3_305 = arith.constant 3 : index
    %c2_306 = arith.constant 2 : index
    %c0_307 = arith.constant 0 : index
    %c0_308 = arith.constant 0 : index
    %456 = vector.load %arg7[%c3_305, %c2_306, %c0_307, %c0_308] : memref<4x4x16x32xbf16, #tpu.memory_space<vmem>>, vector<1x1x16x32xbf16>
    %457 = vector.shape_cast %456 : vector<1x1x16x32xbf16> to vector<16x32xbf16>
    %cst_309 = arith.constant dense<0.000000e+00> : vector<16x64xf32>
    %458 = tpu.matmul %457, %382, %cst_309 {dimension_numbers = #tpu.dot_dimension_numbers<[1], [0], [0], [1], [0, 0, 1, 1], [], []>} : vector<16x32xbf16>, vector<32x64xbf16>, vector<16x64xf32> -> vector<16x64xf32>
    %459 = arith.addf %455, %458 : vector<16x64xf32>
    %c3_310 = arith.constant 3 : index
    %c3_311 = arith.constant 3 : index
    %c0_312 = arith.constant 0 : index
    %c0_313 = arith.constant 0 : index
    %460 = vector.load %arg7[%c3_310, %c3_311, %c0_312, %c0_313] : memref<4x4x16x32xbf16, #tpu.memory_space<vmem>>, vector<1x1x16x32xbf16>
    %461 = vector.shape_cast %460 : vector<1x1x16x32xbf16> to vector<16x32xbf16>
    %cst_314 = arith.constant dense<0.000000e+00> : vector<16x64xf32>
    %462 = tpu.matmul %461, %390, %cst_314 {dimension_numbers = #tpu.dot_dimension_numbers<[1], [0], [0], [1], [0, 0, 1, 1], [], []>} : vector<16x32xbf16>, vector<32x64xbf16>, vector<16x64xf32> -> vector<16x64xf32>
    %463 = arith.addf %459, %462 : vector<16x64xf32>
    %cst_315 = arith.constant 0.000000e+00 : f32
    %464 = vector.broadcast %cst_315 : f32 to vector<16x64xf32>
    %465 = arith.maximumf %463, %464 : vector<16x64xf32>
    %466 = arith.truncf %411 : vector<16x64xf32> to vector<16x64xbf16>
    %467 = vector.extract_strided_slice %411 {offsets = [0, 1], sizes = [16, 63], strides = [1, 1]} : vector<16x64xf32> to vector<16x63xf32>
    %468 = vector.extract_strided_slice %411 {offsets = [0, 0], sizes = [16, 1], strides = [1, 1]} : vector<16x64xf32> to vector<16x1xf32>
    %469 = tpu.concatenate %467, %468 in 1 : vector<16x63xf32>, vector<16x1xf32> -> vector<16x64xf32>
    %c5_316 = arith.constant 5 : index
    %c0_317 = arith.constant 0 : index
    %c0_318 = arith.constant 0 : index
    %470 = vector.load %arg1[%c5_316, %c0_317, %c0_318] : memref<9x1x64xf32, #tpu.memory_space<vmem>>, vector<1x1x64xf32>
    %471 = vector.shape_cast %470 : vector<1x1x64xf32> to vector<1x64xf32>
    %472 = vector.broadcast %471 : vector<1x64xf32> to vector<16x64xf32>
    %473 = arith.mulf %469, %472 : vector<16x64xf32>
    %474 = arith.truncf %473 : vector<16x64xf32> to vector<16x64xbf16>
    %475 = vector.extract_strided_slice %411 {offsets = [0, 8], sizes = [16, 56], strides = [1, 1]} : vector<16x64xf32> to vector<16x56xf32>
    %476 = vector.extract_strided_slice %411 {offsets = [0, 0], sizes = [16, 8], strides = [1, 1]} : vector<16x64xf32> to vector<16x8xf32>
    %477 = tpu.concatenate %475, %476 in 1 : vector<16x56xf32>, vector<16x8xf32> -> vector<16x64xf32>
    %c7_319 = arith.constant 7 : index
    %c0_320 = arith.constant 0 : index
    %c0_321 = arith.constant 0 : index
    %478 = vector.load %arg1[%c7_319, %c0_320, %c0_321] : memref<9x1x64xf32, #tpu.memory_space<vmem>>, vector<1x1x64xf32>
    %479 = vector.shape_cast %478 : vector<1x1x64xf32> to vector<1x64xf32>
    %480 = vector.broadcast %479 : vector<1x64xf32> to vector<16x64xf32>
    %481 = arith.mulf %477, %480 : vector<16x64xf32>
    %482 = arith.truncf %481 : vector<16x64xf32> to vector<16x64xbf16>
    %483 = vector.extract_strided_slice %411 {offsets = [0, 9], sizes = [16, 55], strides = [1, 1]} : vector<16x64xf32> to vector<16x55xf32>
    %484 = vector.extract_strided_slice %411 {offsets = [0, 0], sizes = [16, 9], strides = [1, 1]} : vector<16x64xf32> to vector<16x9xf32>
    %485 = tpu.concatenate %483, %484 in 1 : vector<16x55xf32>, vector<16x9xf32> -> vector<16x64xf32>
    %c8_322 = arith.constant 8 : index
    %c0_323 = arith.constant 0 : index
    %c0_324 = arith.constant 0 : index
    %486 = vector.load %arg1[%c8_322, %c0_323, %c0_324] : memref<9x1x64xf32, #tpu.memory_space<vmem>>, vector<1x1x64xf32>
    %487 = vector.shape_cast %486 : vector<1x1x64xf32> to vector<1x64xf32>
    %488 = vector.broadcast %487 : vector<1x64xf32> to vector<16x64xf32>
    %489 = arith.mulf %485, %488 : vector<16x64xf32>
    %490 = arith.truncf %489 : vector<16x64xf32> to vector<16x64xbf16>
    %491 = vector.extract_strided_slice %429 {offsets = [0, 63], sizes = [16, 1], strides = [1, 1]} : vector<16x64xf32> to vector<16x1xf32>
    %492 = vector.extract_strided_slice %429 {offsets = [0, 0], sizes = [16, 63], strides = [1, 1]} : vector<16x64xf32> to vector<16x63xf32>
    %493 = tpu.concatenate %491, %492 in 1 : vector<16x1xf32>, vector<16x63xf32> -> vector<16x64xf32>
    %c3_325 = arith.constant 3 : index
    %c0_326 = arith.constant 0 : index
    %c0_327 = arith.constant 0 : index
    %494 = vector.load %arg1[%c3_325, %c0_326, %c0_327] : memref<9x1x64xf32, #tpu.memory_space<vmem>>, vector<1x1x64xf32>
    %495 = vector.shape_cast %494 : vector<1x1x64xf32> to vector<1x64xf32>
    %496 = vector.broadcast %495 : vector<1x64xf32> to vector<16x64xf32>
    %497 = arith.mulf %493, %496 : vector<16x64xf32>
    %498 = arith.truncf %497 : vector<16x64xf32> to vector<16x64xbf16>
    %499 = arith.truncf %429 : vector<16x64xf32> to vector<16x64xbf16>
    %500 = vector.extract_strided_slice %429 {offsets = [0, 7], sizes = [16, 57], strides = [1, 1]} : vector<16x64xf32> to vector<16x57xf32>
    %501 = vector.extract_strided_slice %429 {offsets = [0, 0], sizes = [16, 7], strides = [1, 1]} : vector<16x64xf32> to vector<16x7xf32>
    %502 = tpu.concatenate %500, %501 in 1 : vector<16x57xf32>, vector<16x7xf32> -> vector<16x64xf32>
    %c6_328 = arith.constant 6 : index
    %c0_329 = arith.constant 0 : index
    %c0_330 = arith.constant 0 : index
    %503 = vector.load %arg1[%c6_328, %c0_329, %c0_330] : memref<9x1x64xf32, #tpu.memory_space<vmem>>, vector<1x1x64xf32>
    %504 = vector.shape_cast %503 : vector<1x1x64xf32> to vector<1x64xf32>
    %505 = vector.broadcast %504 : vector<1x64xf32> to vector<16x64xf32>
    %506 = arith.mulf %502, %505 : vector<16x64xf32>
    %507 = arith.truncf %506 : vector<16x64xf32> to vector<16x64xbf16>
    %508 = vector.extract_strided_slice %429 {offsets = [0, 8], sizes = [16, 56], strides = [1, 1]} : vector<16x64xf32> to vector<16x56xf32>
    %509 = vector.extract_strided_slice %429 {offsets = [0, 0], sizes = [16, 8], strides = [1, 1]} : vector<16x64xf32> to vector<16x8xf32>
    %510 = tpu.concatenate %508, %509 in 1 : vector<16x56xf32>, vector<16x8xf32> -> vector<16x64xf32>
    %c7_331 = arith.constant 7 : index
    %c0_332 = arith.constant 0 : index
    %c0_333 = arith.constant 0 : index
    %511 = vector.load %arg1[%c7_331, %c0_332, %c0_333] : memref<9x1x64xf32, #tpu.memory_space<vmem>>, vector<1x1x64xf32>
    %512 = vector.shape_cast %511 : vector<1x1x64xf32> to vector<1x64xf32>
    %513 = vector.broadcast %512 : vector<1x64xf32> to vector<16x64xf32>
    %514 = arith.mulf %510, %513 : vector<16x64xf32>
    %515 = arith.truncf %514 : vector<16x64xf32> to vector<16x64xbf16>
    %516 = vector.extract_strided_slice %447 {offsets = [0, 56], sizes = [16, 8], strides = [1, 1]} : vector<16x64xf32> to vector<16x8xf32>
    %517 = vector.extract_strided_slice %447 {offsets = [0, 0], sizes = [16, 56], strides = [1, 1]} : vector<16x64xf32> to vector<16x56xf32>
    %518 = tpu.concatenate %516, %517 in 1 : vector<16x8xf32>, vector<16x56xf32> -> vector<16x64xf32>
    %c1_334 = arith.constant 1 : index
    %c0_335 = arith.constant 0 : index
    %c0_336 = arith.constant 0 : index
    %519 = vector.load %arg1[%c1_334, %c0_335, %c0_336] : memref<9x1x64xf32, #tpu.memory_space<vmem>>, vector<1x1x64xf32>
    %520 = vector.shape_cast %519 : vector<1x1x64xf32> to vector<1x64xf32>
    %521 = vector.broadcast %520 : vector<1x64xf32> to vector<16x64xf32>
    %522 = arith.mulf %518, %521 : vector<16x64xf32>
    %523 = arith.truncf %522 : vector<16x64xf32> to vector<16x64xbf16>
    %524 = vector.extract_strided_slice %447 {offsets = [0, 57], sizes = [16, 7], strides = [1, 1]} : vector<16x64xf32> to vector<16x7xf32>
    %525 = vector.extract_strided_slice %447 {offsets = [0, 0], sizes = [16, 57], strides = [1, 1]} : vector<16x64xf32> to vector<16x57xf32>
    %526 = tpu.concatenate %524, %525 in 1 : vector<16x7xf32>, vector<16x57xf32> -> vector<16x64xf32>
    %c2_337 = arith.constant 2 : index
    %c0_338 = arith.constant 0 : index
    %c0_339 = arith.constant 0 : index
    %527 = vector.load %arg1[%c2_337, %c0_338, %c0_339] : memref<9x1x64xf32, #tpu.memory_space<vmem>>, vector<1x1x64xf32>
    %528 = vector.shape_cast %527 : vector<1x1x64xf32> to vector<1x64xf32>
    %529 = vector.broadcast %528 : vector<1x64xf32> to vector<16x64xf32>
    %530 = arith.mulf %526, %529 : vector<16x64xf32>
    %531 = arith.truncf %530 : vector<16x64xf32> to vector<16x64xbf16>
    %532 = arith.truncf %447 : vector<16x64xf32> to vector<16x64xbf16>
    %533 = vector.extract_strided_slice %447 {offsets = [0, 1], sizes = [16, 63], strides = [1, 1]} : vector<16x64xf32> to vector<16x63xf32>
    %534 = vector.extract_strided_slice %447 {offsets = [0, 0], sizes = [16, 1], strides = [1, 1]} : vector<16x64xf32> to vector<16x1xf32>
    %535 = tpu.concatenate %533, %534 in 1 : vector<16x63xf32>, vector<16x1xf32> -> vector<16x64xf32>
    %c5_340 = arith.constant 5 : index
    %c0_341 = arith.constant 0 : index
    %c0_342 = arith.constant 0 : index
    %536 = vector.load %arg1[%c5_340, %c0_341, %c0_342] : memref<9x1x64xf32, #tpu.memory_space<vmem>>, vector<1x1x64xf32>
    %537 = vector.shape_cast %536 : vector<1x1x64xf32> to vector<1x64xf32>
    %538 = vector.broadcast %537 : vector<1x64xf32> to vector<16x64xf32>
    %539 = arith.mulf %535, %538 : vector<16x64xf32>
    %540 = arith.truncf %539 : vector<16x64xf32> to vector<16x64xbf16>
    %541 = vector.extract_strided_slice %465 {offsets = [0, 55], sizes = [16, 9], strides = [1, 1]} : vector<16x64xf32> to vector<16x9xf32>
    %542 = vector.extract_strided_slice %465 {offsets = [0, 0], sizes = [16, 55], strides = [1, 1]} : vector<16x64xf32> to vector<16x55xf32>
    %543 = tpu.concatenate %541, %542 in 1 : vector<16x9xf32>, vector<16x55xf32> -> vector<16x64xf32>
    %c0_343 = arith.constant 0 : index
    %c0_344 = arith.constant 0 : index
    %c0_345 = arith.constant 0 : index
    %544 = vector.load %arg1[%c0_343, %c0_344, %c0_345] : memref<9x1x64xf32, #tpu.memory_space<vmem>>, vector<1x1x64xf32>
    %545 = vector.shape_cast %544 : vector<1x1x64xf32> to vector<1x64xf32>
    %546 = vector.broadcast %545 : vector<1x64xf32> to vector<16x64xf32>
    %547 = arith.mulf %543, %546 : vector<16x64xf32>
    %548 = arith.truncf %547 : vector<16x64xf32> to vector<16x64xbf16>
    %549 = vector.extract_strided_slice %465 {offsets = [0, 56], sizes = [16, 8], strides = [1, 1]} : vector<16x64xf32> to vector<16x8xf32>
    %550 = vector.extract_strided_slice %465 {offsets = [0, 0], sizes = [16, 56], strides = [1, 1]} : vector<16x64xf32> to vector<16x56xf32>
    %551 = tpu.concatenate %549, %550 in 1 : vector<16x8xf32>, vector<16x56xf32> -> vector<16x64xf32>
    %c1_346 = arith.constant 1 : index
    %c0_347 = arith.constant 0 : index
    %c0_348 = arith.constant 0 : index
    %552 = vector.load %arg1[%c1_346, %c0_347, %c0_348] : memref<9x1x64xf32, #tpu.memory_space<vmem>>, vector<1x1x64xf32>
    %553 = vector.shape_cast %552 : vector<1x1x64xf32> to vector<1x64xf32>
    %554 = vector.broadcast %553 : vector<1x64xf32> to vector<16x64xf32>
    %555 = arith.mulf %551, %554 : vector<16x64xf32>
    %556 = arith.truncf %555 : vector<16x64xf32> to vector<16x64xbf16>
    %557 = vector.extract_strided_slice %465 {offsets = [0, 63], sizes = [16, 1], strides = [1, 1]} : vector<16x64xf32> to vector<16x1xf32>
    %558 = vector.extract_strided_slice %465 {offsets = [0, 0], sizes = [16, 63], strides = [1, 1]} : vector<16x64xf32> to vector<16x63xf32>
    %559 = tpu.concatenate %557, %558 in 1 : vector<16x1xf32>, vector<16x63xf32> -> vector<16x64xf32>
    %c3_349 = arith.constant 3 : index
    %c0_350 = arith.constant 0 : index
    %c0_351 = arith.constant 0 : index
    %560 = vector.load %arg1[%c3_349, %c0_350, %c0_351] : memref<9x1x64xf32, #tpu.memory_space<vmem>>, vector<1x1x64xf32>
    %561 = vector.shape_cast %560 : vector<1x1x64xf32> to vector<1x64xf32>
    %562 = vector.broadcast %561 : vector<1x64xf32> to vector<16x64xf32>
    %563 = arith.mulf %559, %562 : vector<16x64xf32>
    %564 = arith.truncf %563 : vector<16x64xf32> to vector<16x64xbf16>
    %565 = arith.truncf %465 : vector<16x64xf32> to vector<16x64xbf16>
    %c0_352 = arith.constant 0 : index
    %c0_353 = arith.constant 0 : index
    %566 = vector.load %arg10[%c0_352, %c0_353] : memref<3x1xf32, #tpu.memory_space<vmem>>, vector<3x1xf32>
    %567 = vector.shape_cast %566 : vector<3x1xf32> to vector<3x1xf32>
    %568 = vector.broadcast %567 : vector<3x1xf32> to vector<3x64xf32>
    %c0_354 = arith.constant 0 : index
    %c0_355 = arith.constant 0 : index
    %c0_356 = arith.constant 0 : index
    %c0_357 = arith.constant 0 : index
    %569 = vector.load %arg9[%c0_354, %c0_355, %c0_356, %c0_357] : memref<4x4x3x16xbf16, #tpu.memory_space<vmem>>, vector<1x1x3x16xbf16>
    %570 = vector.shape_cast %569 : vector<1x1x3x16xbf16> to vector<3x16xbf16>
    %cst_358 = arith.constant dense<0.000000e+00> : vector<3x64xf32>
    %571 = tpu.matmul %570, %548, %cst_358 {dimension_numbers = #tpu.dot_dimension_numbers<[1], [0], [0], [1], [0, 0, 1, 1], [], []>} : vector<3x16xbf16>, vector<16x64xbf16>, vector<3x64xf32> -> vector<3x64xf32>
    %572 = arith.addf %568, %571 : vector<3x64xf32>
    %c0_359 = arith.constant 0 : index
    %c1_360 = arith.constant 1 : index
    %c0_361 = arith.constant 0 : index
    %c0_362 = arith.constant 0 : index
    %573 = vector.load %arg9[%c0_359, %c1_360, %c0_361, %c0_362] : memref<4x4x3x16xbf16, #tpu.memory_space<vmem>>, vector<1x1x3x16xbf16>
    %574 = vector.shape_cast %573 : vector<1x1x3x16xbf16> to vector<3x16xbf16>
    %cst_363 = arith.constant dense<0.000000e+00> : vector<3x64xf32>
    %575 = tpu.matmul %574, %523, %cst_363 {dimension_numbers = #tpu.dot_dimension_numbers<[1], [0], [0], [1], [0, 0, 1, 1], [], []>} : vector<3x16xbf16>, vector<16x64xbf16>, vector<3x64xf32> -> vector<3x64xf32>
    %576 = arith.addf %572, %575 : vector<3x64xf32>
    %c0_364 = arith.constant 0 : index
    %c2_365 = arith.constant 2 : index
    %c0_366 = arith.constant 0 : index
    %c0_367 = arith.constant 0 : index
    %577 = vector.load %arg9[%c0_364, %c2_365, %c0_366, %c0_367] : memref<4x4x3x16xbf16, #tpu.memory_space<vmem>>, vector<1x1x3x16xbf16>
    %578 = vector.shape_cast %577 : vector<1x1x3x16xbf16> to vector<3x16xbf16>
    %cst_368 = arith.constant dense<0.000000e+00> : vector<3x64xf32>
    %579 = tpu.matmul %578, %498, %cst_368 {dimension_numbers = #tpu.dot_dimension_numbers<[1], [0], [0], [1], [0, 0, 1, 1], [], []>} : vector<3x16xbf16>, vector<16x64xbf16>, vector<3x64xf32> -> vector<3x64xf32>
    %580 = arith.addf %576, %579 : vector<3x64xf32>
    %c0_369 = arith.constant 0 : index
    %c3_370 = arith.constant 3 : index
    %c0_371 = arith.constant 0 : index
    %c0_372 = arith.constant 0 : index
    %581 = vector.load %arg9[%c0_369, %c3_370, %c0_371, %c0_372] : memref<4x4x3x16xbf16, #tpu.memory_space<vmem>>, vector<1x1x3x16xbf16>
    %582 = vector.shape_cast %581 : vector<1x1x3x16xbf16> to vector<3x16xbf16>
    %cst_373 = arith.constant dense<0.000000e+00> : vector<3x64xf32>
    %583 = tpu.matmul %582, %466, %cst_373 {dimension_numbers = #tpu.dot_dimension_numbers<[1], [0], [0], [1], [0, 0, 1, 1], [], []>} : vector<3x16xbf16>, vector<16x64xbf16>, vector<3x64xf32> -> vector<3x64xf32>
    %584 = arith.addf %580, %583 : vector<3x64xf32>
    %c0_374 = arith.constant 0 : index
    %c0_375 = arith.constant 0 : index
    %c0_376 = arith.constant 0 : index
    %c0_377 = arith.constant 0 : index
    %585 = vector.load %arg11[%c0_374, %c0_375, %c0_376, %c0_377] : memref<1x16x3x64xf32, #tpu.memory_space<vmem>>, vector<1x1x3x64xf32>
    %586 = vector.shape_cast %585 : vector<1x1x3x64xf32> to vector<3x64xf32>
    %587 = vector.shape_cast %584 : vector<3x64xf32> to vector<1x1x3x64xf32>
    tpu.vector_store %arg11[%c0_374, %c0_375, %c0_376, %c0_377], %587 {strides = array<i32>} : memref<1x16x3x64xf32, #tpu.memory_space<vmem>>, vector<1x1x3x64xf32>,
    %c1_378 = arith.constant 1 : index
    %c0_379 = arith.constant 0 : index
    %c0_380 = arith.constant 0 : index
    %c0_381 = arith.constant 0 : index
    %588 = vector.load %arg9[%c1_378, %c0_379, %c0_380, %c0_381] : memref<4x4x3x16xbf16, #tpu.memory_space<vmem>>, vector<1x1x3x16xbf16>
    %589 = vector.shape_cast %588 : vector<1x1x3x16xbf16> to vector<3x16xbf16>
    %cst_382 = arith.constant dense<0.000000e+00> : vector<3x64xf32>
    %590 = tpu.matmul %589, %523, %cst_382 {dimension_numbers = #tpu.dot_dimension_numbers<[1], [0], [0], [1], [0, 0, 1, 1], [], []>} : vector<3x16xbf16>, vector<16x64xbf16>, vector<3x64xf32> -> vector<3x64xf32>
    %591 = arith.addf %568, %590 : vector<3x64xf32>
    %c1_383 = arith.constant 1 : index
    %c1_384 = arith.constant 1 : index
    %c0_385 = arith.constant 0 : index
    %c0_386 = arith.constant 0 : index
    %592 = vector.load %arg9[%c1_383, %c1_384, %c0_385, %c0_386] : memref<4x4x3x16xbf16, #tpu.memory_space<vmem>>, vector<1x1x3x16xbf16>
    %593 = vector.shape_cast %592 : vector<1x1x3x16xbf16> to vector<3x16xbf16>
    %cst_387 = arith.constant dense<0.000000e+00> : vector<3x64xf32>
    %594 = tpu.matmul %593, %556, %cst_387 {dimension_numbers = #tpu.dot_dimension_numbers<[1], [0], [0], [1], [0, 0, 1, 1], [], []>} : vector<3x16xbf16>, vector<16x64xbf16>, vector<3x64xf32> -> vector<3x64xf32>
    %595 = arith.addf %591, %594 : vector<3x64xf32>
    %c1_388 = arith.constant 1 : index
    %c2_389 = arith.constant 2 : index
    %c0_390 = arith.constant 0 : index
    %c0_391 = arith.constant 0 : index
    %596 = vector.load %arg9[%c1_388, %c2_389, %c0_390, %c0_391] : memref<4x4x3x16xbf16, #tpu.memory_space<vmem>>, vector<1x1x3x16xbf16>
    %597 = vector.shape_cast %596 : vector<1x1x3x16xbf16> to vector<3x16xbf16>
    %cst_392 = arith.constant dense<0.000000e+00> : vector<3x64xf32>
    %598 = tpu.matmul %597, %466, %cst_392 {dimension_numbers = #tpu.dot_dimension_numbers<[1], [0], [0], [1], [0, 0, 1, 1], [], []>} : vector<3x16xbf16>, vector<16x64xbf16>, vector<3x64xf32> -> vector<3x64xf32>
    %599 = arith.addf %595, %598 : vector<3x64xf32>
    %c1_393 = arith.constant 1 : index
    %c3_394 = arith.constant 3 : index
    %c0_395 = arith.constant 0 : index
    %c0_396 = arith.constant 0 : index
    %600 = vector.load %arg9[%c1_393, %c3_394, %c0_395, %c0_396] : memref<4x4x3x16xbf16, #tpu.memory_space<vmem>>, vector<1x1x3x16xbf16>
    %601 = vector.shape_cast %600 : vector<1x1x3x16xbf16> to vector<3x16xbf16>
    %cst_397 = arith.constant dense<0.000000e+00> : vector<3x64xf32>
    %602 = tpu.matmul %601, %499, %cst_397 {dimension_numbers = #tpu.dot_dimension_numbers<[1], [0], [0], [1], [0, 0, 1, 1], [], []>} : vector<3x16xbf16>, vector<16x64xbf16>, vector<3x64xf32> -> vector<3x64xf32>
    %603 = arith.addf %599, %602 : vector<3x64xf32>
    %c0_398 = arith.constant 0 : index
    %c1_399 = arith.constant 1 : index
    %c0_400 = arith.constant 0 : index
    %c0_401 = arith.constant 0 : index
    %604 = vector.load %arg11[%c0_398, %c1_399, %c0_400, %c0_401] : memref<1x16x3x64xf32, #tpu.memory_space<vmem>>, vector<1x1x3x64xf32>
    %605 = vector.shape_cast %604 : vector<1x1x3x64xf32> to vector<3x64xf32>
    %606 = vector.shape_cast %603 : vector<3x64xf32> to vector<1x1x3x64xf32>
    tpu.vector_store %arg11[%c0_398, %c1_399, %c0_400, %c0_401], %606 {strides = array<i32>} : memref<1x16x3x64xf32, #tpu.memory_space<vmem>>, vector<1x1x3x64xf32>,
    %c0_402 = arith.constant 0 : index
    %c0_403 = arith.constant 0 : index
    %c0_404 = arith.constant 0 : index
    %c0_405 = arith.constant 0 : index
    %607 = vector.load %arg9[%c0_402, %c0_403, %c0_404, %c0_405] : memref<4x4x3x16xbf16, #tpu.memory_space<vmem>>, vector<1x1x3x16xbf16>
    %608 = vector.shape_cast %607 : vector<1x1x3x16xbf16> to vector<3x16xbf16>
    %cst_406 = arith.constant dense<0.000000e+00> : vector<3x64xf32>
    %609 = tpu.matmul %608, %523, %cst_406 {dimension_numbers = #tpu.dot_dimension_numbers<[1], [0], [0], [1], [0, 0, 1, 1], [], []>} : vector<3x16xbf16>, vector<16x64xbf16>, vector<3x64xf32> -> vector<3x64xf32>
    %610 = arith.addf %568, %609 : vector<3x64xf32>
    %c0_407 = arith.constant 0 : index
    %c1_408 = arith.constant 1 : index
    %c0_409 = arith.constant 0 : index
    %c0_410 = arith.constant 0 : index
    %611 = vector.load %arg9[%c0_407, %c1_408, %c0_409, %c0_410] : memref<4x4x3x16xbf16, #tpu.memory_space<vmem>>, vector<1x1x3x16xbf16>
    %612 = vector.shape_cast %611 : vector<1x1x3x16xbf16> to vector<3x16xbf16>
    %cst_411 = arith.constant dense<0.000000e+00> : vector<3x64xf32>
    %613 = tpu.matmul %612, %556, %cst_411 {dimension_numbers = #tpu.dot_dimension_numbers<[1], [0], [0], [1], [0, 0, 1, 1], [], []>} : vector<3x16xbf16>, vector<16x64xbf16>, vector<3x64xf32> -> vector<3x64xf32>
    %614 = arith.addf %610, %613 : vector<3x64xf32>
    %c0_412 = arith.constant 0 : index
    %c2_413 = arith.constant 2 : index
    %c0_414 = arith.constant 0 : index
    %c0_415 = arith.constant 0 : index
    %615 = vector.load %arg9[%c0_412, %c2_413, %c0_414, %c0_415] : memref<4x4x3x16xbf16, #tpu.memory_space<vmem>>, vector<1x1x3x16xbf16>
    %616 = vector.shape_cast %615 : vector<1x1x3x16xbf16> to vector<3x16xbf16>
    %cst_416 = arith.constant dense<0.000000e+00> : vector<3x64xf32>
    %617 = tpu.matmul %616, %466, %cst_416 {dimension_numbers = #tpu.dot_dimension_numbers<[1], [0], [0], [1], [0, 0, 1, 1], [], []>} : vector<3x16xbf16>, vector<16x64xbf16>, vector<3x64xf32> -> vector<3x64xf32>
    %618 = arith.addf %614, %617 : vector<3x64xf32>
    %c0_417 = arith.constant 0 : index
    %c3_418 = arith.constant 3 : index
    %c0_419 = arith.constant 0 : index
    %c0_420 = arith.constant 0 : index
    %619 = vector.load %arg9[%c0_417, %c3_418, %c0_419, %c0_420] : memref<4x4x3x16xbf16, #tpu.memory_space<vmem>>, vector<1x1x3x16xbf16>
    %620 = vector.shape_cast %619 : vector<1x1x3x16xbf16> to vector<3x16xbf16>
    %cst_421 = arith.constant dense<0.000000e+00> : vector<3x64xf32>
    %621 = tpu.matmul %620, %499, %cst_421 {dimension_numbers = #tpu.dot_dimension_numbers<[1], [0], [0], [1], [0, 0, 1, 1], [], []>} : vector<3x16xbf16>, vector<16x64xbf16>, vector<3x64xf32> -> vector<3x64xf32>
    %622 = arith.addf %618, %621 : vector<3x64xf32>
    %c0_422 = arith.constant 0 : index
    %c2_423 = arith.constant 2 : index
    %c0_424 = arith.constant 0 : index
    %c0_425 = arith.constant 0 : index
    %623 = vector.load %arg11[%c0_422, %c2_423, %c0_424, %c0_425] : memref<1x16x3x64xf32, #tpu.memory_space<vmem>>, vector<1x1x3x64xf32>
    %624 = vector.shape_cast %623 : vector<1x1x3x64xf32> to vector<3x64xf32>
    %625 = vector.shape_cast %622 : vector<3x64xf32> to vector<1x1x3x64xf32>
    tpu.vector_store %arg11[%c0_422, %c2_423, %c0_424, %c0_425], %625 {strides = array<i32>} : memref<1x16x3x64xf32, #tpu.memory_space<vmem>>, vector<1x1x3x64xf32>,
    %c1_426 = arith.constant 1 : index
    %c0_427 = arith.constant 0 : index
    %c0_428 = arith.constant 0 : index
    %c0_429 = arith.constant 0 : index
    %626 = vector.load %arg9[%c1_426, %c0_427, %c0_428, %c0_429] : memref<4x4x3x16xbf16, #tpu.memory_space<vmem>>, vector<1x1x3x16xbf16>
    %627 = vector.shape_cast %626 : vector<1x1x3x16xbf16> to vector<3x16xbf16>
    %cst_430 = arith.constant dense<0.000000e+00> : vector<3x64xf32>
    %628 = tpu.matmul %627, %556, %cst_430 {dimension_numbers = #tpu.dot_dimension_numbers<[1], [0], [0], [1], [0, 0, 1, 1], [], []>} : vector<3x16xbf16>, vector<16x64xbf16>, vector<3x64xf32> -> vector<3x64xf32>
    %629 = arith.addf %568, %628 : vector<3x64xf32>
    %c1_431 = arith.constant 1 : index
    %c1_432 = arith.constant 1 : index
    %c0_433 = arith.constant 0 : index
    %c0_434 = arith.constant 0 : index
    %630 = vector.load %arg9[%c1_431, %c1_432, %c0_433, %c0_434] : memref<4x4x3x16xbf16, #tpu.memory_space<vmem>>, vector<1x1x3x16xbf16>
    %631 = vector.shape_cast %630 : vector<1x1x3x16xbf16> to vector<3x16xbf16>
    %cst_435 = arith.constant dense<0.000000e+00> : vector<3x64xf32>
    %632 = tpu.matmul %631, %531, %cst_435 {dimension_numbers = #tpu.dot_dimension_numbers<[1], [0], [0], [1], [0, 0, 1, 1], [], []>} : vector<3x16xbf16>, vector<16x64xbf16>, vector<3x64xf32> -> vector<3x64xf32>
    %633 = arith.addf %629, %632 : vector<3x64xf32>
    %c1_436 = arith.constant 1 : index
    %c2_437 = arith.constant 2 : index
    %c0_438 = arith.constant 0 : index
    %c0_439 = arith.constant 0 : index
    %634 = vector.load %arg9[%c1_436, %c2_437, %c0_438, %c0_439] : memref<4x4x3x16xbf16, #tpu.memory_space<vmem>>, vector<1x1x3x16xbf16>
    %635 = vector.shape_cast %634 : vector<1x1x3x16xbf16> to vector<3x16xbf16>
    %cst_440 = arith.constant dense<0.000000e+00> : vector<3x64xf32>
    %636 = tpu.matmul %635, %499, %cst_440 {dimension_numbers = #tpu.dot_dimension_numbers<[1], [0], [0], [1], [0, 0, 1, 1], [], []>} : vector<3x16xbf16>, vector<16x64xbf16>, vector<3x64xf32> -> vector<3x64xf32>
    %637 = arith.addf %633, %636 : vector<3x64xf32>
    %c1_441 = arith.constant 1 : index
    %c3_442 = arith.constant 3 : index
    %c0_443 = arith.constant 0 : index
    %c0_444 = arith.constant 0 : index
    %638 = vector.load %arg9[%c1_441, %c3_442, %c0_443, %c0_444] : memref<4x4x3x16xbf16, #tpu.memory_space<vmem>>, vector<1x1x3x16xbf16>
    %639 = vector.shape_cast %638 : vector<1x1x3x16xbf16> to vector<3x16xbf16>
    %cst_445 = arith.constant dense<0.000000e+00> : vector<3x64xf32>
    %640 = tpu.matmul %639, %474, %cst_445 {dimension_numbers = #tpu.dot_dimension_numbers<[1], [0], [0], [1], [0, 0, 1, 1], [], []>} : vector<3x16xbf16>, vector<16x64xbf16>, vector<3x64xf32> -> vector<3x64xf32>
    %641 = arith.addf %637, %640 : vector<3x64xf32>
    %c0_446 = arith.constant 0 : index
    %c3_447 = arith.constant 3 : index
    %c0_448 = arith.constant 0 : index
    %c0_449 = arith.constant 0 : index
    %642 = vector.load %arg11[%c0_446, %c3_447, %c0_448, %c0_449] : memref<1x16x3x64xf32, #tpu.memory_space<vmem>>, vector<1x1x3x64xf32>
    %643 = vector.shape_cast %642 : vector<1x1x3x64xf32> to vector<3x64xf32>
    %644 = vector.shape_cast %641 : vector<3x64xf32> to vector<1x1x3x64xf32>
    tpu.vector_store %arg11[%c0_446, %c3_447, %c0_448, %c0_449], %644 {strides = array<i32>} : memref<1x16x3x64xf32, #tpu.memory_space<vmem>>, vector<1x1x3x64xf32>,
    %c2_450 = arith.constant 2 : index
    %c0_451 = arith.constant 0 : index
    %c0_452 = arith.constant 0 : index
    %c0_453 = arith.constant 0 : index
    %645 = vector.load %arg9[%c2_450, %c0_451, %c0_452, %c0_453] : memref<4x4x3x16xbf16, #tpu.memory_space<vmem>>, vector<1x1x3x16xbf16>
    %646 = vector.shape_cast %645 : vector<1x1x3x16xbf16> to vector<3x16xbf16>
    %cst_454 = arith.constant dense<0.000000e+00> : vector<3x64xf32>
    %647 = tpu.matmul %646, %498, %cst_454 {dimension_numbers = #tpu.dot_dimension_numbers<[1], [0], [0], [1], [0, 0, 1, 1], [], []>} : vector<3x16xbf16>, vector<16x64xbf16>, vector<3x64xf32> -> vector<3x64xf32>
    %648 = arith.addf %568, %647 : vector<3x64xf32>
    %c2_455 = arith.constant 2 : index
    %c1_456 = arith.constant 1 : index
    %c0_457 = arith.constant 0 : index
    %c0_458 = arith.constant 0 : index
    %649 = vector.load %arg9[%c2_455, %c1_456, %c0_457, %c0_458] : memref<4x4x3x16xbf16, #tpu.memory_space<vmem>>, vector<1x1x3x16xbf16>
    %650 = vector.shape_cast %649 : vector<1x1x3x16xbf16> to vector<3x16xbf16>
    %cst_459 = arith.constant dense<0.000000e+00> : vector<3x64xf32>
    %651 = tpu.matmul %650, %466, %cst_459 {dimension_numbers = #tpu.dot_dimension_numbers<[1], [0], [0], [1], [0, 0, 1, 1], [], []>} : vector<3x16xbf16>, vector<16x64xbf16>, vector<3x64xf32> -> vector<3x64xf32>
    %652 = arith.addf %648, %651 : vector<3x64xf32>
    %c2_460 = arith.constant 2 : index
    %c2_461 = arith.constant 2 : index
    %c0_462 = arith.constant 0 : index
    %c0_463 = arith.constant 0 : index
    %653 = vector.load %arg9[%c2_460, %c2_461, %c0_462, %c0_463] : memref<4x4x3x16xbf16, #tpu.memory_space<vmem>>, vector<1x1x3x16xbf16>
    %654 = vector.shape_cast %653 : vector<1x1x3x16xbf16> to vector<3x16xbf16>
    %cst_464 = arith.constant dense<0.000000e+00> : vector<3x64xf32>
    %655 = tpu.matmul %654, %564, %cst_464 {dimension_numbers = #tpu.dot_dimension_numbers<[1], [0], [0], [1], [0, 0, 1, 1], [], []>} : vector<3x16xbf16>, vector<16x64xbf16>, vector<3x64xf32> -> vector<3x64xf32>
    %656 = arith.addf %652, %655 : vector<3x64xf32>
    %c2_465 = arith.constant 2 : index
    %c3_466 = arith.constant 3 : index
    %c0_467 = arith.constant 0 : index
    %c0_468 = arith.constant 0 : index
    %657 = vector.load %arg9[%c2_465, %c3_466, %c0_467, %c0_468] : memref<4x4x3x16xbf16, #tpu.memory_space<vmem>>, vector<1x1x3x16xbf16>
    %658 = vector.shape_cast %657 : vector<1x1x3x16xbf16> to vector<3x16xbf16>
    %cst_469 = arith.constant dense<0.000000e+00> : vector<3x64xf32>
    %659 = tpu.matmul %658, %532, %cst_469 {dimension_numbers = #tpu.dot_dimension_numbers<[1], [0], [0], [1], [0, 0, 1, 1], [], []>} : vector<3x16xbf16>, vector<16x64xbf16>, vector<3x64xf32> -> vector<3x64xf32>
    %660 = arith.addf %656, %659 : vector<3x64xf32>
    %c0_470 = arith.constant 0 : index
    %c4_471 = arith.constant 4 : index
    %c0_472 = arith.constant 0 : index
    %c0_473 = arith.constant 0 : index
    %661 = vector.load %arg11[%c0_470, %c4_471, %c0_472, %c0_473] : memref<1x16x3x64xf32, #tpu.memory_space<vmem>>, vector<1x1x3x64xf32>
    %662 = vector.shape_cast %661 : vector<1x1x3x64xf32> to vector<3x64xf32>
    %663 = vector.shape_cast %660 : vector<3x64xf32> to vector<1x1x3x64xf32>
    tpu.vector_store %arg11[%c0_470, %c4_471, %c0_472, %c0_473], %663 {strides = array<i32>} : memref<1x16x3x64xf32, #tpu.memory_space<vmem>>, vector<1x1x3x64xf32>,
    %c3_474 = arith.constant 3 : index
    %c0_475 = arith.constant 0 : index
    %c0_476 = arith.constant 0 : index
    %c0_477 = arith.constant 0 : index
    %664 = vector.load %arg9[%c3_474, %c0_475, %c0_476, %c0_477] : memref<4x4x3x16xbf16, #tpu.memory_space<vmem>>, vector<1x1x3x16xbf16>
    %665 = vector.shape_cast %664 : vector<1x1x3x16xbf16> to vector<3x16xbf16>
    %cst_478 = arith.constant dense<0.000000e+00> : vector<3x64xf32>
    %666 = tpu.matmul %665, %466, %cst_478 {dimension_numbers = #tpu.dot_dimension_numbers<[1], [0], [0], [1], [0, 0, 1, 1], [], []>} : vector<3x16xbf16>, vector<16x64xbf16>, vector<3x64xf32> -> vector<3x64xf32>
    %667 = arith.addf %568, %666 : vector<3x64xf32>
    %c3_479 = arith.constant 3 : index
    %c1_480 = arith.constant 1 : index
    %c0_481 = arith.constant 0 : index
    %c0_482 = arith.constant 0 : index
    %668 = vector.load %arg9[%c3_479, %c1_480, %c0_481, %c0_482] : memref<4x4x3x16xbf16, #tpu.memory_space<vmem>>, vector<1x1x3x16xbf16>
    %669 = vector.shape_cast %668 : vector<1x1x3x16xbf16> to vector<3x16xbf16>
    %cst_483 = arith.constant dense<0.000000e+00> : vector<3x64xf32>
    %670 = tpu.matmul %669, %499, %cst_483 {dimension_numbers = #tpu.dot_dimension_numbers<[1], [0], [0], [1], [0, 0, 1, 1], [], []>} : vector<3x16xbf16>, vector<16x64xbf16>, vector<3x64xf32> -> vector<3x64xf32>
    %671 = arith.addf %667, %670 : vector<3x64xf32>
    %c3_484 = arith.constant 3 : index
    %c2_485 = arith.constant 2 : index
    %c0_486 = arith.constant 0 : index
    %c0_487 = arith.constant 0 : index
    %672 = vector.load %arg9[%c3_484, %c2_485, %c0_486, %c0_487] : memref<4x4x3x16xbf16, #tpu.memory_space<vmem>>, vector<1x1x3x16xbf16>
    %673 = vector.shape_cast %672 : vector<1x1x3x16xbf16> to vector<3x16xbf16>
    %cst_488 = arith.constant dense<0.000000e+00> : vector<3x64xf32>
    %674 = tpu.matmul %673, %532, %cst_488 {dimension_numbers = #tpu.dot_dimension_numbers<[1], [0], [0], [1], [0, 0, 1, 1], [], []>} : vector<3x16xbf16>, vector<16x64xbf16>, vector<3x64xf32> -> vector<3x64xf32>
    %675 = arith.addf %671, %674 : vector<3x64xf32>
    %c3_489 = arith.constant 3 : index
    %c3_490 = arith.constant 3 : index
    %c0_491 = arith.constant 0 : index
    %c0_492 = arith.constant 0 : index
    %676 = vector.load %arg9[%c3_489, %c3_490, %c0_491, %c0_492] : memref<4x4x3x16xbf16, #tpu.memory_space<vmem>>, vector<1x1x3x16xbf16>
    %677 = vector.shape_cast %676 : vector<1x1x3x16xbf16> to vector<3x16xbf16>
    %cst_493 = arith.constant dense<0.000000e+00> : vector<3x64xf32>
    %678 = tpu.matmul %677, %565, %cst_493 {dimension_numbers = #tpu.dot_dimension_numbers<[1], [0], [0], [1], [0, 0, 1, 1], [], []>} : vector<3x16xbf16>, vector<16x64xbf16>, vector<3x64xf32> -> vector<3x64xf32>
    %679 = arith.addf %675, %678 : vector<3x64xf32>
    %c0_494 = arith.constant 0 : index
    %c5_495 = arith.constant 5 : index
    %c0_496 = arith.constant 0 : index
    %c0_497 = arith.constant 0 : index
    %680 = vector.load %arg11[%c0_494, %c5_495, %c0_496, %c0_497] : memref<1x16x3x64xf32, #tpu.memory_space<vmem>>, vector<1x1x3x64xf32>
    %681 = vector.shape_cast %680 : vector<1x1x3x64xf32> to vector<3x64xf32>
    %682 = vector.shape_cast %679 : vector<3x64xf32> to vector<1x1x3x64xf32>
    tpu.vector_store %arg11[%c0_494, %c5_495, %c0_496, %c0_497], %682 {strides = array<i32>} : memref<1x16x3x64xf32, #tpu.memory_space<vmem>>, vector<1x1x3x64xf32>,
    %c2_498 = arith.constant 2 : index
    %c0_499 = arith.constant 0 : index
    %c0_500 = arith.constant 0 : index
    %c0_501 = arith.constant 0 : index
    %683 = vector.load %arg9[%c2_498, %c0_499, %c0_500, %c0_501] : memref<4x4x3x16xbf16, #tpu.memory_space<vmem>>, vector<1x1x3x16xbf16>
    %684 = vector.shape_cast %683 : vector<1x1x3x16xbf16> to vector<3x16xbf16>
    %cst_502 = arith.constant dense<0.000000e+00> : vector<3x64xf32>
    %685 = tpu.matmul %684, %466, %cst_502 {dimension_numbers = #tpu.dot_dimension_numbers<[1], [0], [0], [1], [0, 0, 1, 1], [], []>} : vector<3x16xbf16>, vector<16x64xbf16>, vector<3x64xf32> -> vector<3x64xf32>
    %686 = arith.addf %568, %685 : vector<3x64xf32>
    %c2_503 = arith.constant 2 : index
    %c1_504 = arith.constant 1 : index
    %c0_505 = arith.constant 0 : index
    %c0_506 = arith.constant 0 : index
    %687 = vector.load %arg9[%c2_503, %c1_504, %c0_505, %c0_506] : memref<4x4x3x16xbf16, #tpu.memory_space<vmem>>, vector<1x1x3x16xbf16>
    %688 = vector.shape_cast %687 : vector<1x1x3x16xbf16> to vector<3x16xbf16>
    %cst_507 = arith.constant dense<0.000000e+00> : vector<3x64xf32>
    %689 = tpu.matmul %688, %499, %cst_507 {dimension_numbers = #tpu.dot_dimension_numbers<[1], [0], [0], [1], [0, 0, 1, 1], [], []>} : vector<3x16xbf16>, vector<16x64xbf16>, vector<3x64xf32> -> vector<3x64xf32>
    %690 = arith.addf %686, %689 : vector<3x64xf32>
    %c2_508 = arith.constant 2 : index
    %c2_509 = arith.constant 2 : index
    %c0_510 = arith.constant 0 : index
    %c0_511 = arith.constant 0 : index
    %691 = vector.load %arg9[%c2_508, %c2_509, %c0_510, %c0_511] : memref<4x4x3x16xbf16, #tpu.memory_space<vmem>>, vector<1x1x3x16xbf16>
    %692 = vector.shape_cast %691 : vector<1x1x3x16xbf16> to vector<3x16xbf16>
    %cst_512 = arith.constant dense<0.000000e+00> : vector<3x64xf32>
    %693 = tpu.matmul %692, %532, %cst_512 {dimension_numbers = #tpu.dot_dimension_numbers<[1], [0], [0], [1], [0, 0, 1, 1], [], []>} : vector<3x16xbf16>, vector<16x64xbf16>, vector<3x64xf32> -> vector<3x64xf32>
    %694 = arith.addf %690, %693 : vector<3x64xf32>
    %c2_513 = arith.constant 2 : index
    %c3_514 = arith.constant 3 : index
    %c0_515 = arith.constant 0 : index
    %c0_516 = arith.constant 0 : index
    %695 = vector.load %arg9[%c2_513, %c3_514, %c0_515, %c0_516] : memref<4x4x3x16xbf16, #tpu.memory_space<vmem>>, vector<1x1x3x16xbf16>
    %696 = vector.shape_cast %695 : vector<1x1x3x16xbf16> to vector<3x16xbf16>
    %cst_517 = arith.constant dense<0.000000e+00> : vector<3x64xf32>
    %697 = tpu.matmul %696, %565, %cst_517 {dimension_numbers = #tpu.dot_dimension_numbers<[1], [0], [0], [1], [0, 0, 1, 1], [], []>} : vector<3x16xbf16>, vector<16x64xbf16>, vector<3x64xf32> -> vector<3x64xf32>
    %698 = arith.addf %694, %697 : vector<3x64xf32>
    %c0_518 = arith.constant 0 : index
    %c6_519 = arith.constant 6 : index
    %c0_520 = arith.constant 0 : index
    %c0_521 = arith.constant 0 : index
    %699 = vector.load %arg11[%c0_518, %c6_519, %c0_520, %c0_521] : memref<1x16x3x64xf32, #tpu.memory_space<vmem>>, vector<1x1x3x64xf32>
    %700 = vector.shape_cast %699 : vector<1x1x3x64xf32> to vector<3x64xf32>
    %701 = vector.shape_cast %698 : vector<3x64xf32> to vector<1x1x3x64xf32>
    tpu.vector_store %arg11[%c0_518, %c6_519, %c0_520, %c0_521], %701 {strides = array<i32>} : memref<1x16x3x64xf32, #tpu.memory_space<vmem>>, vector<1x1x3x64xf32>,
    %c3_522 = arith.constant 3 : index
    %c0_523 = arith.constant 0 : index
    %c0_524 = arith.constant 0 : index
    %c0_525 = arith.constant 0 : index
    %702 = vector.load %arg9[%c3_522, %c0_523, %c0_524, %c0_525] : memref<4x4x3x16xbf16, #tpu.memory_space<vmem>>, vector<1x1x3x16xbf16>
    %703 = vector.shape_cast %702 : vector<1x1x3x16xbf16> to vector<3x16xbf16>
    %cst_526 = arith.constant dense<0.000000e+00> : vector<3x64xf32>
    %704 = tpu.matmul %703, %499, %cst_526 {dimension_numbers = #tpu.dot_dimension_numbers<[1], [0], [0], [1], [0, 0, 1, 1], [], []>} : vector<3x16xbf16>, vector<16x64xbf16>, vector<3x64xf32> -> vector<3x64xf32>
    %705 = arith.addf %568, %704 : vector<3x64xf32>
    %c3_527 = arith.constant 3 : index
    %c1_528 = arith.constant 1 : index
    %c0_529 = arith.constant 0 : index
    %c0_530 = arith.constant 0 : index
    %706 = vector.load %arg9[%c3_527, %c1_528, %c0_529, %c0_530] : memref<4x4x3x16xbf16, #tpu.memory_space<vmem>>, vector<1x1x3x16xbf16>
    %707 = vector.shape_cast %706 : vector<1x1x3x16xbf16> to vector<3x16xbf16>
    %cst_531 = arith.constant dense<0.000000e+00> : vector<3x64xf32>
    %708 = tpu.matmul %707, %474, %cst_531 {dimension_numbers = #tpu.dot_dimension_numbers<[1], [0], [0], [1], [0, 0, 1, 1], [], []>} : vector<3x16xbf16>, vector<16x64xbf16>, vector<3x64xf32> -> vector<3x64xf32>
    %709 = arith.addf %705, %708 : vector<3x64xf32>
    %c3_532 = arith.constant 3 : index
    %c2_533 = arith.constant 2 : index
    %c0_534 = arith.constant 0 : index
    %c0_535 = arith.constant 0 : index
    %710 = vector.load %arg9[%c3_532, %c2_533, %c0_534, %c0_535] : memref<4x4x3x16xbf16, #tpu.memory_space<vmem>>, vector<1x1x3x16xbf16>
    %711 = vector.shape_cast %710 : vector<1x1x3x16xbf16> to vector<3x16xbf16>
    %cst_536 = arith.constant dense<0.000000e+00> : vector<3x64xf32>
    %712 = tpu.matmul %711, %565, %cst_536 {dimension_numbers = #tpu.dot_dimension_numbers<[1], [0], [0], [1], [0, 0, 1, 1], [], []>} : vector<3x16xbf16>, vector<16x64xbf16>, vector<3x64xf32> -> vector<3x64xf32>
    %713 = arith.addf %709, %712 : vector<3x64xf32>
    %c3_537 = arith.constant 3 : index
    %c3_538 = arith.constant 3 : index
    %c0_539 = arith.constant 0 : index
    %c0_540 = arith.constant 0 : index
    %714 = vector.load %arg9[%c3_537, %c3_538, %c0_539, %c0_540] : memref<4x4x3x16xbf16, #tpu.memory_space<vmem>>, vector<1x1x3x16xbf16>
    %715 = vector.shape_cast %714 : vector<1x1x3x16xbf16> to vector<3x16xbf16>
    %cst_541 = arith.constant dense<0.000000e+00> : vector<3x64xf32>
    %716 = tpu.matmul %715, %540, %cst_541 {dimension_numbers = #tpu.dot_dimension_numbers<[1], [0], [0], [1], [0, 0, 1, 1], [], []>} : vector<3x16xbf16>, vector<16x64xbf16>, vector<3x64xf32> -> vector<3x64xf32>
    %717 = arith.addf %713, %716 : vector<3x64xf32>
    %c0_542 = arith.constant 0 : index
    %c7_543 = arith.constant 7 : index
    %c0_544 = arith.constant 0 : index
    %c0_545 = arith.constant 0 : index
    %718 = vector.load %arg11[%c0_542, %c7_543, %c0_544, %c0_545] : memref<1x16x3x64xf32, #tpu.memory_space<vmem>>, vector<1x1x3x64xf32>
    %719 = vector.shape_cast %718 : vector<1x1x3x64xf32> to vector<3x64xf32>
    %720 = vector.shape_cast %717 : vector<3x64xf32> to vector<1x1x3x64xf32>
    tpu.vector_store %arg11[%c0_542, %c7_543, %c0_544, %c0_545], %720 {strides = array<i32>} : memref<1x16x3x64xf32, #tpu.memory_space<vmem>>, vector<1x1x3x64xf32>,
    %c0_546 = arith.constant 0 : index
    %c0_547 = arith.constant 0 : index
    %c0_548 = arith.constant 0 : index
    %c0_549 = arith.constant 0 : index
    %721 = vector.load %arg9[%c0_546, %c0_547, %c0_548, %c0_549] : memref<4x4x3x16xbf16, #tpu.memory_space<vmem>>, vector<1x1x3x16xbf16>
    %722 = vector.shape_cast %721 : vector<1x1x3x16xbf16> to vector<3x16xbf16>
    %cst_550 = arith.constant dense<0.000000e+00> : vector<3x64xf32>
    %723 = tpu.matmul %722, %498, %cst_550 {dimension_numbers = #tpu.dot_dimension_numbers<[1], [0], [0], [1], [0, 0, 1, 1], [], []>} : vector<3x16xbf16>, vector<16x64xbf16>, vector<3x64xf32> -> vector<3x64xf32>
    %724 = arith.addf %568, %723 : vector<3x64xf32>
    %c0_551 = arith.constant 0 : index
    %c1_552 = arith.constant 1 : index
    %c0_553 = arith.constant 0 : index
    %c0_554 = arith.constant 0 : index
    %725 = vector.load %arg9[%c0_551, %c1_552, %c0_553, %c0_554] : memref<4x4x3x16xbf16, #tpu.memory_space<vmem>>, vector<1x1x3x16xbf16>
    %726 = vector.shape_cast %725 : vector<1x1x3x16xbf16> to vector<3x16xbf16>
    %cst_555 = arith.constant dense<0.000000e+00> : vector<3x64xf32>
    %727 = tpu.matmul %726, %466, %cst_555 {dimension_numbers = #tpu.dot_dimension_numbers<[1], [0], [0], [1], [0, 0, 1, 1], [], []>} : vector<3x16xbf16>, vector<16x64xbf16>, vector<3x64xf32> -> vector<3x64xf32>
    %728 = arith.addf %724, %727 : vector<3x64xf32>
    %c0_556 = arith.constant 0 : index
    %c2_557 = arith.constant 2 : index
    %c0_558 = arith.constant 0 : index
    %c0_559 = arith.constant 0 : index
    %729 = vector.load %arg9[%c0_556, %c2_557, %c0_558, %c0_559] : memref<4x4x3x16xbf16, #tpu.memory_space<vmem>>, vector<1x1x3x16xbf16>
    %730 = vector.shape_cast %729 : vector<1x1x3x16xbf16> to vector<3x16xbf16>
    %cst_560 = arith.constant dense<0.000000e+00> : vector<3x64xf32>
    %731 = tpu.matmul %730, %564, %cst_560 {dimension_numbers = #tpu.dot_dimension_numbers<[1], [0], [0], [1], [0, 0, 1, 1], [], []>} : vector<3x16xbf16>, vector<16x64xbf16>, vector<3x64xf32> -> vector<3x64xf32>
    %732 = arith.addf %728, %731 : vector<3x64xf32>
    %c0_561 = arith.constant 0 : index
    %c3_562 = arith.constant 3 : index
    %c0_563 = arith.constant 0 : index
    %c0_564 = arith.constant 0 : index
    %733 = vector.load %arg9[%c0_561, %c3_562, %c0_563, %c0_564] : memref<4x4x3x16xbf16, #tpu.memory_space<vmem>>, vector<1x1x3x16xbf16>
    %734 = vector.shape_cast %733 : vector<1x1x3x16xbf16> to vector<3x16xbf16>
    %cst_565 = arith.constant dense<0.000000e+00> : vector<3x64xf32>
    %735 = tpu.matmul %734, %532, %cst_565 {dimension_numbers = #tpu.dot_dimension_numbers<[1], [0], [0], [1], [0, 0, 1, 1], [], []>} : vector<3x16xbf16>, vector<16x64xbf16>, vector<3x64xf32> -> vector<3x64xf32>
    %736 = arith.addf %732, %735 : vector<3x64xf32>
    %c0_566 = arith.constant 0 : index
    %c8_567 = arith.constant 8 : index
    %c0_568 = arith.constant 0 : index
    %c0_569 = arith.constant 0 : index
    %737 = vector.load %arg11[%c0_566, %c8_567, %c0_568, %c0_569] : memref<1x16x3x64xf32, #tpu.memory_space<vmem>>, vector<1x1x3x64xf32>
    %738 = vector.shape_cast %737 : vector<1x1x3x64xf32> to vector<3x64xf32>
    %739 = vector.shape_cast %736 : vector<3x64xf32> to vector<1x1x3x64xf32>
    tpu.vector_store %arg11[%c0_566, %c8_567, %c0_568, %c0_569], %739 {strides = array<i32>} : memref<1x16x3x64xf32, #tpu.memory_space<vmem>>, vector<1x1x3x64xf32>,
    %c1_570 = arith.constant 1 : index
    %c0_571 = arith.constant 0 : index
    %c0_572 = arith.constant 0 : index
    %c0_573 = arith.constant 0 : index
    %740 = vector.load %arg9[%c1_570, %c0_571, %c0_572, %c0_573] : memref<4x4x3x16xbf16, #tpu.memory_space<vmem>>, vector<1x1x3x16xbf16>
    %741 = vector.shape_cast %740 : vector<1x1x3x16xbf16> to vector<3x16xbf16>
    %cst_574 = arith.constant dense<0.000000e+00> : vector<3x64xf32>
    %742 = tpu.matmul %741, %466, %cst_574 {dimension_numbers = #tpu.dot_dimension_numbers<[1], [0], [0], [1], [0, 0, 1, 1], [], []>} : vector<3x16xbf16>, vector<16x64xbf16>, vector<3x64xf32> -> vector<3x64xf32>
    %743 = arith.addf %568, %742 : vector<3x64xf32>
    %c1_575 = arith.constant 1 : index
    %c1_576 = arith.constant 1 : index
    %c0_577 = arith.constant 0 : index
    %c0_578 = arith.constant 0 : index
    %744 = vector.load %arg9[%c1_575, %c1_576, %c0_577, %c0_578] : memref<4x4x3x16xbf16, #tpu.memory_space<vmem>>, vector<1x1x3x16xbf16>
    %745 = vector.shape_cast %744 : vector<1x1x3x16xbf16> to vector<3x16xbf16>
    %cst_579 = arith.constant dense<0.000000e+00> : vector<3x64xf32>
    %746 = tpu.matmul %745, %499, %cst_579 {dimension_numbers = #tpu.dot_dimension_numbers<[1], [0], [0], [1], [0, 0, 1, 1], [], []>} : vector<3x16xbf16>, vector<16x64xbf16>, vector<3x64xf32> -> vector<3x64xf32>
    %747 = arith.addf %743, %746 : vector<3x64xf32>
    %c1_580 = arith.constant 1 : index
    %c2_581 = arith.constant 2 : index
    %c0_582 = arith.constant 0 : index
    %c0_583 = arith.constant 0 : index
    %748 = vector.load %arg9[%c1_580, %c2_581, %c0_582, %c0_583] : memref<4x4x3x16xbf16, #tpu.memory_space<vmem>>, vector<1x1x3x16xbf16>
    %749 = vector.shape_cast %748 : vector<1x1x3x16xbf16> to vector<3x16xbf16>
    %cst_584 = arith.constant dense<0.000000e+00> : vector<3x64xf32>
    %750 = tpu.matmul %749, %532, %cst_584 {dimension_numbers = #tpu.dot_dimension_numbers<[1], [0], [0], [1], [0, 0, 1, 1], [], []>} : vector<3x16xbf16>, vector<16x64xbf16>, vector<3x64xf32> -> vector<3x64xf32>
    %751 = arith.addf %747, %750 : vector<3x64xf32>
    %c1_585 = arith.constant 1 : index
    %c3_586 = arith.constant 3 : index
    %c0_587 = arith.constant 0 : index
    %c0_588 = arith.constant 0 : index
    %752 = vector.load %arg9[%c1_585, %c3_586, %c0_587, %c0_588] : memref<4x4x3x16xbf16, #tpu.memory_space<vmem>>, vector<1x1x3x16xbf16>
    %753 = vector.shape_cast %752 : vector<1x1x3x16xbf16> to vector<3x16xbf16>
    %cst_589 = arith.constant dense<0.000000e+00> : vector<3x64xf32>
    %754 = tpu.matmul %753, %565, %cst_589 {dimension_numbers = #tpu.dot_dimension_numbers<[1], [0], [0], [1], [0, 0, 1, 1], [], []>} : vector<3x16xbf16>, vector<16x64xbf16>, vector<3x64xf32> -> vector<3x64xf32>
    %755 = arith.addf %751, %754 : vector<3x64xf32>
    %c0_590 = arith.constant 0 : index
    %c9 = arith.constant 9 : index
    %c0_591 = arith.constant 0 : index
    %c0_592 = arith.constant 0 : index
    %756 = vector.load %arg11[%c0_590, %c9, %c0_591, %c0_592] : memref<1x16x3x64xf32, #tpu.memory_space<vmem>>, vector<1x1x3x64xf32>
    %757 = vector.shape_cast %756 : vector<1x1x3x64xf32> to vector<3x64xf32>
    %758 = vector.shape_cast %755 : vector<3x64xf32> to vector<1x1x3x64xf32>
    tpu.vector_store %arg11[%c0_590, %c9, %c0_591, %c0_592], %758 {strides = array<i32>} : memref<1x16x3x64xf32, #tpu.memory_space<vmem>>, vector<1x1x3x64xf32>,
    %c0_593 = arith.constant 0 : index
    %c0_594 = arith.constant 0 : index
    %c0_595 = arith.constant 0 : index
    %c0_596 = arith.constant 0 : index
    %759 = vector.load %arg9[%c0_593, %c0_594, %c0_595, %c0_596] : memref<4x4x3x16xbf16, #tpu.memory_space<vmem>>, vector<1x1x3x16xbf16>
    %760 = vector.shape_cast %759 : vector<1x1x3x16xbf16> to vector<3x16xbf16>
    %cst_597 = arith.constant dense<0.000000e+00> : vector<3x64xf32>
    %761 = tpu.matmul %760, %466, %cst_597 {dimension_numbers = #tpu.dot_dimension_numbers<[1], [0], [0], [1], [0, 0, 1, 1], [], []>} : vector<3x16xbf16>, vector<16x64xbf16>, vector<3x64xf32> -> vector<3x64xf32>
    %762 = arith.addf %568, %761 : vector<3x64xf32>
    %c0_598 = arith.constant 0 : index
    %c1_599 = arith.constant 1 : index
    %c0_600 = arith.constant 0 : index
    %c0_601 = arith.constant 0 : index
    %763 = vector.load %arg9[%c0_598, %c1_599, %c0_600, %c0_601] : memref<4x4x3x16xbf16, #tpu.memory_space<vmem>>, vector<1x1x3x16xbf16>
    %764 = vector.shape_cast %763 : vector<1x1x3x16xbf16> to vector<3x16xbf16>
    %cst_602 = arith.constant dense<0.000000e+00> : vector<3x64xf32>
    %765 = tpu.matmul %764, %499, %cst_602 {dimension_numbers = #tpu.dot_dimension_numbers<[1], [0], [0], [1], [0, 0, 1, 1], [], []>} : vector<3x16xbf16>, vector<16x64xbf16>, vector<3x64xf32> -> vector<3x64xf32>
    %766 = arith.addf %762, %765 : vector<3x64xf32>
    %c0_603 = arith.constant 0 : index
    %c2_604 = arith.constant 2 : index
    %c0_605 = arith.constant 0 : index
    %c0_606 = arith.constant 0 : index
    %767 = vector.load %arg9[%c0_603, %c2_604, %c0_605, %c0_606] : memref<4x4x3x16xbf16, #tpu.memory_space<vmem>>, vector<1x1x3x16xbf16>
    %768 = vector.shape_cast %767 : vector<1x1x3x16xbf16> to vector<3x16xbf16>
    %cst_607 = arith.constant dense<0.000000e+00> : vector<3x64xf32>
    %769 = tpu.matmul %768, %532, %cst_607 {dimension_numbers = #tpu.dot_dimension_numbers<[1], [0], [0], [1], [0, 0, 1, 1], [], []>} : vector<3x16xbf16>, vector<16x64xbf16>, vector<3x64xf32> -> vector<3x64xf32>
    %770 = arith.addf %766, %769 : vector<3x64xf32>
    %c0_608 = arith.constant 0 : index
    %c3_609 = arith.constant 3 : index
    %c0_610 = arith.constant 0 : index
    %c0_611 = arith.constant 0 : index
    %771 = vector.load %arg9[%c0_608, %c3_609, %c0_610, %c0_611] : memref<4x4x3x16xbf16, #tpu.memory_space<vmem>>, vector<1x1x3x16xbf16>
    %772 = vector.shape_cast %771 : vector<1x1x3x16xbf16> to vector<3x16xbf16>
    %cst_612 = arith.constant dense<0.000000e+00> : vector<3x64xf32>
    %773 = tpu.matmul %772, %565, %cst_612 {dimension_numbers = #tpu.dot_dimension_numbers<[1], [0], [0], [1], [0, 0, 1, 1], [], []>} : vector<3x16xbf16>, vector<16x64xbf16>, vector<3x64xf32> -> vector<3x64xf32>
    %774 = arith.addf %770, %773 : vector<3x64xf32>
    %c0_613 = arith.constant 0 : index
    %c10 = arith.constant 10 : index
    %c0_614 = arith.constant 0 : index
    %c0_615 = arith.constant 0 : index
    %775 = vector.load %arg11[%c0_613, %c10, %c0_614, %c0_615] : memref<1x16x3x64xf32, #tpu.memory_space<vmem>>, vector<1x1x3x64xf32>
    %776 = vector.shape_cast %775 : vector<1x1x3x64xf32> to vector<3x64xf32>
    %777 = vector.shape_cast %774 : vector<3x64xf32> to vector<1x1x3x64xf32>
    tpu.vector_store %arg11[%c0_613, %c10, %c0_614, %c0_615], %777 {strides = array<i32>} : memref<1x16x3x64xf32, #tpu.memory_space<vmem>>, vector<1x1x3x64xf32>,
    %c1_616 = arith.constant 1 : index
    %c0_617 = arith.constant 0 : index
    %c0_618 = arith.constant 0 : index
    %c0_619 = arith.constant 0 : index
    %778 = vector.load %arg9[%c1_616, %c0_617, %c0_618, %c0_619] : memref<4x4x3x16xbf16, #tpu.memory_space<vmem>>, vector<1x1x3x16xbf16>
    %779 = vector.shape_cast %778 : vector<1x1x3x16xbf16> to vector<3x16xbf16>
    %cst_620 = arith.constant dense<0.000000e+00> : vector<3x64xf32>
    %780 = tpu.matmul %779, %499, %cst_620 {dimension_numbers = #tpu.dot_dimension_numbers<[1], [0], [0], [1], [0, 0, 1, 1], [], []>} : vector<3x16xbf16>, vector<16x64xbf16>, vector<3x64xf32> -> vector<3x64xf32>
    %781 = arith.addf %568, %780 : vector<3x64xf32>
    %c1_621 = arith.constant 1 : index
    %c1_622 = arith.constant 1 : index
    %c0_623 = arith.constant 0 : index
    %c0_624 = arith.constant 0 : index
    %782 = vector.load %arg9[%c1_621, %c1_622, %c0_623, %c0_624] : memref<4x4x3x16xbf16, #tpu.memory_space<vmem>>, vector<1x1x3x16xbf16>
    %783 = vector.shape_cast %782 : vector<1x1x3x16xbf16> to vector<3x16xbf16>
    %cst_625 = arith.constant dense<0.000000e+00> : vector<3x64xf32>
    %784 = tpu.matmul %783, %474, %cst_625 {dimension_numbers = #tpu.dot_dimension_numbers<[1], [0], [0], [1], [0, 0, 1, 1], [], []>} : vector<3x16xbf16>, vector<16x64xbf16>, vector<3x64xf32> -> vector<3x64xf32>
    %785 = arith.addf %781, %784 : vector<3x64xf32>
    %c1_626 = arith.constant 1 : index
    %c2_627 = arith.constant 2 : index
    %c0_628 = arith.constant 0 : index
    %c0_629 = arith.constant 0 : index
    %786 = vector.load %arg9[%c1_626, %c2_627, %c0_628, %c0_629] : memref<4x4x3x16xbf16, #tpu.memory_space<vmem>>, vector<1x1x3x16xbf16>
    %787 = vector.shape_cast %786 : vector<1x1x3x16xbf16> to vector<3x16xbf16>
    %cst_630 = arith.constant dense<0.000000e+00> : vector<3x64xf32>
    %788 = tpu.matmul %787, %565, %cst_630 {dimension_numbers = #tpu.dot_dimension_numbers<[1], [0], [0], [1], [0, 0, 1, 1], [], []>} : vector<3x16xbf16>, vector<16x64xbf16>, vector<3x64xf32> -> vector<3x64xf32>
    %789 = arith.addf %785, %788 : vector<3x64xf32>
    %c1_631 = arith.constant 1 : index
    %c3_632 = arith.constant 3 : index
    %c0_633 = arith.constant 0 : index
    %c0_634 = arith.constant 0 : index
    %790 = vector.load %arg9[%c1_631, %c3_632, %c0_633, %c0_634] : memref<4x4x3x16xbf16, #tpu.memory_space<vmem>>, vector<1x1x3x16xbf16>
    %791 = vector.shape_cast %790 : vector<1x1x3x16xbf16> to vector<3x16xbf16>
    %cst_635 = arith.constant dense<0.000000e+00> : vector<3x64xf32>
    %792 = tpu.matmul %791, %540, %cst_635 {dimension_numbers = #tpu.dot_dimension_numbers<[1], [0], [0], [1], [0, 0, 1, 1], [], []>} : vector<3x16xbf16>, vector<16x64xbf16>, vector<3x64xf32> -> vector<3x64xf32>
    %793 = arith.addf %789, %792 : vector<3x64xf32>
    %c0_636 = arith.constant 0 : index
    %c11 = arith.constant 11 : index
    %c0_637 = arith.constant 0 : index
    %c0_638 = arith.constant 0 : index
    %794 = vector.load %arg11[%c0_636, %c11, %c0_637, %c0_638] : memref<1x16x3x64xf32, #tpu.memory_space<vmem>>, vector<1x1x3x64xf32>
    %795 = vector.shape_cast %794 : vector<1x1x3x64xf32> to vector<3x64xf32>
    %796 = vector.shape_cast %793 : vector<3x64xf32> to vector<1x1x3x64xf32>
    tpu.vector_store %arg11[%c0_636, %c11, %c0_637, %c0_638], %796 {strides = array<i32>} : memref<1x16x3x64xf32, #tpu.memory_space<vmem>>, vector<1x1x3x64xf32>,
    %c2_639 = arith.constant 2 : index
    %c0_640 = arith.constant 0 : index
    %c0_641 = arith.constant 0 : index
    %c0_642 = arith.constant 0 : index
    %797 = vector.load %arg9[%c2_639, %c0_640, %c0_641, %c0_642] : memref<4x4x3x16xbf16, #tpu.memory_space<vmem>>, vector<1x1x3x16xbf16>
    %798 = vector.shape_cast %797 : vector<1x1x3x16xbf16> to vector<3x16xbf16>
    %cst_643 = arith.constant dense<0.000000e+00> : vector<3x64xf32>
    %799 = tpu.matmul %798, %564, %cst_643 {dimension_numbers = #tpu.dot_dimension_numbers<[1], [0], [0], [1], [0, 0, 1, 1], [], []>} : vector<3x16xbf16>, vector<16x64xbf16>, vector<3x64xf32> -> vector<3x64xf32>
    %800 = arith.addf %568, %799 : vector<3x64xf32>
    %c2_644 = arith.constant 2 : index
    %c1_645 = arith.constant 1 : index
    %c0_646 = arith.constant 0 : index
    %c0_647 = arith.constant 0 : index
    %801 = vector.load %arg9[%c2_644, %c1_645, %c0_646, %c0_647] : memref<4x4x3x16xbf16, #tpu.memory_space<vmem>>, vector<1x1x3x16xbf16>
    %802 = vector.shape_cast %801 : vector<1x1x3x16xbf16> to vector<3x16xbf16>
    %cst_648 = arith.constant dense<0.000000e+00> : vector<3x64xf32>
    %803 = tpu.matmul %802, %532, %cst_648 {dimension_numbers = #tpu.dot_dimension_numbers<[1], [0], [0], [1], [0, 0, 1, 1], [], []>} : vector<3x16xbf16>, vector<16x64xbf16>, vector<3x64xf32> -> vector<3x64xf32>
    %804 = arith.addf %800, %803 : vector<3x64xf32>
    %c2_649 = arith.constant 2 : index
    %c2_650 = arith.constant 2 : index
    %c0_651 = arith.constant 0 : index
    %c0_652 = arith.constant 0 : index
    %805 = vector.load %arg9[%c2_649, %c2_650, %c0_651, %c0_652] : memref<4x4x3x16xbf16, #tpu.memory_space<vmem>>, vector<1x1x3x16xbf16>
    %806 = vector.shape_cast %805 : vector<1x1x3x16xbf16> to vector<3x16xbf16>
    %cst_653 = arith.constant dense<0.000000e+00> : vector<3x64xf32>
    %807 = tpu.matmul %806, %507, %cst_653 {dimension_numbers = #tpu.dot_dimension_numbers<[1], [0], [0], [1], [0, 0, 1, 1], [], []>} : vector<3x16xbf16>, vector<16x64xbf16>, vector<3x64xf32> -> vector<3x64xf32>
    %808 = arith.addf %804, %807 : vector<3x64xf32>
    %c2_654 = arith.constant 2 : index
    %c3_655 = arith.constant 3 : index
    %c0_656 = arith.constant 0 : index
    %c0_657 = arith.constant 0 : index
    %809 = vector.load %arg9[%c2_654, %c3_655, %c0_656, %c0_657] : memref<4x4x3x16xbf16, #tpu.memory_space<vmem>>, vector<1x1x3x16xbf16>
    %810 = vector.shape_cast %809 : vector<1x1x3x16xbf16> to vector<3x16xbf16>
    %cst_658 = arith.constant dense<0.000000e+00> : vector<3x64xf32>
    %811 = tpu.matmul %810, %482, %cst_658 {dimension_numbers = #tpu.dot_dimension_numbers<[1], [0], [0], [1], [0, 0, 1, 1], [], []>} : vector<3x16xbf16>, vector<16x64xbf16>, vector<3x64xf32> -> vector<3x64xf32>
    %812 = arith.addf %808, %811 : vector<3x64xf32>
    %c0_659 = arith.constant 0 : index
    %c12 = arith.constant 12 : index
    %c0_660 = arith.constant 0 : index
    %c0_661 = arith.constant 0 : index
    %813 = vector.load %arg11[%c0_659, %c12, %c0_660, %c0_661] : memref<1x16x3x64xf32, #tpu.memory_space<vmem>>, vector<1x1x3x64xf32>
    %814 = vector.shape_cast %813 : vector<1x1x3x64xf32> to vector<3x64xf32>
    %815 = vector.shape_cast %812 : vector<3x64xf32> to vector<1x1x3x64xf32>
    tpu.vector_store %arg11[%c0_659, %c12, %c0_660, %c0_661], %815 {strides = array<i32>} : memref<1x16x3x64xf32, #tpu.memory_space<vmem>>, vector<1x1x3x64xf32>,
    %c3_662 = arith.constant 3 : index
    %c0_663 = arith.constant 0 : index
    %c0_664 = arith.constant 0 : index
    %c0_665 = arith.constant 0 : index
    %816 = vector.load %arg9[%c3_662, %c0_663, %c0_664, %c0_665] : memref<4x4x3x16xbf16, #tpu.memory_space<vmem>>, vector<1x1x3x16xbf16>
    %817 = vector.shape_cast %816 : vector<1x1x3x16xbf16> to vector<3x16xbf16>
    %cst_666 = arith.constant dense<0.000000e+00> : vector<3x64xf32>
    %818 = tpu.matmul %817, %532, %cst_666 {dimension_numbers = #tpu.dot_dimension_numbers<[1], [0], [0], [1], [0, 0, 1, 1], [], []>} : vector<3x16xbf16>, vector<16x64xbf16>, vector<3x64xf32> -> vector<3x64xf32>
    %819 = arith.addf %568, %818 : vector<3x64xf32>
    %c3_667 = arith.constant 3 : index
    %c1_668 = arith.constant 1 : index
    %c0_669 = arith.constant 0 : index
    %c0_670 = arith.constant 0 : index
    %820 = vector.load %arg9[%c3_667, %c1_668, %c0_669, %c0_670] : memref<4x4x3x16xbf16, #tpu.memory_space<vmem>>, vector<1x1x3x16xbf16>
    %821 = vector.shape_cast %820 : vector<1x1x3x16xbf16> to vector<3x16xbf16>
    %cst_671 = arith.constant dense<0.000000e+00> : vector<3x64xf32>
    %822 = tpu.matmul %821, %565, %cst_671 {dimension_numbers = #tpu.dot_dimension_numbers<[1], [0], [0], [1], [0, 0, 1, 1], [], []>} : vector<3x16xbf16>, vector<16x64xbf16>, vector<3x64xf32> -> vector<3x64xf32>
    %823 = arith.addf %819, %822 : vector<3x64xf32>
    %c3_672 = arith.constant 3 : index
    %c2_673 = arith.constant 2 : index
    %c0_674 = arith.constant 0 : index
    %c0_675 = arith.constant 0 : index
    %824 = vector.load %arg9[%c3_672, %c2_673, %c0_674, %c0_675] : memref<4x4x3x16xbf16, #tpu.memory_space<vmem>>, vector<1x1x3x16xbf16>
    %825 = vector.shape_cast %824 : vector<1x1x3x16xbf16> to vector<3x16xbf16>
    %cst_676 = arith.constant dense<0.000000e+00> : vector<3x64xf32>
    %826 = tpu.matmul %825, %482, %cst_676 {dimension_numbers = #tpu.dot_dimension_numbers<[1], [0], [0], [1], [0, 0, 1, 1], [], []>} : vector<3x16xbf16>, vector<16x64xbf16>, vector<3x64xf32> -> vector<3x64xf32>
    %827 = arith.addf %823, %826 : vector<3x64xf32>
    %c3_677 = arith.constant 3 : index
    %c3_678 = arith.constant 3 : index
    %c0_679 = arith.constant 0 : index
    %c0_680 = arith.constant 0 : index
    %828 = vector.load %arg9[%c3_677, %c3_678, %c0_679, %c0_680] : memref<4x4x3x16xbf16, #tpu.memory_space<vmem>>, vector<1x1x3x16xbf16>
    %829 = vector.shape_cast %828 : vector<1x1x3x16xbf16> to vector<3x16xbf16>
    %cst_681 = arith.constant dense<0.000000e+00> : vector<3x64xf32>
    %830 = tpu.matmul %829, %515, %cst_681 {dimension_numbers = #tpu.dot_dimension_numbers<[1], [0], [0], [1], [0, 0, 1, 1], [], []>} : vector<3x16xbf16>, vector<16x64xbf16>, vector<3x64xf32> -> vector<3x64xf32>
    %831 = arith.addf %827, %830 : vector<3x64xf32>
    %c0_682 = arith.constant 0 : index
    %c13 = arith.constant 13 : index
    %c0_683 = arith.constant 0 : index
    %c0_684 = arith.constant 0 : index
    %832 = vector.load %arg11[%c0_682, %c13, %c0_683, %c0_684] : memref<1x16x3x64xf32, #tpu.memory_space<vmem>>, vector<1x1x3x64xf32>
    %833 = vector.shape_cast %832 : vector<1x1x3x64xf32> to vector<3x64xf32>
    %834 = vector.shape_cast %831 : vector<3x64xf32> to vector<1x1x3x64xf32>
    tpu.vector_store %arg11[%c0_682, %c13, %c0_683, %c0_684], %834 {strides = array<i32>} : memref<1x16x3x64xf32, #tpu.memory_space<vmem>>, vector<1x1x3x64xf32>,
    %c2_685 = arith.constant 2 : index
    %c0_686 = arith.constant 0 : index
    %c0_687 = arith.constant 0 : index
    %c0_688 = arith.constant 0 : index
    %835 = vector.load %arg9[%c2_685, %c0_686, %c0_687, %c0_688] : memref<4x4x3x16xbf16, #tpu.memory_space<vmem>>, vector<1x1x3x16xbf16>
    %836 = vector.shape_cast %835 : vector<1x1x3x16xbf16> to vector<3x16xbf16>
    %cst_689 = arith.constant dense<0.000000e+00> : vector<3x64xf32>
    %837 = tpu.matmul %836, %532, %cst_689 {dimension_numbers = #tpu.dot_dimension_numbers<[1], [0], [0], [1], [0, 0, 1, 1], [], []>} : vector<3x16xbf16>, vector<16x64xbf16>, vector<3x64xf32> -> vector<3x64xf32>
    %838 = arith.addf %568, %837 : vector<3x64xf32>
    %c2_690 = arith.constant 2 : index
    %c1_691 = arith.constant 1 : index
    %c0_692 = arith.constant 0 : index
    %c0_693 = arith.constant 0 : index
    %839 = vector.load %arg9[%c2_690, %c1_691, %c0_692, %c0_693] : memref<4x4x3x16xbf16, #tpu.memory_space<vmem>>, vector<1x1x3x16xbf16>
    %840 = vector.shape_cast %839 : vector<1x1x3x16xbf16> to vector<3x16xbf16>
    %cst_694 = arith.constant dense<0.000000e+00> : vector<3x64xf32>
    %841 = tpu.matmul %840, %565, %cst_694 {dimension_numbers = #tpu.dot_dimension_numbers<[1], [0], [0], [1], [0, 0, 1, 1], [], []>} : vector<3x16xbf16>, vector<16x64xbf16>, vector<3x64xf32> -> vector<3x64xf32>
    %842 = arith.addf %838, %841 : vector<3x64xf32>
    %c2_695 = arith.constant 2 : index
    %c2_696 = arith.constant 2 : index
    %c0_697 = arith.constant 0 : index
    %c0_698 = arith.constant 0 : index
    %843 = vector.load %arg9[%c2_695, %c2_696, %c0_697, %c0_698] : memref<4x4x3x16xbf16, #tpu.memory_space<vmem>>, vector<1x1x3x16xbf16>
    %844 = vector.shape_cast %843 : vector<1x1x3x16xbf16> to vector<3x16xbf16>
    %cst_699 = arith.constant dense<0.000000e+00> : vector<3x64xf32>
    %845 = tpu.matmul %844, %482, %cst_699 {dimension_numbers = #tpu.dot_dimension_numbers<[1], [0], [0], [1], [0, 0, 1, 1], [], []>} : vector<3x16xbf16>, vector<16x64xbf16>, vector<3x64xf32> -> vector<3x64xf32>
    %846 = arith.addf %842, %845 : vector<3x64xf32>
    %c2_700 = arith.constant 2 : index
    %c3_701 = arith.constant 3 : index
    %c0_702 = arith.constant 0 : index
    %c0_703 = arith.constant 0 : index
    %847 = vector.load %arg9[%c2_700, %c3_701, %c0_702, %c0_703] : memref<4x4x3x16xbf16, #tpu.memory_space<vmem>>, vector<1x1x3x16xbf16>
    %848 = vector.shape_cast %847 : vector<1x1x3x16xbf16> to vector<3x16xbf16>
    %cst_704 = arith.constant dense<0.000000e+00> : vector<3x64xf32>
    %849 = tpu.matmul %848, %515, %cst_704 {dimension_numbers = #tpu.dot_dimension_numbers<[1], [0], [0], [1], [0, 0, 1, 1], [], []>} : vector<3x16xbf16>, vector<16x64xbf16>, vector<3x64xf32> -> vector<3x64xf32>
    %850 = arith.addf %846, %849 : vector<3x64xf32>
    %c0_705 = arith.constant 0 : index
    %c14 = arith.constant 14 : index
    %c0_706 = arith.constant 0 : index
    %c0_707 = arith.constant 0 : index
    %851 = vector.load %arg11[%c0_705, %c14, %c0_706, %c0_707] : memref<1x16x3x64xf32, #tpu.memory_space<vmem>>, vector<1x1x3x64xf32>
    %852 = vector.shape_cast %851 : vector<1x1x3x64xf32> to vector<3x64xf32>
    %853 = vector.shape_cast %850 : vector<3x64xf32> to vector<1x1x3x64xf32>
    tpu.vector_store %arg11[%c0_705, %c14, %c0_706, %c0_707], %853 {strides = array<i32>} : memref<1x16x3x64xf32, #tpu.memory_space<vmem>>, vector<1x1x3x64xf32>,
    %c3_708 = arith.constant 3 : index
    %c0_709 = arith.constant 0 : index
    %c0_710 = arith.constant 0 : index
    %c0_711 = arith.constant 0 : index
    %854 = vector.load %arg9[%c3_708, %c0_709, %c0_710, %c0_711] : memref<4x4x3x16xbf16, #tpu.memory_space<vmem>>, vector<1x1x3x16xbf16>
    %855 = vector.shape_cast %854 : vector<1x1x3x16xbf16> to vector<3x16xbf16>
    %cst_712 = arith.constant dense<0.000000e+00> : vector<3x64xf32>
    %856 = tpu.matmul %855, %565, %cst_712 {dimension_numbers = #tpu.dot_dimension_numbers<[1], [0], [0], [1], [0, 0, 1, 1], [], []>} : vector<3x16xbf16>, vector<16x64xbf16>, vector<3x64xf32> -> vector<3x64xf32>
    %857 = arith.addf %568, %856 : vector<3x64xf32>
    %c3_713 = arith.constant 3 : index
    %c1_714 = arith.constant 1 : index
    %c0_715 = arith.constant 0 : index
    %c0_716 = arith.constant 0 : index
    %858 = vector.load %arg9[%c3_713, %c1_714, %c0_715, %c0_716] : memref<4x4x3x16xbf16, #tpu.memory_space<vmem>>, vector<1x1x3x16xbf16>
    %859 = vector.shape_cast %858 : vector<1x1x3x16xbf16> to vector<3x16xbf16>
    %cst_717 = arith.constant dense<0.000000e+00> : vector<3x64xf32>
    %860 = tpu.matmul %859, %540, %cst_717 {dimension_numbers = #tpu.dot_dimension_numbers<[1], [0], [0], [1], [0, 0, 1, 1], [], []>} : vector<3x16xbf16>, vector<16x64xbf16>, vector<3x64xf32> -> vector<3x64xf32>
    %861 = arith.addf %857, %860 : vector<3x64xf32>
    %c3_718 = arith.constant 3 : index
    %c2_719 = arith.constant 2 : index
    %c0_720 = arith.constant 0 : index
    %c0_721 = arith.constant 0 : index
    %862 = vector.load %arg9[%c3_718, %c2_719, %c0_720, %c0_721] : memref<4x4x3x16xbf16, #tpu.memory_space<vmem>>, vector<1x1x3x16xbf16>
    %863 = vector.shape_cast %862 : vector<1x1x3x16xbf16> to vector<3x16xbf16>
    %cst_722 = arith.constant dense<0.000000e+00> : vector<3x64xf32>
    %864 = tpu.matmul %863, %515, %cst_722 {dimension_numbers = #tpu.dot_dimension_numbers<[1], [0], [0], [1], [0, 0, 1, 1], [], []>} : vector<3x16xbf16>, vector<16x64xbf16>, vector<3x64xf32> -> vector<3x64xf32>
    %865 = arith.addf %861, %864 : vector<3x64xf32>
    %c3_723 = arith.constant 3 : index
    %c3_724 = arith.constant 3 : index
    %c0_725 = arith.constant 0 : index
    %c0_726 = arith.constant 0 : index
    %866 = vector.load %arg9[%c3_723, %c3_724, %c0_725, %c0_726] : memref<4x4x3x16xbf16, #tpu.memory_space<vmem>>, vector<1x1x3x16xbf16>
    %867 = vector.shape_cast %866 : vector<1x1x3x16xbf16> to vector<3x16xbf16>
    %cst_727 = arith.constant dense<0.000000e+00> : vector<3x64xf32>
    %868 = tpu.matmul %867, %490, %cst_727 {dimension_numbers = #tpu.dot_dimension_numbers<[1], [0], [0], [1], [0, 0, 1, 1], [], []>} : vector<3x16xbf16>, vector<16x64xbf16>, vector<3x64xf32> -> vector<3x64xf32>
    %869 = arith.addf %865, %868 : vector<3x64xf32>
    %c0_728 = arith.constant 0 : index
    %c15 = arith.constant 15 : index
    %c0_729 = arith.constant 0 : index
    %c0_730 = arith.constant 0 : index
    %870 = vector.load %arg11[%c0_728, %c15, %c0_729, %c0_730] : memref<1x16x3x64xf32, #tpu.memory_space<vmem>>, vector<1x1x3x64xf32>
    %871 = vector.shape_cast %870 : vector<1x1x3x64xf32> to vector<3x64xf32>
    %872 = vector.shape_cast %869 : vector<3x64xf32> to vector<1x1x3x64xf32>
    tpu.vector_store %arg11[%c0_728, %c15, %c0_729, %c0_730], %872 {strides = array<i32>} : memref<1x16x3x64xf32, #tpu.memory_space<vmem>>, vector<1x1x3x64xf32>,
    return
  }
  func.func @transform_0(%arg0: i32) -> (i32, i32, i32) {
    %c0_i32 = arith.constant 0 : i32
    %c0_i32_0 = arith.constant 0 : i32
    %c0_i32_1 = arith.constant 0 : i32
    %c0_i32_2 = arith.constant 0 : i32
    return %c0_i32, %c0_i32_0, %c0_i32_1 : i32, i32, i32
  }
  func.func @transform_1(%arg0: i32) -> (i32, i32, i32) {
    %c0_i32 = arith.constant 0 : i32
    %c0_i32_0 = arith.constant 0 : i32
    %c0_i32_1 = arith.constant 0 : i32
    return %arg0, %c0_i32, %c0_i32_0 : i32, i32, i32
  }
  func.func @transform_2(%arg0: i32) -> (i32, i32, i32) {
    %c0_i32 = arith.constant 0 : i32
    %c0_i32_0 = arith.constant 0 : i32
    %c0_i32_1 = arith.constant 0 : i32
    %c0_i32_2 = arith.constant 0 : i32
    return %c0_i32, %c0_i32_0, %c0_i32_1 : i32, i32, i32
  }
  func.func @transform_3(%arg0: i32) -> (i32, i32) {
    %c0_i32 = arith.constant 0 : i32
    %c0_i32_0 = arith.constant 0 : i32
    %c0_i32_1 = arith.constant 0 : i32
    return %c0_i32, %c0_i32_0 : i32, i32
  }
  func.func @transform_4(%arg0: i32) -> (i32, i32, i32, i32) {
    %c0_i32 = arith.constant 0 : i32
    %c0_i32_0 = arith.constant 0 : i32
    %c0_i32_1 = arith.constant 0 : i32
    %c0_i32_2 = arith.constant 0 : i32
    %c0_i32_3 = arith.constant 0 : i32
    return %c0_i32, %c0_i32_0, %c0_i32_1, %c0_i32_2 : i32, i32, i32, i32
  }
  func.func @transform_5(%arg0: i32) -> (i32, i32, i32) {
    %c0_i32 = arith.constant 0 : i32
    %c0_i32_0 = arith.constant 0 : i32
    %c0_i32_1 = arith.constant 0 : i32
    %c0_i32_2 = arith.constant 0 : i32
    return %c0_i32, %c0_i32_0, %c0_i32_1 : i32, i32, i32
  }
  func.func @transform_6(%arg0: i32) -> (i32, i32, i32, i32) {
    %c0_i32 = arith.constant 0 : i32
    %c0_i32_0 = arith.constant 0 : i32
    %c0_i32_1 = arith.constant 0 : i32
    %c0_i32_2 = arith.constant 0 : i32
    %c0_i32_3 = arith.constant 0 : i32
    return %c0_i32, %c0_i32_0, %c0_i32_1, %c0_i32_2 : i32, i32, i32, i32
  }
  func.func @transform_7(%arg0: i32) -> (i32, i32) {
    %c0_i32 = arith.constant 0 : i32
    %c0_i32_0 = arith.constant 0 : i32
    %c0_i32_1 = arith.constant 0 : i32
    return %c0_i32, %c0_i32_0 : i32, i32
  }
  func.func @transform_8(%arg0: i32) -> (i32, i32, i32, i32) {
    %c0_i32 = arith.constant 0 : i32
    %c0_i32_0 = arith.constant 0 : i32
    %c0_i32_1 = arith.constant 0 : i32
    %c0_i32_2 = arith.constant 0 : i32
    %c0_i32_3 = arith.constant 0 : i32
    return %c0_i32, %c0_i32_0, %c0_i32_1, %c0_i32_2 : i32, i32, i32, i32
  }
  func.func @transform_9(%arg0: i32) -> (i32, i32) {
    %c0_i32 = arith.constant 0 : i32
    %c0_i32_0 = arith.constant 0 : i32
    %c0_i32_1 = arith.constant 0 : i32
    return %c0_i32, %c0_i32_0 : i32, i32
  }
  func.func @transform_10(%arg0: i32) -> (i32, i32, i32, i32) {
    %c0_i32 = arith.constant 0 : i32
    %c0_i32_0 = arith.constant 0 : i32
    %c0_i32_1 = arith.constant 0 : i32
    %c0_i32_2 = arith.constant 0 : i32
    return %arg0, %c0_i32, %c0_i32_0, %c0_i32_1 : i32, i32, i32, i32
  }
}

</mosaic_0001>

<bundles_post_ra>
// kernel: decoder_forward.1
= control target key start
LH: loop header
LB: loop body
LE: loop exit
PB: predicated region body
PF: predicated region fallthrough
CT: control target
= control target key end

     0   :  { %s8827_s13 = smov 0   ;;  %s10988_s0 = inlined_call_operand.vmem [shape: f32[9,1,64], index: 0, kind: input, shape index: {}]   ;;  %s10989_s1 = inlined_call_operand.vmem [shape: f32[2,4,64], index: 1, kind: input, shape index: {}]   ;;  %s10990_s2 = inlined_call_operand.vmem [shape: bf16[9,32,4], index: 2, kind: input, shape index: {}]   ;;  %s10991_s3 = inlined_call_operand.vmem [shape: f32[32,1], index: 3, kind: input, shape index: {}]   ;;  %s10992_s4 = inlined_call_operand.vmem [shape: bf16[2,9,16,32], index: 4, kind: input, shape index: {}]   ;;  %s10993_s5 = inlined_call_operand.vmem [shape: bf16[2,32,16], index: 5, kind: input, shape index: {}]   ;;  %s10994_s6 = inlined_call_operand.vmem [shape: bf16[4,4,16,32], index: 6, kind: input, shape index: {}]   ;;  %s10995_s7 = inlined_call_operand.vmem [shape: f32[16,1], index: 7, kind: input, shape index: {}]   ;;  %s10996_s8 = inlined_call_operand.vmem [shape: bf16[4,4,3,16], index: 8, kind: input, shape index: {}]   ;;  %s10997_s9 = inlined_call_operand.vmem [shape: f32[3,1], index: 9, kind: input, shape index: {}]   ;;  %s10998_s10 = inlined_call_operand.vmem [shape: f32[2,16,3,64], index: 10, kind: output, shape index: {}]  }
   0x1 LB: > { %s7273_s14 = sadd.s32 4294967295, %s8751_s13   ;;  %p7277_p0 = scmp.ge.s32.totalorder %s8751_s13, 1  ;;  %s8751_s13 = sphi %s8827_s13, %s20_s13  }
   0x2   : > { %p311_p1 = scmp.lt.s32.totalorder %s8751_s13, 3 }
   0x4   : > { %p312_p2 = pnand %p7277_p0, %p311_p1 }
   0x5   : > { %p348_p3 = scmp.lt.s32.totalorder (!%p312_p2), %s7273_s14, 1  ;;  %s8753_s23 = smov (!%p312_p2), 72  }
   0x6   : > { %315 = sbr.rel (%p312_p2) target bundleno = 2709 (0xa95), region = 60  ;;  %s11025_s24 = smov (!%p312_p2), 73  }
   0x7   : > { %s8755_s25 = smov (!%p312_p2), 8   ;;  %s11023_s26 = smov (!%p312_p2), 9  }
   0x8   : > { %s11015_s27 = smov (!%p312_p2), 7   ;;  %s11017_s28 = smov (!%p312_p2), 71  }
   0x9   : > { %s11019_s29 = smov (!%p312_p2), 1   ;;  %s11021_s30 = smov (!%p312_p2), 65  }
   0xa   : > { %s11009_s11 = smov (!%p312_p2), 63   ;;  %s11013_s12 = smov (!%p312_p2), 127  }
   0xb   : > { %s11042_s14 = smov (!%p348_p3, %s7273_s14), 1  ;;  %v8673_v0 = vld [vmem:[%s10990_s2] sm:$0xff]   ;;  %v8674_v1 = vld [vmem:[%s10990_s2 + $0x10] sm:$0xff]   ;;  %vm542_vm0 = vcmask 31744   ;;  %s11001_s16 = smov 121   ;;  %v507_v3 = vld [vmem:[%s10991_s3 + $0x18] sm:$0xff] }
   0xc   : > { %s7278_s15 = sshll.u32 %s11042_s14, 2  ;;  %7915 = vmatprep.mubr.msk.bf16.mxu0 %vm542_vm0, %v8673_v0  ;;  %7921 = vmatprep.mubr.msk.bf16.mxu1 %vm542_vm0, %v8674_v1  ;;  %s11003_s17 = smov 56   ;;  %v506_v4 = vld [vmem:[%s10991_s3 + $0x10] sm:$0xff]  ;;  %v8769_v5 = vmov 0   ;;  %v504_v6 = vld [vmem:[%s10991_s3] sm:$0xff]  ;;  %v505_v7 = vld [vmem:[%s10991_s3 + $0x8] sm:$0xff] }
   0xd   : > { %s351_s22 = scalar_lea.vmem %s10989_s1, %s7278_s15  ;;  %s10999_s15 = smov 57   ;;  %8672 = vset.pattern.permute.xlu1 %v8769_v5  ;;  %8671 = vset.pattern.permute.xlu0 %v8769_v5  ;;  %vm383_vm1 = vcmask 64512   ;;  %vm366_vm2 = vcmask 72704   ;;  %v8898_v10 = vld [vmem:[%s10988_s0] ss:$0 sm:$0xff]  ;;  %vm401_vm3 = vcmask 56320  }
   0xe   : > { %v8847_v2 = vld [vmem:[%s351_s22] sm:$0xf]  ;;  %s11005_s18 = smov 120   ;;  %s11007_s19 = smov 55   ;;  %vm549_vm4 = vcmask 1041408   ;;  %vm419_vm5 = vcmask 7168  }
   0xf   : > { %377 = vrot.lane.b32.xlu1 %v8847_v2, %s8753_s23  ;;  %360 = vrot.lane.b32.xlu0 %v8847_v2, %s11025_s24  ;;  %s11011_s20 = smov 119   ;;  %v8903_v11 = vld [vmem:[%s10988_s0 + $0x1] ss:$0 sm:$0xff]  ;;  %v8912_v18 = vld [vmem:[%s10988_s0 + $0x2] ss:$0 sm:$0xff]  ;;  %v431_v36 = vpack.c.bf16 %v8847_v2, %v8847_v2  ;;  %vm438_vm6 = vcmask 515072  }
  0x10   : > { %v8675_v27 = vld [vmem:[%s10990_s2 + $0x8] sm:$0xff]   ;;  %v8676_v28 = vld [vmem:[%s10990_s2 + $0x18] sm:$0xff]   ;;  %v8929_v29 = vld [vmem:[%s10988_s0 + $0x3] ss:$0 sm:$0xff]  ;;  %vm456_vm7 = vcmask 465920   ;;  %vm474_vm8 = vcmask 457728  }
  0x11   : > { %v8677_v30 = vld [vmem:[%s10990_s2 + $0x20] sm:$0xff]   ;;  %v8678_v34 = vld [vmem:[%s10990_s2 + $0x30] sm:$0xff]   ;;  %v8679_v46 = vld [vmem:[%s10990_s2 + $0x28] sm:$0xff]   ;;  %v859_v52 = vsel %vm549_vm4, %v431_v36, 0  ;;  %vm492_vm9 = vcmask 449536   ;;  %s11029_s21 = smov 57  }
  0x12   : > { %v8948_v39 = vld [vmem:[%s10988_s0 + $0x5] ss:$0 sm:$0xff]  ;;  %v8680_v47 = vld [vmem:[%s10990_s2 + $0x38] sm:$0xff]   ;;  %v8966_v48 = vld [vmem:[%s10988_s0 + $0x6] ss:$0 sm:$0xff]  ;;  %vm8771_vm10 = vmmov 0  }
  0x13   : > { %380 = vrot.lane.b32.xlu1 %v8847_v2, %s8755_s25  ;;  %363 = vrot.lane.b32.xlu0 %v8847_v2, %s11023_s26  ;;  %v8681_v53 = vld [vmem:[%s10990_s2 + $0x40] sm:$0xff]   ;;  %v8682_v55 = vld [vmem:[%s10990_s2 + $0x50] sm:$0xff]   ;;  %vm1514_vm11 = vcmask 261120   ;;  %vm2003_vm12 = vcmask 130048   ;;  %s11036_s22 = smov 1   ;;  %vm4474_vm13 = vcmask 518144  }
  0x14   : > { %v8984_v58 = vld [vmem:[%s10988_s0 + $0x7] ss:$0 sm:$0xff]  ;;  %v8683_v0 = vld [vmem:[%s10990_s2 + $0x48] sm:$0xff]   ;;  %v8684_v1 = vld [vmem:[%s10990_s2 + $0x58] sm:$0xff]  }
  0x17   : > { %398 = vrot.lane.b32.xlu1 %v8847_v2, %s11015_s27  ;;  %395 = vrot.lane.b32.xlu0 %v8847_v2, %s11017_s28 }
  0x1b   : > { %416 = vrot.lane.b32.xlu1 %v8847_v2, %s11019_s29  ;;  %413 = vrot.lane.b32.xlu0 %v8847_v2, %s11021_s30 }
  0x1f   : > { %435 = vrot.lane.b32.xlu1 %v8847_v2, %s11009_s11  ;;  %432 = vrot.lane.b32.xlu0 %v8847_v2, %s11013_s12  ;;  %s11031_s11 = smov 56  }
  0x23   : > { %453 = vrot.lane.b32.xlu1 %v8847_v2, %s10999_s15  ;;  %450 = vrot.lane.b32.xlu0 %v8847_v2, %s11001_s16  ;;  %s11027_s15 = smov 63   ;;  %s11028_s16 = smov 121  }
  0x27   : > { %471 = vrot.lane.b32.xlu1 %v8847_v2, %s11003_s17  ;;  %468 = vrot.lane.b32.xlu0 %v8847_v2, %s11005_s18  ;;  %s11030_s17 = smov 120   ;;  %s11032_s18 = smov 55  }
  0x2b   : > { %489 = vrot.lane.b32.xlu1 %v8847_v2, %s11007_s19  ;;  %486 = vrot.lane.b32.xlu0 %v8847_v2, %s11011_s20  ;;  %v9000_v2 = vld [vmem:[%s10988_s0 + $0x8] ss:$0 sm:$0xff]  ;;  %s11035_s19 = smov 65  }
  0x2f   : > { %525 = vperm.xlu1 %8672, %v507_v3   ;;  %520 = vperm.xlu0 %8671, %v506_v4  }
  0x33   : > { %510 = vperm.xlu1 %8672, %v504_v6   ;;  %515 = vperm.xlu0 %8671, %v505_v7   ;;  %v8685_v7 = vld [vmem:[%s10990_s2 + $0x60] sm:$0xff]  }
  0x81   : > { %v378_v8 = vpop.permute.xlu1 %377  ;;  %v361_v9 = vpop.permute.xlu0 %360 }
  0x85   : > { %v381_v12 = vpop.permute.xlu1 %380  ;;  %v364_v13 = vpop.permute.xlu0 %363 }
  0x86   : > { %v384_v14 = vsel %vm383_vm1, %v378_v8, %v381_v12  ;;  %v367_v15 = vsel %vm366_vm2, %v361_v9, %v364_v13  ;;  %v8686_v9 = vld [vmem:[%s10990_s2 + $0x70] sm:$0xff]  }
  0x87   : > { %v375_v16 = vmul.f32 %v8898_v10, %v367_v15  ;;  %v393_v17 = vmul.f32 %v8903_v11, %v384_v14  ;;  %v8687_v15 = vld [vmem:[%s10990_s2 + $0x68] sm:$0xff]  }
  0x89   : > { %v399_v19 = vpop.permute.xlu1 %398  ;;  %v396_v20 = vpop.permute.xlu0 %395  ;;  %v376_v21 = vpack.c.bf16 %v375_v16, %v375_v16  ;;  %v394_v22 = vpack.c.bf16 %v393_v17, %v393_v17  ;;  %v8688_v16 = vld [vmem:[%s10990_s2 + $0x78] sm:$0xff]   ;;  %v8689_v17 = vld [vmem:[%s10990_s2 + $0x80] sm:$0xff]  }
  0x8a   : > { %v402_v23 = vsel %vm401_vm3, %v396_v20, %v399_v19  ;;  %v8690_v20 = vld [vmem:[%s10990_s2 + $0x88] sm:$0xff]  }
  0x8b   : > { %v411_v24 = vmul.f32 %v8912_v18, %v402_v23  ;;  %8635 = vmatprep.subr.msk.bf16.mxu0 %vm549_vm4, %v376_v21  ;;  %8636 = vmatprep.subr.msk.bf16.mxu1 %vm549_vm4, %v394_v22  ;;  %v551_v25 = vsel %vm549_vm4, %v376_v21, 0  ;;  %v628_v26 = vsel %vm549_vm4, %v394_v22, 0 }
  0x8c   : > { %7914 = vmatpush3.bf16.msra.mxu0 %v551_v25  ;;  %7920 = vmatpush3.bf16.msra.mxu1 %v628_v26 }
  0x8d   : > { %v412_v31 = vpack.c.bf16 %v411_v24, %v411_v24  ;;  %v417_v32 = vpop.permute.xlu1 %416  ;;  %v414_v33 = vpop.permute.xlu0 %413 }
  0x8e   : > { %v420_v35 = vsel %vm419_vm5, %v414_v33, %v417_v32 }
  0x8f   : > { %v429_v37 = vmul.f32 %v8929_v29, %v420_v35  ;;  %7916 = vmatmul.mubr.msk.bf16.vlgmr.msra.gmra.mxu0 %vm542_vm0, %v8675_v27  ;;  %7922 = vmatmul.mubr.msk.bf16.vlgmr.msra.gmra.mxu1 %vm542_vm0, %v8676_v28  ;;  %v705_v38 = vsel %vm549_vm4, %v412_v31, 0 }
  0x90   : > { %8637 = vmatprep.subr.msk.bf16.mxu0 %vm549_vm4, %v412_v31  ;;  %7927 = vmatprep.mubr.msk.bf16.mxu0 %vm542_vm0, %v8677_v30 }
  0x91   : > { %v430_v40 = vpack.c.bf16 %v429_v37, %v429_v37  ;;  %7926 = vmatpush3.bf16.msra.mxu0 %v705_v38  ;;  %v436_v41 = vpop.permute.xlu1 %435  ;;  %v433_v42 = vpop.permute.xlu0 %432  ;;  %7933 = vmatprep.mubr.msk.bf16.mxu1 %vm542_vm0, %v8678_v34 }
  0x92   : > { %v439_v43 = vsel %vm438_vm6, %v433_v42, %v436_v41  ;;  %8639 = vmatprep.subr.msk.bf16.mxu0 %vm549_vm4, %v431_v36 }
  0x93   : > { %8638 = vmatprep.subr.msk.bf16.mxu1 %vm549_vm4, %v430_v40  ;;  %v782_v44 = vsel %vm549_vm4, %v430_v40, 0  ;;  %v448_v45 = vmul.f32 %v8948_v39, %v439_v43 }
  0x94   : > { %7932 = vmatpush3.bf16.msra.mxu1 %v782_v44 }
  0x95   : > { %v449_v49 = vpack.c.bf16 %v448_v45, %v448_v45  ;;  %v454_v50 = vpop.permute.xlu1 %453  ;;  %v451_v51 = vpop.permute.xlu0 %450 }
  0x96   : > { %v457_v54 = vsel %vm456_vm7, %v451_v51, %v454_v50 }
  0x97   : > { %7928 = vmatmul.mubr.msk.bf16.vlgmr.msra.gmra.mxu0 %vm542_vm0, %v8679_v46  ;;  %7934 = vmatmul.mubr.msk.bf16.vlgmr.msra.gmra.mxu1 %vm542_vm0, %v8680_v47  ;;  %v466_v56 = vmul.f32 %v8966_v48, %v457_v54  ;;  %v936_v57 = vsel %vm549_vm4, %v449_v49, 0 }
  0x98   : > { %8640 = vmatprep.subr.msk.bf16.mxu1 %vm549_vm4, %v449_v49  ;;  %7938 = vmatpush3.bf16.msra.mxu0 %v859_v52 }
  0x99   : > { %v467_v59 = vpack.c.bf16 %v466_v56, %v466_v56  ;;  %7944 = vmatpush3.bf16.msra.mxu1 %v936_v57  ;;  %v472_v60 = vpop.permute.xlu1 %471  ;;  %v469_v61 = vpop.permute.xlu0 %468  ;;  %7939 = vmatprep.mubr.msk.bf16.mxu0 %vm542_vm0, %v8681_v53 }
  0x9a   : > { %v475_v62 = vsel %vm474_vm8, %v469_v61, %v472_v60  ;;  %7945 = vmatprep.mubr.msk.bf16.mxu1 %vm542_vm0, %v8682_v55 }
  0x9b   : > { %v484_v63 = vmul.f32 %v8984_v58, %v475_v62  ;;  %8641 = vmatprep.subr.msk.bf16.mxu0 %vm549_vm4, %v467_v59  ;;  %v1013_v4 = vsel %vm549_vm4, %v467_v59, 0 }
  0x9d   : > { %v485_v3 = vpack.c.bf16 %v484_v63, %v484_v63  ;;  %v490_v5 = vpop.permute.xlu1 %489  ;;  %v487_v6 = vpop.permute.xlu0 %486 }
  0x9e   : > { %v493_v8 = vsel %vm492_vm9, %v487_v6, %v490_v5 }
  0x9f   : > { %7940 = vmatmul.mubr.msk.bf16.vlgmr.msra.gmra.mxu0 %vm542_vm0, %v8683_v0  ;;  %7946 = vmatmul.mubr.msk.bf16.vlgmr.msra.gmra.mxu1 %vm542_vm0, %v8684_v1  ;;  %v1090_v12 = vsel %vm549_vm4, %v485_v3, 0  ;;  %v502_v13 = vmul.f32 %v9000_v2, %v493_v8 }
  0xa0   : > { %8642 = vmatprep.subr.msk.bf16.mxu1 %vm549_vm4, %v485_v3  ;;  %7950 = vmatpush3.bf16.msra.mxu0 %v1013_v4 }
  0xa1   : > { %7956 = vmatpush3.bf16.msra.mxu1 %v1090_v12  ;;  %v503_v14 = vpack.c.bf16 %v502_v13, %v502_v13  ;;  %7951 = vmatprep.mubr.msk.bf16.mxu0 %vm542_vm0, %v8685_v7 }
  0xa2   : > { %7957 = vmatprep.mubr.msk.bf16.mxu1 %vm542_vm0, %v8686_v9 }
  0xa3   : > { %8643 = vmatprep.subr.msk.bf16.mxu0 %vm549_vm4, %v503_v14  ;;  %v1167_v19 = vsel %vm549_vm4, %v503_v14, 0 }
  0xa7   : > { %7952 = vmatmul.mubr.msk.bf16.vlgmr.msra.gmra.mxu0 %vm542_vm0, %v8687_v15  ;;  %7958 = vmatmul.mubr.msk.bf16.vlgmr.msra.gmra.mxu1 %vm542_vm0, %v8688_v16 }
  0xa8   : > { %7962 = vmatpush3.bf16.msra.mxu0 %v1167_v19  ;;  %7963 = vmatprep.mubr.msk.bf16.mxu0 %vm542_vm0, %v8689_v17 }
  0xaa   : > { %v526_v21 = vpop.permute.xlu1 %525  ;;  %v521_v31 = vpop.permute.xlu0 %520 }
  0xae   : > { %v511_v22 = vpop.permute.xlu1 %510 }
  0xaf   : > { %7964 = vmatmul.mubr.msk.bf16.vlgmr.msra.gmra.mxu0 %vm542_vm0, %v8690_v20 }
 0x14f   : > { %v7917_v23 = vpop.f32.mrf.mxu0  ;;  %v7923_v24 = vpop.f32.mrf.mxu1 }
 0x150   : > { %v604_v37 = vadd.f32 %v7917_v23, %v521_v31 }
 0x151   : > { %v664_v25 = vpop.f32.mrf.mxu1  ;;  %v587_v26 = vpop.f32.mrf.mxu0 }
 0x152   : > { %v602_v27 = vadd.f32 %v587_v26, %v511_v22  ;;  %v681_v45 = vadd.f32 %v7923_v24, %v604_v37 }
 0x153   : > { %v7918_v28 = vpop.f32.mrf.mxu0  ;;  %v7924_v30 = vpop.f32.mrf.mxu1 }
 0x154   : > { %v679_v32 = vadd.f32 %v664_v25, %v602_v27  ;;  %v605_v44 = vadd.f32 %v7918_v28, %v526_v21  ;;  %v8770_v27 = vmov 0.0  }
 0x155   : > { %v9035_v33 = vpop.f32.mrf.mxu0  ;;  %v9037_v34 = vpop.f32.mrf.mxu1  ;;  %7967 = vmatprep.subr.bf16.mxu1 %v8770_v27  ;;  %7975 = vmatprep.subr.bf16.mxu0 %v8770_v27 }
 0x156   : > { %v682_v53 = vadd.f32 %v7924_v30, %v605_v44  ;;  %7971 = vmatprep.mubr.msk.bf16.mxu1 %vm8771_vm10, %v8770_v27  ;;  %7979 = vmatprep.mubr.msk.bf16.mxu0 %vm8771_vm10, %v8770_v27 }
 0x157   : > { %v7929_v35 = vpop.f32.mrf.mxu0  ;;  %v7935_v36 = vpop.f32.mrf.mxu1 }
 0x158   : > { %v758_v50 = vadd.f32 %v7929_v35, %v681_v45 }
 0x159   : > { %v741_v38 = vpop.f32.mrf.mxu0  ;;  %v818_v40 = vpop.f32.mrf.mxu1 }
 0x15a   : > { %v756_v41 = vadd.f32 %v741_v38, %v679_v32  ;;  %v835_v56 = vadd.f32 %v7935_v36, %v758_v50  ;;  %v516_v32 = vpop.permute.xlu0 %515 }
 0x15b   : > { %v7930_v42 = vpop.f32.mrf.mxu0  ;;  %v7936_v43 = vpop.f32.mrf.mxu1  ;;  %v603_v35 = vadd.f32 %v9035_v33, %v516_v32 }
 0x15c   : > { %v833_v46 = vadd.f32 %v818_v40, %v756_v41  ;;  %v759_v57 = vadd.f32 %v7930_v42, %v682_v53 }
 0x15d   : > { %v9039_v47 = vpop.f32.mrf.mxu0  ;;  %v9041_v49 = vpop.f32.mrf.mxu1  ;;  %v680_v36 = vadd.f32 %v9037_v34, %v603_v35 }
 0x15e   : > { %v836_v3 = vadd.f32 %v7936_v43, %v759_v57 }
 0x15f   : > { %v7941_v51 = vpop.f32.mrf.mxu0  ;;  %v7947_v52 = vpop.f32.mrf.mxu1  ;;  %v757_v37 = vadd.f32 %v9039_v47, %v680_v36 }
 0x160   : > { %v912_v62 = vadd.f32 %v7941_v51, %v835_v56 }
 0x161   : > { %v895_v54 = vpop.f32.mrf.mxu0  ;;  %v972_v55 = vpop.f32.mrf.mxu1  ;;  %v834_v38 = vadd.f32 %v9041_v49, %v757_v37 }
 0x162   : > { %v910_v59 = vadd.f32 %v895_v54, %v833_v46  ;;  %v989_v5 = vadd.f32 %v7947_v52, %v912_v62 }
 0x163   : > { %v7942_v60 = vpop.f32.mrf.mxu0  ;;  %v7948_v61 = vpop.f32.mrf.mxu1 }
 0x164   : > { %v987_v63 = vadd.f32 %v972_v55, %v910_v59  ;;  %v913_v6 = vadd.f32 %v7942_v60, %v836_v3 }
 0x165   : > { %v898_v0 = vpop.f32.mrf.mxu0  ;;  %v975_v1 = vpop.f32.mrf.mxu1 }
 0x166   : > { %v990_v14 = vadd.f32 %v7948_v61, %v913_v6  ;;  %v911_v33 = vadd.f32 %v898_v0, %v834_v38 }
 0x167   : > { %v7953_v4 = vpop.f32.mrf.mxu0  ;;  %v7959_v7 = vpop.f32.mrf.mxu1 }
 0x168   : > { %v1066_v9 = vadd.f32 %v7953_v4, %v989_v5  ;;  %v988_v34 = vadd.f32 %v975_v1, %v911_v33 }
 0x169   : > { %v1049_v8 = vpop.f32.mrf.mxu0  ;;  %v1126_v15 = vpop.f32.mrf.mxu1 }
 0x16a   : > { %v1064_v12 = vadd.f32 %v1049_v8, %v987_v63  ;;  %v1143_v17 = vadd.f32 %v7959_v7, %v1066_v9 }
 0x16b   : > { %v7954_v13 = vpop.f32.mrf.mxu0  ;;  %v7960_v22 = vpop.f32.mrf.mxu1 }
 0x16c   : > { %v1067_v19 = vadd.f32 %v7954_v13, %v990_v14  ;;  %v1141_v40 = vadd.f32 %v1126_v15, %v1064_v12 }
 0x16d   : > { %v1052_v16 = vpop.f32.mrf.mxu0  ;;  %v1129_v43 = vpop.f32.mrf.mxu1 }
 0x16e   : > { %v1144_v24 = vadd.f32 %v7960_v22, %v1067_v19  ;;  %v1065_v41 = vadd.f32 %v1052_v16, %v988_v34 }
 0x16f   : > { %v7965_v20 = vpop.f32.mrf.mxu0 }
 0x170   : > { %v9043_v21 = vadd.f32 %v7965_v20, %v1143_v17  ;;  %v1142_v45 = vadd.f32 %v1129_v43, %v1065_v41 }
 0x171   : > { %v1203_v23 = vpop.f32.mrf.mxu0 }
 0x172   : > { %v9046_v25 = vmax.f32 %v9043_v21, 0.0  ;;  %v9119_v42 = vadd.f32 %v1203_v23, %v1141_v40 }
 0x173   : > { %v7966_v26 = vpop.f32.mrf.mxu0 }
 0x174   : > { %v9050_v28 = vadd.f32 %v7966_v26, %v1144_v24  ;;  %1268 = vrot.lane.b32.xlu1 %v9046_v25, %s8753_s23  ;;  %v9126_v46 = vmax.f32 %v9119_v42, 0.0 }
 0x175   : > { %v1206_v44 = vpop.f32.mrf.mxu0 }
 0x176   : > { %v9055_v30 = vmax.f32 %v9050_v28, 0.0  ;;  %v9128_v47 = vadd.f32 %v1206_v44, %v1142_v45 }
 0x178   : > { %1280 = vrot.lane.b32.xlu1 %v9046_v25, %s8755_s25  ;;  %1270 = vrot.lane.b32.xlu0 %v9055_v30, %s8753_s23  ;;  %v1367_v31 = vpack.c.bf16 %v9055_v30, %v9046_v25  ;;  %v9135_v49 = vmax.f32 %v9128_v47, 0.0 }
 0x17c   : > { %1234 = vrot.lane.b32.xlu1 %v9046_v25, %s11025_s24  ;;  %1282 = vrot.lane.b32.xlu0 %v9055_v30, %s8755_s25 }
 0x180   : > { %1246 = vrot.lane.b32.xlu1 %v9046_v25, %s11023_s26  ;;  %1236 = vrot.lane.b32.xlu0 %v9055_v30, %s11025_s24 }
 0x184   : > { %1302 = vrot.lane.b32.xlu1 %v9046_v25, %s11017_s28  ;;  %1248 = vrot.lane.b32.xlu0 %v9055_v30, %s11023_s26 }
 0x188   : > { %1314 = vrot.lane.b32.xlu1 %v9046_v25, %s11015_s27  ;;  %1304 = vrot.lane.b32.xlu0 %v9055_v30, %s11017_s28 }
 0x18c   : > { %1336 = vrot.lane.b32.xlu1 %v9046_v25, %s11021_s30  ;;  %1316 = vrot.lane.b32.xlu0 %v9055_v30, %s11015_s27 }
 0x190   : > { %1348 = vrot.lane.b32.xlu1 %v9046_v25, %s11019_s29  ;;  %1338 = vrot.lane.b32.xlu0 %v9055_v30, %s11021_s30 }
 0x194   : > { %1372 = vrot.lane.b32.xlu1 %v9046_v25, %s11013_s12  ;;  %1350 = vrot.lane.b32.xlu0 %v9055_v30, %s11019_s29 }
 0x198   : > { %1384 = vrot.lane.b32.xlu1 %v9046_v25, %s11027_s15  ;;  %1374 = vrot.lane.b32.xlu0 %v9055_v30, %s11013_s12 }
 0x19c   : > { %1406 = vrot.lane.b32.xlu1 %v9046_v25, %s11028_s16  ;;  %1386 = vrot.lane.b32.xlu0 %v9055_v30, %s11027_s15 }
 0x1a0   : > { %1418 = vrot.lane.b32.xlu1 %v9046_v25, %s11029_s21  ;;  %1408 = vrot.lane.b32.xlu0 %v9055_v30, %s11028_s16 }
 0x1a4   : > { %1440 = vrot.lane.b32.xlu1 %v9046_v25, %s11030_s17  ;;  %1420 = vrot.lane.b32.xlu0 %v9055_v30, %s11029_s21 }
 0x1a8   : > { %1452 = vrot.lane.b32.xlu1 %v9046_v25, %s11031_s11  ;;  %1442 = vrot.lane.b32.xlu0 %v9055_v30, %s11030_s17 }
 0x1ac   : > { %1474 = vrot.lane.b32.xlu1 %v9046_v25, %s11011_s20  ;;  %1454 = vrot.lane.b32.xlu0 %v9055_v30, %s11031_s11 }
 0x1b0   : > { %1486 = vrot.lane.b32.xlu1 %v9046_v25, %s11032_s18  ;;  %1476 = vrot.lane.b32.xlu0 %v9055_v30, %s11011_s20 }
 0x1b4   : > { %1264 = vrot.lane.b32.xlu1 %v9126_v46, %s8753_s23  ;;  %1488 = vrot.lane.b32.xlu0 %v9055_v30, %s11032_s18 }
 0x1b8   : > { %1276 = vrot.lane.b32.xlu1 %v9126_v46, %s8755_s25  ;;  %1266 = vrot.lane.b32.xlu0 %v9135_v49, %s8753_s23 }
 0x1bc   : > { %1230 = vrot.lane.b32.xlu1 %v9126_v46, %s11025_s24  ;;  %1278 = vrot.lane.b32.xlu0 %v9135_v49, %s8755_s25 }
 0x1c0   : > { %1242 = vrot.lane.b32.xlu1 %v9126_v46, %s11023_s26  ;;  %1232 = vrot.lane.b32.xlu0 %v9135_v49, %s11025_s24 }
 0x1c4   : > { %1298 = vrot.lane.b32.xlu1 %v9126_v46, %s11017_s28  ;;  %1244 = vrot.lane.b32.xlu0 %v9135_v49, %s11023_s26 }
 0x1c8   : > { %1310 = vrot.lane.b32.xlu1 %v9126_v46, %s11015_s27  ;;  %1300 = vrot.lane.b32.xlu0 %v9135_v49, %s11017_s28 }
 0x1cc   : > { %1332 = vrot.lane.b32.xlu1 %v9126_v46, %s11021_s30  ;;  %1312 = vrot.lane.b32.xlu0 %v9135_v49, %s11015_s27 }
 0x1d0   : > { %1344 = vrot.lane.b32.xlu1 %v9126_v46, %s11019_s29  ;;  %1334 = vrot.lane.b32.xlu0 %v9135_v49, %s11021_s30 }
 0x1d4   : > { %1368 = vrot.lane.b32.xlu1 %v9126_v46, %s11013_s12  ;;  %1346 = vrot.lane.b32.xlu0 %v9135_v49, %s11019_s29 }
 0x1d8   : > { %1380 = vrot.lane.b32.xlu1 %v9126_v46, %s11027_s15  ;;  %1370 = vrot.lane.b32.xlu0 %v9135_v49, %s11013_s12  ;;  %s11033_s12 = smov 127  }
 0x1dc   : > { %1402 = vrot.lane.b32.xlu1 %v9126_v46, %s11028_s16  ;;  %1382 = vrot.lane.b32.xlu0 %v9135_v49, %s11027_s15 }
 0x1e0   : > { %1414 = vrot.lane.b32.xlu1 %v9126_v46, %s11029_s21  ;;  %1404 = vrot.lane.b32.xlu0 %v9135_v49, %s11028_s16 }
 0x1e4   : > { %1436 = vrot.lane.b32.xlu1 %v9126_v46, %s11030_s17  ;;  %1416 = vrot.lane.b32.xlu0 %v9135_v49, %s11029_s21 }
 0x1e6   : > { %v1269_v50 = vpop.permute.xlu1 %1268 }
 0x1e8   : > { %1448 = vrot.lane.b32.xlu1 %v9126_v46, %s11031_s11  ;;  %1438 = vrot.lane.b32.xlu0 %v9135_v49, %s11030_s17 }
 0x1ea   : > { %v1281_v51 = vpop.permute.xlu1 %1280  ;;  %v1271_v52 = vpop.permute.xlu0 %1270 }
 0x1eb   : > { %v1290_v53 = vsel %vm383_vm1, %v1269_v50, %v1281_v51 }
 0x1ec   : > { %1470 = vrot.lane.b32.xlu1 %v9126_v46, %s11011_s20  ;;  %1450 = vrot.lane.b32.xlu0 %v9135_v49, %s11031_s11  ;;  %v1294_v57 = vmul.f32 %v8903_v11, %v1290_v53 }
 0x1ee   : > { %v1235_v54 = vpop.permute.xlu1 %1234  ;;  %v1283_v55 = vpop.permute.xlu0 %1282 }
 0x1ef   : > { %v1291_v56 = vsel %vm383_vm1, %v1271_v52, %v1283_v55 }
 0x1f0   : > { %v1295_v59 = vmul.f32 %v8903_v11, %v1291_v56  ;;  %1482 = vrot.lane.b32.xlu1 %v9126_v46, %s11032_s18  ;;  %1472 = vrot.lane.b32.xlu0 %v9135_v49, %s11011_s20  ;;  %s11034_s20 = smov 119  }
 0x1f2   : > { %v1297_v60 = vpack.c.bf16 %v1295_v59, %v1294_v57  ;;  %v1247_v61 = vpop.permute.xlu1 %1246  ;;  %v1237_v62 = vpop.permute.xlu0 %1236 }
 0x1f3   : > { %v1256_v63 = vsel %vm366_vm2, %v1235_v54, %v1247_v61 }
 0x1f4   : > { %7968 = vmatpush3.bf16.msra.mxu1 %v1297_v60  ;;  %1484 = vrot.lane.b32.xlu0 %v9135_v49, %s11032_s18  ;;  %v1260_v4 = vmul.f32 %v8898_v10, %v1256_v63 }
 0x1f5   : > { %7969 = vmatprep.subr.bf16.mxu1 %v8770_v27 }
 0x1f6   : > { %v1303_v0 = vpop.permute.xlu1 %1302  ;;  %v1249_v1 = vpop.permute.xlu0 %1248 }
 0x1f7   : > { %v1257_v3 = vsel %vm366_vm2, %v1237_v62, %v1249_v1  ;;  %v8691_v62 = vld [vmem:[%s10992_s4 + $0x8] sm:$0xff]  }
 0x1f8   : > { %v1261_v5 = vmul.f32 %v8898_v10, %v1257_v3 }
 0x1fa   : > { %v1263_v6 = vpack.c.bf16 %v1261_v5, %v1260_v4  ;;  %v1315_v7 = vpop.permute.xlu1 %1314  ;;  %v1305_v8 = vpop.permute.xlu0 %1304 }
 0x1fb   : > { %v1324_v56 = vsel %vm401_vm3, %v1303_v0, %v1315_v7 }
 0x1fc   : > { %7976 = vmatpush3.bf16.msra.mxu0 %v1263_v6  ;;  %v1328_v63 = vmul.f32 %v8912_v18, %v1324_v56  ;;  %v8693_v56 = vld [vmem:[%s10992_s4 + $0x10] sm:$0xff]  }
 0x1fd   : > { %7977 = vmatprep.subr.bf16.mxu0 %v8770_v27 }
 0x1fe   : > { %v1337_v9 = vpop.permute.xlu1 %1336  ;;  %v1317_v12 = vpop.permute.xlu0 %1316 }
 0x1ff   : > { %v1325_v52 = vsel %vm401_vm3, %v1305_v8, %v1317_v12 }
 0x200   : > { %v1329_v57 = vmul.f32 %v8912_v18, %v1325_v52 }
 0x202   : > { %v1349_v13 = vpop.permute.xlu1 %1348  ;;  %v1339_v14 = vpop.permute.xlu0 %1338 }
 0x203   : > { %v1358_v8 = vsel %vm419_vm5, %v1337_v9, %v1349_v13 }
 0x206   : > { %v9213_v15 = vpop.permute.xlu1 %1372  ;;  %v1351_v16 = vpop.permute.xlu0 %1350 }
 0x207   : > { %v1359_v4 = vsel %vm419_vm5, %v1339_v14, %v1351_v16 }
 0x208   : > { %v1363_v12 = vmul.f32 %v8929_v29, %v1359_v4 }
 0x20a   : > { %v9215_v17 = vpop.permute.xlu1 %1384  ;;  %v9217_v19 = vpop.permute.xlu0 %1374 }
 0x20e   : > { %v9219_v20 = vpop.permute.xlu1 %1406  ;;  %v9221_v22 = vpop.permute.xlu0 %1386 }
 0x212   : > { %v9223_v23 = vpop.permute.xlu1 %1418  ;;  %v9225_v24 = vpop.permute.xlu0 %1408 }
 0x216   : > { %v9227_v26 = vpop.permute.xlu1 %1440  ;;  %v9229_v32 = vpop.permute.xlu0 %1420 }
 0x21a   : > { %v9231_v35 = vpop.permute.xlu1 %1452  ;;  %v9233_v36 = vpop.permute.xlu0 %1442 }
 0x21e   : > { %v9235_v37 = vpop.permute.xlu1 %1474  ;;  %v9237_v38 = vpop.permute.xlu0 %1454 }
 0x21f   : > { %v1463_v4 = vsel %vm474_vm8, %v9233_v36, %v9237_v38 }
 0x220   : > { %v1467_v36 = vmul.f32 %v8984_v58, %v1463_v4 }
 0x222   : > { %v9239_v33 = vpop.permute.xlu1 %1486  ;;  %v9241_v34 = vpop.permute.xlu0 %1476 }
 0x226   : > { %v1265_v40 = vpop.permute.xlu1 %1264  ;;  %v9243_v41 = vpop.permute.xlu0 %1488 }
 0x22a   : > { %v1277_v43 = vpop.permute.xlu1 %1276  ;;  %v1267_v44 = vpop.permute.xlu0 %1266 }
 0x22b   : > { %v1288_v45 = vsel %vm383_vm1, %v1265_v40, %v1277_v43  ;;  %v8692_v43 = vld [vmem:[%s10992_s4] sm:$0xff]  }
 0x22c   : > { %v1292_v54 = vmul.f32 %v8903_v11, %v1288_v45 }
 0x22e   : > { %v1231_v50 = vpop.permute.xlu1 %1230  ;;  %v1279_v51 = vpop.permute.xlu0 %1278 }
 0x22f   : > { %v1289_v53 = vsel %vm383_vm1, %v1267_v44, %v1279_v51  ;;  %v1362_v44 = vmul.f32 %v8929_v29, %v1358_v8  ;;  %v1462_v8 = vsel %vm474_vm8, %v9227_v26, %v9231_v35 }
 0x230   : > { %v1293_v55 = vmul.f32 %v8903_v11, %v1289_v53  ;;  %v1331_v11 = vpack.c.bf16 %v1329_v57, %v1328_v63  ;;  %v1466_v26 = vmul.f32 %v8984_v58, %v1462_v8 }
 0x231   : > { %v1365_v45 = vpack.c.bf16 %v1363_v12, %v1362_v44  ;;  %v1497_v44 = vsel %vm492_vm9, %v9241_v34, %v9243_v41 }
 0x232   : > { %v1296_v59 = vpack.c.bf16 %v1293_v55, %v1292_v54  ;;  %v1243_v60 = vpop.permute.xlu1 %1242  ;;  %v1233_v61 = vpop.permute.xlu0 %1232  ;;  %v1501_v34 = vmul.f32 %v9000_v2, %v1497_v44 }
 0x233   : > { %v1254_v1 = vsel %vm366_vm2, %v1231_v50, %v1243_v60  ;;  %v1395_v60 = vsel %vm438_vm6, %v9217_v19, %v9221_v22  ;;  %v1394_v19 = vsel %vm438_vm6, %v9213_v15, %v9215_v17  ;;  %v1428_v22 = vsel %vm456_vm7, %v9219_v20, %v9223_v23  ;;  %v8694_v15 = vld [vmem:[%s10992_s4 + $0x18] sm:$0xff]   ;;  %v8695_v17 = vld [vmem:[%s10992_s4 + $0x20] sm:$0xff]  }
 0x234   : > { %7970 = vmatpush3.bf16.msra.mxu1 %v1296_v59  ;;  %v1258_v6 = vmul.f32 %v8898_v10, %v1254_v1  ;;  %v1398_v20 = vmul.f32 %v8948_v39, %v1394_v19  ;;  %v1432_v23 = vmul.f32 %v8966_v48, %v1428_v22 }
 0x235   : > { %7983 = vmatprep.subr.bf16.mxu1 %v8770_v27 }
 0x236   : > { %v1299_v3 = vpop.permute.xlu1 %1298  ;;  %v1245_v0 = vpop.permute.xlu0 %1244 }
 0x237   : > { %v1255_v5 = vsel %vm366_vm2, %v1233_v61, %v1245_v0  ;;  %7972 = vmatmul.mubr.msk.bf16.vlgmr.msra.gmra.mxu1 %vm1514_vm11, %v8691_v62  ;;  %v1429_v61 = vsel %vm456_vm7, %v9225_v24, %v9229_v32  ;;  %v1399_v24 = vmul.f32 %v8948_v39, %v1395_v60 }
 0x238   : > { %v1259_v7 = vmul.f32 %v8898_v10, %v1255_v5  ;;  %7984 = vmatpush3.bf16.msra.mxu1 %v1331_v11  ;;  %7987 = vmatprep.mubr.msk.bf16.mxu1 %vm8771_vm10, %v8770_v27 }
 0x239   : > { %7985 = vmatprep.subr.bf16.mxu1 %v8770_v27 }
 0x23a   : > { %v1262_v40 = vpack.c.bf16 %v1259_v7, %v1258_v6  ;;  %v1311_v14 = vpop.permute.xlu1 %1310  ;;  %v1301_v16 = vpop.permute.xlu0 %1300 }
 0x23b   : > { %v1322_v10 = vsel %vm401_vm3, %v1299_v3, %v1311_v14  ;;  %v1469_v14 = vpack.c.bf16 %v1467_v36, %v1466_v26 }
 0x23c   : > { %7978 = vmatpush3.bf16.msra.mxu0 %v1262_v40  ;;  %v1326_v51 = vmul.f32 %v8912_v18, %v1322_v10 }
 0x23d   : > { %7991 = vmatprep.subr.bf16.mxu0 %v8770_v27 }
 0x23e   : > { %v1333_v9 = vpop.permute.xlu1 %1332  ;;  %v1313_v13 = vpop.permute.xlu0 %1312 }
 0x23f   : > { %v1323_v50 = vsel %vm401_vm3, %v1301_v16, %v1313_v13  ;;  %7980 = vmatmul.mubr.msk.bf16.vlgmr.msra.gmra.mxu0 %vm1514_vm11, %v8692_v43  ;;  %v1496_v13 = vsel %vm492_vm9, %v9235_v37, %v9239_v33 }
 0x240   : > { %v1327_v52 = vmul.f32 %v8912_v18, %v1323_v50  ;;  %7992 = vmatpush3.bf16.msra.mxu0 %v1365_v45  ;;  %7995 = vmatprep.mubr.msk.bf16.mxu0 %vm8771_vm10, %v8770_v27 }
 0x241   : > { %7993 = vmatprep.subr.bf16.mxu0 %v8770_v27 }
 0x242   : > { %v1330_v53 = vpack.c.bf16 %v1327_v52, %v1326_v51  ;;  %v1345_v54 = vpop.permute.xlu1 %1344  ;;  %v1335_v55 = vpop.permute.xlu0 %1334  ;;  %v8697_v52 = vld [vmem:[%s10992_s4 + $0x30] sm:$0xff]  }
 0x243   : > { %v1356_v57 = vsel %vm419_vm5, %v1333_v9, %v1345_v54 }
 0x244   : > { %7986 = vmatpush3.bf16.msra.mxu1 %v1330_v53  ;;  %v1360_v63 = vmul.f32 %v8929_v29, %v1356_v57 }
 0x245   : > { %7999 = vmatprep.subr.bf16.mxu1 %v8770_v27 }
 0x246   : > { %v1369_v59 = vpop.permute.xlu1 %1368  ;;  %v1347_v18 = vpop.permute.xlu0 %1346 }
 0x247   : > { %v1357_v62 = vsel %vm419_vm5, %v1335_v55, %v1347_v18  ;;  %7988 = vmatmul.mubr.msk.bf16.vlgmr.msra.gmra.mxu1 %vm1514_vm11, %v8693_v56 }
 0x248   : > { %v1361_v1 = vmul.f32 %v8929_v29, %v1357_v62  ;;  %8000 = vmatpush3.bf16.msra.mxu1 %v1367_v31  ;;  %8003 = vmatprep.mubr.msk.bf16.mxu1 %vm8771_vm10, %v8770_v27  ;;  %v1433_v29 = vmul.f32 %v8966_v48, %v1429_v61  ;;  %v1366_v31 = vpack.c.bf16 %v9135_v49, %v9126_v46  ;;  %v8698_v61 = vld [vmem:[%s10992_s4 + $0x38] sm:$0xff]  }
 0x249   : > { %8001 = vmatprep.subr.bf16.mxu1 %v8770_v27  ;;  %v1401_v46 = vpack.c.bf16 %v1399_v24, %v1398_v20  ;;  %v8699_v24 = vld [vmem:[%s10992_s4 + $0x40] sm:$0xff]  }
 0x24a   : > { %v1364_v32 = vpack.c.bf16 %v1361_v1, %v1360_v63  ;;  %v1381_v25 = vpop.permute.xlu1 %1380  ;;  %v1371_v30 = vpop.permute.xlu0 %1370  ;;  %v1435_v49 = vpack.c.bf16 %v1433_v29, %v1432_v23  ;;  %v8700_v29 = vld [vmem:[%s10993_s5] sm:$0xff]  }
 0x24b   : > { %v1392_v11 = vsel %vm438_vm6, %v1369_v59, %v1381_v25 }
 0x24c   : > { %7994 = vmatpush3.bf16.msra.mxu0 %v1364_v32  ;;  %8002 = vmatpush3.bf16.msra.mxu1 %v1366_v31  ;;  %v1396_v6 = vmul.f32 %v8948_v39, %v1392_v11 }
 0x24d   : > { %8007 = vmatprep.subr.bf16.mxu0 %v8770_v27  ;;  %8015 = vmatprep.subr.bf16.mxu1 %v8770_v27 }
 0x24e   : > { %v1403_v3 = vpop.permute.xlu1 %1402  ;;  %v1383_v0 = vpop.permute.xlu0 %1382 }
 0x24f   : > { %v1393_v5 = vsel %vm438_vm6, %v1371_v30, %v1383_v0  ;;  %7996 = vmatmul.mubr.msk.bf16.vlgmr.msra.gmra.mxu0 %vm1514_vm11, %v8694_v15  ;;  %8004 = vmatmul.mubr.msk.bf16.vlgmr.msra.gmra.mxu1 %vm1514_vm11, %v8695_v17 }
 0x250   : > { %v1397_v7 = vmul.f32 %v8948_v39, %v1393_v5  ;;  %8008 = vmatpush3.bf16.msra.mxu0 %v1401_v46  ;;  %8016 = vmatpush3.bf16.msra.mxu1 %v1435_v49  ;;  %v8696_v39 = vld [vmem:[%s10992_s4 + $0x28] sm:$0xff]  }
 0x251   : > { %8009 = vmatprep.subr.bf16.mxu0 %v8770_v27  ;;  %8011 = vmatprep.mubr.msk.bf16.mxu0 %vm8771_vm10, %v8770_v27 }
 0x252   : > { %v1400_v38 = vpack.c.bf16 %v1397_v7, %v1396_v6  ;;  %v1415_v12 = vpop.permute.xlu1 %1414  ;;  %v1405_v40 = vpop.permute.xlu0 %1404  ;;  %8017 = vmatprep.subr.bf16.mxu1 %v8770_v27  ;;  %8019 = vmatprep.mubr.msk.bf16.mxu1 %vm8771_vm10, %v8770_v27 }
 0x253   : > { %v1426_v35 = vsel %vm456_vm7, %v1403_v3, %v1415_v12 }
 0x254   : > { %8010 = vmatpush3.bf16.msra.mxu0 %v1400_v38  ;;  %v1430_v45 = vmul.f32 %v8966_v48, %v1426_v35 }
 0x255   : > { %8023 = vmatprep.subr.bf16.mxu0 %v8770_v27 }
 0x256   : > { %v1437_v16 = vpop.permute.xlu1 %1436  ;;  %v1417_v43 = vpop.permute.xlu0 %1416 }
 0x257   : > { %v1427_v10 = vsel %vm456_vm7, %v1405_v40, %v1417_v43  ;;  %8012 = vmatmul.mubr.msk.bf16.vlgmr.msra.gmra.mxu0 %vm1514_vm11, %v8696_v39 }
 0x258   : > { %v1431_v9 = vmul.f32 %v8966_v48, %v1427_v10  ;;  %8024 = vmatpush3.bf16.msra.mxu0 %v1469_v14  ;;  %8027 = vmatprep.mubr.msk.bf16.mxu0 %vm8771_vm10, %v8770_v27  ;;  %v1500_v48 = vmul.f32 %v9000_v2, %v1496_v13 }
 0x259   : > { %8025 = vmatprep.subr.bf16.mxu0 %v8770_v27 }
 0x25a   : > { %v1434_v41 = vpack.c.bf16 %v1431_v9, %v1430_v45  ;;  %v1449_v50 = vpop.permute.xlu1 %1448  ;;  %v1439_v51 = vpop.permute.xlu0 %1438  ;;  %v1503_v54 = vpack.c.bf16 %v1501_v34, %v1500_v48 }
 0x25b   : > { %v1460_v53 = vsel %vm474_vm8, %v1437_v16, %v1449_v50 }
 0x25c   : > { %8018 = vmatpush3.bf16.msra.mxu1 %v1434_v41  ;;  %v1464_v56 = vmul.f32 %v8984_v58, %v1460_v53 }
 0x25d   : > { %8031 = vmatprep.subr.bf16.mxu1 %v8770_v27 }
 0x25e   : > { %v1471_v37 = vpop.permute.xlu1 %1470  ;;  %v1451_v33 = vpop.permute.xlu0 %1450 }
 0x25f   : > { %v1461_v55 = vsel %vm474_vm8, %v1439_v51, %v1451_v33  ;;  %8020 = vmatmul.mubr.msk.bf16.vlgmr.msra.gmra.mxu1 %vm1514_vm11, %v8697_v52 }
 0x260   : > { %v1465_v57 = vmul.f32 %v8984_v58, %v1461_v55  ;;  %8032 = vmatpush3.bf16.msra.mxu1 %v1503_v54  ;;  %8035 = vmatprep.mubr.msk.bf16.mxu1 %vm8771_vm10, %v8770_v27 }
 0x261   : > { %8033 = vmatprep.subr.bf16.mxu1 %v8770_v27 }
 0x262   : > { %v1468_v59 = vpack.c.bf16 %v1465_v57, %v1464_v56  ;;  %v1483_v18 = vpop.permute.xlu1 %1482  ;;  %v1473_v60 = vpop.permute.xlu0 %1472 }
 0x263   : > { %v1494_v62 = vsel %vm492_vm9, %v1471_v37, %v1483_v18 }
 0x264   : > { %8026 = vmatpush3.bf16.msra.mxu0 %v1468_v59  ;;  %v1498_v58 = vmul.f32 %v9000_v2, %v1494_v62 }
 0x266   : > { %v1485_v63 = vpop.permute.xlu0 %1484 }
 0x267   : > { %v1495_v1 = vsel %vm492_vm9, %v1473_v60, %v1485_v63  ;;  %8028 = vmatmul.mubr.msk.bf16.vlgmr.msra.gmra.mxu0 %vm1514_vm11, %v8698_v61 }
 0x268   : > { %v1499_v19 = vmul.f32 %v9000_v2, %v1495_v1  ;;  %8041 = vmatprep.mubr.msk.bf16.mxu0 %vm2003_vm12, %v8700_v29 }
 0x26a   : > { %v1502_v22 = vpack.c.bf16 %v1499_v19, %v1498_v58  ;;  %v8701_v19 = vld [vmem:[%s10993_s5 + $0x8] sm:$0xff]  }
 0x26c   : > { %8034 = vmatpush3.bf16.msra.mxu1 %v1502_v22 }
 0x26d   : > { %8045 = vmatprep.subr.bf16.mxu1 %v8770_v27 }
 0x26f   : > { %8036 = vmatmul.mubr.msk.bf16.vlgmr.msra.gmra.mxu1 %vm1514_vm11, %v8699_v24 }
 0x270   : > { %8049 = vmatprep.mubr.msk.bf16.mxu1 %vm8771_vm10, %v8770_v27 }
 0x2f7   : > { %v1552_v2 = vpop.f32.mrf.mxu1 }
 0x2f9   : > { %v7973_v32 = vpop.f32.mrf.mxu1 }
 0x2fb   : > { %v1555_v25 = vpop.f32.mrf.mxu1 }
 0x2fd   : > { %v7974_v30 = vpop.f32.mrf.mxu1 }
 0x2ff   : > { %v1601_v31 = vpop.f32.mrf.mxu0 }
 0x300   : > { %v1602_v39 = vadd.f32 %v1601_v31, %v1552_v2 }
 0x301   : > { %v7981_v15 = vpop.f32.mrf.mxu0 }
 0x303   : > { %v1604_v17 = vpop.f32.mrf.mxu0 }
 0x304   : > { %v1605_v16 = vadd.f32 %v1604_v17, %v1555_v25 }
 0x305   : > { %v7982_v20 = vpop.f32.mrf.mxu0 }
 0x307   : > { %v1653_v23 = vpop.f32.mrf.mxu1 }
 0x308   : > { %v1660_v14 = vadd.f32 %v1653_v23, %v1602_v39  ;;  %v9569_v39 = vld [vmem:[%s10988_s0] ss:$0 sm:$0xff] }
 0x309   : > { %v7989_v11 = vpop.f32.mrf.mxu1 }
 0x30b   : > { %v1656_v46 = vpop.f32.mrf.mxu1 }
 0x30c   : > { %v1661_v10 = vadd.f32 %v1656_v46, %v1605_v16 }
 0x30d   : > { %v7990_v49 = vpop.f32.mrf.mxu1 }
 0x30f   : > { %v1707_v3 = vpop.f32.mrf.mxu0  ;;  %v1761_v0 = vpop.f32.mrf.mxu1 }
 0x310   : > { %v1714_v45 = vadd.f32 %v1707_v3, %v1660_v14 }
 0x311   : > { %v7997_v4 = vpop.f32.mrf.mxu0  ;;  %v8005_v5 = vpop.f32.mrf.mxu1 }
 0x312   : > { %v1768_v34 = vadd.f32 %v1761_v0, %v1714_v45  ;;  %v9553_v0 = vld [vmem:[%s10988_s0 + $0x1] ss:$0 sm:$0xff] }
 0x313   : > { %v1710_v6 = vpop.f32.mrf.mxu0  ;;  %v1764_v7 = vpop.f32.mrf.mxu1 }
 0x314   : > { %v1715_v41 = vadd.f32 %v1710_v6, %v1661_v10 }
 0x315   : > { %v7998_v8 = vpop.f32.mrf.mxu0  ;;  %v8006_v36 = vpop.f32.mrf.mxu1 }
 0x316   : > { %v1769_v52 = vadd.f32 %v1764_v7, %v1715_v41 }
 0x317   : > { %v1815_v38 = vpop.f32.mrf.mxu0 }
 0x318   : > { %v1822_v48 = vadd.f32 %v1815_v38, %v1768_v34 }
 0x319   : > { %v8013_v12 = vpop.f32.mrf.mxu0 }
 0x31b   : > { %v1818_v40 = vpop.f32.mrf.mxu0 }
 0x31c   : > { %v1823_v54 = vadd.f32 %v1818_v40, %v1769_v52 }
 0x31d   : > { %v8014_v26 = vpop.f32.mrf.mxu0 }
 0x31f   : > { %v1869_v35 = vpop.f32.mrf.mxu1 }
 0x320   : > { %v1876_v37 = vadd.f32 %v1869_v35, %v1822_v48 }
 0x321   : > { %v8021_v43 = vpop.f32.mrf.mxu1 }
 0x323   : > { %v1872_v44 = vpop.f32.mrf.mxu1 }
 0x324   : > { %v1877_v55 = vadd.f32 %v1872_v44, %v1823_v54 }
 0x325   : > { %v8022_v9 = vpop.f32.mrf.mxu1 }
 0x327   : > { %v1923_v13 = vpop.f32.mrf.mxu0 }
 0x328   : > { %v1930_v56 = vadd.f32 %v1923_v13, %v1876_v37 }
 0x329   : > { %v8029_v50 = vpop.f32.mrf.mxu0 }
 0x32b   : > { %v1926_v51 = vpop.f32.mrf.mxu0 }
 0x32c   : > { %v1931_v59 = vadd.f32 %v1926_v51, %v1877_v55 }
 0x32d   : > { %v8030_v53 = vpop.f32.mrf.mxu0 }
 0x32f   : > { %v1977_v33 = vpop.f32.mrf.mxu1 }
 0x330   : > { %v1984_v18 = vadd.f32 %v1977_v33, %v1930_v56 }
 0x331   : > { %v8037_v57 = vpop.f32.mrf.mxu1 }
 0x332   : > { %v1986_v63 = vmax.f32 %v1984_v18, 0.0 }
 0x333   : > { %v1980_v60 = vpop.f32.mrf.mxu1 }
 0x334   : > { %v1985_v61 = vadd.f32 %v1980_v60, %v1931_v59 }
 0x335   : > { %v8038_v62 = vpop.f32.mrf.mxu1 }
 0x336   : > { %v1987_v1 = vmax.f32 %v1985_v61, 0.0 }
 0x338   : > { %v1988_v58 = vpack.c.bf16 %v1987_v1, %v1986_v63 }
 0x33a   : > { %8039 = vmatprep.subr.bf16.mxu0 %v1988_v58 }
 0x33b   : > { %8040 = vmatpush3.bf16.msra.mxu0 %v1988_v58 }
 0x33c   : > { %8053 = vmatprep.subr.bf16.mxu0 %v8770_v27 }
 0x33e   : > { %8042 = vmatmul.mubr.msk.bf16.vlgmr.msra.gmra.mxu0 %vm2003_vm12, %v8701_v19 }
 0x33f   : > { %8057 = vmatprep.mubr.msk.bf16.mxu0 %vm8771_vm10, %v8770_v27 }
 0x3fe   : > { %v8043_v22 = vpop.f32.mrf.mxu0 }
 0x3ff   : > { %v9401_v24 = vadd.f32 %v8043_v22, %v9043_v21 }
 0x400   : > { %v2044_v29 = vpop.f32.mrf.mxu0 }
 0x401   : > { %v9404_v2 = vmax.f32 %v9401_v24, 0.0 }
 0x402   : > { %v8044_v32 = vpop.f32.mrf.mxu0 }
 0x403   : > { %v9407_v25 = vadd.f32 %v8044_v32, %v9050_v28  ;;  %2109 = vrot.lane.b32.xlu1 %v9404_v2, %s8753_s23  ;;  %v9473_v28 = vadd.f32 %v2044_v29, %v9119_v42 }
 0x404   : > { %v2047_v31 = vpop.f32.mrf.mxu0 }
 0x405   : > { %v9412_v30 = vmax.f32 %v9407_v25, 0.0  ;;  %v9480_v15 = vmax.f32 %v9473_v28, 0.0  ;;  %v9483_v17 = vadd.f32 %v2047_v31, %v9128_v47 }
 0x407   : > { %2121 = vrot.lane.b32.xlu1 %v9404_v2, %s8755_s25  ;;  %2111 = vrot.lane.b32.xlu0 %v9412_v30, %s8753_s23  ;;  %v2208_v21 = vpack.c.bf16 %v9412_v30, %v9404_v2  ;;  %v9490_v42 = vmax.f32 %v9483_v17, 0.0 }
 0x40b   : > { %2075 = vrot.lane.b32.xlu1 %v9404_v2, %s11025_s24  ;;  %2123 = vrot.lane.b32.xlu0 %v9412_v30, %s8755_s25 }
 0x40f   : > { %2087 = vrot.lane.b32.xlu1 %v9404_v2, %s11023_s26  ;;  %2077 = vrot.lane.b32.xlu0 %v9412_v30, %s11025_s24 }
 0x413   : > { %2143 = vrot.lane.b32.xlu1 %v9404_v2, %s11017_s28  ;;  %2089 = vrot.lane.b32.xlu0 %v9412_v30, %s11023_s26 }
 0x417   : > { %2155 = vrot.lane.b32.xlu1 %v9404_v2, %s11015_s27  ;;  %2145 = vrot.lane.b32.xlu0 %v9412_v30, %s11017_s28 }
 0x41b   : > { %2177 = vrot.lane.b32.xlu1 %v9404_v2, %s11021_s30  ;;  %2157 = vrot.lane.b32.xlu0 %v9412_v30, %s11015_s27 }
 0x41f   : > { %2189 = vrot.lane.b32.xlu1 %v9404_v2, %s11019_s29  ;;  %2179 = vrot.lane.b32.xlu0 %v9412_v30, %s11021_s30 }
 0x423   : > { %2213 = vrot.lane.b32.xlu1 %v9404_v2, %s11033_s12  ;;  %2191 = vrot.lane.b32.xlu0 %v9412_v30, %s11019_s29 }
 0x427   : > { %2225 = vrot.lane.b32.xlu1 %v9404_v2, %s11027_s15  ;;  %2215 = vrot.lane.b32.xlu0 %v9412_v30, %s11033_s12 }
 0x42b   : > { %2247 = vrot.lane.b32.xlu1 %v9404_v2, %s11028_s16  ;;  %2227 = vrot.lane.b32.xlu0 %v9412_v30, %s11027_s15 }
 0x42f   : > { %2259 = vrot.lane.b32.xlu1 %v9404_v2, %s11029_s21  ;;  %2249 = vrot.lane.b32.xlu0 %v9412_v30, %s11028_s16 }
 0x433   : > { %2281 = vrot.lane.b32.xlu1 %v9404_v2, %s11030_s17  ;;  %2261 = vrot.lane.b32.xlu0 %v9412_v30, %s11029_s21 }
 0x437   : > { %2293 = vrot.lane.b32.xlu1 %v9404_v2, %s11031_s11  ;;  %2283 = vrot.lane.b32.xlu0 %v9412_v30, %s11030_s17 }
 0x43b   : > { %2315 = vrot.lane.b32.xlu1 %v9404_v2, %s11034_s20  ;;  %2295 = vrot.lane.b32.xlu0 %v9412_v30, %s11031_s11 }
 0x43f   : > { %2327 = vrot.lane.b32.xlu1 %v9404_v2, %s11032_s18  ;;  %2317 = vrot.lane.b32.xlu0 %v9412_v30, %s11034_s20 }
 0x443   : > { %2105 = vrot.lane.b32.xlu1 %v9480_v15, %s8753_s23  ;;  %2329 = vrot.lane.b32.xlu0 %v9412_v30, %s11032_s18  ;;  %v9688_v30 = vld [vmem:[%s10988_s0 + $0x6] ss:$0 sm:$0xff] }
 0x447   : > { %2117 = vrot.lane.b32.xlu1 %v9480_v15, %s8755_s25  ;;  %2107 = vrot.lane.b32.xlu0 %v9490_v42, %s8753_s23 }
 0x44b   : > { %2071 = vrot.lane.b32.xlu1 %v9480_v15, %s11025_s24  ;;  %2119 = vrot.lane.b32.xlu0 %v9490_v42, %s8755_s25 }
 0x44f   : > { %2083 = vrot.lane.b32.xlu1 %v9480_v15, %s11023_s26  ;;  %2073 = vrot.lane.b32.xlu0 %v9490_v42, %s11025_s24 }
 0x453   : > { %2139 = vrot.lane.b32.xlu1 %v9480_v15, %s11017_s28  ;;  %2085 = vrot.lane.b32.xlu0 %v9490_v42, %s11023_s26 }
 0x457   : > { %2151 = vrot.lane.b32.xlu1 %v9480_v15, %s11015_s27  ;;  %2141 = vrot.lane.b32.xlu0 %v9490_v42, %s11017_s28 }
 0x45b   : > { %2173 = vrot.lane.b32.xlu1 %v9480_v15, %s11021_s30  ;;  %2153 = vrot.lane.b32.xlu0 %v9490_v42, %s11015_s27 }
 0x45f   : > { %2185 = vrot.lane.b32.xlu1 %v9480_v15, %s11019_s29  ;;  %2175 = vrot.lane.b32.xlu0 %v9490_v42, %s11021_s30  ;;  %s11038_s30 = smov 7  }
 0x463   : > { %2209 = vrot.lane.b32.xlu1 %v9480_v15, %s11033_s12  ;;  %2187 = vrot.lane.b32.xlu0 %v9490_v42, %s11019_s29  ;;  %s11037_s29 = smov 71  }
 0x467   : > { %2221 = vrot.lane.b32.xlu1 %v9480_v15, %s11027_s15  ;;  %2211 = vrot.lane.b32.xlu0 %v9490_v42, %s11033_s12 }
 0x46b   : > { %2243 = vrot.lane.b32.xlu1 %v9480_v15, %s11028_s16  ;;  %2223 = vrot.lane.b32.xlu0 %v9490_v42, %s11027_s15 }
 0x46f   : > { %2255 = vrot.lane.b32.xlu1 %v9480_v15, %s11029_s21  ;;  %2245 = vrot.lane.b32.xlu0 %v9490_v42, %s11028_s16 }
 0x473   : > { %2277 = vrot.lane.b32.xlu1 %v9480_v15, %s11030_s17  ;;  %2257 = vrot.lane.b32.xlu0 %v9490_v42, %s11029_s21 }
 0x475   : > { %v2110_v47 = vpop.permute.xlu1 %2109 }
 0x477   : > { %2289 = vrot.lane.b32.xlu1 %v9480_v15, %s11031_s11  ;;  %2279 = vrot.lane.b32.xlu0 %v9490_v42, %s11030_s17 }
 0x479   : > { %v2122_v20 = vpop.permute.xlu1 %2121  ;;  %v2112_v23 = vpop.permute.xlu0 %2111 }
 0x47a   : > { %v2131_v11 = vsel %vm383_vm1, %v2110_v47, %v2122_v20  ;;  %v9615_v20 = vld [vmem:[%s10988_s0 + $0x2] ss:$0 sm:$0xff] }
 0x47b   : > { %2311 = vrot.lane.b32.xlu1 %v9480_v15, %s11034_s20  ;;  %2291 = vrot.lane.b32.xlu0 %v9490_v42, %s11031_s11  ;;  %v2135_v4 = vmul.f32 %v9553_v0, %v2131_v11 }
 0x47d   : > { %v2076_v46 = vpop.permute.xlu1 %2075  ;;  %v2124_v49 = vpop.permute.xlu0 %2123 }
 0x47e   : > { %v2132_v3 = vsel %vm383_vm1, %v2112_v23, %v2124_v49 }
 0x47f   : > { %v2136_v5 = vmul.f32 %v9553_v0, %v2132_v3  ;;  %2323 = vrot.lane.b32.xlu1 %v9480_v15, %s11032_s18  ;;  %2313 = vrot.lane.b32.xlu0 %v9490_v42, %s11034_s20  ;;  %v8702_v3 = vld [vmem:[%s10992_s4 + $0x50] sm:$0xff]  }
 0x481   : > { %v2138_v6 = vpack.c.bf16 %v2136_v5, %v2135_v4  ;;  %v2088_v7 = vpop.permute.xlu1 %2087  ;;  %v2078_v8 = vpop.permute.xlu0 %2077 }
 0x482   : > { %v2097_v36 = vsel %vm366_vm2, %v2076_v46, %v2088_v7 }
 0x483   : > { %8046 = vmatpush3.bf16.msra.mxu1 %v2138_v6  ;;  %2325 = vrot.lane.b32.xlu0 %v9490_v42, %s11032_s18  ;;  %v2101_v26 = vmul.f32 %v9569_v39, %v2097_v36 }
 0x484   : > { %8047 = vmatprep.subr.bf16.mxu1 %v8770_v27 }
 0x485   : > { %v2144_v38 = vpop.permute.xlu1 %2143  ;;  %v2090_v12 = vpop.permute.xlu0 %2089 }
 0x486   : > { %v2098_v40 = vsel %vm366_vm2, %v2078_v8, %v2090_v12 }
 0x487   : > { %v2102_v35 = vmul.f32 %v9569_v39, %v2098_v40 }
 0x489   : > { %v2104_v14 = vpack.c.bf16 %v2102_v35, %v2101_v26  ;;  %v2156_v16 = vpop.permute.xlu1 %2155  ;;  %v2146_v43 = vpop.permute.xlu0 %2145  ;;  %v9636_v35 = vld [vmem:[%s10988_s0 + $0x3] ss:$0 sm:$0xff] }
 0x48a   : > { %v2165_v47 = vsel %vm401_vm3, %v2144_v38, %v2156_v16 }
 0x48b   : > { %8054 = vmatpush3.bf16.msra.mxu0 %v2104_v14  ;;  %v2169_v4 = vmul.f32 %v9615_v20, %v2165_v47 }
 0x48c   : > { %8055 = vmatprep.subr.bf16.mxu0 %v8770_v27 }
 0x48d   : > { %v2178_v44 = vpop.permute.xlu1 %2177  ;;  %v2158_v10 = vpop.permute.xlu0 %2157 }
 0x48e   : > { %v2166_v22 = vsel %vm401_vm3, %v2146_v43, %v2158_v10 }
 0x48f   : > { %v2170_v23 = vmul.f32 %v9615_v20, %v2166_v22 }
 0x491   : > { %v2190_v45 = vpop.permute.xlu1 %2189  ;;  %v2180_v9 = vpop.permute.xlu0 %2179  ;;  %v2172_v6 = vpack.c.bf16 %v2170_v23, %v2169_v4 }
 0x492   : > { %v2199_v26 = vsel %vm419_vm5, %v2178_v44, %v2190_v45 }
 0x495   : > { %v9574_v13 = vpop.permute.xlu1 %2213  ;;  %v2192_v34 = vpop.permute.xlu0 %2191 }
 0x496   : > { %v2200_v36 = vsel %vm419_vm5, %v2180_v9, %v2192_v34  ;;  %v8703_v9 = vld [vmem:[%s10992_s4 + $0x48] sm:$0xff]   ;;  %v2203_v34 = vmul.f32 %v9636_v35, %v2199_v26 }
 0x497   : > { %v2204_v14 = vmul.f32 %v9636_v35, %v2200_v36 }
 0x499   : > { %v9576_v41 = vpop.permute.xlu1 %2225  ;;  %v9578_v50 = vpop.permute.xlu0 %2215  ;;  %v2206_v45 = vpack.c.bf16 %v2204_v14, %v2203_v34 }
 0x49d   : > { %v9580_v51 = vpop.permute.xlu1 %2247  ;;  %v9582_v52 = vpop.permute.xlu0 %2227 }
 0x4a1   : > { %v9584_v48 = vpop.permute.xlu1 %2259  ;;  %v9586_v53 = vpop.permute.xlu0 %2249 }
 0x4a5   : > { %v9588_v54 = vpop.permute.xlu1 %2281  ;;  %v9590_v37 = vpop.permute.xlu0 %2261 }
 0x4a9   : > { %v9592_v33 = vpop.permute.xlu1 %2293  ;;  %v9594_v55 = vpop.permute.xlu0 %2283 }
 0x4ad   : > { %v9596_v56 = vpop.permute.xlu1 %2315  ;;  %v9598_v57 = vpop.permute.xlu0 %2295 }
 0x4b1   : > { %v9600_v59 = vpop.permute.xlu1 %2327  ;;  %v9602_v18 = vpop.permute.xlu0 %2317 }
 0x4b5   : > { %v2106_v60 = vpop.permute.xlu1 %2105  ;;  %v9604_v61 = vpop.permute.xlu0 %2329 }
 0x4b9   : > { %v2118_v62 = vpop.permute.xlu1 %2117  ;;  %v2108_v63 = vpop.permute.xlu0 %2107 }
 0x4ba   : > { %v2129_v1 = vsel %vm383_vm1, %v2106_v60, %v2118_v62 }
 0x4bb   : > { %v2133_v32 = vmul.f32 %v9553_v0, %v2129_v1 }
 0x4bd   : > { %v2072_v58 = vpop.permute.xlu1 %2071  ;;  %v2120_v19 = vpop.permute.xlu0 %2119 }
 0x4be   : > { %v2130_v29 = vsel %vm383_vm1, %v2108_v63, %v2120_v19 }
 0x4bf   : > { %v2134_v31 = vmul.f32 %v9553_v0, %v2130_v29 }
 0x4c1   : > { %v2137_v11 = vpack.c.bf16 %v2134_v31, %v2133_v32  ;;  %v2084_v46 = vpop.permute.xlu1 %2083  ;;  %v2074_v49 = vpop.permute.xlu0 %2073  ;;  %v8704_v32 = vld [vmem:[%s10992_s4 + $0x58] sm:$0xff]  }
 0x4c2   : > { %v2095_v5 = vsel %vm366_vm2, %v2072_v58, %v2084_v46  ;;  %v2270_v46 = vsel %vm456_vm7, %v9586_v53, %v9590_v37  ;;  %v9682_v53 = vld [vmem:[%s10988_s0 + $0x5] ss:$0 sm:$0xff] }
 0x4c3   : > { %8048 = vmatpush3.bf16.msra.mxu1 %v2137_v11  ;;  %v2099_v12 = vmul.f32 %v9569_v39, %v2095_v5  ;;  %v2236_v11 = vsel %vm438_vm6, %v9578_v50, %v9582_v52  ;;  %v2235_v50 = vsel %vm438_vm6, %v9574_v13, %v9576_v41  ;;  %v2269_v52 = vsel %vm456_vm7, %v9580_v51, %v9584_v48  ;;  %v8705_v48 = vld [vmem:[%s10992_s4 + $0x60] sm:$0xff]   ;;  %v8706_v5 = vld [vmem:[%s10992_s4 + $0x68] sm:$0xff]  }
 0x4c4   : > { %8061 = vmatprep.subr.bf16.mxu1 %v8770_v27  ;;  %v2240_v2 = vmul.f32 %v9682_v53, %v2236_v11  ;;  %v2207_v51 = vpack.c.bf16 %v9490_v42, %v9480_v15 }
 0x4c5   : > { %v2140_v7 = vpop.permute.xlu1 %2139  ;;  %v2086_v8 = vpop.permute.xlu0 %2085 }
 0x4c6   : > { %v2096_v38 = vsel %vm366_vm2, %v2074_v49, %v2086_v8  ;;  %8050 = vmatmul.mubr.msk.bf16.vlgmr.msra.gmra.mxu1 %vm1514_vm11, %v8702_v3 }
 0x4c7   : > { %v2100_v40 = vmul.f32 %v9569_v39, %v2096_v38  ;;  %8062 = vmatpush3.bf16.msra.mxu1 %v2172_v6  ;;  %8065 = vmatprep.mubr.msk.bf16.mxu1 %vm8771_vm10, %v8770_v27  ;;  %v2239_v6 = vmul.f32 %v9682_v53, %v2235_v50 }
 0x4c8   : > { %8063 = vmatprep.subr.bf16.mxu1 %v8770_v27 }
 0x4c9   : > { %v2103_v16 = vpack.c.bf16 %v2100_v40, %v2099_v12  ;;  %v2152_v43 = vpop.permute.xlu1 %2151  ;;  %v2142_v10 = vpop.permute.xlu0 %2141  ;;  %v2242_v15 = vpack.c.bf16 %v2240_v2, %v2239_v6  ;;  %v2304_v12 = vsel %vm474_vm8, %v9594_v55, %v9598_v57  ;;  %v9721_v55 = vld [vmem:[%s10988_s0 + $0x7] ss:$0 sm:$0xff]  ;;  %v8711_v6 = vld [vmem:[%s10993_s5 + $0x10] sm:$0xff]  }
 0x4ca   : > { %v2163_v44 = vsel %vm401_vm3, %v2140_v7, %v2152_v43  ;;  %v2273_v7 = vmul.f32 %v9688_v30, %v2269_v52  ;;  %v2308_v57 = vmul.f32 %v9721_v55, %v2304_v12  ;;  %v8709_v2 = vld [vmem:[%s10992_s4 + $0x80] sm:$0xff]  }
 0x4cb   : > { %8056 = vmatpush3.bf16.msra.mxu0 %v2103_v16  ;;  %v2167_v1 = vmul.f32 %v9615_v20, %v2163_v44  ;;  %v2303_v16 = vsel %vm474_vm8, %v9588_v54, %v9592_v33  ;;  %v8707_v54 = vld [vmem:[%s10992_s4 + $0x70] sm:$0xff]  }
 0x4cc   : > { %8069 = vmatprep.subr.bf16.mxu0 %v8770_v27  ;;  %v2307_v33 = vmul.f32 %v9721_v55, %v2303_v16 }
 0x4cd   : > { %v2174_v60 = vpop.permute.xlu1 %2173  ;;  %v2154_v62 = vpop.permute.xlu0 %2153 }
 0x4ce   : > { %v2164_v63 = vsel %vm401_vm3, %v2142_v10, %v2154_v62  ;;  %8058 = vmatmul.mubr.msk.bf16.vlgmr.msra.gmra.mxu0 %vm1514_vm11, %v8703_v9  ;;  %v2310_v44 = vpack.c.bf16 %v2308_v57, %v2307_v33  ;;  %v2338_v62 = vsel %vm492_vm9, %v9602_v18, %v9604_v61  ;;  %v9749_v18 = vld [vmem:[%s10988_s0 + $0x8] ss:$0 sm:$0xff] }
 0x4cf   : > { %v2168_v58 = vmul.f32 %v9615_v20, %v2164_v63  ;;  %8070 = vmatpush3.bf16.msra.mxu0 %v2206_v45  ;;  %8073 = vmatprep.mubr.msk.bf16.mxu0 %vm8771_vm10, %v8770_v27  ;;  %v2342_v61 = vmul.f32 %v9749_v18, %v2338_v62 }
 0x4d0   : > { %8071 = vmatprep.subr.bf16.mxu0 %v8770_v27 }
 0x4d1   : > { %v2171_v19 = vpack.c.bf16 %v2168_v58, %v2167_v1  ;;  %v2186_v22 = vpop.permute.xlu1 %2185  ;;  %v2176_v29 = vpop.permute.xlu0 %2175 }
 0x4d2   : > { %v2197_v31 = vsel %vm419_vm5, %v2174_v60, %v2186_v22 }
 0x4d3   : > { %8064 = vmatpush3.bf16.msra.mxu1 %v2171_v19  ;;  %v2201_v3 = vmul.f32 %v9636_v35, %v2197_v31  ;;  %v2337_v19 = vsel %vm492_vm9, %v9596_v56, %v9600_v59  ;;  %v8708_v31 = vld [vmem:[%s10992_s4 + $0x78] sm:$0xff]  }
 0x4d4   : > { %8077 = vmatprep.subr.bf16.mxu1 %v8770_v27 }
 0x4d5   : > { %v2210_v47 = vpop.permute.xlu1 %2209  ;;  %v2188_v23 = vpop.permute.xlu0 %2187 }
 0x4d6   : > { %v2198_v49 = vsel %vm419_vm5, %v2176_v29, %v2188_v23  ;;  %8066 = vmatmul.mubr.msk.bf16.vlgmr.msra.gmra.mxu1 %vm1514_vm11, %v8704_v32 }
 0x4d7   : > { %v2202_v4 = vmul.f32 %v9636_v35, %v2198_v49  ;;  %8078 = vmatpush3.bf16.msra.mxu1 %v2208_v21  ;;  %8081 = vmatprep.mubr.msk.bf16.mxu1 %vm8771_vm10, %v8770_v27  ;;  %v2274_v21 = vmul.f32 %v9688_v30, %v2270_v46 }
 0x4d8   : > { %8079 = vmatprep.subr.bf16.mxu1 %v8770_v27 }
 0x4d9   : > { %v2205_v13 = vpack.c.bf16 %v2202_v4, %v2201_v3  ;;  %v2222_v41 = vpop.permute.xlu1 %2221  ;;  %v2212_v37 = vpop.permute.xlu0 %2211  ;;  %v2276_v42 = vpack.c.bf16 %v2274_v21, %v2273_v7 }
 0x4da   : > { %v2233_v8 = vsel %vm438_vm6, %v2210_v47, %v2222_v41  ;;  %v2341_v47 = vmul.f32 %v9749_v18, %v2337_v19 }
 0x4db   : > { %8072 = vmatpush3.bf16.msra.mxu0 %v2205_v13  ;;  %8080 = vmatpush3.bf16.msra.mxu1 %v2207_v51  ;;  %v2237_v26 = vmul.f32 %v9682_v53, %v2233_v8 }
 0x4dc   : > { %8085 = vmatprep.subr.bf16.mxu0 %v8770_v27  ;;  %8093 = vmatprep.subr.bf16.mxu1 %v8770_v27  ;;  %v2344_v59 = vpack.c.bf16 %v2342_v61, %v2341_v47 }
 0x4dd   : > { %v2244_v36 = vpop.permute.xlu1 %2243  ;;  %v2224_v38 = vpop.permute.xlu0 %2223 }
 0x4de   : > { %v2234_v40 = vsel %vm438_vm6, %v2212_v37, %v2224_v38  ;;  %8074 = vmatmul.mubr.msk.bf16.vlgmr.msra.gmra.mxu0 %vm1514_vm11, %v8705_v48  ;;  %8082 = vmatmul.mubr.msk.bf16.vlgmr.msra.gmra.mxu1 %vm1514_vm11, %v8706_v5  ;;  %v8710_v5 = vld [vmem:[%s10992_s4 + $0x88] sm:$0xff]  }
 0x4df   : > { %v2238_v14 = vmul.f32 %v9682_v53, %v2234_v40  ;;  %8086 = vmatpush3.bf16.msra.mxu0 %v2242_v15  ;;  %8094 = vmatpush3.bf16.msra.mxu1 %v2276_v42 }
 0x4e0   : > { %8087 = vmatprep.subr.bf16.mxu0 %v8770_v27  ;;  %8089 = vmatprep.mubr.msk.bf16.mxu0 %vm8771_vm10, %v8770_v27 }
 0x4e1   : > { %v2241_v43 = vpack.c.bf16 %v2238_v14, %v2237_v26  ;;  %v2256_v10 = vpop.permute.xlu1 %2255  ;;  %v2246_v9 = vpop.permute.xlu0 %2245  ;;  %8095 = vmatprep.subr.bf16.mxu1 %v8770_v27  ;;  %8097 = vmatprep.mubr.msk.bf16.mxu1 %vm8771_vm10, %v8770_v27 }
 0x4e2   : > { %v2267_v34 = vsel %vm456_vm7, %v2244_v36, %v2256_v10 }
 0x4e3   : > { %8088 = vmatpush3.bf16.msra.mxu0 %v2241_v43  ;;  %v2271_v1 = vmul.f32 %v9688_v30, %v2267_v34 }
 0x4e4   : > { %8101 = vmatprep.subr.bf16.mxu0 %v8770_v27 }
 0x4e5   : > { %v2278_v45 = vpop.permute.xlu1 %2277  ;;  %v2258_v60 = vpop.permute.xlu0 %2257 }
 0x4e6   : > { %v2268_v63 = vsel %vm456_vm7, %v2246_v9, %v2258_v60  ;;  %8090 = vmatmul.mubr.msk.bf16.vlgmr.msra.gmra.mxu0 %vm1514_vm11, %v8707_v54 }
 0x4e7   : > { %v2272_v58 = vmul.f32 %v9688_v30, %v2268_v63  ;;  %8102 = vmatpush3.bf16.msra.mxu0 %v2310_v44  ;;  %8105 = vmatprep.mubr.msk.bf16.mxu0 %vm8771_vm10, %v8770_v27 }
 0x4e8   : > { %8103 = vmatprep.subr.bf16.mxu0 %v8770_v27 }
 0x4e9   : > { %v2275_v22 = vpack.c.bf16 %v2272_v58, %v2271_v1  ;;  %v2290_v29 = vpop.permute.xlu1 %2289  ;;  %v2280_v32 = vpop.permute.xlu0 %2279 }
 0x4ea   : > { %v2301_v56 = vsel %vm474_vm8, %v2278_v45, %v2290_v29 }
 0x4eb   : > { %8096 = vmatpush3.bf16.msra.mxu1 %v2275_v22  ;;  %v2305_v49 = vmul.f32 %v9721_v55, %v2301_v56 }
 0x4ec   : > { %8109 = vmatprep.subr.bf16.mxu1 %v8770_v27 }
 0x4ed   : > { %v2312_v23 = vpop.permute.xlu1 %2311  ;;  %v2292_v11 = vpop.permute.xlu0 %2291 }
 0x4ee   : > { %v2302_v46 = vsel %vm474_vm8, %v2280_v32, %v2292_v11  ;;  %8098 = vmatmul.mubr.msk.bf16.vlgmr.msra.gmra.mxu1 %vm1514_vm11, %v8708_v31 }
 0x4ef   : > { %v2306_v3 = vmul.f32 %v9721_v55, %v2302_v46  ;;  %8110 = vmatpush3.bf16.msra.mxu1 %v2344_v59  ;;  %8113 = vmatprep.mubr.msk.bf16.mxu1 %vm8771_vm10, %v8770_v27 }
 0x4f0   : > { %8111 = vmatprep.subr.bf16.mxu1 %v8770_v27 }
 0x4f1   : > { %v2309_v4 = vpack.c.bf16 %v2306_v3, %v2305_v49  ;;  %v2324_v50 = vpop.permute.xlu1 %2323  ;;  %v2314_v52 = vpop.permute.xlu0 %2313 }
 0x4f2   : > { %v2335_v21 = vsel %vm492_vm9, %v2312_v23, %v2324_v50 }
 0x4f3   : > { %8104 = vmatpush3.bf16.msra.mxu0 %v2309_v4  ;;  %v2339_v37 = vmul.f32 %v9749_v18, %v2335_v21 }
 0x4f5   : > { %v2326_v13 = vpop.permute.xlu0 %2325 }
 0x4f6   : > { %v2336_v41 = vsel %vm492_vm9, %v2314_v52, %v2326_v13  ;;  %8106 = vmatmul.mubr.msk.bf16.vlgmr.msra.gmra.mxu0 %vm1514_vm11, %v8709_v2 }
 0x4f7   : > { %v2340_v51 = vmul.f32 %v9749_v18, %v2336_v41  ;;  %8119 = vmatprep.mubr.msk.bf16.mxu0 %vm2003_vm12, %v8711_v6 }
 0x4f9   : > { %v2343_v48 = vpack.c.bf16 %v2340_v51, %v2339_v37 }
 0x4fb   : > { %8112 = vmatpush3.bf16.msra.mxu1 %v2343_v48 }
 0x4fc   : > { %8123 = vmatprep.subr.bf16.mxu1 %v8770_v27 }
 0x4fe   : > { %8114 = vmatmul.mubr.msk.bf16.vlgmr.msra.gmra.mxu1 %vm1514_vm11, %v8710_v5 }
 0x4ff   : > { %8127 = vmatprep.mubr.msk.bf16.mxu1 %vm8771_vm10, %v8770_v27 }
 0x586   : > { %v2393_v7 = vpop.f32.mrf.mxu1 }
 0x588   : > { %v8051_v8 = vpop.f32.mrf.mxu1 }
 0x58a   : > { %v2396_v15 = vpop.f32.mrf.mxu1 }
 0x58c   : > { %v8052_v42 = vpop.f32.mrf.mxu1 }
 0x58e   : > { %v2442_v36 = vpop.f32.mrf.mxu0 }
 0x58f   : > { %v2443_v1 = vadd.f32 %v2442_v36, %v2393_v7  ;;  %v8712_v36 = vld [vmem:[%s10993_s5 + $0x18] sm:$0xff]  }
 0x590   : > { %v8059_v38 = vpop.f32.mrf.mxu0 }
 0x592   : > { %v2445_v12 = vpop.f32.mrf.mxu0 }
 0x593   : > { %v2446_v22 = vadd.f32 %v2445_v12, %v2396_v15 }
 0x594   : > { %v8060_v40 = vpop.f32.mrf.mxu0 }
 0x596   : > { %v2494_v26 = vpop.f32.mrf.mxu1 }
 0x597   : > { %v2501_v61 = vadd.f32 %v2494_v26, %v2443_v1 }
 0x598   : > { %v8067_v14 = vpop.f32.mrf.mxu1 }
 0x59a   : > { %v2497_v16 = vpop.f32.mrf.mxu1 }
 0x59b   : > { %v2502_v31 = vadd.f32 %v2497_v16, %v2446_v22 }
 0x59c   : > { %v8068_v57 = vpop.f32.mrf.mxu1 }
 0x59e   : > { %v2548_v43 = vpop.f32.mrf.mxu0  ;;  %v2602_v10 = vpop.f32.mrf.mxu1 }
 0x59f   : > { %v2555_v47 = vadd.f32 %v2548_v43, %v2501_v61 }
 0x5a0   : > { %v8075_v9 = vpop.f32.mrf.mxu0  ;;  %v8083_v54 = vpop.f32.mrf.mxu1 }
 0x5a1   : > { %v2609_v23 = vadd.f32 %v2602_v10, %v2555_v47 }
 0x5a2   : > { %v2551_v33 = vpop.f32.mrf.mxu0  ;;  %v2605_v34 = vpop.f32.mrf.mxu1 }
 0x5a3   : > { %v2556_v11 = vadd.f32 %v2551_v33, %v2502_v31 }
 0x5a4   : > { %v8076_v44 = vpop.f32.mrf.mxu0  ;;  %v8084_v45 = vpop.f32.mrf.mxu1 }
 0x5a5   : > { %v2610_v3 = vadd.f32 %v2605_v34, %v2556_v11 }
 0x5a6   : > { %v2656_v60 = vpop.f32.mrf.mxu0 }
 0x5a7   : > { %v2663_v4 = vadd.f32 %v2656_v60, %v2609_v23 }
 0x5a8   : > { %v8091_v62 = vpop.f32.mrf.mxu0 }
 0x5aa   : > { %v2659_v63 = vpop.f32.mrf.mxu0 }
 0x5ab   : > { %v2664_v52 = vadd.f32 %v2659_v63, %v2610_v3  ;;  %v3186_v63 = vld [vmem:[%s10995_s7] sm:$0xff] }
 0x5ac   : > { %v8092_v58 = vpop.f32.mrf.mxu0 }
 0x5ae   : > { %v2710_v19 = vpop.f32.mrf.mxu1 }
 0x5af   : > { %v2717_v2 = vadd.f32 %v2710_v19, %v2663_v4 }
 0x5b0   : > { %v8099_v29 = vpop.f32.mrf.mxu1 }
 0x5b2   : > { %v2713_v32 = vpop.f32.mrf.mxu1 }
 0x5b3   : > { %v2718_v13 = vadd.f32 %v2713_v32, %v2664_v52  ;;  %v3187_v32 = vld [vmem:[%s10995_s7 + $0x8] sm:$0xff] }
 0x5b4   : > { %v8100_v56 = vpop.f32.mrf.mxu1 }
 0x5b6   : > { %v2764_v59 = vpop.f32.mrf.mxu0 }
 0x5b7   : > { %v2771_v41 = vadd.f32 %v2764_v59, %v2717_v2 }
 0x5b8   : > { %v8107_v46 = vpop.f32.mrf.mxu0 }
 0x5ba   : > { %v2767_v49 = vpop.f32.mrf.mxu0 }
 0x5bb   : > { %v2772_v51 = vadd.f32 %v2767_v49, %v2718_v13 }
 0x5bc   : > { %v8108_v50 = vpop.f32.mrf.mxu0 }
 0x5be   : > { %v2818_v21 = vpop.f32.mrf.mxu1 }
 0x5bf   : > { %v2825_v48 = vadd.f32 %v2818_v21, %v2771_v41 }
 0x5c0   : > { %v8115_v37 = vpop.f32.mrf.mxu1 }
 0x5c1   : > { %v2827_v8 = vmax.f32 %v2825_v48, 0.0 }
 0x5c2   : > { %v2821_v5 = vpop.f32.mrf.mxu1 }
 0x5c3   : > { %v2826_v6 = vadd.f32 %v2821_v5, %v2772_v51 }
 0x5c4   : > { %v8116_v7 = vpop.f32.mrf.mxu1 }
 0x5c5   : > { %v2828_v15 = vmax.f32 %v2826_v6, 0.0 }
 0x5c7   : > { %v2829_v42 = vpack.c.bf16 %v2828_v15, %v2827_v8 }
 0x5c9   : > { %8117 = vmatprep.subr.bf16.mxu0 %v2829_v42 }
 0x5ca   : > { %8118 = vmatpush3.bf16.msra.mxu0 %v2829_v42 }
 0x5cb   : > { %8131 = vmatprep.subr.bf16.mxu0 %v8770_v27 }
 0x5cd   : > { %8120 = vmatmul.mubr.msk.bf16.vlgmr.msra.gmra.mxu0 %vm2003_vm12, %v8712_v36 }
 0x5ce   : > { %8135 = vmatprep.mubr.msk.bf16.mxu0 %vm8771_vm10, %v8770_v27 }
 0x68d   : > { %v8121_v38 = vpop.f32.mrf.mxu0 }
 0x68e   : > { %v2902_v12 = vadd.f32 %v8121_v38, %v9401_v24 }
 0x68f   : > { %v2885_v40 = vpop.f32.mrf.mxu0 }
 0x690   : > { %v9792_v26 = vmax.f32 %v2902_v12, 0.0  ;;  %v2900_v24 = vadd.f32 %v2885_v40, %v9473_v28 }
 0x691   : > { %v8122_v14 = vpop.f32.mrf.mxu0 }
 0x692   : > { %v2903_v16 = vadd.f32 %v8122_v14, %v9407_v25  ;;  %2916 = vrot.lane.b32.xlu1 %v9792_v26, %s11025_s24  ;;  %v9848_v43 = vmax.f32 %v2900_v24, 0.0 }
 0x693   : > { %v2888_v25 = vpop.f32.mrf.mxu0 }
 0x694   : > { %v9797_v57 = vmax.f32 %v2903_v16, 0.0  ;;  %v2901_v10 = vadd.f32 %v2888_v25, %v9483_v17 }
 0x696   : > { %2928 = vrot.lane.b32.xlu1 %v9792_v26, %s11023_s26  ;;  %2918 = vrot.lane.b32.xlu0 %v9797_v57, %s11025_s24  ;;  %v9855_v9 = vmax.f32 %v2901_v10, 0.0 }
 0x69a   : > { %2950 = vrot.lane.b32.xlu1 %v9792_v26, %s8753_s23  ;;  %2930 = vrot.lane.b32.xlu0 %v9797_v57, %s11023_s26 }
 0x69e   : > { %2962 = vrot.lane.b32.xlu1 %v9792_v26, %s8755_s25  ;;  %2952 = vrot.lane.b32.xlu0 %v9797_v57, %s8753_s23 }
 0x6a2   : > { %3018 = vrot.lane.b32.xlu1 %v9792_v26, %s11035_s19  ;;  %2964 = vrot.lane.b32.xlu0 %v9797_v57, %s8755_s25 }
 0x6a6   : > { %3030 = vrot.lane.b32.xlu1 %v9792_v26, %s11036_s22  ;;  %3020 = vrot.lane.b32.xlu0 %v9797_v57, %s11035_s19 }
 0x6aa   : > { %2984 = vrot.lane.b32.xlu1 %v9792_v26, %s11037_s29  ;;  %3032 = vrot.lane.b32.xlu0 %v9797_v57, %s11036_s22 }
 0x6ae   : > { %2996 = vrot.lane.b32.xlu1 %v9792_v26, %s11038_s30  ;;  %2986 = vrot.lane.b32.xlu0 %v9797_v57, %s11037_s29 }
 0x6b2   : > { %3054 = vrot.lane.b32.xlu1 %v9792_v26, %s11033_s12  ;;  %2998 = vrot.lane.b32.xlu0 %v9797_v57, %s11038_s30 }
 0x6b6   : > { %3066 = vrot.lane.b32.xlu1 %v9792_v26, %s11027_s15  ;;  %3056 = vrot.lane.b32.xlu0 %v9797_v57, %s11033_s12 }
 0x6ba   : > { %3088 = vrot.lane.b32.xlu1 %v9792_v26, %s11028_s16  ;;  %3068 = vrot.lane.b32.xlu0 %v9797_v57, %s11027_s15 }
 0x6be   : > { %3100 = vrot.lane.b32.xlu1 %v9792_v26, %s11029_s21  ;;  %3090 = vrot.lane.b32.xlu0 %v9797_v57, %s11028_s16 }
 0x6c2   : > { %3122 = vrot.lane.b32.xlu1 %v9792_v26, %s11030_s17  ;;  %3102 = vrot.lane.b32.xlu0 %v9797_v57, %s11029_s21 }
 0x6c6   : > { %2912 = vrot.lane.b32.xlu1 %v9848_v43, %s11025_s24  ;;  %3124 = vrot.lane.b32.xlu0 %v9797_v57, %s11030_s17 }
 0x6ca   : > { %2924 = vrot.lane.b32.xlu1 %v9848_v43, %s11023_s26  ;;  %2914 = vrot.lane.b32.xlu0 %v9855_v9, %s11025_s24  ;;  %s11039_s24 = smov 73  }
 0x6ce   : > { %2946 = vrot.lane.b32.xlu1 %v9848_v43, %s8753_s23  ;;  %2926 = vrot.lane.b32.xlu0 %v9855_v9, %s11023_s26  ;;  %s11040_s26 = smov 9  }
 0x6d2   : > { %2958 = vrot.lane.b32.xlu1 %v9848_v43, %s8755_s25  ;;  %2948 = vrot.lane.b32.xlu0 %v9855_v9, %s8753_s23 }
 0x6d6   : > { %3014 = vrot.lane.b32.xlu1 %v9848_v43, %s11035_s19  ;;  %2960 = vrot.lane.b32.xlu0 %v9855_v9, %s8755_s25 }
 0x6da   : > { %3026 = vrot.lane.b32.xlu1 %v9848_v43, %s11036_s22  ;;  %3016 = vrot.lane.b32.xlu0 %v9855_v9, %s11035_s19 }
 0x6de   : > { %3134 = vrot.lane.b32.xlu1 %v9792_v26, %s11031_s11  ;;  %3028 = vrot.lane.b32.xlu0 %v9855_v9, %s11036_s22 }
 0x6e2   : > { %2980 = vrot.lane.b32.xlu1 %v9848_v43, %s11037_s29  ;;  %3136 = vrot.lane.b32.xlu0 %v9797_v57, %s11031_s11 }
 0x6e6   : > { %2992 = vrot.lane.b32.xlu1 %v9848_v43, %s11038_s30  ;;  %2982 = vrot.lane.b32.xlu0 %v9855_v9, %s11037_s29 }
 0x6ea   : > { %3050 = vrot.lane.b32.xlu1 %v9848_v43, %s11033_s12  ;;  %2994 = vrot.lane.b32.xlu0 %v9855_v9, %s11038_s30 }
 0x6ee   : > { %3062 = vrot.lane.b32.xlu1 %v9848_v43, %s11027_s15  ;;  %3052 = vrot.lane.b32.xlu0 %v9855_v9, %s11033_s12 }
 0x6f2   : > { %3084 = vrot.lane.b32.xlu1 %v9848_v43, %s11028_s16  ;;  %3064 = vrot.lane.b32.xlu0 %v9855_v9, %s11027_s15 }
 0x6f6   : > { %3096 = vrot.lane.b32.xlu1 %v9848_v43, %s11029_s21  ;;  %3086 = vrot.lane.b32.xlu0 %v9855_v9, %s11028_s16 }
 0x6fa   : > { %3118 = vrot.lane.b32.xlu1 %v9848_v43, %s11030_s17  ;;  %3098 = vrot.lane.b32.xlu0 %v9855_v9, %s11029_s21 }
 0x6fe   : > { %3130 = vrot.lane.b32.xlu1 %v9848_v43, %s11031_s11  ;;  %3120 = vrot.lane.b32.xlu0 %v9855_v9, %s11030_s17 }
 0x702   : > { %3156 = vrot.lane.b32.xlu1 %v9792_v26, %s11034_s20  ;;  %3132 = vrot.lane.b32.xlu0 %v9855_v9, %s11031_s11 }
 0x704   : > { %v2917_v28 = vpop.permute.xlu1 %2916 }
 0x706   : > { %3168 = vrot.lane.b32.xlu1 %v9792_v26, %s11032_s18  ;;  %3158 = vrot.lane.b32.xlu0 %v9797_v57, %s11034_s20 }
 0x708   : > { %v2929_v17 = vpop.permute.xlu1 %2928  ;;  %v2919_v54 = vpop.permute.xlu0 %2918 }
 0x709   : > { %v2938_v33 = vsel %vm366_vm2, %v2917_v28, %v2929_v17 }
 0x70a   : > { %3152 = vrot.lane.b32.xlu1 %v9848_v43, %s11034_s20  ;;  %3170 = vrot.lane.b32.xlu0 %v9797_v57, %s11032_s18  ;;  %v2942_v60 = vmul.f32 %v9569_v39, %v2938_v33 }
 0x70c   : > { %v2951_v34 = vpop.permute.xlu1 %2950  ;;  %v2931_v44 = vpop.permute.xlu0 %2930 }
 0x70d   : > { %v2939_v45 = vsel %vm366_vm2, %v2919_v54, %v2931_v44  ;;  %v8713_v54 = vld [vmem:[%s10994_s6] sm:$0xff]  }
 0x70e   : > { %v2943_v62 = vmul.f32 %v9569_v39, %v2939_v45  ;;  %3164 = vrot.lane.b32.xlu1 %v9848_v43, %s11032_s18  ;;  %3154 = vrot.lane.b32.xlu0 %v9855_v9, %s11034_s20 }
 0x710   : > { %v2945_v1 = vpack.c.bf16 %v2943_v62, %v2942_v60  ;;  %v2963_v58 = vpop.permute.xlu1 %2962  ;;  %v2953_v19 = vpop.permute.xlu0 %2952 }
 0x711   : > { %v2972_v61 = vsel %vm383_vm1, %v2951_v34, %v2963_v58 }
 0x712   : > { %3190 = vperm.xlu1 %8672, %v3186_v63   ;;  %8124 = vmatpush3.bf16.msra.mxu1 %v2945_v1  ;;  %v2976_v47 = vmul.f32 %v9553_v0, %v2972_v61  ;;  %v8714_v61 = vld [vmem:[%s10994_s6 + $0x8] sm:$0xff]  }
 0x713   : > { %3166 = vrot.lane.b32.xlu0 %v9855_v9, %s11032_s18  ;;  %8125 = vmatprep.subr.bf16.mxu1 %v8770_v27 }
 0x714   : > { %v3019_v22 = vpop.permute.xlu1 %3018  ;;  %v2965_v29 = vpop.permute.xlu0 %2964 }
 0x715   : > { %v2973_v31 = vsel %vm383_vm1, %v2953_v19, %v2965_v29 }
 0x716   : > { %v2977_v56 = vmul.f32 %v9553_v0, %v2973_v31 }
 0x717   : > { %3195 = vperm.xlu0 %8671, %v3187_v32   ;;  %v10004_v32 = vpack.c.bf16 %v9797_v57, %v9792_v26 }
 0x718   : > { %v9946_v59 = vpack.c.bf16 %v2977_v56, %v2976_v47  ;;  %v3031_v23 = vpop.permute.xlu1 %3030  ;;  %v3021_v11 = vpop.permute.xlu0 %3020 }
 0x719   : > { %v3040_v24 = vsel %vm419_vm5, %v3019_v22, %v3031_v23 }
 0x71a   : > { %8132 = vmatpush3.bf16.msra.mxu0 %v9946_v59  ;;  %v3044_v33 = vmul.f32 %v9636_v35, %v3040_v24 }
 0x71b   : > { %8133 = vmatprep.subr.bf16.mxu0 %v8770_v27 }
 0x71c   : > { %v9950_v46 = vpop.permute.xlu1 %2984  ;;  %v3033_v49 = vpop.permute.xlu0 %3032 }
 0x71d   : > { %v3041_v12 = vsel %vm419_vm5, %v3021_v11, %v3033_v49 }
 0x71e   : > { %v3045_v25 = vmul.f32 %v9636_v35, %v3041_v12 }
 0x720   : > { %v2997_v3 = vpop.permute.xlu1 %2996  ;;  %v2987_v4 = vpop.permute.xlu0 %2986  ;;  %v9985_v44 = vpack.c.bf16 %v3045_v25, %v3044_v33  ;;  %v8718_v25 = vld [vmem:[%s10994_s6 + $0x28] sm:$0xff]  }
 0x721   : > { %v3006_v11 = vsel %vm401_vm3, %v9950_v46, %v2997_v3  ;;  %v8716_v46 = vld [vmem:[%s10994_s6 + $0x18] sm:$0xff]  }
 0x722   : > { %v3010_v3 = vmul.f32 %v9615_v20, %v3006_v11 }
 0x724   : > { %v9952_v50 = vpop.permute.xlu1 %3054  ;;  %v2999_v52 = vpop.permute.xlu0 %2998 }
 0x725   : > { %v3007_v31 = vsel %vm401_vm3, %v2987_v4, %v2999_v52  ;;  %v8715_v52 = vld [vmem:[%s10994_s6 + $0x10] sm:$0xff]  }
 0x726   : > { %v3011_v26 = vmul.f32 %v9615_v20, %v3007_v31 }
 0x728   : > { %v9954_v2 = vpop.permute.xlu1 %3066  ;;  %v9956_v21 = vpop.permute.xlu0 %3056 }
 0x72c   : > { %v9958_v13 = vpop.permute.xlu1 %3088  ;;  %v9960_v41 = vpop.permute.xlu0 %3068 }
 0x730   : > { %v9962_v37 = vpop.permute.xlu1 %3100  ;;  %v9964_v51 = vpop.permute.xlu0 %3090 }
 0x734   : > { %v9966_v48 = vpop.permute.xlu1 %3122  ;;  %v9968_v5 = vpop.permute.xlu0 %3102 }
 0x738   : > { %v2913_v6 = vpop.permute.xlu1 %2912  ;;  %v9970_v7 = vpop.permute.xlu0 %3124 }
 0x73c   : > { %v2925_v8 = vpop.permute.xlu1 %2924  ;;  %v2915_v15 = vpop.permute.xlu0 %2914 }
 0x73d   : > { %v2936_v42 = vsel %vm366_vm2, %v2913_v6, %v2925_v8 }
 0x73e   : > { %v2940_v14 = vmul.f32 %v9569_v39, %v2936_v42 }
 0x740   : > { %v2947_v36 = vpop.permute.xlu1 %2946  ;;  %v2927_v38 = vpop.permute.xlu0 %2926 }
 0x741   : > { %v2937_v40 = vsel %vm366_vm2, %v2915_v15, %v2927_v38  ;;  %v8717_v38 = vld [vmem:[%s10994_s6 + $0x20] sm:$0xff]  }
 0x742   : > { %v2941_v16 = vmul.f32 %v9569_v39, %v2937_v40 }
 0x744   : > { %v2944_v10 = vpack.c.bf16 %v2941_v16, %v2940_v14  ;;  %v2959_v28 = vpop.permute.xlu1 %2958  ;;  %v2949_v17 = vpop.permute.xlu0 %2948  ;;  %v3076_v14 = vsel %vm438_vm6, %v9952_v50, %v9954_v2 }
 0x745   : > { %v2970_v34 = vsel %vm383_vm1, %v2947_v36, %v2959_v28  ;;  %v3077_v36 = vsel %vm438_vm6, %v9956_v21, %v9960_v41 }
 0x746   : > { %8126 = vmatpush3.bf16.msra.mxu1 %v2944_v10  ;;  %v2974_v62 = vmul.f32 %v9553_v0, %v2970_v34  ;;  %v3081_v16 = vmul.f32 %v9682_v53, %v3077_v36 }
 0x747   : > { %8139 = vmatprep.subr.bf16.mxu1 %v8770_v27 }
 0x748   : > { %v3015_v39 = vpop.permute.xlu1 %3014  ;;  %v2961_v45 = vpop.permute.xlu0 %2960 }
 0x749   : > { %v2971_v60 = vsel %vm383_vm1, %v2949_v17, %v2961_v45  ;;  %8128 = vmatmul.mubr.msk.bf16.vlgmr.msra.gmra.mxu1 %vm1514_vm11, %v8713_v54  ;;  %v8719_v54 = vld [vmem:[%s10994_s6 + $0x30] sm:$0xff]  }
 0x74a   : > { %v2975_v63 = vmul.f32 %v9553_v0, %v2971_v60  ;;  %8140 = vmatpush3.bf16.msra.mxu1 %v9985_v44  ;;  %8143 = vmatprep.mubr.msk.bf16.mxu1 %vm8771_vm10, %v8770_v27 }
 0x74b   : > { %8141 = vmatprep.subr.bf16.mxu1 %v8770_v27 }
 0x74c   : > { %v2978_v1 = vpack.c.bf16 %v2975_v63, %v2974_v62  ;;  %v3027_v58 = vpop.permute.xlu1 %3026  ;;  %v3017_v19 = vpop.permute.xlu0 %3016  ;;  %v3111_v62 = vsel %vm456_vm7, %v9964_v51, %v9968_v5  ;;  %v3110_v63 = vsel %vm456_vm7, %v9958_v13, %v9962_v37  ;;  %v8721_v13 = vld [vmem:[%s10994_s6 + $0x40] sm:$0xff]  }
 0x74d   : > { %v3038_v22 = vsel %vm419_vm5, %v3015_v39, %v3027_v58  ;;  %v3115_v51 = vmul.f32 %v9688_v30, %v3111_v62  ;;  %v3114_v37 = vmul.f32 %v9688_v30, %v3110_v63 }
 0x74e   : > { %8134 = vmatpush3.bf16.msra.mxu0 %v2978_v1  ;;  %v3042_v56 = vmul.f32 %v9636_v35, %v3038_v22 }
 0x74f   : > { %8147 = vmatprep.subr.bf16.mxu0 %v8770_v27 }
 0x750   : > { %v10000_v0 = vpop.permute.xlu1 %3134  ;;  %v3029_v29 = vpop.permute.xlu0 %3028 }
 0x751   : > { %v3039_v47 = vsel %vm419_vm5, %v3017_v19, %v3029_v29  ;;  %8136 = vmatmul.mubr.msk.bf16.vlgmr.msra.gmra.mxu0 %vm1514_vm11, %v8714_v61  ;;  %v3144_v19 = vsel %vm474_vm8, %v9966_v48, %v10000_v0  ;;  %v3117_v61 = vpack.c.bf16 %v3115_v51, %v3114_v37  ;;  %v8722_v48 = vld [vmem:[%s10994_s6 + $0x48] sm:$0xff]  }
 0x752   : > { %v3043_v23 = vmul.f32 %v9636_v35, %v3039_v47  ;;  %8148 = vmatpush3.bf16.msra.mxu0 %v10004_v32  ;;  %8151 = vmatprep.mubr.msk.bf16.mxu0 %vm8771_vm10, %v8770_v27  ;;  %v10024_v35 = vpack.c.bf16 %v9855_v9, %v9848_v43  ;;  %v3013_v43 = vpack.c.bf16 %v3011_v26, %v3010_v3 }
 0x753   : > { %8149 = vmatprep.subr.bf16.mxu0 %v8770_v27  ;;  %v3148_v0 = vmul.f32 %v9721_v55, %v3144_v19 }
 0x754   : > { %v10018_v57 = vpack.c.bf16 %v3043_v23, %v3042_v56  ;;  %v2981_v49 = vpop.permute.xlu1 %2980  ;;  %v10020_v4 = vpop.permute.xlu0 %3136 }
 0x755   : > { %v3145_v58 = vsel %vm474_vm8, %v9970_v7, %v10020_v4 }
 0x756   : > { %8142 = vmatpush3.bf16.msra.mxu1 %v10018_v57  ;;  %8150 = vmatpush3.bf16.msra.mxu0 %v10024_v35  ;;  %v3149_v22 = vmul.f32 %v9721_v55, %v3145_v58 }
 0x757   : > { %8155 = vmatprep.subr.bf16.mxu1 %v8770_v27  ;;  %8163 = vmatprep.subr.bf16.mxu0 %v8770_v27 }
 0x758   : > { %v2993_v9 = vpop.permute.xlu1 %2992  ;;  %v2983_v6 = vpop.permute.xlu0 %2982  ;;  %v3151_v11 = vpack.c.bf16 %v3149_v22, %v3148_v0 }
 0x759   : > { %8144 = vmatmul.mubr.msk.bf16.vlgmr.msra.gmra.mxu1 %vm1514_vm11, %v8715_v52  ;;  %8152 = vmatmul.mubr.msk.bf16.vlgmr.msra.gmra.mxu0 %vm1514_vm11, %v8716_v46  ;;  %v3004_v8 = vsel %vm401_vm3, %v2981_v49, %v2993_v9 }
 0x75a   : > { %8156 = vmatpush3.bf16.msra.mxu1 %v9946_v59  ;;  %8164 = vmatpush3.bf16.msra.mxu0 %v3013_v43  ;;  %v3008_v12 = vmul.f32 %v9615_v20, %v3004_v8 }
 0x75b   : > { %8157 = vmatprep.subr.bf16.mxu1 %v8770_v27  ;;  %8159 = vmatprep.mubr.msk.bf16.mxu1 %vm8771_vm10, %v8770_v27 }
 0x75c   : > { %v3051_v15 = vpop.permute.xlu1 %3050  ;;  %v2995_v42 = vpop.permute.xlu0 %2994  ;;  %8165 = vmatprep.subr.bf16.mxu0 %v8770_v27  ;;  %8167 = vmatprep.mubr.msk.bf16.mxu0 %vm8771_vm10, %v8770_v27 }
 0x75d   : > { %v3005_v59 = vsel %vm401_vm3, %v2983_v6, %v2995_v42  ;;  %v8724_v6 = vld [vmem:[%s10994_s6 + $0x58] sm:$0xff]   ;;  %v8725_v42 = vld [vmem:[%s10994_s6 + $0x60] sm:$0xff]  }
 0x75e   : > { %v3009_v40 = vmul.f32 %v9615_v20, %v3005_v59  ;;  %8158 = vmatpush3.bf16.msra.mxu1 %v2978_v1  ;;  %v3080_v20 = vmul.f32 %v9682_v53, %v3076_v14 }
 0x75f   : > { %8171 = vmatprep.subr.bf16.mxu1 %v8770_v27 }
 0x760   : > { %v3012_v21 = vpack.c.bf16 %v3009_v40, %v3008_v12  ;;  %v3063_v41 = vpop.permute.xlu1 %3062  ;;  %v3053_v24 = vpop.permute.xlu0 %3052  ;;  %v10070_v2 = vpack.c.bf16 %v3081_v16, %v3080_v20 }
 0x761   : > { %8160 = vmatmul.mubr.msk.bf16.vlgmr.msra.gmra.mxu1 %vm1514_vm11, %v8717_v38  ;;  %v3074_v50 = vsel %vm438_vm6, %v3051_v15, %v3063_v41 }
 0x762   : > { %8166 = vmatpush3.bf16.msra.mxu0 %v3012_v21  ;;  %8172 = vmatpush3.bf16.msra.mxu1 %v10004_v32  ;;  %v3078_v33 = vmul.f32 %v9682_v53, %v3074_v50  ;;  %v8727_v21 = vld [vmem:[%s10994_s6 + $0x70] sm:$0xff]   ;;  %v8728_v50 = vld [vmem:[%s10994_s6 + $0x78] sm:$0xff]  }
 0x763   : > { %8173 = vmatprep.subr.bf16.mxu1 %v8770_v27  ;;  %8179 = vmatprep.subr.bf16.mxu0 %v8770_v27 }
 0x764   : > { %v3085_v10 = vpop.permute.xlu1 %3084  ;;  %v3065_v28 = vpop.permute.xlu0 %3064  ;;  %8175 = vmatprep.mubr.msk.bf16.mxu1 %vm8771_vm10, %v8770_v27 }
 0x765   : > { %v3075_v17 = vsel %vm438_vm6, %v3053_v24, %v3065_v28  ;;  %8168 = vmatmul.mubr.msk.bf16.vlgmr.msra.gmra.mxu0 %vm1514_vm11, %v8718_v25 }
 0x766   : > { %v3079_v34 = vmul.f32 %v9682_v53, %v3075_v17  ;;  %8174 = vmatpush3.bf16.msra.mxu1 %v10024_v35  ;;  %8180 = vmatpush3.bf16.msra.mxu0 %v10070_v2  ;;  %v8720_v53 = vld [vmem:[%s10994_s6 + $0x38] sm:$0xff]  }
 0x767   : > { %8181 = vmatprep.subr.bf16.mxu0 %v8770_v27  ;;  %8187 = vmatprep.subr.bf16.mxu1 %v8770_v27 }
 0x768   : > { %v10085_v39 = vpack.c.bf16 %v3079_v34, %v3078_v33  ;;  %v3097_v45 = vpop.permute.xlu1 %3096  ;;  %v3087_v60 = vpop.permute.xlu0 %3086  ;;  %8183 = vmatprep.mubr.msk.bf16.mxu0 %vm8771_vm10, %v8770_v27 }
 0x769   : > { %8176 = vmatmul.mubr.msk.bf16.vlgmr.msra.gmra.mxu1 %vm1514_vm11, %v8719_v54  ;;  %v3108_v7 = vsel %vm456_vm7, %v3085_v10, %v3097_v45 }
 0x76a   : > { %8182 = vmatpush3.bf16.msra.mxu0 %v10085_v39  ;;  %8188 = vmatpush3.bf16.msra.mxu1 %v9985_v44  ;;  %v3112_v56 = vmul.f32 %v9688_v30, %v3108_v7 }
 0x76b   : > { %8189 = vmatprep.subr.bf16.mxu1 %v8770_v27  ;;  %8195 = vmatprep.subr.bf16.mxu0 %v8770_v27 }
 0x76c   : > { %v3119_v5 = vpop.permute.xlu1 %3118  ;;  %v3099_v1 = vpop.permute.xlu0 %3098  ;;  %8191 = vmatprep.mubr.msk.bf16.mxu1 %vm8771_vm10, %v8770_v27 }
 0x76d   : > { %v3109_v44 = vsel %vm456_vm7, %v3087_v60, %v3099_v1  ;;  %8184 = vmatmul.mubr.msk.bf16.vlgmr.msra.gmra.mxu0 %vm1514_vm11, %v8720_v53 }
 0x76e   : > { %8190 = vmatpush3.bf16.msra.mxu1 %v10018_v57  ;;  %8196 = vmatpush3.bf16.msra.mxu0 %v10004_v32  ;;  %v3113_v29 = vmul.f32 %v9688_v30, %v3109_v44  ;;  %v8723_v30 = vld [vmem:[%s10994_s6 + $0x50] sm:$0xff]  }
 0x76f   : > { %8197 = vmatprep.subr.bf16.mxu0 %v8770_v27  ;;  %8203 = vmatprep.subr.bf16.mxu1 %v8770_v27 }
 0x770   : > { %v3131_v31 = vpop.permute.xlu1 %3130  ;;  %v3121_v47 = vpop.permute.xlu0 %3120  ;;  %8199 = vmatprep.mubr.msk.bf16.mxu0 %vm8771_vm10, %v8770_v27  ;;  %v3116_v26 = vpack.c.bf16 %v3113_v29, %v3112_v56 }
 0x771   : > { %8192 = vmatmul.mubr.msk.bf16.vlgmr.msra.gmra.mxu1 %vm1514_vm11, %v8721_v13  ;;  %v3142_v23 = vsel %vm474_vm8, %v3119_v5, %v3131_v31 }
 0x772   : > { %8198 = vmatpush3.bf16.msra.mxu0 %v10024_v35  ;;  %8204 = vmatpush3.bf16.msra.mxu1 %v3117_v61  ;;  %v3146_v52 = vmul.f32 %v9721_v55, %v3142_v23 }
 0x773   : > { %8205 = vmatprep.subr.bf16.mxu1 %v8770_v27  ;;  %8211 = vmatprep.subr.bf16.mxu0 %v8770_v27 }
 0x774   : > { %v3157_v57 = vpop.permute.xlu1 %3156  ;;  %v3133_v49 = vpop.permute.xlu0 %3132  ;;  %8207 = vmatprep.mubr.msk.bf16.mxu1 %vm8771_vm10, %v8770_v27 }
 0x775   : > { %v3143_v4 = vsel %vm474_vm8, %v3121_v47, %v3133_v49  ;;  %8200 = vmatmul.mubr.msk.bf16.vlgmr.msra.gmra.mxu0 %vm1514_vm11, %v8722_v48 }
 0x776   : > { %v3147_v46 = vmul.f32 %v9721_v55, %v3143_v4  ;;  %8206 = vmatpush3.bf16.msra.mxu1 %v3116_v26  ;;  %8212 = vmatpush3.bf16.msra.mxu0 %v3151_v11 }
 0x777   : > { %8213 = vmatprep.subr.bf16.mxu0 %v8770_v27  ;;  %8219 = vmatprep.subr.bf16.mxu1 %v8770_v27 }
 0x778   : > { %v3150_v3 = vpack.c.bf16 %v3147_v46, %v3146_v52  ;;  %v3169_v43 = vpop.permute.xlu1 %3168  ;;  %v3159_v9 = vpop.permute.xlu0 %3158  ;;  %8215 = vmatprep.mubr.msk.bf16.mxu0 %vm8771_vm10, %v8770_v27 }
 0x779   : > { %8208 = vmatmul.mubr.msk.bf16.vlgmr.msra.gmra.mxu1 %vm1514_vm11, %v8723_v30 }
 0x77a   : > { %8214 = vmatpush3.bf16.msra.mxu0 %v3150_v3  ;;  %8220 = vmatpush3.bf16.msra.mxu1 %v10004_v32  ;;  %v3178_v32 = vsel %vm492_vm9, %v3157_v57, %v3169_v43 }
 0x77b   : > { %8221 = vmatprep.subr.bf16.mxu1 %v8770_v27  ;;  %8227 = vmatprep.subr.bf16.mxu0 %v8770_v27  ;;  %v3182_v12 = vmul.f32 %v9749_v18, %v3178_v32 }
 0x77c   : > { %v3153_v55 = vpop.permute.xlu1 %3152  ;;  %v3171_v8 = vpop.permute.xlu0 %3170  ;;  %8223 = vmatprep.mubr.msk.bf16.mxu1 %vm8771_vm10, %v8770_v27 }
 0x77d   : > { %v3179_v15 = vsel %vm492_vm9, %v3159_v9, %v3171_v8  ;;  %8216 = vmatmul.mubr.msk.bf16.vlgmr.msra.gmra.mxu0 %vm1514_vm11, %v8724_v6 }
 0x77e   : > { %8222 = vmatpush3.bf16.msra.mxu1 %v10024_v35  ;;  %8228 = vmatpush3.bf16.msra.mxu0 %v10070_v2  ;;  %v3183_v36 = vmul.f32 %v9749_v18, %v3179_v15  ;;  %v8726_v35 = vld [vmem:[%s10994_s6 + $0x68] sm:$0xff]  }
 0x77f   : > { %8229 = vmatprep.subr.bf16.mxu0 %v8770_v27  ;;  %8235 = vmatprep.subr.bf16.mxu1 %v8770_v27 }
 0x780   : > { %v3155_v59 = vpop.permute.xlu0 %3154  ;;  %8231 = vmatprep.mubr.msk.bf16.mxu0 %vm8771_vm10, %v8770_v27  ;;  %v3165_v38 = vpop.permute.xlu1 %3164  ;;  %v3185_v40 = vpack.c.bf16 %v3183_v36, %v3182_v12 }
 0x781   : > { %8224 = vmatmul.mubr.msk.bf16.vlgmr.msra.gmra.mxu1 %vm1514_vm11, %v8725_v42  ;;  %v3176_v14 = vsel %vm492_vm9, %v3153_v55, %v3165_v38 }
 0x782   : > { %8230 = vmatpush3.bf16.msra.mxu0 %v10085_v39  ;;  %8236 = vmatpush3.bf16.msra.mxu1 %v3151_v11  ;;  %v3180_v24 = vmul.f32 %v9749_v18, %v3176_v14 }
 0x783   : > { %8237 = vmatprep.subr.bf16.mxu1 %v8770_v27  ;;  %8243 = vmatprep.subr.bf16.mxu0 %v8770_v27 }
 0x784   : > { %8239 = vmatprep.mubr.msk.bf16.mxu1 %vm8771_vm10, %v8770_v27 }
 0x785   : > { %v3167_v16 = vpop.permute.xlu0 %3166  ;;  %8232 = vmatmul.mubr.msk.bf16.vlgmr.msra.gmra.mxu0 %vm1514_vm11, %v8726_v35 }
 0x786   : > { %v3177_v41 = vsel %vm492_vm9, %v3155_v59, %v3167_v16  ;;  %8238 = vmatpush3.bf16.msra.mxu1 %v3150_v3  ;;  %8244 = vmatpush3.bf16.msra.mxu0 %v3185_v40 }
 0x787   : > { %v3181_v25 = vmul.f32 %v9749_v18, %v3177_v41  ;;  %8245 = vmatprep.subr.bf16.mxu0 %v8770_v27  ;;  %8247 = vmatprep.mubr.msk.bf16.mxu0 %vm8771_vm10, %v8770_v27 }
 0x788   : > { %8251 = vmatprep.subr.bf16.mxu1 %v8770_v27 }
 0x789   : > { %v3184_v20 = vpack.c.bf16 %v3181_v25, %v3180_v24  ;;  %8240 = vmatmul.mubr.msk.bf16.vlgmr.msra.gmra.mxu1 %vm1514_vm11, %v8727_v21 }
 0x78a   : > { %8253 = vmatprep.mubr.msk.bf16.mxu1 %vm8771_vm10, %v8770_v27 }
 0x78b   : > { %8246 = vmatpush3.bf16.msra.mxu0 %v3184_v20 }
 0x78c   : > { %8257 = vmatprep.subr.bf16.mxu0 %v8770_v27 }
 0x78d   : > { %v10204_v28 = vpop.permute.xlu1 %3190 }
 0x78e   : > { %8248 = vmatmul.mubr.msk.bf16.vlgmr.msra.gmra.mxu0 %vm1514_vm11, %v8728_v50 }
 0x78f   : > { %8259 = vmatprep.mubr.msk.bf16.mxu0 %vm8771_vm10, %v8770_v27 }
 0x792   : > { %v10207_v39 = vpop.permute.xlu0 %3195 }
 0x809   : > { %v3242_v18 = vpop.f32.mrf.mxu1 }
 0x80a   : > { %v3249_v54 = vadd.f32 %v3242_v18, %v10204_v28 }
 0x80b   : > { %v8129_v2 = vpop.f32.mrf.mxu1 }
 0x80d   : > { %v3245_v10 = vpop.f32.mrf.mxu1 }
 0x80e   : > { %v3250_v60 = vadd.f32 %v3245_v10, %v10207_v39 }
 0x80f   : > { %v8130_v17 = vpop.f32.mrf.mxu1 }
 0x811   : > { %v3296_v33 = vpop.f32.mrf.mxu0 }
 0x812   : > { %v3303_v34 = vadd.f32 %v3296_v33, %v3249_v54 }
 0x813   : > { %v8137_v45 = vpop.f32.mrf.mxu0 }
 0x815   : > { %v3299_v62 = vpop.f32.mrf.mxu0 }
 0x816   : > { %v3304_v53 = vadd.f32 %v3299_v62, %v3250_v60 }
 0x817   : > { %v8138_v63 = vpop.f32.mrf.mxu0 }
 0x819   : > { %v3350_v51 = vpop.f32.mrf.mxu1  ;;  %v3404_v5 = vpop.f32.mrf.mxu0 }
 0x81a   : > { %v3357_v1 = vadd.f32 %v3350_v51, %v3303_v34 }
 0x81b   : > { %v8145_v58 = vpop.f32.mrf.mxu1  ;;  %v8153_v44 = vpop.f32.mrf.mxu0 }
 0x81c   : > { %v10210_v13 = vadd.f32 %v3404_v5, %v3357_v1 }
 0x81d   : > { %v3353_v37 = vpop.f32.mrf.mxu1  ;;  %v3407_v19 = vpop.f32.mrf.mxu0 }
 0x81e   : > { %v3358_v7 = vadd.f32 %v3353_v37, %v3304_v53 }
 0x81f   : > { %v8146_v61 = vpop.f32.mrf.mxu1  ;;  %v8154_v22 = vpop.f32.mrf.mxu0 }
 0x820   : > { %v10212_v29 = vadd.f32 %v3407_v19, %v3358_v7 }
 0x821   : > { %v3460_v31 = vpop.f32.mrf.mxu1 }
 0x822   : > { %v3467_v22 = vadd.f32 %v3460_v31, %v10204_v28 }
 0x823   : > { %v8161_v47 = vpop.f32.mrf.mxu1 }
 0x825   : > { %v10214_v48 = vpop.f32.mrf.mxu1  ;;  %v10216_v0 = vpop.f32.mrf.mxu0 }
 0x827   : > { %v8162_v56 = vpop.f32.mrf.mxu1  ;;  %v8169_v23 = vpop.f32.mrf.mxu0 }
 0x829   : > { %v10218_v11 = vpop.f32.mrf.mxu0  ;;  %v10220_v26 = vpop.f32.mrf.mxu1 }
 0x82b   : > { %v8170_v57 = vpop.f32.mrf.mxu0  ;;  %v8177_v49 = vpop.f32.mrf.mxu1 }
 0x82c   : > { %v3521_v49 = vadd.f32 %v10216_v0, %v3467_v22  ;;  %v7511_v22 = vld [vmem:[%s10996_s8 + $0x4] sm:$0x3] }
 0x82d   : > { %v10222_v4 = vpop.f32.mrf.mxu1  ;;  %v10224_v30 = vpop.f32.mrf.mxu0 }
 0x82f   : > { %v8178_v52 = vpop.f32.mrf.mxu1  ;;  %v8185_v46 = vpop.f32.mrf.mxu0 }
 0x831   : > { %v10226_v3 = vpop.f32.mrf.mxu0  ;;  %v3678_v43 = vpop.f32.mrf.mxu1 }
 0x832   : > { %v3685_v32 = vadd.f32 %v3678_v43, %v10204_v28 }
 0x833   : > { %v8186_v9 = vpop.f32.mrf.mxu0  ;;  %v8193_v6 = vpop.f32.mrf.mxu1 }
 0x834   : > { %v3468_v9 = vadd.f32 %v10214_v48, %v10207_v39  ;;  %v3575_v6 = vadd.f32 %v10220_v26, %v3521_v49  ;;  %v3413_v26 = vmax.f32 %v10210_v13, 0.0  ;;  %v4285_v13 = vld [vmem:[%s10997_s9] sm:$0x7] }
 0x835   : > { %v3681_v55 = vpop.f32.mrf.mxu1  ;;  %v3732_v8 = vpop.f32.mrf.mxu0 }
 0x836   : > { %v3739_v38 = vadd.f32 %v3732_v8, %v3685_v32  ;;  %v3686_v40 = vadd.f32 %v3681_v55, %v10207_v39  ;;  %v3629_v31 = vadd.f32 %v10224_v30, %v3575_v6 }
 0x837   : > { %v8194_v15 = vpop.f32.mrf.mxu1  ;;  %v8201_v42 = vpop.f32.mrf.mxu0 }
 0x839   : > { %v3735_v36 = vpop.f32.mrf.mxu0  ;;  %v3786_v59 = vpop.f32.mrf.mxu1 }
 0x83a   : > { %v3793_v14 = vadd.f32 %v3786_v59, %v3739_v38  ;;  %v3740_v41 = vadd.f32 %v3735_v36, %v3686_v40  ;;  %v8737_v38 = vld [vmem:[%s10988_s0 + $0x1] ss:$0 sm:$0xff] }
 0x83b   : > { %v8202_v35 = vpop.f32.mrf.mxu0  ;;  %v8209_v12 = vpop.f32.mrf.mxu1 }
 0x83d   : > { %v3789_v16 = vpop.f32.mrf.mxu1  ;;  %v3840_v21 = vpop.f32.mrf.mxu0 }
 0x83e   : > { %v3847_v24 = vadd.f32 %v3840_v21, %v3793_v14  ;;  %v3794_v50 = vadd.f32 %v3789_v16, %v3740_v41  ;;  %v7509_v14 = vld [vmem:[%s10996_s8 + $0x2] sm:$0x3] }
 0x83f   : > { %v8210_v25 = vpop.f32.mrf.mxu1  ;;  %v8217_v20 = vpop.f32.mrf.mxu0 }
 0x840   : > { %v10230_v18 = vmax.f32 %v3847_v24, 0.0  ;;  %v7513_v25 = vld [vmem:[%s10996_s8 + $0x6] sm:$0x3] }
 0x841   : > { %v3843_v2 = vpop.f32.mrf.mxu0  ;;  %v3896_v10 = vpop.f32.mrf.mxu1 }
 0x842   : > { %v3848_v17 = vadd.f32 %v3843_v2, %v3794_v50  ;;  %4179 = vrot.lane.b32.xlu1 %v10230_v18, %s8753_s23  ;;  %v3903_v63 = vadd.f32 %v3896_v10, %v10204_v28  ;;  %v3522_v28 = vadd.f32 %v10218_v11, %v3468_v9 }
 0x843   : > { %v8218_v54 = vpop.f32.mrf.mxu0  ;;  %v8225_v33 = vpop.f32.mrf.mxu1 }
 0x844   : > { %v10234_v34 = vmax.f32 %v3848_v17, 0.0  ;;  %v3576_v42 = vadd.f32 %v10222_v4, %v3522_v28  ;;  %v3414_v4 = vmax.f32 %v10212_v29, 0.0  ;;  %v8738_v17 = vld [vmem:[%s10988_s0] ss:$0 sm:$0xff]  ;;  %v7521_v28 = vld [vmem:[%s10996_s8 + $0xe] sm:$0x3] }
 0x845   : > { %v3899_v45 = vpop.f32.mrf.mxu1  ;;  %v3950_v60 = vpop.f32.mrf.mxu0 }
 0x846   : > { %4185 = vrot.lane.b32.xlu1 %v10230_v18, %s8755_s25  ;;  %4181 = vrot.lane.b32.xlu0 %v10234_v34, %s8753_s23  ;;  %v3957_v1 = vadd.f32 %v3950_v60, %v3903_v63  ;;  %v3904_v37 = vadd.f32 %v3899_v45, %v10207_v39  ;;  %v10257_v39 = vmax.f32 %v3629_v31, 0.0  ;;  %v3630_v48 = vadd.f32 %v10226_v3, %v3576_v42  ;;  %v4662_v42 = vld [vmem:[%s10996_s8] sm:$0x3] }
 0x847   : > { %v8226_v62 = vpop.f32.mrf.mxu1  ;;  %v8233_v53 = vpop.f32.mrf.mxu0  ;;  %v10340_v16 = vpack.c.bf16 %v3414_v4, %v3413_v26 }
 0x848   : > { %v10263_v11 = vmax.f32 %v3630_v48, 0.0  ;;  %v4291_v53 = vld [vmem:[%s10996_s8] sm:$0x3] }
 0x849   : > { %v3953_v51 = vpop.f32.mrf.mxu0  ;;  %v4004_v5 = vpop.f32.mrf.mxu1 }
 0x84a   : > { %4187 = vrot.lane.b32.xlu0 %v10234_v34, %s8755_s25  ;;  %v4011_v19 = vadd.f32 %v4004_v5, %v3957_v1  ;;  %v3958_v47 = vadd.f32 %v3953_v51, %v3904_v37  ;;  %v10397_v9 = vpack.c.bf16 %v10263_v11, %v10257_v39 }
 0x84b   : > { %v8234_v58 = vpop.f32.mrf.mxu0  ;;  %v8241_v44 = vpop.f32.mrf.mxu1 }
 0x84c   : > { %v10368_v58 = vld [vmem:[%s10988_s0 + $0x3] ss:$0 sm:$0xff] }
 0x84d   : > { %v4007_v7 = vpop.f32.mrf.mxu1 }
 0x84e   : > { %v4058_v61 = vpop.f32.mrf.mxu0  ;;  %v4012_v52 = vadd.f32 %v4007_v7, %v3958_v47 }
 0x84f   : > { %v4065_v56 = vadd.f32 %v4058_v61, %v4011_v19  ;;  %v8242_v23 = vpop.f32.mrf.mxu1 }
 0x850   : > { %v8249_v57 = vpop.f32.mrf.mxu0 }
 0x851   : > { %v4067_v46 = vmax.f32 %v4065_v56, 0.0 }
 0x852   : > { %v4061_v43 = vpop.f32.mrf.mxu0 }
 0x853   : > { %v4066_v55 = vadd.f32 %v4061_v43, %v4012_v52  ;;  %4233 = vrot.lane.b32.xlu1 %v4067_v46, %s11039_s24  ;;  %v7517_v43 = vld [vmem:[%s10996_s8 + $0xa] sm:$0x3] }
 0x854   : > { %v8250_v8 = vpop.f32.mrf.mxu0 }
 0x855   : > { %v4068_v15 = vmax.f32 %v4066_v55, 0.0  ;;  %v7519_v8 = vld [vmem:[%s10996_s8 + $0xc] sm:$0x3] }
 0x857   : > { %v10253_v0 = vpack.c.bf16 %v4068_v15, %v4067_v46  ;;  %4239 = vrot.lane.b32.xlu1 %v4067_v46, %s11040_s26  ;;  %4235 = vrot.lane.b32.xlu0 %v4068_v15, %s11039_s24 }
 0x85b   : > { %4125 = vrot.lane.b32.xlu1 %v10257_v39, %s11035_s19  ;;  %4241 = vrot.lane.b32.xlu0 %v4068_v15, %s11040_s26 }
 0x85f   : > { %4131 = vrot.lane.b32.xlu1 %v10257_v39, %s11036_s22  ;;  %4127 = vrot.lane.b32.xlu0 %v10263_v11, %s11035_s19 }
 0x863   : > { %4250 = vrot.lane.b32.xlu1 %v4067_v46, %s8753_s23  ;;  %4133 = vrot.lane.b32.xlu0 %v10263_v11, %s11036_s22 }
 0x867   : > { %4256 = vrot.lane.b32.xlu1 %v4067_v46, %s8755_s25  ;;  %4252 = vrot.lane.b32.xlu0 %v4068_v15, %s8753_s23 }
 0x86b   : > { %4196 = vrot.lane.b32.xlu1 %v10230_v18, %s11037_s29  ;;  %4258 = vrot.lane.b32.xlu0 %v4068_v15, %s8755_s25 }
 0x86f   : > { %4202 = vrot.lane.b32.xlu1 %v10230_v18, %s11038_s30  ;;  %4198 = vrot.lane.b32.xlu0 %v10234_v34, %s11037_s29  ;;  %s7649_s29 = sshll.u32 %s11042_s14, 6 }
 0x870   : > { %s10836_s27 = scalar_lea.vmem %s10998_s10, %s7649_s29 }
 0x873   : > { %4072 = vrot.lane.b32.xlu1 %v3413_v26, %s11033_s12  ;;  %4204 = vrot.lane.b32.xlu0 %v10234_v34, %s11038_s30 }
 0x877   : > { %4078 = vrot.lane.b32.xlu1 %v3413_v26, %s11027_s15  ;;  %4074 = vrot.lane.b32.xlu0 %v3414_v4, %s11033_s12 }
 0x87b   : > { %4267 = vrot.lane.b32.xlu1 %v4067_v46, %s11035_s19  ;;  %4080 = vrot.lane.b32.xlu0 %v3414_v4, %s11027_s15 }
 0x87f   : > { %4273 = vrot.lane.b32.xlu1 %v4067_v46, %s11036_s22  ;;  %4269 = vrot.lane.b32.xlu0 %v4068_v15, %s11035_s19  ;;  %v7515_v46 = vld [vmem:[%s10996_s8 + $0x8] sm:$0x3] }
 0x883   : > { %4214 = vrot.lane.b32.xlu1 %v10230_v18, %s11033_s12  ;;  %4275 = vrot.lane.b32.xlu0 %v4068_v15, %s11036_s22 }
 0x887   : > { %4220 = vrot.lane.b32.xlu1 %v10230_v18, %s11027_s15  ;;  %4216 = vrot.lane.b32.xlu0 %v10234_v34, %s11033_s12 }
 0x88b   : > { %4089 = vrot.lane.b32.xlu1 %v3413_v26, %s11030_s17  ;;  %4222 = vrot.lane.b32.xlu0 %v10234_v34, %s11027_s15 }
 0x88f   : > { %4095 = vrot.lane.b32.xlu1 %v3413_v26, %s11031_s11  ;;  %4091 = vrot.lane.b32.xlu0 %v3414_v4, %s11030_s17 }
 0x893   : > { %4143 = vrot.lane.b32.xlu1 %v10257_v39, %s11028_s16  ;;  %4097 = vrot.lane.b32.xlu0 %v3414_v4, %s11031_s11 }
 0x897   : > { %4149 = vrot.lane.b32.xlu1 %v10257_v39, %s11029_s21  ;;  %4145 = vrot.lane.b32.xlu0 %v10263_v11, %s11028_s16 }
 0x89b   : > { %4160 = vrot.lane.b32.xlu1 %v10257_v39, %s11030_s17  ;;  %4151 = vrot.lane.b32.xlu0 %v10263_v11, %s11029_s21 }
 0x89f   : > { %4166 = vrot.lane.b32.xlu1 %v10257_v39, %s11031_s11  ;;  %4162 = vrot.lane.b32.xlu0 %v10263_v11, %s11030_s17  ;;  %v7525_v39 = vld [vmem:[%s10996_s8 + $0x2] sm:$0x3] }
 0x8a3   : > { %4106 = vrot.lane.b32.xlu1 %v3413_v26, %s11034_s20  ;;  %4168 = vrot.lane.b32.xlu0 %v10263_v11, %s11031_s11 }
 0x8a7   : > { %4112 = vrot.lane.b32.xlu1 %v3413_v26, %s11032_s18  ;;  %4108 = vrot.lane.b32.xlu0 %v3414_v4, %s11034_s20 }
 0x8ab   : > { %4288 = vperm.xlu1 %8672, %v4285_v13   ;;  %4114 = vrot.lane.b32.xlu0 %v3414_v4, %s11032_s18  ;;  %v8740_v13 = vld [vmem:[%s10988_s0 + $0x2] ss:$0 sm:$0xff] }
 0x8b4   : > { %v4180_v29 = vpop.permute.xlu1 %4179 }
 0x8b8   : > { %v4186_v30 = vpop.permute.xlu1 %4185  ;;  %v4182_v3 = vpop.permute.xlu0 %4181 }
 0x8b9   : > { %v4191_v32 = vsel %vm383_vm1, %v4180_v29, %v4186_v30 }
 0x8ba   : > { %v4193_v35 = vmul.f32 %v8737_v38, %v4191_v32  ;;  %v7527_v32 = vld [vmem:[%s10996_s8 + $0x4] sm:$0x3] }
 0x8bc   : > { %v4188_v36 = vpop.permute.xlu0 %4187 }
 0x8bd   : > { %v4192_v59 = vsel %vm383_vm1, %v4182_v3, %v4188_v36  ;;  %v7529_v36 = vld [vmem:[%s10996_s8 + $0x6] sm:$0x3] }
 0x8be   : > { %v4194_v12 = vmul.f32 %v8737_v38, %v4192_v59 }
 0x8c0   : > { %v10333_v40 = vpack.c.bf16 %v4194_v12, %v4193_v35 }
 0x8c2   : > { %8258 = vmatpush3.bf16.msra.mxu0 %v10333_v40 }
 0x8c3   : > { %8269 = vmatprep.subr.bf16.mxu0 %v8770_v27 }
 0x8c5   : > { %v4234_v21 = vpop.permute.xlu1 %4233  ;;  %8260 = vmatmul.mubr.msk.bf16.vlgmr.msra.gmra.mxu0 %vm2003_vm12, %v7509_v14 }
 0x8c6   : > { %8270 = vmatpush3.bf16.msra.mxu0 %v10340_v16  ;;  %8271 = vmatprep.mubr.msk.bf16.mxu0 %vm8771_vm10, %v8770_v27 }
 0x8c7   : > { %8281 = vmatprep.subr.bf16.mxu0 %v8770_v27 }
 0x8c9   : > { %v4240_v41 = vpop.permute.xlu1 %4239  ;;  %v4236_v24 = vpop.permute.xlu0 %4235 }
 0x8ca   : > { %v4245_v20 = vsel %vm366_vm2, %v4234_v21, %v4240_v41  ;;  %v7532_v41 = vld [vmem:[%s10996_s8 + $0x8] sm:$0x3] }
 0x8cb   : > { %v4247_v54 = vmul.f32 %v8738_v17, %v4245_v20 }
 0x8cd   : > { %v4126_v50 = vpop.permute.xlu1 %4125  ;;  %v4242_v2 = vpop.permute.xlu0 %4241  ;;  %8272 = vmatmul.mubr.msk.bf16.vlgmr.msra.gmra.mxu0 %vm2003_vm12, %v7513_v25 }
 0x8ce   : > { %v4246_v10 = vsel %vm366_vm2, %v4236_v24, %v4242_v2  ;;  %8283 = vmatprep.mubr.msk.bf16.mxu0 %vm8771_vm10, %v8770_v27  ;;  %v7534_v24 = vld [vmem:[%s10996_s8 + $0xa] sm:$0x3] }
 0x8cf   : > { %v4248_v33 = vmul.f32 %v8738_v17, %v4246_v10  ;;  %v7536_v10 = vld [vmem:[%s10996_s8 + $0xc] sm:$0x3]  ;;  %v7538_v17 = vld [vmem:[%s10996_s8 + $0xe] sm:$0x3] }
 0x8d1   : > { %v4249_v45 = vpack.c.bf16 %v4248_v33, %v4247_v54  ;;  %v4132_v60 = vpop.permute.xlu1 %4131  ;;  %v4128_v62 = vpop.permute.xlu0 %4127 }
 0x8d2   : > { %v4137_v63 = vsel %vm419_vm5, %v4126_v50, %v4132_v60 }
 0x8d3   : > { %8252 = vmatpush3.bf16.msra.mxu1 %v4249_v45  ;;  %v4139_v44 = vmul.f32 %v10368_v58, %v4137_v63  ;;  %v7543_v63 = vld [vmem:[%s10996_s8 + $0x12] sm:$0x3] }
 0x8d4   : > { %8263 = vmatprep.subr.bf16.mxu1 %v8770_v27 }
 0x8d5   : > { %v4251_v51 = vpop.permute.xlu1 %4250  ;;  %v4134_v5 = vpop.permute.xlu0 %4133 }
 0x8d6   : > { %v4138_v1 = vsel %vm419_vm5, %v4128_v62, %v4134_v5  ;;  %8254 = vmatmul.mubr.msk.bf16.vlgmr.msra.gmra.mxu1 %vm2003_vm12, %v4291_v53  ;;  %v7541_v53 = vld [vmem:[%s10996_s8 + $0x10] sm:$0x3] }
 0x8d7   : > { %v4140_v37 = vmul.f32 %v10368_v58, %v4138_v1  ;;  %8265 = vmatprep.mubr.msk.bf16.mxu1 %vm8771_vm10, %v8770_v27  ;;  %v7550_v1 = vld [vmem:[%s10996_s8 + $0x18] sm:$0x3] }
 0x8d9   : > { %v10374_v19 = vpack.c.bf16 %v4140_v37, %v4139_v44  ;;  %v4257_v7 = vpop.permute.xlu1 %4256  ;;  %v4253_v61 = vpop.permute.xlu0 %4252  ;;  %v7554_v44 = vld [vmem:[%s10996_s8 + $0x1c] sm:$0x3]  ;;  %v7556_v37 = vld [vmem:[%s10996_s8 + $0x1e] sm:$0x3] }
 0x8da   : > { %v4262_v47 = vsel %vm383_vm1, %v4251_v51, %v4257_v7  ;;  %v10514_v51 = vpack.c.bf16 %v10234_v34, %v10230_v18  ;;  %v7545_v18 = vld [vmem:[%s10996_s8 + $0x14] sm:$0x3]  ;;  %v7547_v34 = vld [vmem:[%s10996_s8 + $0x16] sm:$0x3]  ;;  %v7559_v7 = vld [vmem:[%s10996_s8 + $0x10] sm:$0x3] }
 0x8db   : > { %8264 = vmatpush3.bf16.msra.mxu1 %v10374_v19  ;;  %v4264_v57 = vmul.f32 %v8737_v38, %v4262_v47 }
 0x8dc   : > { %8275 = vmatprep.subr.bf16.mxu1 %v8770_v27 }
 0x8dd   : > { %v4259_v56 = vpop.permute.xlu0 %4258  ;;  %v4197_v55 = vpop.permute.xlu1 %4196 }
 0x8de   : > { %v4263_v23 = vsel %vm383_vm1, %v4253_v61, %v4259_v56  ;;  %8266 = vmatmul.mubr.msk.bf16.vlgmr.msra.gmra.mxu1 %vm2003_vm12, %v7511_v22  ;;  %v7561_v61 = vld [vmem:[%s10996_s8 + $0x12] sm:$0x3] }
 0x8df   : > { %v4265_v49 = vmul.f32 %v8737_v38, %v4263_v23  ;;  %8276 = vmatpush3.bf16.msra.mxu1 %v10333_v40  ;;  %8277 = vmatprep.mubr.msk.bf16.mxu1 %vm8771_vm10, %v8770_v27  ;;  %v7563_v23 = vld [vmem:[%s10996_s8 + $0x14] sm:$0x3] }
 0x8e0   : > { %8287 = vmatprep.subr.bf16.mxu1 %v8770_v27 }
 0x8e1   : > { %v4266_v52 = vpack.c.bf16 %v4265_v49, %v4264_v57  ;;  %v4199_v6 = vpop.permute.xlu0 %4198  ;;  %v4203_v15 = vpop.permute.xlu1 %4202  ;;  %v7565_v57 = vld [vmem:[%s10996_s8 + $0x16] sm:$0x3] }
 0x8e2   : > { %v4208_v4 = vsel %vm401_vm3, %v4197_v55, %v4203_v15  ;;  %v7568_v55 = vld [vmem:[%s10996_s8 + $0x18] sm:$0x3]  ;;  %v7574_v15 = vld [vmem:[%s10996_s8 + $0x1e] sm:$0x3] }
 0x8e3   : > { %8282 = vmatpush3.bf16.msra.mxu0 %v4266_v52  ;;  %v4210_v30 = vmul.f32 %v8740_v13, %v4208_v4 }
 0x8e4   : > { %8293 = vmatprep.subr.bf16.mxu0 %v8770_v27 }
 0x8e5   : > { %v4205_v31 = vpop.permute.xlu0 %4204  ;;  %v4073_v26 = vpop.permute.xlu1 %4072 }
 0x8e6   : > { %8278 = vmatmul.mubr.msk.bf16.vlgmr.msra.gmra.mxu1 %vm2003_vm12, %v7515_v46  ;;  %8284 = vmatmul.mubr.msk.bf16.vlgmr.msra.gmra.mxu0 %vm2003_vm12, %v7517_v43  ;;  %v4209_v11 = vsel %vm401_vm3, %v4199_v6, %v4205_v31  ;;  %v7572_v31 = vld [vmem:[%s10996_s8 + $0x1c] sm:$0x3] }
 0x8e7   : > { %8288 = vmatpush3.bf16.msra.mxu1 %v10340_v16  ;;  %8294 = vmatpush3.bf16.msra.mxu0 %v10397_v9  ;;  %v4211_v29 = vmul.f32 %v8740_v13, %v4209_v11  ;;  %v7585_v11 = vld [vmem:[%s10996_s8 + $0x8] sm:$0x3]  ;;  %v7589_v13 = vld [vmem:[%s10996_s8 + $0xc] sm:$0x3] }
 0x8e8   : > { %8289 = vmatprep.mubr.msk.bf16.mxu1 %vm8771_vm10, %v8770_v27  ;;  %8295 = vmatprep.mubr.msk.bf16.mxu0 %vm8771_vm10, %v8770_v27 }
 0x8e9   : > { %8299 = vmatprep.subr.bf16.mxu1 %v8770_v27  ;;  %8305 = vmatprep.subr.bf16.mxu0 %v8770_v27  ;;  %v4075_v48 = vpop.permute.xlu0 %4074  ;;  %v4212_v59 = vpack.c.bf16 %v4211_v29, %v4210_v30  ;;  %v4079_v38 = vpop.permute.xlu1 %4078  ;;  %v7591_v29 = vld [vmem:[%s10996_s8 + $0xe] sm:$0x3] }
 0x8ea   : > { %v4084_v12 = vsel %vm438_vm6, %v4073_v26, %v4079_v38  ;;  %v7587_v26 = vld [vmem:[%s10996_s8 + $0xa] sm:$0x3]  ;;  %v7599_v38 = vld [vmem:[%s10996_s8 + $0x6] sm:$0x3] }
 0x8ed   : > { %v4081_v3 = vpop.permute.xlu0 %4080  ;;  %v4268_v50 = vpop.permute.xlu1 %4267 }
 0x8ee   : > { %8290 = vmatmul.mubr.msk.bf16.vlgmr.msra.gmra.mxu1 %vm2003_vm12, %v7519_v8  ;;  %8296 = vmatmul.mubr.msk.bf16.vlgmr.msra.gmra.mxu0 %vm2003_vm12, %v7521_v28  ;;  %v4085_v35 = vsel %vm438_vm6, %v4075_v48, %v4081_v3  ;;  %v7570_v8 = vld [vmem:[%s10996_s8 + $0x1a] sm:$0x3]  ;;  %v7582_v48 = vld [vmem:[%s10996_s8 + $0x6] sm:$0x3]  ;;  %v6126_v3 = vld [vmem:[%s10996_s8] sm:$0x3] }
 0x8ef   : > { %8300 = vmatpush3.bf16.msra.mxu1 %v10333_v40  ;;  %8306 = vmatpush3.bf16.msra.mxu0 %v4266_v52  ;;  %v10462_v40 = vld [vmem:[%s10988_s0 + $0x5] ss:$0 sm:$0xff] }
 0x8f0   : > { %8301 = vmatprep.mubr.msk.bf16.mxu1 %vm8771_vm10, %v8770_v27  ;;  %8307 = vmatprep.mubr.msk.bf16.mxu0 %vm8771_vm10, %v8770_v27  ;;  %v4087_v14 = vmul.f32 %v10462_v40, %v4085_v35  ;;  %v4086_v21 = vmul.f32 %v10462_v40, %v4084_v12 }
 0x8f1   : > { %8311 = vmatprep.subr.bf16.mxu1 %v8770_v27  ;;  %8317 = vmatprep.subr.bf16.mxu0 %v8770_v27  ;;  %v4270_v20 = vpop.permute.xlu0 %4269  ;;  %v4274_v54 = vpop.permute.xlu1 %4273 }
 0x8f2   : > { %v10474_v25 = vpack.c.bf16 %v4087_v14, %v4086_v21  ;;  %v4279_v45 = vsel %vm419_vm5, %v4268_v50, %v4274_v54  ;;  %v7602_v14 = vld [vmem:[%s10996_s8 + $0x8] sm:$0x3] }
 0x8f3   : > { %v4281_v62 = vmul.f32 %v10368_v58, %v4279_v45 }
 0x8f5   : > { %v4276_v2 = vpop.permute.xlu0 %4275  ;;  %v4215_v47 = vpop.permute.xlu1 %4214 }
 0x8f6   : > { %8302 = vmatmul.mubr.msk.bf16.vlgmr.msra.gmra.mxu1 %vm2003_vm12, %v4662_v42  ;;  %8308 = vmatmul.mubr.msk.bf16.vlgmr.msra.gmra.mxu0 %vm2003_vm12, %v7525_v39  ;;  %v4280_v33 = vsel %vm419_vm5, %v4270_v20, %v4276_v2  ;;  %v5762_v42 = vld [vmem:[%s10996_s8] sm:$0x3]  ;;  %v7580_v39 = vld [vmem:[%s10996_s8 + $0x4] sm:$0x3]  ;;  %v7606_v2 = vld [vmem:[%s10996_s8 + $0xc] sm:$0x3] }
 0x8f7   : > { %8312 = vmatpush3.bf16.msra.mxu1 %v10340_v16  ;;  %8318 = vmatpush3.bf16.msra.mxu0 %v10397_v9  ;;  %v4282_v60 = vmul.f32 %v10368_v58, %v4280_v33  ;;  %v7552_v58 = vld [vmem:[%s10996_s8 + $0x1a] sm:$0x3] }
 0x8f8   : > { %8313 = vmatprep.mubr.msk.bf16.mxu1 %vm8771_vm10, %v8770_v27  ;;  %8319 = vmatprep.mubr.msk.bf16.mxu0 %vm8771_vm10, %v8770_v27 }
 0x8f9   : > { %8323 = vmatprep.subr.bf16.mxu1 %v8770_v27  ;;  %8329 = vmatprep.subr.bf16.mxu0 %v8770_v27  ;;  %v10516_v5 = vpack.c.bf16 %v4282_v60, %v4281_v62  ;;  %v4217_v22 = vpop.permute.xlu0 %4216  ;;  %v4221_v49 = vpop.permute.xlu1 %4220 }
 0x8fa   : > { %v4226_v46 = vsel %vm438_vm6, %v4215_v47, %v4221_v49 }
 0x8fb   : > { %v4228_v6 = vmul.f32 %v10462_v40, %v4226_v46 }
 0x8fd   : > { %v4223_v56 = vpop.permute.xlu0 %4222  ;;  %v10694_v4 = vpop.permute.xlu1 %4089 }
 0x8fe   : > { %8314 = vmatmul.mubr.msk.bf16.vlgmr.msra.gmra.mxu1 %vm2003_vm12, %v7527_v32  ;;  %8320 = vmatmul.mubr.msk.bf16.vlgmr.msra.gmra.mxu0 %vm2003_vm12, %v7529_v36 }
 0x8ff   : > { %8324 = vmatpush3.bf16.msra.mxu1 %v4266_v52  ;;  %8330 = vmatpush3.bf16.msra.mxu0 %v4212_v59  ;;  %v4227_v52 = vsel %vm438_vm6, %v4217_v22, %v4223_v56  ;;  %v7597_v59 = vld [vmem:[%s10996_s8 + $0x4] sm:$0x3] }
 0x900   : > { %8325 = vmatprep.mubr.msk.bf16.mxu1 %vm8771_vm10, %v8770_v27  ;;  %8331 = vmatprep.mubr.msk.bf16.mxu0 %vm8771_vm10, %v8770_v27  ;;  %v4229_v43 = vmul.f32 %v10462_v40, %v4227_v52 }
 0x901   : > { %8335 = vmatprep.subr.bf16.mxu1 %v8770_v27  ;;  %8341 = vmatprep.subr.bf16.mxu0 %v8770_v27  ;;  %v4096_v30 = vpop.permute.xlu1 %4095  ;;  %v4092_v36 = vpop.permute.xlu0 %4091 }
 0x902   : > { %v10618_v28 = vpack.c.bf16 %v4229_v43, %v4228_v6 }
 0x905   : > { %v4144_v32 = vpop.permute.xlu1 %4143  ;;  %v4098_v12 = vpop.permute.xlu0 %4097 }
 0x906   : > { %8326 = vmatmul.mubr.msk.bf16.vlgmr.msra.gmra.mxu1 %vm2003_vm12, %v7532_v41  ;;  %8332 = vmatmul.mubr.msk.bf16.vlgmr.msra.gmra.mxu0 %vm2003_vm12, %v7534_v24  ;;  %v4102_v33 = vsel %vm474_vm8, %v4092_v36, %v4098_v12 }
 0x907   : > { %8336 = vmatpush3.bf16.msra.mxu1 %v10397_v9  ;;  %8342 = vmatpush3.bf16.msra.mxu0 %v10474_v25 }
 0x908   : > { %8337 = vmatprep.mubr.msk.bf16.mxu1 %vm8771_vm10, %v8770_v27  ;;  %8343 = vmatprep.mubr.msk.bf16.mxu0 %vm8771_vm10, %v8770_v27 }
 0x909   : > { %8347 = vmatprep.subr.bf16.mxu1 %v8770_v27  ;;  %8353 = vmatprep.subr.bf16.mxu0 %v8770_v27  ;;  %v4150_v35 = vpop.permute.xlu1 %4149  ;;  %v4146_v21 = vpop.permute.xlu0 %4145 }
 0x90d   : > { %v10744_v40 = vpop.permute.xlu1 %4160  ;;  %v4152_v50 = vpop.permute.xlu0 %4151 }
 0x90e   : > { %8338 = vmatmul.mubr.msk.bf16.vlgmr.msra.gmra.mxu1 %vm2003_vm12, %v7536_v10  ;;  %8344 = vmatmul.mubr.msk.bf16.vlgmr.msra.gmra.mxu0 %vm2003_vm12, %v7538_v17  ;;  %v7608_v10 = vld [vmem:[%s10996_s8 + $0xe] sm:$0x3]  ;;  %v4156_v45 = vsel %vm456_vm7, %v4146_v21, %v4152_v50  ;;  %v7624_v21 = vld [vmem:[%s10996_s8 + $0x1c] sm:$0x3] }
 0x90f   : > { %8348 = vmatpush3.bf16.msra.mxu1 %v10374_v19  ;;  %8354 = vmatpush3.bf16.msra.mxu0 %v10340_v16 }
 0x910   : > { %8349 = vmatprep.mubr.msk.bf16.mxu1 %vm8771_vm10, %v8770_v27  ;;  %8355 = vmatprep.mubr.msk.bf16.mxu0 %vm8771_vm10, %v8770_v27 }
 0x911   : > { %8359 = vmatprep.subr.bf16.mxu1 %v8770_v27  ;;  %8365 = vmatprep.subr.bf16.mxu0 %v8770_v27 }
 0x916   : > { %8350 = vmatmul.mubr.msk.bf16.vlgmr.msra.gmra.mxu1 %vm2003_vm12, %v7541_v53  ;;  %8356 = vmatmul.mubr.msk.bf16.vlgmr.msra.gmra.mxu0 %vm2003_vm12, %v7543_v63  ;;  %v4101_v53 = vsel %vm474_vm8, %v10694_v4, %v4096_v30  ;;  %v4155_v63 = vsel %vm456_vm7, %v4144_v32, %v4150_v35 }
 0x917   : > { %8360 = vmatpush3.bf16.msra.mxu1 %v10516_v5  ;;  %8366 = vmatpush3.bf16.msra.mxu0 %v10514_v51 }
 0x918   : > { %8361 = vmatprep.mubr.msk.bf16.mxu1 %vm8771_vm10, %v8770_v27  ;;  %8367 = vmatprep.mubr.msk.bf16.mxu0 %vm8771_vm10, %v8770_v27 }
 0x919   : > { %8371 = vmatprep.subr.bf16.mxu1 %v8770_v27  ;;  %8377 = vmatprep.subr.bf16.mxu0 %v8770_v27 }
 0x91e   : > { %8362 = vmatmul.mubr.msk.bf16.vlgmr.msra.gmra.mxu1 %vm2003_vm12, %v7545_v18  ;;  %8368 = vmatmul.mubr.msk.bf16.vlgmr.msra.gmra.mxu0 %vm2003_vm12, %v7547_v34  ;;  %v8742_v18 = vld [vmem:[%s10988_s0 + $0x7] ss:$0 sm:$0xff] }
 0x91f   : > { %8372 = vmatpush3.bf16.msra.mxu1 %v10340_v16  ;;  %8378 = vmatpush3.bf16.msra.mxu0 %v10397_v9  ;;  %v4104_v34 = vmul.f32 %v8742_v18, %v4102_v33 }
 0x920   : > { %8373 = vmatprep.mubr.msk.bf16.mxu1 %vm8771_vm10, %v8770_v27  ;;  %8379 = vmatprep.mubr.msk.bf16.mxu0 %vm8771_vm10, %v8770_v27 }
 0x921   : > { %8383 = vmatprep.subr.bf16.mxu1 %v8770_v27  ;;  %8389 = vmatprep.subr.bf16.mxu0 %v8770_v27 }
 0x926   : > { %8374 = vmatmul.mubr.msk.bf16.vlgmr.msra.gmra.mxu1 %vm2003_vm12, %v7550_v1  ;;  %8380 = vmatmul.mubr.msk.bf16.vlgmr.msra.gmra.mxu0 %vm2003_vm12, %v7552_v58 }
 0x927   : > { %8384 = vmatpush3.bf16.msra.mxu1 %v10514_v51  ;;  %8390 = vmatpush3.bf16.msra.mxu0 %v10253_v0 }
 0x928   : > { %8385 = vmatprep.mubr.msk.bf16.mxu1 %vm8771_vm10, %v8770_v27  ;;  %8391 = vmatprep.mubr.msk.bf16.mxu0 %vm8771_vm10, %v8770_v27 }
 0x929   : > { %8395 = vmatprep.subr.bf16.mxu1 %v8770_v27  ;;  %8401 = vmatprep.subr.bf16.mxu0 %v8770_v27 }
 0x92e   : > { %8386 = vmatmul.mubr.msk.bf16.vlgmr.msra.gmra.mxu1 %vm2003_vm12, %v7554_v44  ;;  %8392 = vmatmul.mubr.msk.bf16.vlgmr.msra.gmra.mxu0 %vm2003_vm12, %v7556_v37  ;;  %v4103_v44 = vmul.f32 %v8742_v18, %v4101_v53  ;;  %v7631_v53 = vld [vmem:[%s10996_s8 + $0x12] sm:$0x3] }
 0x92f   : > { %8396 = vmatpush3.bf16.msra.mxu1 %v10340_v16  ;;  %8402 = vmatpush3.bf16.msra.mxu0 %v10397_v9 }
 0x930   : > { %8397 = vmatprep.mubr.msk.bf16.mxu1 %vm8771_vm10, %v8770_v27  ;;  %8403 = vmatprep.mubr.msk.bf16.mxu0 %vm8771_vm10, %v8770_v27  ;;  %v10803_v56 = vpack.c.bf16 %v4104_v34, %v4103_v44 }
 0x931   : > { %8407 = vmatprep.subr.bf16.mxu1 %v8770_v27  ;;  %8413 = vmatprep.subr.bf16.mxu0 %v8770_v27 }
 0x936   : > { %8398 = vmatmul.mubr.msk.bf16.vlgmr.msra.gmra.mxu1 %vm2003_vm12, %v7559_v7  ;;  %8404 = vmatmul.mubr.msk.bf16.vlgmr.msra.gmra.mxu0 %vm2003_vm12, %v7561_v61  ;;  %v7611_v7 = vld [vmem:[%s10996_s8 + $0x10] sm:$0x3]  ;;  %v7613_v61 = vld [vmem:[%s10996_s8 + $0x12] sm:$0x3] }
 0x937   : > { %8408 = vmatpush3.bf16.msra.mxu1 %v10514_v51  ;;  %8414 = vmatpush3.bf16.msra.mxu0 %v10253_v0 }
 0x938   : > { %8409 = vmatprep.mubr.msk.bf16.mxu1 %vm8771_vm10, %v8770_v27  ;;  %8415 = vmatprep.mubr.msk.bf16.mxu0 %vm8771_vm10, %v8770_v27 }
 0x939   : > { %8419 = vmatprep.subr.bf16.mxu1 %v8770_v27  ;;  %8425 = vmatprep.subr.bf16.mxu0 %v8770_v27 }
 0x93e   : > { %8410 = vmatmul.mubr.msk.bf16.vlgmr.msra.gmra.mxu1 %vm2003_vm12, %v7563_v23  ;;  %8416 = vmatmul.mubr.msk.bf16.vlgmr.msra.gmra.mxu0 %vm2003_vm12, %v7565_v57  ;;  %v4163_v57 = vpop.permute.xlu0 %4162 }
 0x93f   : > { %8420 = vmatpush3.bf16.msra.mxu1 %v10397_v9  ;;  %8426 = vmatpush3.bf16.msra.mxu0 %v10474_v25 }
 0x940   : > { %8421 = vmatprep.mubr.msk.bf16.mxu1 %vm8771_vm10, %v8770_v27  ;;  %8427 = vmatprep.mubr.msk.bf16.mxu0 %vm8771_vm10, %v8770_v27 }
 0x941   : > { %8431 = vmatprep.subr.bf16.mxu1 %v8770_v27  ;;  %8437 = vmatprep.subr.bf16.mxu0 %v8770_v27 }
 0x946   : > { %8422 = vmatmul.mubr.msk.bf16.vlgmr.msra.gmra.mxu1 %vm2003_vm12, %v7568_v55  ;;  %8428 = vmatmul.mubr.msk.bf16.vlgmr.msra.gmra.mxu0 %vm2003_vm12, %v7570_v8  ;;  %v4169_v55 = vpop.permute.xlu0 %4168  ;;  %v7615_v8 = vld [vmem:[%s10996_s8 + $0x14] sm:$0x3] }
 0x947   : > { %8432 = vmatpush3.bf16.msra.mxu1 %v10253_v0  ;;  %8438 = vmatpush3.bf16.msra.mxu0 %v10618_v28 }
 0x948   : > { %8433 = vmatprep.mubr.msk.bf16.mxu1 %vm8771_vm10, %v8770_v27  ;;  %8439 = vmatprep.mubr.msk.bf16.mxu0 %vm8771_vm10, %v8770_v27 }
 0x949   : > { %8443 = vmatprep.subr.bf16.mxu1 %v8770_v27  ;;  %8449 = vmatprep.subr.bf16.mxu0 %v8770_v27 }
 0x94a   : > { %v4109_v34 = vpop.permute.xlu0 %4108 }
 0x94e   : > { %8434 = vmatmul.mubr.msk.bf16.vlgmr.msra.gmra.mxu1 %vm2003_vm12, %v7572_v31  ;;  %8440 = vmatmul.mubr.msk.bf16.vlgmr.msra.gmra.mxu0 %vm2003_vm12, %v7574_v15  ;;  %v7617_v31 = vld [vmem:[%s10996_s8 + $0x16] sm:$0x3] }
 0x94f   : > { %8444 = vmatpush3.bf16.msra.mxu1 %v10374_v19  ;;  %8450 = vmatpush3.bf16.msra.mxu0 %v10340_v16  ;;  %v7578_v19 = vld [vmem:[%s10996_s8 + $0x2] sm:$0x3] }
 0x950   : > { %8445 = vmatprep.mubr.msk.bf16.mxu1 %vm8771_vm10, %v8770_v27  ;;  %8451 = vmatprep.mubr.msk.bf16.mxu0 %vm8771_vm10, %v8770_v27 }
 0x951   : > { %8455 = vmatprep.subr.bf16.mxu1 %v8770_v27  ;;  %8461 = vmatprep.subr.bf16.mxu0 %v8770_v27 }
 0x956   : > { %8446 = vmatmul.mubr.msk.bf16.vlgmr.msra.gmra.mxu1 %vm2003_vm12, %v5762_v42  ;;  %8452 = vmatmul.mubr.msk.bf16.vlgmr.msra.gmra.mxu0 %vm2003_vm12, %v7578_v19  ;;  %v4173_v19 = vsel %vm474_vm8, %v4163_v57, %v4169_v55 }
 0x957   : > { %8456 = vmatpush3.bf16.msra.mxu1 %v10516_v5  ;;  %8462 = vmatpush3.bf16.msra.mxu0 %v10514_v51  ;;  %v4175_v4 = vmul.f32 %v8742_v18, %v4173_v19  ;;  %v8744_v19 = vld [vmem:[%s10988_s0 + $0x8] ss:$0 sm:$0xff] }
 0x958   : > { %8457 = vmatprep.mubr.msk.bf16.mxu1 %vm8771_vm10, %v8770_v27  ;;  %8463 = vmatprep.mubr.msk.bf16.mxu0 %vm8771_vm10, %v8770_v27 }
 0x959   : > { %8467 = vmatprep.subr.bf16.mxu1 %v8770_v27  ;;  %8473 = vmatprep.subr.bf16.mxu0 %v8770_v27 }
 0x95e   : > { %8458 = vmatmul.mubr.msk.bf16.vlgmr.msra.gmra.mxu1 %vm2003_vm12, %v7580_v39  ;;  %8464 = vmatmul.mubr.msk.bf16.vlgmr.msra.gmra.mxu0 %vm2003_vm12, %v7582_v48 }
 0x95f   : > { %8468 = vmatpush3.bf16.msra.mxu1 %v10340_v16  ;;  %8474 = vmatpush3.bf16.msra.mxu0 %v10397_v9 }
 0x960   : > { %8469 = vmatprep.mubr.msk.bf16.mxu1 %vm8771_vm10, %v8770_v27  ;;  %8475 = vmatprep.mubr.msk.bf16.mxu0 %vm8771_vm10, %v8770_v27 }
 0x961   : > { %8479 = vmatprep.subr.bf16.mxu1 %v8770_v27  ;;  %8485 = vmatprep.subr.bf16.mxu0 %v8770_v27 }
 0x966   : > { %8470 = vmatmul.mubr.msk.bf16.vlgmr.msra.gmra.mxu1 %vm2003_vm12, %v7585_v11  ;;  %8476 = vmatmul.mubr.msk.bf16.vlgmr.msra.gmra.mxu0 %vm2003_vm12, %v7587_v26 }
 0x967   : > { %8480 = vmatpush3.bf16.msra.mxu1 %v10514_v51  ;;  %8486 = vmatpush3.bf16.msra.mxu0 %v10253_v0 }
 0x968   : > { %8481 = vmatprep.mubr.msk.bf16.mxu1 %vm8771_vm10, %v8770_v27  ;;  %8487 = vmatprep.mubr.msk.bf16.mxu0 %vm8771_vm10, %v8770_v27 }
 0x969   : > { %8491 = vmatprep.subr.bf16.mxu1 %v8770_v27  ;;  %8497 = vmatprep.subr.bf16.mxu0 %v8770_v27 }
 0x96e   : > { %8482 = vmatmul.mubr.msk.bf16.vlgmr.msra.gmra.mxu1 %vm2003_vm12, %v7589_v13  ;;  %8488 = vmatmul.mubr.msk.bf16.vlgmr.msra.gmra.mxu0 %vm2003_vm12, %v7591_v29 }
 0x96f   : > { %8492 = vmatpush3.bf16.msra.mxu1 %v10340_v16  ;;  %8498 = vmatpush3.bf16.msra.mxu0 %v10397_v9  ;;  %v7595_v16 = vld [vmem:[%s10996_s8 + $0x2] sm:$0x3] }
 0x970   : > { %8493 = vmatprep.mubr.msk.bf16.mxu1 %vm8771_vm10, %v8770_v27  ;;  %8499 = vmatprep.mubr.msk.bf16.mxu0 %vm8771_vm10, %v8770_v27 }
 0x971   : > { %8503 = vmatprep.subr.bf16.mxu1 %v8770_v27  ;;  %8509 = vmatprep.subr.bf16.mxu0 %v8770_v27 }
 0x976   : > { %8494 = vmatmul.mubr.msk.bf16.vlgmr.msra.gmra.mxu1 %vm2003_vm12, %v6126_v3  ;;  %8500 = vmatmul.mubr.msk.bf16.vlgmr.msra.gmra.mxu0 %vm2003_vm12, %v7595_v16  ;;  %v7620_v3 = vld [vmem:[%s10996_s8 + $0x18] sm:$0x3]  ;;  %v7622_v16 = vld [vmem:[%s10996_s8 + $0x1a] sm:$0x3] }
 0x977   : > { %8504 = vmatpush3.bf16.msra.mxu1 %v10514_v51  ;;  %8510 = vmatpush3.bf16.msra.mxu0 %v10253_v0 }
 0x978   : > { %8505 = vmatprep.mubr.msk.bf16.mxu1 %vm8771_vm10, %v8770_v27  ;;  %8511 = vmatprep.mubr.msk.bf16.mxu0 %vm8771_vm10, %v8770_v27 }
 0x979   : > { %8515 = vmatprep.subr.bf16.mxu1 %v8770_v27  ;;  %8521 = vmatprep.subr.bf16.mxu0 %v8770_v27 }
 0x97e   : > { %8506 = vmatmul.mubr.msk.bf16.vlgmr.msra.gmra.mxu1 %vm2003_vm12, %v7597_v59  ;;  %8512 = vmatmul.mubr.msk.bf16.vlgmr.msra.gmra.mxu0 %vm2003_vm12, %v7599_v38 }
 0x97f   : > { %8516 = vmatpush3.bf16.msra.mxu1 %v10397_v9  ;;  %8522 = vmatpush3.bf16.msra.mxu0 %v10474_v25  ;;  %v7604_v9 = vld [vmem:[%s10996_s8 + $0xa] sm:$0x3]  ;;  %v10758_v25 = vpop.permute.xlu1 %4166 }
 0x980   : > { %8517 = vmatprep.mubr.msk.bf16.mxu1 %vm8771_vm10, %v8770_v27  ;;  %8523 = vmatprep.mubr.msk.bf16.mxu0 %vm8771_vm10, %v8770_v27  ;;  %v4172_v11 = vsel %vm474_vm8, %v10744_v40, %v10758_v25 }
 0x981   : > { %8527 = vmatprep.subr.bf16.mxu1 %v8770_v27  ;;  %8533 = vmatprep.subr.bf16.mxu0 %v8770_v27  ;;  %v4174_v30 = vmul.f32 %v8742_v18, %v4172_v11  ;;  %v7640_v11 = vld [vmem:[%s10996_s8 + $0x1a] sm:$0x3] }
 0x983   : > { %v10774_v60 = vpop.permute.xlu1 %4106  ;;  %v10852_v36 = vpack.c.bf16 %v4175_v4, %v4174_v30 }
 0x985   : > { %v10752_v41 = vpop.f32.mrf.mxu0 }
 0x986   : > { %8518 = vmatmul.mubr.msk.bf16.vlgmr.msra.gmra.mxu1 %vm2003_vm12, %v7602_v14  ;;  %8524 = vmatmul.mubr.msk.bf16.vlgmr.msra.gmra.mxu0 %vm2003_vm12, %v7604_v9 }
 0x987   : > { %8528 = vmatpush3.bf16.msra.mxu1 %v10253_v0  ;;  %8534 = vmatpush3.bf16.msra.mxu0 %v10618_v28  ;;  %v8261_v24 = vpop.f32.mrf.mxu0  ;;  %v10801_v47 = vpop.permute.xlu1 %4112 }
 0x988   : > { %8529 = vmatprep.mubr.msk.bf16.mxu1 %vm8771_vm10, %v8770_v27  ;;  %8535 = vmatprep.mubr.msk.bf16.mxu0 %vm8771_vm10, %v8770_v27 }
 0x989   : > { %8539 = vmatprep.subr.bf16.mxu1 %v8770_v27  ;;  %8545 = vmatprep.subr.bf16.mxu0 %v8770_v27  ;;  %v4378_v20 = vpop.f32.mrf.mxu0 }
 0x98b   : > { %v8262_v17 = vpop.f32.mrf.mxu0  ;;  %v10808_v52 = vpop.permute.xlu1 %4288 }
 0x98d   : > { %v4467_v54 = vpop.f32.mrf.mxu0 }
 0x98e   : > { %8530 = vmatmul.mubr.msk.bf16.vlgmr.msra.gmra.mxu1 %vm2003_vm12, %v7606_v2  ;;  %8536 = vmatmul.mubr.msk.bf16.vlgmr.msra.gmra.mxu0 %vm2003_vm12, %v7608_v10 }
 0x98f   : > { %8540 = vmatpush3.bf16.msra.mxu1 %v10516_v5  ;;  %8546 = vmatpush3.bf16.msra.mxu0 %v10514_v51  ;;  %v8273_v62 = vpop.f32.mrf.mxu0  ;;  %v8743_v5 = vld [vmem:[%s10988_s0 + $0x6] ss:$0 sm:$0xff] }
 0x990   : > { %8541 = vmatprep.mubr.msk.bf16.mxu1 %vm8771_vm10, %v8770_v27  ;;  %8547 = vmatprep.mubr.msk.bf16.mxu0 %vm8771_vm10, %v8770_v27  ;;  %v4158_v1 = vmul.f32 %v8743_v5, %v4156_v45  ;;  %v4157_v37 = vmul.f32 %v8743_v5, %v4155_v63 }
 0x991   : > { %8551 = vmatprep.subr.bf16.mxu1 %v8770_v27  ;;  %8557 = vmatprep.subr.bf16.mxu0 %v8770_v27  ;;  %v4470_v58 = vpop.f32.mrf.mxu0 }
 0x992   : > { %v4159_v23 = vpack.c.bf16 %v4158_v1, %v4157_v37 }
 0x993   : > { %v8274_v22 = vpop.f32.mrf.mxu0 }
 0x994   : > { %v4115_v22 = vpop.permute.xlu0 %4114 }
 0x996   : > { %v4329_v49 = vpop.f32.mrf.mxu1  ;;  %8542 = vmatmul.mubr.msk.bf16.vlgmr.msra.gmra.mxu1 %vm2003_vm12, %v7611_v7  ;;  %8548 = vmatmul.mubr.msk.bf16.vlgmr.msra.gmra.mxu0 %vm2003_vm12, %v7613_v61 }
 0x997   : > { %8552 = vmatpush3.bf16.msra.mxu1 %v4159_v23  ;;  %8558 = vmatpush3.bf16.msra.mxu0 %v10803_v56  ;;  %v4335_v43 = vadd.f32 %v4329_v49, %v10808_v52  ;;  %v7635_v23 = vld [vmem:[%s10996_s8 + $0x16] sm:$0x3] }
 0x998   : > { %v8255_v46 = vpop.f32.mrf.mxu1  ;;  %8553 = vmatprep.mubr.msk.bf16.mxu1 %vm8771_vm10, %v8770_v27  ;;  %8559 = vmatprep.mubr.msk.bf16.mxu0 %vm8771_vm10, %v8770_v27 }
 0x999   : > { %8563 = vmatprep.subr.bf16.mxu1 %v8770_v27  ;;  %8569 = vmatprep.subr.bf16.mxu0 %v8770_v27  ;;  %v4381_v42 = vadd.f32 %v10752_v41, %v4335_v43  ;;  %v7626_v41 = vld [vmem:[%s10996_s8 + $0x1e] sm:$0x3]  ;;  %v4119_v43 = vsel %vm492_vm9, %v4109_v34, %v4115_v22 }
 0x99a   : > { %v4332_v6 = vpop.f32.mrf.mxu1 }
 0x99c   : > { %v8256_v15 = vpop.f32.mrf.mxu1 }
 0x99e   : > { %v4421_v39 = vpop.f32.mrf.mxu1  ;;  %8554 = vmatmul.mubr.msk.bf16.vlgmr.msra.gmra.mxu1 %vm2003_vm12, %v7615_v8  ;;  %8560 = vmatmul.mubr.msk.bf16.vlgmr.msra.gmra.mxu0 %vm2003_vm12, %v7617_v31  ;;  %v4118_v31 = vsel %vm492_vm9, %v10774_v60, %v10801_v47 }
 0x99f   : > { %v4427_v48 = vadd.f32 %v4421_v39, %v4381_v42  ;;  %8564 = vmatpush3.bf16.msra.mxu1 %v10514_v51  ;;  %8570 = vmatpush3.bf16.msra.mxu0 %v10253_v0  ;;  %v4121_v39 = vmul.f32 %v8744_v19, %v4119_v43  ;;  %v4120_v47 = vmul.f32 %v8744_v19, %v4118_v31 }
 0x9a0   : > { %v8267_v26 = vpop.f32.mrf.mxu1  ;;  %8565 = vmatprep.mubr.msk.bf16.mxu1 %vm8771_vm10, %v8770_v27  ;;  %8571 = vmatprep.mubr.msk.bf16.mxu0 %vm8771_vm10, %v8770_v27 }
 0x9a1   : > { %v4473_v13 = vadd.f32 %v4467_v54, %v4427_v48  ;;  %8575 = vmatprep.subr.bf16.mxu1 %v8770_v27  ;;  %8581 = vmatprep.subr.bf16.mxu0 %v8770_v27  ;;  %v7638_v48 = vld [vmem:[%s10996_s8 + $0x18] sm:$0x3] }
 0x9a2   : > { %v4424_v29 = vpop.f32.mrf.mxu1 }
 0x9a3   : > { %4475 = vst.msk [vmem:[%s10836_s27] sm:$0x7] %vm4474_vm13, %v4473_v13  ;;  %v4122_v13 = vpack.c.bf16 %v4121_v39, %v4120_v47 }
 0x9a4   : > { %v8268_v32 = vpop.f32.mrf.mxu1 }
 0x9a6   : > { %v4515_v59 = vpop.f32.mrf.mxu1  ;;  %v4561_v38 = vpop.f32.mrf.mxu0  ;;  %8566 = vmatmul.mubr.msk.bf16.vlgmr.msra.gmra.mxu1 %vm2003_vm12, %v7620_v3  ;;  %8572 = vmatmul.mubr.msk.bf16.vlgmr.msra.gmra.mxu0 %vm2003_vm12, %v7622_v16 }
 0x9a7   : > { %8576 = vmatpush3.bf16.msra.mxu1 %v10803_v56  ;;  %8582 = vmatpush3.bf16.msra.mxu0 %v10852_v36  ;;  %v4521_v40 = vadd.f32 %v4515_v59, %v10808_v52 }
 0x9a8   : > { %v8279_v35 = vpop.f32.mrf.mxu1  ;;  %v8285_v12 = vpop.f32.mrf.mxu0  ;;  %8577 = vmatprep.mubr.msk.bf16.mxu1 %vm8771_vm10, %v8770_v27  ;;  %8583 = vmatprep.mubr.msk.bf16.mxu0 %vm8771_vm10, %v8770_v27 }
 0x9a9   : > { %8587 = vmatprep.subr.bf16.mxu1 %v8770_v27  ;;  %8593 = vmatprep.subr.bf16.mxu0 %v8770_v27  ;;  %v4567_v20 = vadd.f32 %v4561_v38, %v4521_v40  ;;  %v7642_v35 = vld [vmem:[%s10996_s8 + $0x1c] sm:$0x3] }
 0x9aa   : > { %v4518_v14 = vpop.f32.mrf.mxu1  ;;  %v4564_v9 = vpop.f32.mrf.mxu0 }
 0x9ac   : > { %v8280_v24 = vpop.f32.mrf.mxu1  ;;  %v8286_v25 = vpop.f32.mrf.mxu0 }
 0x9ae   : > { %v4607_v50 = vpop.f32.mrf.mxu1  ;;  %v4653_v2 = vpop.f32.mrf.mxu0  ;;  %8578 = vmatmul.mubr.msk.bf16.vlgmr.msra.gmra.mxu1 %vm2003_vm12, %v7624_v21  ;;  %8584 = vmatmul.mubr.msk.bf16.vlgmr.msra.gmra.mxu0 %vm2003_vm12, %v7626_v41 }
 0x9af   : > { %v4613_v10 = vadd.f32 %v4607_v50, %v4567_v20  ;;  %8588 = vmatpush3.bf16.msra.mxu1 %v10514_v51  ;;  %8594 = vmatpush3.bf16.msra.mxu0 %v10253_v0  ;;  %v7629_v51 = vld [vmem:[%s10996_s8 + $0x10] sm:$0x3] }
 0x9b0   : > { %v8291_v17 = vpop.f32.mrf.mxu1  ;;  %v8297_v54 = vpop.f32.mrf.mxu0  ;;  %8589 = vmatprep.mubr.msk.bf16.mxu1 %vm8771_vm10, %v8770_v27  ;;  %8595 = vmatprep.mubr.msk.bf16.mxu0 %vm8771_vm10, %v8770_v27 }
 0x9b1   : > { %v4659_v33 = vadd.f32 %v4653_v2, %v4613_v10  ;;  %8599 = vmatprep.subr.bf16.mxu1 %v8770_v27  ;;  %8605 = vmatprep.subr.bf16.mxu0 %v8770_v27 }
 0x9b2   : > { %v4610_v45 = vpop.f32.mrf.mxu1  ;;  %v4656_v62 = vpop.f32.mrf.mxu0 }
 0x9b3   : > { %7523 = vst.msk [vmem:[%s10836_s27 + $0x4] sm:$0x7] %vm4474_vm13, %v4659_v33 }
 0x9b4   : > { %v8292_v63 = vpop.f32.mrf.mxu1  ;;  %v8298_v18 = vpop.f32.mrf.mxu0 }
 0x9b6   : > { %v4700_v5 = vpop.f32.mrf.mxu1  ;;  %v4745_v1 = vpop.f32.mrf.mxu0  ;;  %8590 = vmatmul.mubr.msk.bf16.vlgmr.msra.gmra.mxu1 %vm2003_vm12, %v7629_v51  ;;  %8596 = vmatmul.mubr.msk.bf16.vlgmr.msra.gmra.mxu0 %vm2003_vm12, %v7631_v53 }
 0x9b7   : > { %8600 = vmatpush3.bf16.msra.mxu1 %v10803_v56  ;;  %8606 = vmatpush3.bf16.msra.mxu0 %v10852_v36  ;;  %v4706_v37 = vadd.f32 %v4700_v5, %v10808_v52  ;;  %v7633_v56 = vld [vmem:[%s10996_s8 + $0x14] sm:$0x3] }
 0x9b8   : > { %v8303_v58 = vpop.f32.mrf.mxu1  ;;  %v8309_v44 = vpop.f32.mrf.mxu0  ;;  %8601 = vmatprep.mubr.msk.bf16.mxu1 %vm8771_vm10, %v8770_v27  ;;  %8607 = vmatprep.mubr.msk.bf16.mxu0 %vm8771_vm10, %v8770_v27 }
 0x9b9   : > { %8611 = vmatprep.subr.bf16.mxu1 %v8770_v27  ;;  %8617 = vmatprep.subr.bf16.mxu0 %v8770_v27  ;;  %v4751_v46 = vadd.f32 %v4745_v1, %v4706_v37 }
 0x9ba   : > { %v4703_v7 = vpop.f32.mrf.mxu1  ;;  %v4748_v61 = vpop.f32.mrf.mxu0 }
 0x9bc   : > { %v8304_v57 = vpop.f32.mrf.mxu1  ;;  %v8310_v49 = vpop.f32.mrf.mxu0 }
 0x9be   : > { %v4790_v6 = vpop.f32.mrf.mxu1  ;;  %v4835_v55 = vpop.f32.mrf.mxu0  ;;  %8602 = vmatmul.mubr.msk.bf16.vlgmr.msra.gmra.mxu1 %vm2003_vm12, %v7633_v56  ;;  %8608 = vmatmul.mubr.msk.bf16.vlgmr.msra.gmra.mxu0 %vm2003_vm12, %v7635_v23 }
 0x9bf   : > { %v4796_v8 = vadd.f32 %v4790_v6, %v4751_v46  ;;  %8612 = vmatpush3.bf16.msra.mxu1 %v10253_v0  ;;  %8618 = vmatpush3.bf16.msra.mxu0 %v10618_v28 }
 0x9c0   : > { %v8315_v15 = vpop.f32.mrf.mxu1  ;;  %v8321_v42 = vpop.f32.mrf.mxu0  ;;  %8613 = vmatprep.mubr.msk.bf16.mxu1 %vm8771_vm10, %v8770_v27  ;;  %8619 = vmatprep.mubr.msk.bf16.mxu0 %vm8771_vm10, %v8770_v27 }
 0x9c1   : > { %v4841_v0 = vadd.f32 %v4835_v55, %v4796_v8  ;;  %8623 = vmatprep.subr.bf16.mxu1 %v8770_v27  ;;  %8629 = vmatprep.subr.bf16.mxu0 %v8770_v27 }
 0x9c2   : > { %v4793_v28 = vpop.f32.mrf.mxu1  ;;  %v4838_v60 = vpop.f32.mrf.mxu0 }
 0x9c3   : > { %7531 = vst.msk [vmem:[%s10836_s27 + $0x8] sm:$0x7] %vm4474_vm13, %v4841_v0 }
 0x9c4   : > { %v8316_v26 = vpop.f32.mrf.mxu1  ;;  %v8322_v4 = vpop.f32.mrf.mxu0 }
 0x9c6   : > { %v4882_v29 = vpop.f32.mrf.mxu1  ;;  %v4927_v30 = vpop.f32.mrf.mxu0  ;;  %8614 = vmatmul.mubr.msk.bf16.vlgmr.msra.gmra.mxu1 %vm2003_vm12, %v7638_v48  ;;  %8620 = vmatmul.mubr.msk.bf16.vlgmr.msra.gmra.mxu0 %vm2003_vm12, %v7640_v11 }
 0x9c7   : > { %8624 = vmatpush3.bf16.msra.mxu1 %v10852_v36  ;;  %8630 = vmatpush3.bf16.msra.mxu0 %v4122_v13  ;;  %v4888_v32 = vadd.f32 %v4882_v29, %v10808_v52  ;;  %v7644_v36 = vld [vmem:[%s10996_s8 + $0x1e] sm:$0x3] }
 0x9c8   : > { %v8327_v3 = vpop.f32.mrf.mxu1  ;;  %v8333_v16 = vpop.f32.mrf.mxu0  ;;  %8625 = vmatprep.mubr.msk.bf16.mxu1 %vm8771_vm10, %v8770_v27  ;;  %8631 = vmatprep.mubr.msk.bf16.mxu0 %vm8771_vm10, %v8770_v27 }
 0x9c9   : > { %v4933_v14 = vadd.f32 %v4927_v30, %v4888_v32 }
 0x9ca   : > { %v4885_v59 = vpop.f32.mrf.mxu1  ;;  %v4930_v38 = vpop.f32.mrf.mxu0 }
 0x9cc   : > { %v8328_v12 = vpop.f32.mrf.mxu1  ;;  %v8334_v40 = vpop.f32.mrf.mxu0 }
 0x9ce   : > { %v4972_v9 = vpop.f32.mrf.mxu1  ;;  %v5017_v21 = vpop.f32.mrf.mxu0  ;;  %8626 = vmatmul.mubr.msk.bf16.vlgmr.msra.gmra.mxu1 %vm2003_vm12, %v7642_v35  ;;  %8632 = vmatmul.mubr.msk.bf16.vlgmr.msra.gmra.mxu0 %vm2003_vm12, %v7644_v36 }
 0x9cf   : > { %v4978_v27 = vadd.f32 %v4972_v9, %v4933_v14 }
 0x9d0   : > { %v8339_v41 = vpop.f32.mrf.mxu1  ;;  %v8345_v24 = vpop.f32.mrf.mxu0 }
 0x9d1   : > { %v5023_v25 = vadd.f32 %v5017_v21, %v4978_v27 }
 0x9d2   : > { %v4975_v20 = vpop.f32.mrf.mxu1  ;;  %v5020_v50 = vpop.f32.mrf.mxu0 }
 0x9d3   : > { %7540 = vst.msk [vmem:[%s10836_s27 + $0xc] sm:$0x7] %vm4474_vm13, %v5023_v25 }
 0x9d4   : > { %v8340_v2 = vpop.f32.mrf.mxu1  ;;  %v8346_v10 = vpop.f32.mrf.mxu0 }
 0x9d6   : > { %v5065_v17 = vpop.f32.mrf.mxu1  ;;  %v5111_v54 = vpop.f32.mrf.mxu0 }
 0x9d7   : > { %v5071_v62 = vadd.f32 %v5065_v17, %v10808_v52 }
 0x9d8   : > { %v8351_v33 = vpop.f32.mrf.mxu1  ;;  %v8357_v45 = vpop.f32.mrf.mxu0 }
 0x9d9   : > { %v5117_v34 = vadd.f32 %v5111_v54, %v5071_v62 }
 0x9da   : > { %v5068_v51 = vpop.f32.mrf.mxu1  ;;  %v5114_v53 = vpop.f32.mrf.mxu0 }
 0x9dc   : > { %v8352_v63 = vpop.f32.mrf.mxu1  ;;  %v8358_v18 = vpop.f32.mrf.mxu0 }
 0x9de   : > { %v5157_v5 = vpop.f32.mrf.mxu1  ;;  %v5203_v1 = vpop.f32.mrf.mxu0 }
 0x9df   : > { %v5163_v58 = vadd.f32 %v5157_v5, %v5117_v34 }
 0x9e0   : > { %v8363_v44 = vpop.f32.mrf.mxu1  ;;  %v8369_v37 = vpop.f32.mrf.mxu0 }
 0x9e1   : > { %v5209_v7 = vadd.f32 %v5203_v1, %v5163_v58 }
 0x9e2   : > { %v5160_v61 = vpop.f32.mrf.mxu1  ;;  %v5206_v22 = vpop.f32.mrf.mxu0 }
 0x9e3   : > { %7549 = vst.msk [vmem:[%s10836_s27 + $0x10] sm:$0x7] %vm4474_vm13, %v5209_v7 }
 0x9e4   : > { %v8364_v56 = vpop.f32.mrf.mxu1  ;;  %v8370_v23 = vpop.f32.mrf.mxu0 }
 0x9e6   : > { %v5251_v57 = vpop.f32.mrf.mxu1  ;;  %v5297_v49 = vpop.f32.mrf.mxu0 }
 0x9e7   : > { %v5257_v6 = vadd.f32 %v5251_v57, %v10808_v52 }
 0x9e8   : > { %v8375_v46 = vpop.f32.mrf.mxu1  ;;  %v8381_v43 = vpop.f32.mrf.mxu0 }
 0x9e9   : > { %v5303_v42 = vadd.f32 %v5297_v49, %v5257_v6 }
 0x9ea   : > { %v5254_v55 = vpop.f32.mrf.mxu1  ;;  %v5300_v8 = vpop.f32.mrf.mxu0 }
 0x9ec   : > { %v8376_v31 = vpop.f32.mrf.mxu1  ;;  %v8382_v15 = vpop.f32.mrf.mxu0 }
 0x9ee   : > { %v5343_v19 = vpop.f32.mrf.mxu1  ;;  %v5389_v39 = vpop.f32.mrf.mxu0 }
 0x9ef   : > { %v5349_v0 = vadd.f32 %v5343_v19, %v5303_v42 }
 0x9f0   : > { %v8387_v28 = vpop.f32.mrf.mxu1  ;;  %v8393_v60 = vpop.f32.mrf.mxu0 }
 0x9f1   : > { %v5395_v47 = vadd.f32 %v5389_v39, %v5349_v0 }
 0x9f2   : > { %v5346_v48 = vpop.f32.mrf.mxu1  ;;  %v5392_v11 = vpop.f32.mrf.mxu0 }
 0x9f3   : > { %7558 = vst.msk [vmem:[%s10836_s27 + $0x14] sm:$0x7] %vm4474_vm13, %v5395_v47 }
 0x9f4   : > { %v8388_v26 = vpop.f32.mrf.mxu1  ;;  %v8394_v4 = vpop.f32.mrf.mxu0 }
 0x9f6   : > { %v5436_v13 = vpop.f32.mrf.mxu1  ;;  %v5481_v29 = vpop.f32.mrf.mxu0 }
 0x9f7   : > { %v5442_v16 = vadd.f32 %v5436_v13, %v10808_v52 }
 0x9f8   : > { %v8399_v30 = vpop.f32.mrf.mxu1  ;;  %v8405_v3 = vpop.f32.mrf.mxu0 }
 0x9f9   : > { %v5487_v36 = vadd.f32 %v5481_v29, %v5442_v16 }
 0x9fa   : > { %v5439_v32 = vpop.f32.mrf.mxu1  ;;  %v5484_v59 = vpop.f32.mrf.mxu0 }
 0x9fc   : > { %v8400_v38 = vpop.f32.mrf.mxu1  ;;  %v8406_v35 = vpop.f32.mrf.mxu0 }
 0x9fe   : > { %v5526_v12 = vpop.f32.mrf.mxu1  ;;  %v5571_v40 = vpop.f32.mrf.mxu0 }
 0x9ff   : > { %v5532_v14 = vadd.f32 %v5526_v12, %v5487_v36 }
 0xa00   : > { %v8411_v9 = vpop.f32.mrf.mxu1  ;;  %v8417_v21 = vpop.f32.mrf.mxu0 }
 0xa01   : > { %v5577_v27 = vadd.f32 %v5571_v40, %v5532_v14 }
 0xa02   : > { %v5529_v41 = vpop.f32.mrf.mxu1  ;;  %v5574_v24 = vpop.f32.mrf.mxu0 }
 0xa03   : > { %7567 = vst.msk [vmem:[%s10836_s27 + $0x18] sm:$0x7] %vm4474_vm13, %v5577_v27 }
 0xa04   : > { %v8412_v25 = vpop.f32.mrf.mxu1  ;;  %v8418_v20 = vpop.f32.mrf.mxu0 }
 0xa06   : > { %v5618_v50 = vpop.f32.mrf.mxu1  ;;  %v5663_v2 = vpop.f32.mrf.mxu0 }
 0xa07   : > { %v5624_v54 = vadd.f32 %v5618_v50, %v10808_v52 }
 0xa08   : > { %v8423_v10 = vpop.f32.mrf.mxu1  ;;  %v8429_v17 = vpop.f32.mrf.mxu0 }
 0xa09   : > { %v5669_v53 = vadd.f32 %v5663_v2, %v5624_v54 }
 0xa0a   : > { %v5621_v33 = vpop.f32.mrf.mxu1  ;;  %v5666_v45 = vpop.f32.mrf.mxu0 }
 0xa0c   : > { %v8424_v62 = vpop.f32.mrf.mxu1  ;;  %v8430_v51 = vpop.f32.mrf.mxu0 }
 0xa0e   : > { %v5708_v63 = vpop.f32.mrf.mxu1  ;;  %v5753_v18 = vpop.f32.mrf.mxu0 }
 0xa0f   : > { %v5714_v34 = vadd.f32 %v5708_v63, %v5669_v53 }
 0xa10   : > { %v8435_v5 = vpop.f32.mrf.mxu1  ;;  %v8441_v1 = vpop.f32.mrf.mxu0 }
 0xa11   : > { %v5759_v58 = vadd.f32 %v5753_v18, %v5714_v34 }
 0xa12   : > { %v5711_v44 = vpop.f32.mrf.mxu1  ;;  %v5756_v37 = vpop.f32.mrf.mxu0 }
 0xa13   : > { %7576 = vst.msk [vmem:[%s10836_s27 + $0x1c] sm:$0x7] %vm4474_vm13, %v5759_v58 }
 0xa14   : > { %v8436_v7 = vpop.f32.mrf.mxu1  ;;  %v8442_v61 = vpop.f32.mrf.mxu0 }
 0xa16   : > { %v5800_v22 = vpop.f32.mrf.mxu1  ;;  %v5845_v56 = vpop.f32.mrf.mxu0 }
 0xa17   : > { %v5806_v49 = vadd.f32 %v5800_v22, %v10808_v52 }
 0xa18   : > { %v8447_v23 = vpop.f32.mrf.mxu1  ;;  %v8453_v57 = vpop.f32.mrf.mxu0 }
 0xa19   : > { %v5851_v8 = vadd.f32 %v5845_v56, %v5806_v49 }
 0xa1a   : > { %v5803_v46 = vpop.f32.mrf.mxu1  ;;  %v5848_v43 = vpop.f32.mrf.mxu0 }
 0xa1c   : > { %v8448_v6 = vpop.f32.mrf.mxu1  ;;  %v8454_v55 = vpop.f32.mrf.mxu0 }
 0xa1e   : > { %v5890_v31 = vpop.f32.mrf.mxu1  ;;  %v5935_v15 = vpop.f32.mrf.mxu0 }
 0xa1f   : > { %v5896_v42 = vadd.f32 %v5890_v31, %v5851_v8 }
 0xa20   : > { %v8459_v19 = vpop.f32.mrf.mxu1  ;;  %v8465_v39 = vpop.f32.mrf.mxu0 }
 0xa21   : > { %v5941_v0 = vadd.f32 %v5935_v15, %v5896_v42 }
 0xa22   : > { %v5893_v28 = vpop.f32.mrf.mxu1  ;;  %v5938_v60 = vpop.f32.mrf.mxu0 }
 0xa23   : > { %7584 = vst.msk [vmem:[%s10836_s27 + $0x20] sm:$0x7] %vm4474_vm13, %v5941_v0 }
 0xa24   : > { %v8460_v47 = vpop.f32.mrf.mxu1  ;;  %v8466_v48 = vpop.f32.mrf.mxu0 }
 0xa26   : > { %v5982_v11 = vpop.f32.mrf.mxu1  ;;  %v6027_v26 = vpop.f32.mrf.mxu0 }
 0xa27   : > { %v5988_v29 = vadd.f32 %v5982_v11, %v10808_v52 }
 0xa28   : > { %v8471_v4 = vpop.f32.mrf.mxu1  ;;  %v8477_v13 = vpop.f32.mrf.mxu0 }
 0xa29   : > { %v6033_v59 = vadd.f32 %v6027_v26, %v5988_v29 }
 0xa2a   : > { %v5985_v30 = vpop.f32.mrf.mxu1  ;;  %v6030_v3 = vpop.f32.mrf.mxu0 }
 0xa2c   : > { %v8472_v16 = vpop.f32.mrf.mxu1  ;;  %v8478_v32 = vpop.f32.mrf.mxu0 }
 0xa2e   : > { %v6072_v38 = vpop.f32.mrf.mxu1  ;;  %v6117_v35 = vpop.f32.mrf.mxu0 }
 0xa2f   : > { %v6078_v36 = vadd.f32 %v6072_v38, %v6033_v59 }
 0xa30   : > { %v8483_v12 = vpop.f32.mrf.mxu1  ;;  %v8489_v40 = vpop.f32.mrf.mxu0 }
 0xa31   : > { %v6123_v14 = vadd.f32 %v6117_v35, %v6078_v36 }
 0xa32   : > { %v6075_v9 = vpop.f32.mrf.mxu1  ;;  %v6120_v21 = vpop.f32.mrf.mxu0 }
 0xa33   : > { %7593 = vst.msk [vmem:[%s10836_s27 + $0x24] sm:$0x7] %vm4474_vm13, %v6123_v14 }
 0xa34   : > { %v8484_v27 = vpop.f32.mrf.mxu1  ;;  %v8490_v41 = vpop.f32.mrf.mxu0 }
 0xa36   : > { %v6164_v24 = vpop.f32.mrf.mxu1  ;;  %v6209_v25 = vpop.f32.mrf.mxu0 }
 0xa37   : > { %v6170_v2 = vadd.f32 %v6164_v24, %v10808_v52 }
 0xa38   : > { %v8495_v20 = vpop.f32.mrf.mxu1  ;;  %v8501_v50 = vpop.f32.mrf.mxu0 }
 0xa39   : > { %v6215_v45 = vadd.f32 %v6209_v25, %v6170_v2 }
 0xa3a   : > { %v6167_v10 = vpop.f32.mrf.mxu1  ;;  %v6212_v17 = vpop.f32.mrf.mxu0 }
 0xa3c   : > { %v8496_v54 = vpop.f32.mrf.mxu1  ;;  %v8502_v33 = vpop.f32.mrf.mxu0 }
 0xa3e   : > { %v6254_v62 = vpop.f32.mrf.mxu1  ;;  %v6299_v51 = vpop.f32.mrf.mxu0 }
 0xa3f   : > { %v6260_v53 = vadd.f32 %v6254_v62, %v6215_v45 }
 0xa40   : > { %v8507_v63 = vpop.f32.mrf.mxu1  ;;  %v8513_v18 = vpop.f32.mrf.mxu0 }
 0xa41   : > { %v6305_v34 = vadd.f32 %v6299_v51, %v6260_v53 }
 0xa42   : > { %v6257_v5 = vpop.f32.mrf.mxu1  ;;  %v6302_v1 = vpop.f32.mrf.mxu0 }
 0xa43   : > { %7601 = vst.msk [vmem:[%s10836_s27 + $0x28] sm:$0x7] %vm4474_vm13, %v6305_v34 }
 0xa44   : > { %v8508_v58 = vpop.f32.mrf.mxu1  ;;  %v8514_v44 = vpop.f32.mrf.mxu0 }
 0xa46   : > { %v6346_v37 = vpop.f32.mrf.mxu1  ;;  %v6391_v7 = vpop.f32.mrf.mxu0 }
 0xa47   : > { %v6352_v56 = vadd.f32 %v6346_v37, %v10808_v52 }
 0xa48   : > { %v8519_v61 = vpop.f32.mrf.mxu1  ;;  %v8525_v22 = vpop.f32.mrf.mxu0 }
 0xa49   : > { %v6397_v43 = vadd.f32 %v6391_v7, %v6352_v56 }
 0xa4a   : > { %v6349_v23 = vpop.f32.mrf.mxu1  ;;  %v6394_v57 = vpop.f32.mrf.mxu0 }
 0xa4c   : > { %v8520_v49 = vpop.f32.mrf.mxu1  ;;  %v8526_v46 = vpop.f32.mrf.mxu0 }
 0xa4e   : > { %v6436_v6 = vpop.f32.mrf.mxu1  ;;  %v6481_v55 = vpop.f32.mrf.mxu0 }
 0xa4f   : > { %v6442_v8 = vadd.f32 %v6436_v6, %v6397_v43 }
 0xa50   : > { %v8531_v31 = vpop.f32.mrf.mxu1  ;;  %v8537_v15 = vpop.f32.mrf.mxu0 }
 0xa51   : > { %v6487_v42 = vadd.f32 %v6481_v55, %v6442_v8 }
 0xa52   : > { %v6439_v19 = vpop.f32.mrf.mxu1  ;;  %v6484_v39 = vpop.f32.mrf.mxu0 }
 0xa53   : > { %7610 = vst.msk [vmem:[%s10836_s27 + $0x2c] sm:$0x7] %vm4474_vm13, %v6487_v42 }
 0xa54   : > { %v8532_v0 = vpop.f32.mrf.mxu1  ;;  %v8538_v28 = vpop.f32.mrf.mxu0 }
 0xa56   : > { %v6528_v60 = vpop.f32.mrf.mxu1  ;;  %v6573_v47 = vpop.f32.mrf.mxu0 }
 0xa57   : > { %v6534_v26 = vadd.f32 %v6528_v60, %v10808_v52 }
 0xa58   : > { %v8543_v48 = vpop.f32.mrf.mxu1  ;;  %v8549_v11 = vpop.f32.mrf.mxu0 }
 0xa59   : > { %v6579_v3 = vadd.f32 %v6573_v47, %v6534_v26 }
 0xa5a   : > { %v6531_v4 = vpop.f32.mrf.mxu1  ;;  %v6576_v13 = vpop.f32.mrf.mxu0 }
 0xa5c   : > { %v8544_v29 = vpop.f32.mrf.mxu1  ;;  %v8550_v30 = vpop.f32.mrf.mxu0 }
 0xa5e   : > { %v6618_v16 = vpop.f32.mrf.mxu1  ;;  %v6663_v32 = vpop.f32.mrf.mxu0 }
 0xa5f   : > { %v6624_v59 = vadd.f32 %v6618_v16, %v6579_v3 }
 0xa60   : > { %v8555_v38 = vpop.f32.mrf.mxu1  ;;  %v8561_v35 = vpop.f32.mrf.mxu0 }
 0xa61   : > { %v6669_v36 = vadd.f32 %v6663_v32, %v6624_v59 }
 0xa62   : > { %v6621_v12 = vpop.f32.mrf.mxu1  ;;  %v6666_v40 = vpop.f32.mrf.mxu0 }
 0xa63   : > { %7619 = vst.msk [vmem:[%s10836_s27 + $0x30] sm:$0x7] %vm4474_vm13, %v6669_v36 }
 0xa64   : > { %v8556_v14 = vpop.f32.mrf.mxu1  ;;  %v8562_v9 = vpop.f32.mrf.mxu0 }
 0xa66   : > { %v6710_v21 = vpop.f32.mrf.mxu1  ;;  %v6755_v27 = vpop.f32.mrf.mxu0 }
 0xa67   : > { %v6716_v25 = vadd.f32 %v6710_v21, %v10808_v52 }
 0xa68   : > { %v8567_v41 = vpop.f32.mrf.mxu1  ;;  %v8573_v24 = vpop.f32.mrf.mxu0 }
 0xa69   : > { %v6761_v17 = vadd.f32 %v6755_v27, %v6716_v25 }
 0xa6a   : > { %v6713_v20 = vpop.f32.mrf.mxu1  ;;  %v6758_v50 = vpop.f32.mrf.mxu0 }
 0xa6c   : > { %v8568_v2 = vpop.f32.mrf.mxu1  ;;  %v8574_v10 = vpop.f32.mrf.mxu0 }
 0xa6e   : > { %v6800_v54 = vpop.f32.mrf.mxu1  ;;  %v6845_v33 = vpop.f32.mrf.mxu0 }
 0xa6f   : > { %v6806_v45 = vadd.f32 %v6800_v54, %v6761_v17 }
 0xa70   : > { %v8579_v62 = vpop.f32.mrf.mxu1  ;;  %v8585_v51 = vpop.f32.mrf.mxu0 }
 0xa71   : > { %v6851_v53 = vadd.f32 %v6845_v33, %v6806_v45 }
 0xa72   : > { %v6803_v63 = vpop.f32.mrf.mxu1  ;;  %v6848_v18 = vpop.f32.mrf.mxu0 }
 0xa73   : > { %7628 = vst.msk [vmem:[%s10836_s27 + $0x34] sm:$0x7] %vm4474_vm13, %v6851_v53 }
 0xa74   : > { %v8580_v34 = vpop.f32.mrf.mxu1  ;;  %v8586_v5 = vpop.f32.mrf.mxu0 }
 0xa76   : > { %v6892_v1 = vpop.f32.mrf.mxu1  ;;  %v6937_v58 = vpop.f32.mrf.mxu0 }
 0xa77   : > { %v6898_v7 = vadd.f32 %v6892_v1, %v10808_v52 }
 0xa78   : > { %v8591_v44 = vpop.f32.mrf.mxu1  ;;  %v8597_v37 = vpop.f32.mrf.mxu0 }
 0xa79   : > { %v6943_v57 = vadd.f32 %v6937_v58, %v6898_v7 }
 0xa7a   : > { %v6895_v61 = vpop.f32.mrf.mxu1  ;;  %v6940_v22 = vpop.f32.mrf.mxu0 }
 0xa7c   : > { %v8592_v56 = vpop.f32.mrf.mxu1  ;;  %v8598_v23 = vpop.f32.mrf.mxu0 }
 0xa7e   : > { %v6982_v49 = vpop.f32.mrf.mxu1  ;;  %v7027_v46 = vpop.f32.mrf.mxu0 }
 0xa7f   : > { %v6988_v43 = vadd.f32 %v6982_v49, %v6943_v57 }
 0xa80   : > { %v8603_v6 = vpop.f32.mrf.mxu1  ;;  %v8609_v55 = vpop.f32.mrf.mxu0 }
 0xa81   : > { %v7033_v8 = vadd.f32 %v7027_v46, %v6988_v43 }
 0xa82   : > { %v6985_v31 = vpop.f32.mrf.mxu1  ;;  %v7030_v15 = vpop.f32.mrf.mxu0 }
 0xa83   : > { %7637 = vst.msk [vmem:[%s10836_s27 + $0x38] sm:$0x7] %vm4474_vm13, %v7033_v8 }
 0xa84   : > { %v8604_v42 = vpop.f32.mrf.mxu1  ;;  %v8610_v19 = vpop.f32.mrf.mxu0 }
 0xa86   : > { %v7074_v39 = vpop.f32.mrf.mxu1  ;;  %v7119_v0 = vpop.f32.mrf.mxu0 }
 0xa87   : > { %v7080_v47 = vadd.f32 %v7074_v39, %v10808_v52 }
 0xa88   : > { %v8615_v28 = vpop.f32.mrf.mxu1  ;;  %v8621_v60 = vpop.f32.mrf.mxu0 }
 0xa89   : > { %v7125_v13 = vadd.f32 %v7119_v0, %v7080_v47 }
 0xa8a   : > { %v7077_v48 = vpop.f32.mrf.mxu1  ;;  %v7122_v11 = vpop.f32.mrf.mxu0 }
 0xa8c   : > { %v8616_v26 = vpop.f32.mrf.mxu1  ;;  %v8622_v4 = vpop.f32.mrf.mxu0 }
 0xa8e   : > { %v7164_v29 = vpop.f32.mrf.mxu1  ;;  %v7209_v30 = vpop.f32.mrf.mxu0 }
 0xa8f   : > { %v7170_v3 = vadd.f32 %v7164_v29, %v7125_v13 }
 0xa90   : > { %v8627_v16 = vpop.f32.mrf.mxu1  ;;  %v8633_v32 = vpop.f32.mrf.mxu0 }
 0xa91   : > { %v7215_v59 = vadd.f32 %v7209_v30, %v7170_v3 }
 0xa92   : > { %v7167_v38 = vpop.f32.mrf.mxu1  ;;  %v7212_v35 = vpop.f32.mrf.mxu0 }
 0xa93   : > { %7646 = vst.msk [vmem:[%s10836_s27 + $0x3c] sm:$0x7] %vm4474_vm13, %v7215_v59 }
 0xa94   : > { %v8628_v36 = vpop.f32.mrf.mxu1  ;;  %v8634_v12 = vpop.f32.mrf.mxu0 }
 0xa95 PF: > { %s20_s13 = sadd.s32 1, %s8751_s13  }
 0xa96   : > { %p17_p4 = scmp.ge.s32.totalorder %s20_s13, 4  }
 0xa98   :  { %19 = sbr.rel (!%p17_p4) target bundleno = 1 (0x1), region = 168 }

</bundles_post_ra>
